<compile_context>
chip_gen: v5e
topology: v5e:2x2
jax: 0.10.0
libtpu: 0.0.40
codegen_flags: <defaults>
</compile_context>

<pallas_src>
import jax
import jax.numpy as jnp
from jax import lax
from jax.experimental import pallas as pl
from jax.experimental.pallas import tpu as pltpu

# ------------------------- model hyper-parameters ---------------------------
IMAGE_SIZE = 16
PATCH_SIZE = 4
CHANNELS = 3
DIM = 32            # multiple of 4 (sincos posemb requirement)
DEPTH = 4           # must be >= 3 (attention_weights grabbed at layer i == 2)
HEADS = 2
DIM_HEAD = 16
MLP_DIM = 64
NUM_CLASSES = 8
BATCH = 2

GH = IMAGE_SIZE // PATCH_SIZE
GW = IMAGE_SIZE // PATCH_SIZE
N = GH * GW                                   # sequence length (num patches)
N2 = 2 * N                                    # stacked x-path + OR-path rows
PATCH_DIM = CHANNELS * PATCH_SIZE * PATCH_SIZE
INNER = HEADS * DIM_HEAD
SCALE = DIM_HEAD ** -0.5
LN_EPS = 1e-5                                 # torch.nn.LayerNorm default
OUT_LANES = 128                               # lane-dense packed output width

# ----------------------- packed parameter slab layout ------------------------
# p48  : (2, PATCH_DIM)                     rows: p_ln1_w, p_ln1_b
# p32  : (G32 + DEPTH*LBLK32, DIM)
#        rows 0..4  : emb_b, p_ln2_w, p_ln2_b, t_norm_w, t_norm_b  (rows 5:8 pad)
#        rows 8:24  : pos-emb,  rows 24:40 : ORquery,  rows 40:88 : emb_w
#        per layer l (at G32 + l*LBLK32):
#          +0:32  out_w, +32:96 f_w2,
#          +96 a_ln_w, +97 a_ln_b, +98 f_ln_w, +99 f_ln_b,
#          +100 f_b2, +101 occ_w, +102 occ_b (lane 0), +103 pad
# p64  : (DEPTH*LBLK64, MLP_DIM)  per layer: +0:32 f_w1, +32 f_b1, +33:40 pad
# p128 : (DEPTH*DIM + DIM + 1, 128)
#        rows l*DIM:(l+1)*DIM : [Wq | Wk | Wv | Worq]   (lane-dense, 128)
#        rows 128:160 : head_w zero-padded to 128 lanes, row 160 : head_b
G32 = 8 + 2 * N + PATCH_DIM                   # 88
LBLK32 = 104
LBLK64 = 40


# ------------------------------ pure-JAX glue --------------------------------
def posemb_sincos_2d(h, w, dim, temperature=10000.0):
    y, x = jnp.meshgrid(jnp.arange(h, dtype=jnp.float32),
                        jnp.arange(w, dtype=jnp.float32), indexing="ij")
    omega = jnp.arange(dim // 4, dtype=jnp.float32) / (dim // 4 - 1)
    omega = 1.0 / (temperature ** omega)
    y = y.reshape(-1)[:, None] * omega[None, :]
    x = x.reshape(-1)[:, None] * omega[None, :]
    return jnp.concatenate(
        [jnp.sin(x), jnp.cos(x), jnp.sin(y), jnp.cos(y)], axis=1
    ).astype(jnp.float32)


def img_to_patches(img):
    # 'b c (h p1) (w p2) -> b (h w) (p1 p2 c)'
    B, C, H, W = img.shape
    x = img.reshape(B, C, GH, PATCH_SIZE, GW, PATCH_SIZE)
    x = x.transpose(0, 2, 4, 3, 5, 1)          # b h w p1 p2 c
    return x.reshape(B, N, PATCH_DIM)


def init_params(key):
    ks = jax.random.split(key, 16)

    def nrm(k, shape, scale):
        return (jax.random.normal(k, shape) * scale).astype(jnp.float32)

    ones = lambda s: jnp.ones(s, jnp.float32)
    zeros = lambda s: jnp.zeros(s, jnp.float32)

    return dict(
        pe=posemb_sincos_2d(GH, GW, DIM),                      # (N, DIM)
        orq=nrm(ks[0], (N, DIM), 1.0),                         # ORquery param
        p_ln1_w=ones((1, PATCH_DIM)), p_ln1_b=zeros((1, PATCH_DIM)),
        emb_w=nrm(ks[1], (PATCH_DIM, DIM), PATCH_DIM ** -0.5),
        emb_b=nrm(ks[2], (1, DIM), 0.02),
        p_ln2_w=ones((1, DIM)), p_ln2_b=zeros((1, DIM)),
        t_norm_w=ones((1, DIM)), t_norm_b=zeros((1, DIM)),     # shared transformer norm
        a_ln_w=ones((DEPTH, 1, DIM)), a_ln_b=zeros((DEPTH, 1, DIM)),
        qkv_w=nrm(ks[3], (DEPTH, DIM, 3 * INNER), DIM ** -0.5),
        orq_w=nrm(ks[4], (DEPTH, DIM, INNER), DIM ** -0.5),
        out_w=nrm(ks[5], (DEPTH, INNER, DIM), INNER ** -0.5),
        f_ln_w=ones((DEPTH, 1, DIM)), f_ln_b=zeros((DEPTH, 1, DIM)),
        f_w1=nrm(ks[6], (DEPTH, DIM, MLP_DIM), DIM ** -0.5),
        f_b1=nrm(ks[7], (DEPTH, 1, MLP_DIM), 0.02),
        f_w2=nrm(ks[8], (DEPTH, MLP_DIM, DIM), MLP_DIM ** -0.5),
        f_b2=nrm(ks[9], (DEPTH, 1, DIM), 0.02),
        occ_w=nrm(ks[10], (DEPTH, 1, DIM), DIM ** -0.5),       # occlusion head (row form)
        occ_b=nrm(ks[11], (DEPTH, 1, 1), 0.02),
        head_w=nrm(ks[12], (DIM, NUM_CLASSES), DIM ** -0.5),
        head_b=nrm(ks[13], (1, NUM_CLASSES), 0.02),
    )


def pack_params(P):
    """Consolidate the 26 parameters into 4 lane-grouped slabs (done once)."""
    def row(v, width):
        v = jnp.asarray(v, jnp.float32).reshape(1, -1)
        return jnp.pad(v, ((0, 0), (0, width - v.shape[1])))

    def pad_rows(m, rows):
        return jnp.pad(m, ((0, rows - m.shape[0]), (0, 0)))

    # 48-lane slab: patch LayerNorm
    p48 = jnp.concatenate([P["p_ln1_w"], P["p_ln1_b"]], axis=0)          # (2, 48)

    # 32-lane slab: globals + per-layer (out_w, f_w2, LN vectors, occ head)
    glob_vec = pad_rows(jnp.concatenate([
        row(P["emb_b"], DIM), row(P["p_ln2_w"], DIM), row(P["p_ln2_b"], DIM),
        row(P["t_norm_w"], DIM), row(P["t_norm_b"], DIM)], axis=0), 8)
    pieces32 = [glob_vec, P["pe"], P["orq"], P["emb_w"]]                  # 88 rows
    for l in range(DEPTH):
        blk = jnp.concatenate([
            P["out_w"][l], P["f_w2"][l],
            row(P["a_ln_w"][l], DIM), row(P["a_ln_b"][l], DIM),
            row(P["f_ln_w"][l], DIM), row(P["f_ln_b"][l], DIM),
            row(P["f_b2"][l], DIM), row(P["occ_w"][l], DIM),
            row(P["occ_b"][l], DIM)], axis=0)                             # (103, 32)
        pieces32.append(pad_rows(blk, LBLK32))
    p32 = jnp.concatenate(pieces32, axis=0)
    assert p32.shape == (G32 + DEPTH * LBLK32, DIM)

    # 64-lane slab: per-layer f_w1 + f_b1
    pieces64 = []
    for l in range(DEPTH):
        blk = jnp.concatenate([P["f_w1"][l], row(P["f_b1"][l], MLP_DIM)], axis=0)
        pieces64.append(pad_rows(blk, LBLK64))
    p64 = jnp.concatenate(pieces64, axis=0)
    assert p64.shape == (DEPTH * LBLK64, MLP_DIM)

    # 128-lane slab: fused [Wq|Wk|Wv|Worq] per layer + lane-padded head
    attn_w = jnp.concatenate([P["qkv_w"], P["orq_w"]], axis=-1)           # (D, 32, 128)
    attn_w = attn_w.reshape(DEPTH * DIM, 4 * INNER)
    head_w = jnp.pad(P["head_w"], ((0, 0), (0, OUT_LANES - NUM_CLASSES)))
    head_b = row(P["head_b"], OUT_LANES)
    p128 = jnp.concatenate([attn_w, head_w, head_b], axis=0)
    assert p128.shape == (DEPTH * DIM + DIM + 1, OUT_LANES)

    return p48, p32, p64, p128


# ------------------------------ Pallas kernel --------------------------------
def orformer_kernel(patches_ref, p48_ref, p32_ref, p64_ref, p128_ref, out_ref):
    f32 = jnp.float32

    def layernorm(t, w, b):
        mu = jnp.mean(t, axis=-1, keepdims=True)
        var = jnp.mean(jnp.square(t - mu), axis=-1, keepdims=True)
        return (t - mu) * lax.rsqrt(var + LN_EPS) * w + b

    def softmax(t):
        m = jnp.max(t, axis=-1, keepdims=True)
        e = jnp.exp(t - m)
        # EUP reciprocal instead of a VALU divide
        return e * pl.reciprocal(jnp.sum(e, axis=-1, keepdims=True), approx=True)

    def gelu(t):
        # tanh-GELU (tanh runs on the EUP); |err| vs torch's exact erf-GELU < 1e-3
        c = 0.7978845608028654  # sqrt(2/pi)
        return 0.5 * t * (1.0 + jnp.tanh(c * (t + 0.044715 * t * t * t)))

    # ---- unpack global parameters (static row slices of the packed slabs) ----
    p_ln1_w = p48_ref[0:1, :]
    p_ln1_b = p48_ref[1:2, :]
    emb_b = p32_ref[0:1, :]
    p_ln2_w = p32_ref[1:2, :]
    p_ln2_b = p32_ref[2:3, :]
    t_nw = p32_ref[3:4, :]
    t_nb = p32_ref[4:5, :]
    pe = p32_ref[8:8 + N, :]
    orq = p32_ref[8 + N:8 + 2 * N, :]
    emb_w = p32_ref[8 + 2 * N:8 + 2 * N + PATCH_DIM, :]
    head_w = p128_ref[DEPTH * DIM:DEPTH * DIM + DIM, :]          # (DIM, 128) zero-padded
    head_b = p128_ref[DEPTH * DIM + DIM:DEPTH * DIM + DIM + 1, :]

    # ---- constants hoisted out of all loops ----
    row_nn = lax.broadcasted_iota(jnp.int32, (N2, N), 0)
    col_nn = lax.broadcasted_iota(jnp.int32, (N2, N), 1)
    lower_diag = (row_nn - N) == col_nn          # diagonal of the OR half only
    is_bottom = row_nn >= N
    top_mask = (lax.broadcasted_iota(jnp.int32, (N2, 1), 0) < N).astype(f32)
    eye_f = (lax.broadcasted_iota(jnp.int32, (N, N), 0)
             == lax.broadcasted_iota(jnp.int32, (N, N), 1)).astype(f32)
    # base score multiplier: 1/sqrt(dh) everywhere, 0 on the OR-half diagonal
    base_mult = jnp.where(lower_diag, 0.0, SCALE)               # (2N, N)

    # --- to_patch_embedding: LN -> Linear -> LN, plus sincos positional emb ---
    p = patches_ref[0]                                          # (N, PATCH_DIM)
    h = layernorm(p, p_ln1_w, p_ln1_b)
    h = jnp.dot(h, emb_w, preferred_element_type=f32) + emb_b
    x_emb = layernorm(h, p_ln2_w, p_ln2_b) + pe                 # (N, DIM)

    # running state: rows 0:N = x residual stream, rows N:2N = original ORquery
    xs = jnp.concatenate([x_emb, orq], axis=0)                  # (2N, DIM)
    orq_bottom = xs * (1.0 - top_mask)                          # [0 ; ORquery]

    alpha_row = None      # (1, N) previous layer's alpha (key scaling)
    alpha_col = None      # (N, 1) torch-shaped alpha
    attw_col = None
    norm_stacked = None

    for l in range(DEPTH):
        # -------- per-layer weight views (static row slices) --------
        b32 = G32 + l * LBLK32
        out_w = p32_ref[b32:b32 + INNER, :]                     # (INNER, DIM)
        f_w2 = p32_ref[b32 + INNER:b32 + INNER + MLP_DIM, :]    # (MLP, DIM)
        a_ln_w = p32_ref[b32 + 96:b32 + 97, :]
        a_ln_b = p32_ref[b32 + 97:b32 + 98, :]
        f_ln_w = p32_ref[b32 + 98:b32 + 99, :]
        f_ln_b = p32_ref[b32 + 99:b32 + 100, :]
        f_b2 = p32_ref[b32 + 100:b32 + 101, :]
        occ_w = p32_ref[b32 + 101:b32 + 102, :]
        occ_b = p32_ref[b32 + 102:b32 + 103, 0:1]
        b64 = l * LBLK64
        f_w1 = p64_ref[b64:b64 + DIM, :]                        # (DIM, MLP)
        f_b1 = p64_ref[b64 + DIM:b64 + DIM + 1, :]
        attn_w = p128_ref[l * DIM:(l + 1) * DIM, :]             # (DIM, [Wq|Wk|Wv|Worq])

        # -------- attention: shared LN + one fused projection matmul --------
        ln_out = layernorm(xs, a_ln_w, a_ln_b)                  # (2N, DIM)
        proj = jnp.dot(ln_out, attn_w, preferred_element_type=f32)   # (2N, 128)
        k_full = proj[:N, INNER:2 * INNER]                      # (N, INNER)
        v_full = proj[:N, 2 * INNER:3 * INNER]                  # (N, INNER)
        qor = jnp.concatenate([proj[:N, 0:INNER],               # q  of x rows
                               proj[N:, 3 * INNER:4 * INNER]],  # ORq of OR rows
                              axis=0)                           # (2N, INNER)

        # scale + OR-diag-zero + (1 - alpha) key scaling fused into one matrix,
        # hoisted out of the head loop -> one VALU multiply per head
        if alpha_row is not None:
            score_mult = base_mult * jnp.where(is_bottom, 1.0 - alpha_row, 1.0)
        else:
            score_mult = base_mult

        heads_out = []
        for hh in range(HEADS):
            c0 = hh * DIM_HEAD
            c1 = c0 + DIM_HEAD
            # dots (top rows) and ORdots (bottom rows) in one MXU op
            s = jnp.einsum("nd,md->nm", qor[:, c0:c1], k_full[:, c0:c1],
                           preferred_element_type=f32)          # (2N, N)
            pattn = softmax(s * score_mult)
            heads_out.append(jnp.dot(pattn, v_full[:, c0:c1],
                                     preferred_element_type=f32))    # (2N, dh)
        o_full = jnp.concatenate(heads_out, axis=-1)            # (2N, INNER)
        attn_out = jnp.dot(o_full, out_w, preferred_element_type=f32)  # (2N, DIM)

        # -------- residual (x path only) + FeedForward on the stacked pair ----
        ff_in = attn_out + xs * top_mask                        # [x+x_attn ; OR_attn]
        tn = layernorm(ff_in, f_ln_w, f_ln_b)
        hid = gelu(jnp.dot(tn, f_w1, preferred_element_type=f32) + f_b1)
        ff_out = jnp.dot(hid, f_w2, preferred_element_type=f32) + f_b2 + ff_in

        # shared transformer norm on the stacked pair: [norm_x ; norm_ORx]
        norm_stacked = layernorm(ff_out, t_nw, t_nb)

        # -------- occlusion head --------
        diff2 = jnp.square(norm_stacked[:N] - norm_stacked[N:])       # (N, DIM)
        a_lin = jnp.sum(diff2 * occ_w, axis=-1, keepdims=True) + occ_b
        alpha_col = jax.nn.sigmoid(a_lin)                       # (N, 1)
        if l == 2:
            attw_col = alpha_col
        if l < DEPTH - 1:
            # (N,1) -> (1,N) without an explicit relayout/transpose
            alpha_row = jnp.sum(alpha_col * eye_f, axis=0, keepdims=True)
            xs = ff_out * top_mask + orq_bottom                 # [new x ; ORquery]

    # ---- classification head on the stacked pair + lane-dense packed output --
    logits = jnp.dot(norm_stacked, head_w, preferred_element_type=f32) + head_b
    aa = jnp.concatenate([alpha_col, attw_col], axis=0)         # (2N, 1)
    lane_i = lax.broadcasted_iota(jnp.int32, (N2, OUT_LANES), 1)
    # lanes 0:8 logits (x rows then OR rows); lane 8: alpha (top) / attw (bottom)
    out_ref[0] = logits + jnp.where(lane_i == NUM_CLASSES, aa, 0.0)


def _full_spec(a):
    zeros = (0,) * a.ndim
    return pl.BlockSpec(a.shape, lambda b: zeros)


def orformer_forward(img, packed):
    patches = img_to_patches(img)                               # (B, N, PATCH_DIM)
    B = patches.shape[0]
    p48, p32, p64, p128 = packed

    out = pl.pallas_call(
        orformer_kernel,
        out_shape=jax.ShapeDtypeStruct((B, N2, OUT_LANES), jnp.float32),
        grid=(B,),
        in_specs=[
            pl.BlockSpec((1, N, PATCH_DIM), lambda b: (b, 0, 0)),
            _full_spec(p48), _full_spec(p32), _full_spec(p64), _full_spec(p128),
        ],
        out_specs=pl.BlockSpec((1, N2, OUT_LANES), lambda b: (b, 0, 0)),
        compiler_params=pltpu.CompilerParams(dimension_semantics=("parallel",)),
    )(patches, p48, p32, p64, p128)

    logits_x = out[:, :N, :NUM_CLASSES]
    logits_or = out[:, N:, :NUM_CLASSES]
    alpha = out[:, :N, NUM_CLASSES:NUM_CLASSES + 1]
    attw = out[:, N:, NUM_CLASSES:NUM_CLASSES + 1]
    return logits_x, logits_or, alpha, attw


# --------------------------- pure-JAX reference -------------------------------
def reference_forward(img, P):
    patches = img_to_patches(img)
    B = patches.shape[0]

    def ln(t, w, b):
        mu = t.mean(-1, keepdims=True)
        var = ((t - mu) ** 2).mean(-1, keepdims=True)
        return (t - mu) / jnp.sqrt(var + LN_EPS) * w + b

    x = ln(patches, P["p_ln1_w"], P["p_ln1_b"])
    x = x @ P["emb_w"] + P["emb_b"]
    x = ln(x, P["p_ln2_w"], P["p_ln2_b"])
    x = x + P["pe"]
    orq = jnp.broadcast_to(P["orq"][None], (B, N, DIM))

    def to_heads(t):
        return t.reshape(B, N, HEADS, DIM_HEAD).transpose(0, 2, 1, 3)

    eye = jnp.eye(N, dtype=bool)
    alpha = None
    attw = None
    norm_x = norm_orx = None
    for l in range(DEPTH):
        xn = ln(x, P["a_ln_w"][l], P["a_ln_b"][l])
        qkv = xn @ P["qkv_w"][l]
        q, k, v = jnp.split(qkv, 3, axis=-1)
        q, k, v = to_heads(q), to_heads(k), to_heads(v)
        dots = jnp.einsum("bhnd,bhmd->bhnm", q, k) * SCALE
        out = jnp.einsum("bhnm,bhmd->bhnd", jax.nn.softmax(dots, -1), v)
        out = out.transpose(0, 2, 1, 3).reshape(B, N, INNER)

        orqn = ln(orq, P["a_ln_w"][l], P["a_ln_b"][l])
        orqp = to_heads(orqn @ P["orq_w"][l])
        ordots = jnp.einsum("bhnd,bhmd->bhnm", orqp, k) * SCALE
        ordots = jnp.where(eye, 0.0, ordots)
        if alpha is not None:
            ra = jnp.swapaxes(alpha, 1, 2)[:, None, :, :]   # (B,1,1,N)
            ordots = ordots * (1.0 - ra)
        orout = jnp.einsum("bhnm,bhmd->bhnd", jax.nn.softmax(ordots, -1), v)
        orout = orout.transpose(0, 2, 1, 3).reshape(B, N, INNER)

        x_attn = out @ P["out_w"][l]
        or_attn = orout @ P["out_w"][l]

        def ff(t, _l=l):
            tn = ln(t, P["f_ln_w"][_l], P["f_ln_b"][_l])
            hid = jax.nn.gelu(tn @ P["f_w1"][_l] + P["f_b1"][_l], approximate=False)
            return hid @ P["f_w2"][_l] + P["f_b2"][_l]

        x = x_attn + x
        x = ff(x) + x
        orx = ff(or_attn) + or_attn
        norm_x = ln(x, P["t_norm_w"], P["t_norm_b"])
        norm_orx = ln(orx, P["t_norm_w"], P["t_norm_b"])
        diff2 = jnp.square(norm_x - norm_orx)
        alpha = jax.nn.sigmoid(
            jnp.sum(diff2 * P["occ_w"][l], -1, keepdims=True) + P["occ_b"][l])
        if l == 2:
            attw = alpha

    return (norm_x @ P["head_w"] + P["head_b"],
            norm_orx @ P["head_w"] + P["head_b"],
            alpha, attw)


# ----------------------------------- main -------------------------------------
if __name__ == "__main__":
    key = jax.random.PRNGKey(0)
    k_img, k_par = jax.random.split(key)
    img = jax.random.normal(
        k_img, (BATCH, CHANNELS, IMAGE_SIZE, IMAGE_SIZE), dtype=jnp.float32)
    P = init_params(k_par)
    packed = pack_params(P)

    outs = orformer_forward(img, packed)
    outs = jax.block_until_ready(outs)

    refs = reference_forward(img, P)
    names = ("logits_x", "logits_ORx", "alpha", "attention_weights")
    for a, r, name in zip(outs, refs, names):
        assert a.shape == r.shape, (name, a.shape, r.shape)
        assert bool(jnp.all(jnp.isfinite(a))), name
        err = float(jnp.max(jnp.abs(a - r)))
        assert err < 5e-2, (name, err)

    print("KERNEL_OK")
</pallas_src>

<mosaic_0001>
module attributes {stable_mosaic.version = 11 : i64} {
  func.func @orformer_kernel(%arg0: i32, %arg1: memref<1x16x48xf32, #tpu.memory_space<vmem>>, %arg2: memref<2x48xf32, #tpu.memory_space<vmem>>, %arg3: memref<504x32xf32, #tpu.memory_space<vmem>>, %arg4: memref<160x64xf32, #tpu.memory_space<vmem>>, %arg5: memref<161x128xf32, #tpu.memory_space<vmem>>, %arg6: memref<1x32x128xf32, #tpu.memory_space<vmem>>) attributes {dimension_semantics = [#tpu.dimension_semantics<parallel>], iteration_bounds = array<i64: 2>, scalar_prefetch = 0 : i64, scratch_operands = 0 : i64, tpu.core_type = #tpu.core_type<tc>, window_params = [{transform_indices = @transform_0, window_bounds = array<i64: 1, 16, 48>}, {pipeline_mode = #tpu.pipeline_mode<synchronous>, transform_indices = @transform_1, window_bounds = array<i64: 2, 48>}, {pipeline_mode = #tpu.pipeline_mode<synchronous>, transform_indices = @transform_2, window_bounds = array<i64: 504, 32>}, {pipeline_mode = #tpu.pipeline_mode<synchronous>, transform_indices = @transform_3, window_bounds = array<i64: 160, 64>}, {pipeline_mode = #tpu.pipeline_mode<synchronous>, transform_indices = @transform_4, window_bounds = array<i64: 161, 128>}, {transform_indices = @transform_5, window_bounds = array<i64: 1, 32, 128>}]} {
    %c0 = arith.constant 0 : index
    %c0_0 = arith.constant 0 : index
    %0 = vector.load %arg2[%c0, %c0_0] : memref<2x48xf32, #tpu.memory_space<vmem>>, vector<1x48xf32>
    %c1 = arith.constant 1 : index
    %c0_1 = arith.constant 0 : index
    %1 = vector.load %arg2[%c1, %c0_1] : memref<2x48xf32, #tpu.memory_space<vmem>>, vector<1x48xf32>
    %c0_2 = arith.constant 0 : index
    %c0_3 = arith.constant 0 : index
    %2 = vector.load %arg3[%c0_2, %c0_3] : memref<504x32xf32, #tpu.memory_space<vmem>>, vector<1x32xf32>
    %c1_4 = arith.constant 1 : index
    %c0_5 = arith.constant 0 : index
    %3 = vector.load %arg3[%c1_4, %c0_5] : memref<504x32xf32, #tpu.memory_space<vmem>>, vector<1x32xf32>
    %c2 = arith.constant 2 : index
    %c0_6 = arith.constant 0 : index
    %4 = vector.load %arg3[%c2, %c0_6] : memref<504x32xf32, #tpu.memory_space<vmem>>, vector<1x32xf32>
    %c3 = arith.constant 3 : index
    %c0_7 = arith.constant 0 : index
    %5 = vector.load %arg3[%c3, %c0_7] : memref<504x32xf32, #tpu.memory_space<vmem>>, vector<1x32xf32>
    %c4 = arith.constant 4 : index
    %c0_8 = arith.constant 0 : index
    %6 = vector.load %arg3[%c4, %c0_8] : memref<504x32xf32, #tpu.memory_space<vmem>>, vector<1x32xf32>
    %c8 = arith.constant 8 : index
    %c0_9 = arith.constant 0 : index
    %7 = vector.load %arg3[%c8, %c0_9] : memref<504x32xf32, #tpu.memory_space<vmem>>, vector<16x32xf32>
    %c24 = arith.constant 24 : index
    %c0_10 = arith.constant 0 : index
    %8 = vector.load %arg3[%c24, %c0_10] : memref<504x32xf32, #tpu.memory_space<vmem>>, vector<16x32xf32>
    %c40 = arith.constant 40 : index
    %c0_11 = arith.constant 0 : index
    %9 = vector.load %arg3[%c40, %c0_11] : memref<504x32xf32, #tpu.memory_space<vmem>>, vector<48x32xf32>
    %c128 = arith.constant 128 : index
    %c0_12 = arith.constant 0 : index
    %10 = vector.load %arg5[%c128, %c0_12] : memref<161x128xf32, #tpu.memory_space<vmem>>, vector<32x128xf32>
    %c160 = arith.constant 160 : index
    %c0_13 = arith.constant 0 : index
    %11 = vector.load %arg5[%c160, %c0_13] : memref<161x128xf32, #tpu.memory_space<vmem>>, vector<1x128xf32>
    %12 = tpu.iota {dimensions = array<i32: 0>} : vector<32x16xi32>
    %13 = tpu.iota {dimensions = array<i32: 1>} : vector<32x16xi32>
    %c16_i32 = arith.constant 16 : i32
    %14 = vector.broadcast %c16_i32 : i32 to vector<32x16xi32>
    %15 = arith.subi %12, %14 : vector<32x16xi32>
    %16 = arith.cmpi eq, %15, %13 : vector<32x16xi32>
    %c16_i32_14 = arith.constant 16 : i32
    %17 = vector.broadcast %c16_i32_14 : i32 to vector<32x16xi32>
    %18 = arith.cmpi sge, %12, %17 : vector<32x16xi32>
    %19 = tpu.iota {dimensions = array<i32: 0>} : vector<32x1xi32>
    %c16_i32_15 = arith.constant 16 : i32
    %20 = vector.broadcast %c16_i32_15 : i32 to vector<32x1xi32>
    %21 = arith.cmpi slt, %19, %20 : vector<32x1xi32>
    %22 = arith.extui %21 : vector<32x1xi1> to vector<32x1xi32>
    %23 = arith.sitofp %22 : vector<32x1xi32> to vector<32x1xf32>
    %24 = tpu.iota {dimensions = array<i32: 0>} : vector<16x16xi32>
    %25 = tpu.iota {dimensions = array<i32: 1>} : vector<16x16xi32>
    %26 = arith.cmpi eq, %24, %25 : vector<16x16xi32>
    %27 = arith.extui %26 : vector<16x16xi1> to vector<16x16xi32>
    %28 = arith.sitofp %27 : vector<16x16xi32> to vector<16x16xf32>
    %cst = arith.constant 0.000000e+00 : f32
    %cst_16 = arith.constant 2.500000e-01 : f32
    %29 = vector.broadcast %cst : f32 to vector<32x16xf32>
    %30 = vector.broadcast %cst_16 : f32 to vector<32x16xf32>
    %31 = arith.select %16, %29, %30 : vector<32x16xi1>, vector<32x16xf32>
    %c0_17 = arith.constant 0 : index
    %c0_18 = arith.constant 0 : index
    %c0_19 = arith.constant 0 : index
    %32 = vector.load %arg1[%c0_17, %c0_18, %c0_19] : memref<1x16x48xf32, #tpu.memory_space<vmem>>, vector<1x16x48xf32>
    %33 = vector.shape_cast %32 : vector<1x16x48xf32> to vector<16x48xf32>
    %cst_20 = arith.constant dense<0.000000e+00> : vector<16xf32>
    %34 = vector.multi_reduction <add>, %33, %cst_20 [1] : vector<16x48xf32> to vector<16xf32>
    %35 = vector.shape_cast %34 : vector<16xf32> to vector<16x1xf32>
    %cst_21 = arith.constant 4.800000e+01 : f32
    %36 = vector.broadcast %cst_21 : f32 to vector<16x1xf32>
    %37 = arith.divf %35, %36 : vector<16x1xf32>
    %38 = vector.broadcast %37 : vector<16x1xf32> to vector<16x48xf32>
    %39 = arith.subf %33, %38 : vector<16x48xf32>
    %40 = arith.mulf %39, %39 : vector<16x48xf32>
    %cst_22 = arith.constant dense<0.000000e+00> : vector<16xf32>
    %41 = vector.multi_reduction <add>, %40, %cst_22 [1] : vector<16x48xf32> to vector<16xf32>
    %42 = vector.shape_cast %41 : vector<16xf32> to vector<16x1xf32>
    %cst_23 = arith.constant 4.800000e+01 : f32
    %43 = vector.broadcast %cst_23 : f32 to vector<16x1xf32>
    %44 = arith.divf %42, %43 : vector<16x1xf32>
    %45 = vector.broadcast %37 : vector<16x1xf32> to vector<16x48xf32>
    %46 = arith.subf %33, %45 : vector<16x48xf32>
    %cst_24 = arith.constant 9.99999974E-6 : f32
    %47 = vector.broadcast %cst_24 : f32 to vector<16x1xf32>
    %48 = arith.addf %44, %47 : vector<16x1xf32>
    %49 = math.rsqrt %48 : vector<16x1xf32>
    %50 = vector.broadcast %49 : vector<16x1xf32> to vector<16x48xf32>
    %51 = arith.mulf %46, %50 : vector<16x48xf32>
    %52 = vector.broadcast %0 : vector<1x48xf32> to vector<16x48xf32>
    %53 = arith.mulf %51, %52 : vector<16x48xf32>
    %54 = vector.broadcast %1 : vector<1x48xf32> to vector<16x48xf32>
    %55 = arith.addf %53, %54 : vector<16x48xf32>
    %cst_25 = arith.constant dense<0.000000e+00> : vector<16x32xf32>
    %56 = tpu.matmul %55, %9, %cst_25 {dimension_numbers = #tpu.dot_dimension_numbers<[1], [0], [0], [1], [0, 0, 1, 1], [], []>} : vector<16x48xf32>, vector<48x32xf32>, vector<16x32xf32> -> vector<16x32xf32>
    %57 = vector.broadcast %2 : vector<1x32xf32> to vector<16x32xf32>
    %58 = arith.addf %56, %57 : vector<16x32xf32>
    %cst_26 = arith.constant dense<0.000000e+00> : vector<16xf32>
    %59 = vector.multi_reduction <add>, %58, %cst_26 [1] : vector<16x32xf32> to vector<16xf32>
    %60 = vector.shape_cast %59 : vector<16xf32> to vector<16x1xf32>
    %cst_27 = arith.constant 3.200000e+01 : f32
    %61 = vector.broadcast %cst_27 : f32 to vector<16x1xf32>
    %62 = arith.divf %60, %61 : vector<16x1xf32>
    %63 = vector.broadcast %62 : vector<16x1xf32> to vector<16x32xf32>
    %64 = arith.subf %58, %63 : vector<16x32xf32>
    %65 = arith.mulf %64, %64 : vector<16x32xf32>
    %cst_28 = arith.constant dense<0.000000e+00> : vector<16xf32>
    %66 = vector.multi_reduction <add>, %65, %cst_28 [1] : vector<16x32xf32> to vector<16xf32>
    %67 = vector.shape_cast %66 : vector<16xf32> to vector<16x1xf32>
    %cst_29 = arith.constant 3.200000e+01 : f32
    %68 = vector.broadcast %cst_29 : f32 to vector<16x1xf32>
    %69 = arith.divf %67, %68 : vector<16x1xf32>
    %70 = vector.broadcast %62 : vector<16x1xf32> to vector<16x32xf32>
    %71 = arith.subf %58, %70 : vector<16x32xf32>
    %cst_30 = arith.constant 9.99999974E-6 : f32
    %72 = vector.broadcast %cst_30 : f32 to vector<16x1xf32>
    %73 = arith.addf %69, %72 : vector<16x1xf32>
    %74 = math.rsqrt %73 : vector<16x1xf32>
    %75 = vector.broadcast %74 : vector<16x1xf32> to vector<16x32xf32>
    %76 = arith.mulf %71, %75 : vector<16x32xf32>
    %77 = vector.broadcast %3 : vector<1x32xf32> to vector<16x32xf32>
    %78 = arith.mulf %76, %77 : vector<16x32xf32>
    %79 = vector.broadcast %4 : vector<1x32xf32> to vector<16x32xf32>
    %80 = arith.addf %78, %79 : vector<16x32xf32>
    %81 = arith.addf %80, %7 : vector<16x32xf32>
    %82 = tpu.concatenate %81, %8 in 0 : vector<16x32xf32>, vector<16x32xf32> -> vector<32x32xf32>
    %cst_31 = arith.constant 1.000000e+00 : f32
    %83 = vector.broadcast %cst_31 : f32 to vector<32x1xf32>
    %84 = arith.subf %83, %23 : vector<32x1xf32>
    %85 = vector.broadcast %84 : vector<32x1xf32> to vector<32x32xf32>
    %86 = arith.mulf %82, %85 : vector<32x32xf32>
    %c88 = arith.constant 88 : index
    %c0_32 = arith.constant 0 : index
    %87 = vector.load %arg3[%c88, %c0_32] : memref<504x32xf32, #tpu.memory_space<vmem>>, vector<32x32xf32>
    %c120 = arith.constant 120 : index
    %c0_33 = arith.constant 0 : index
    %88 = vector.load %arg3[%c120, %c0_33] : memref<504x32xf32, #tpu.memory_space<vmem>>, vector<64x32xf32>
    %c184 = arith.constant 184 : index
    %c0_34 = arith.constant 0 : index
    %89 = vector.load %arg3[%c184, %c0_34] : memref<504x32xf32, #tpu.memory_space<vmem>>, vector<1x32xf32>
    %c185 = arith.constant 185 : index
    %c0_35 = arith.constant 0 : index
    %90 = vector.load %arg3[%c185, %c0_35] : memref<504x32xf32, #tpu.memory_space<vmem>>, vector<1x32xf32>
    %c186 = arith.constant 186 : index
    %c0_36 = arith.constant 0 : index
    %91 = vector.load %arg3[%c186, %c0_36] : memref<504x32xf32, #tpu.memory_space<vmem>>, vector<1x32xf32>
    %c187 = arith.constant 187 : index
    %c0_37 = arith.constant 0 : index
    %92 = vector.load %arg3[%c187, %c0_37] : memref<504x32xf32, #tpu.memory_space<vmem>>, vector<1x32xf32>
    %c188 = arith.constant 188 : index
    %c0_38 = arith.constant 0 : index
    %93 = vector.load %arg3[%c188, %c0_38] : memref<504x32xf32, #tpu.memory_space<vmem>>, vector<1x32xf32>
    %c189 = arith.constant 189 : index
    %c0_39 = arith.constant 0 : index
    %94 = vector.load %arg3[%c189, %c0_39] : memref<504x32xf32, #tpu.memory_space<vmem>>, vector<1x32xf32>
    %c190 = arith.constant 190 : index
    %c0_40 = arith.constant 0 : index
    %95 = vector.load %arg3[%c190, %c0_40] : memref<504x32xf32, #tpu.memory_space<vmem>>, vector<1x1xf32>
    %c0_41 = arith.constant 0 : index
    %c0_42 = arith.constant 0 : index
    %96 = vector.load %arg4[%c0_41, %c0_42] : memref<160x64xf32, #tpu.memory_space<vmem>>, vector<32x64xf32>
    %c32 = arith.constant 32 : index
    %c0_43 = arith.constant 0 : index
    %97 = vector.load %arg4[%c32, %c0_43] : memref<160x64xf32, #tpu.memory_space<vmem>>, vector<1x64xf32>
    %c0_44 = arith.constant 0 : index
    %c0_45 = arith.constant 0 : index
    %98 = vector.load %arg5[%c0_44, %c0_45] : memref<161x128xf32, #tpu.memory_space<vmem>>, vector<32x128xf32>
    %cst_46 = arith.constant dense<0.000000e+00> : vector<32xf32>
    %99 = vector.multi_reduction <add>, %82, %cst_46 [1] : vector<32x32xf32> to vector<32xf32>
    %100 = vector.shape_cast %99 : vector<32xf32> to vector<32x1xf32>
    %cst_47 = arith.constant 3.200000e+01 : f32
    %101 = vector.broadcast %cst_47 : f32 to vector<32x1xf32>
    %102 = arith.divf %100, %101 : vector<32x1xf32>
    %103 = vector.broadcast %102 : vector<32x1xf32> to vector<32x32xf32>
    %104 = arith.subf %82, %103 : vector<32x32xf32>
    %105 = arith.mulf %104, %104 : vector<32x32xf32>
    %cst_48 = arith.constant dense<0.000000e+00> : vector<32xf32>
    %106 = vector.multi_reduction <add>, %105, %cst_48 [1] : vector<32x32xf32> to vector<32xf32>
    %107 = vector.shape_cast %106 : vector<32xf32> to vector<32x1xf32>
    %cst_49 = arith.constant 3.200000e+01 : f32
    %108 = vector.broadcast %cst_49 : f32 to vector<32x1xf32>
    %109 = arith.divf %107, %108 : vector<32x1xf32>
    %110 = vector.broadcast %102 : vector<32x1xf32> to vector<32x32xf32>
    %111 = arith.subf %82, %110 : vector<32x32xf32>
    %cst_50 = arith.constant 9.99999974E-6 : f32
    %112 = vector.broadcast %cst_50 : f32 to vector<32x1xf32>
    %113 = arith.addf %109, %112 : vector<32x1xf32>
    %114 = math.rsqrt %113 : vector<32x1xf32>
    %115 = vector.broadcast %114 : vector<32x1xf32> to vector<32x32xf32>
    %116 = arith.mulf %111, %115 : vector<32x32xf32>
    %117 = vector.broadcast %89 : vector<1x32xf32> to vector<32x32xf32>
    %118 = arith.mulf %116, %117 : vector<32x32xf32>
    %119 = vector.broadcast %90 : vector<1x32xf32> to vector<32x32xf32>
    %120 = arith.addf %118, %119 : vector<32x32xf32>
    %cst_51 = arith.constant dense<0.000000e+00> : vector<32x128xf32>
    %121 = tpu.matmul %120, %98, %cst_51 {dimension_numbers = #tpu.dot_dimension_numbers<[1], [0], [0], [1], [0, 0, 1, 1], [], []>} : vector<32x32xf32>, vector<32x128xf32>, vector<32x128xf32> -> vector<32x128xf32>
    %122 = vector.extract_strided_slice %121 {offsets = [0, 32], sizes = [16, 32], strides = [1, 1]} : vector<32x128xf32> to vector<16x32xf32>
    %123 = vector.extract_strided_slice %121 {offsets = [0, 64], sizes = [16, 32], strides = [1, 1]} : vector<32x128xf32> to vector<16x32xf32>
    %124 = vector.extract_strided_slice %121 {offsets = [0, 0], sizes = [16, 32], strides = [1, 1]} : vector<32x128xf32> to vector<16x32xf32>
    %125 = vector.extract_strided_slice %121 {offsets = [16, 96], sizes = [16, 32], strides = [1, 1]} : vector<32x128xf32> to vector<16x32xf32>
    %126 = tpu.concatenate %124, %125 in 0 : vector<16x32xf32>, vector<16x32xf32> -> vector<32x32xf32>
    %127 = vector.extract_strided_slice %126 {offsets = [0, 0], sizes = [32, 16], strides = [1, 1]} : vector<32x32xf32> to vector<32x16xf32>
    %128 = vector.extract_strided_slice %122 {offsets = [0, 0], sizes = [16, 16], strides = [1, 1]} : vector<16x32xf32> to vector<16x16xf32>
    "tpu.trace_start"() <{level = 10 : i32, message = "nd,md->nm"}> : () -> ()
    %cst_52 = arith.constant dense<0.000000e+00> : vector<32x16xf32>
    %129 = tpu.matmul %127, %128, %cst_52 {dimension_numbers = #tpu.dot_dimension_numbers<[1], [1], [0], [0], [0, 0, 1, 0], [], []>} : vector<32x16xf32>, vector<16x16xf32>, vector<32x16xf32> -> vector<32x16xf32>
    "tpu.trace_stop"() : () -> ()
    %130 = arith.mulf %129, %31 : vector<32x16xf32>
    %cst_53 = arith.constant dense<0xFF800000> : vector<32xf32>
    %131 = vector.multi_reduction <maximumf>, %130, %cst_53 [1] : vector<32x16xf32> to vector<32xf32>
    %132 = vector.shape_cast %131 : vector<32xf32> to vector<32x1xf32>
    %133 = vector.broadcast %132 : vector<32x1xf32> to vector<32x16xf32>
    %134 = arith.subf %130, %133 : vector<32x16xf32>
    %135 = math.exp %134 : vector<32x16xf32>
    %cst_54 = arith.constant dense<0.000000e+00> : vector<32xf32>
    %136 = vector.multi_reduction <add>, %135, %cst_54 [1] : vector<32x16xf32> to vector<32xf32>
    %137 = vector.shape_cast %136 : vector<32xf32> to vector<32x1xf32>
    %138 = tpu.reciprocal %137 {approx = true} : vector<32x1xf32> -> vector<32x1xf32>
    %139 = vector.broadcast %138 : vector<32x1xf32> to vector<32x16xf32>
    %140 = arith.mulf %135, %139 : vector<32x16xf32>
    %141 = vector.extract_strided_slice %123 {offsets = [0, 0], sizes = [16, 16], strides = [1, 1]} : vector<16x32xf32> to vector<16x16xf32>
    %cst_55 = arith.constant dense<0.000000e+00> : vector<32x16xf32>
    %142 = tpu.matmul %140, %141, %cst_55 {dimension_numbers = #tpu.dot_dimension_numbers<[1], [0], [0], [1], [0, 0, 1, 1], [], []>} : vector<32x16xf32>, vector<16x16xf32>, vector<32x16xf32> -> vector<32x16xf32>
    %143 = vector.extract_strided_slice %126 {offsets = [0, 16], sizes = [32, 16], strides = [1, 1]} : vector<32x32xf32> to vector<32x16xf32>
    %144 = vector.extract_strided_slice %122 {offsets = [0, 16], sizes = [16, 16], strides = [1, 1]} : vector<16x32xf32> to vector<16x16xf32>
    "tpu.trace_start"() <{level = 10 : i32, message = "nd,md->nm"}> : () -> ()
    %cst_56 = arith.constant dense<0.000000e+00> : vector<32x16xf32>
    %145 = tpu.matmul %143, %144, %cst_56 {dimension_numbers = #tpu.dot_dimension_numbers<[1], [1], [0], [0], [0, 0, 1, 0], [], []>} : vector<32x16xf32>, vector<16x16xf32>, vector<32x16xf32> -> vector<32x16xf32>
    "tpu.trace_stop"() : () -> ()
    %146 = arith.mulf %145, %31 : vector<32x16xf32>
    %cst_57 = arith.constant dense<0xFF800000> : vector<32xf32>
    %147 = vector.multi_reduction <maximumf>, %146, %cst_57 [1] : vector<32x16xf32> to vector<32xf32>
    %148 = vector.shape_cast %147 : vector<32xf32> to vector<32x1xf32>
    %149 = vector.broadcast %148 : vector<32x1xf32> to vector<32x16xf32>
    %150 = arith.subf %146, %149 : vector<32x16xf32>
    %151 = math.exp %150 : vector<32x16xf32>
    %cst_58 = arith.constant dense<0.000000e+00> : vector<32xf32>
    %152 = vector.multi_reduction <add>, %151, %cst_58 [1] : vector<32x16xf32> to vector<32xf32>
    %153 = vector.shape_cast %152 : vector<32xf32> to vector<32x1xf32>
    %154 = tpu.reciprocal %153 {approx = true} : vector<32x1xf32> -> vector<32x1xf32>
    %155 = vector.broadcast %154 : vector<32x1xf32> to vector<32x16xf32>
    %156 = arith.mulf %151, %155 : vector<32x16xf32>
    %157 = vector.extract_strided_slice %123 {offsets = [0, 16], sizes = [16, 16], strides = [1, 1]} : vector<16x32xf32> to vector<16x16xf32>
    %cst_59 = arith.constant dense<0.000000e+00> : vector<32x16xf32>
    %158 = tpu.matmul %156, %157, %cst_59 {dimension_numbers = #tpu.dot_dimension_numbers<[1], [0], [0], [1], [0, 0, 1, 1], [], []>} : vector<32x16xf32>, vector<16x16xf32>, vector<32x16xf32> -> vector<32x16xf32>
    %159 = tpu.concatenate %142, %158 in 1 : vector<32x16xf32>, vector<32x16xf32> -> vector<32x32xf32>
    %cst_60 = arith.constant dense<0.000000e+00> : vector<32x32xf32>
    %160 = tpu.matmul %159, %87, %cst_60 {dimension_numbers = #tpu.dot_dimension_numbers<[1], [0], [0], [1], [0, 0, 1, 1], [], []>} : vector<32x32xf32>, vector<32x32xf32>, vector<32x32xf32> -> vector<32x32xf32>
    %161 = vector.broadcast %23 : vector<32x1xf32> to vector<32x32xf32>
    %162 = arith.mulf %82, %161 : vector<32x32xf32>
    %163 = arith.addf %160, %162 : vector<32x32xf32>
    %cst_61 = arith.constant dense<0.000000e+00> : vector<32xf32>
    %164 = vector.multi_reduction <add>, %163, %cst_61 [1] : vector<32x32xf32> to vector<32xf32>
    %165 = vector.shape_cast %164 : vector<32xf32> to vector<32x1xf32>
    %cst_62 = arith.constant 3.200000e+01 : f32
    %166 = vector.broadcast %cst_62 : f32 to vector<32x1xf32>
    %167 = arith.divf %165, %166 : vector<32x1xf32>
    %168 = vector.broadcast %167 : vector<32x1xf32> to vector<32x32xf32>
    %169 = arith.subf %163, %168 : vector<32x32xf32>
    %170 = arith.mulf %169, %169 : vector<32x32xf32>
    %cst_63 = arith.constant dense<0.000000e+00> : vector<32xf32>
    %171 = vector.multi_reduction <add>, %170, %cst_63 [1] : vector<32x32xf32> to vector<32xf32>
    %172 = vector.shape_cast %171 : vector<32xf32> to vector<32x1xf32>
    %cst_64 = arith.constant 3.200000e+01 : f32
    %173 = vector.broadcast %cst_64 : f32 to vector<32x1xf32>
    %174 = arith.divf %172, %173 : vector<32x1xf32>
    %175 = vector.broadcast %167 : vector<32x1xf32> to vector<32x32xf32>
    %176 = arith.subf %163, %175 : vector<32x32xf32>
    %cst_65 = arith.constant 9.99999974E-6 : f32
    %177 = vector.broadcast %cst_65 : f32 to vector<32x1xf32>
    %178 = arith.addf %174, %177 : vector<32x1xf32>
    %179 = math.rsqrt %178 : vector<32x1xf32>
    %180 = vector.broadcast %179 : vector<32x1xf32> to vector<32x32xf32>
    %181 = arith.mulf %176, %180 : vector<32x32xf32>
    %182 = vector.broadcast %91 : vector<1x32xf32> to vector<32x32xf32>
    %183 = arith.mulf %181, %182 : vector<32x32xf32>
    %184 = vector.broadcast %92 : vector<1x32xf32> to vector<32x32xf32>
    %185 = arith.addf %183, %184 : vector<32x32xf32>
    %cst_66 = arith.constant dense<0.000000e+00> : vector<32x64xf32>
    %186 = tpu.matmul %185, %96, %cst_66 {dimension_numbers = #tpu.dot_dimension_numbers<[1], [0], [0], [1], [0, 0, 1, 1], [], []>} : vector<32x32xf32>, vector<32x64xf32>, vector<32x64xf32> -> vector<32x64xf32>
    %187 = vector.broadcast %97 : vector<1x64xf32> to vector<32x64xf32>
    %188 = arith.addf %186, %187 : vector<32x64xf32>
    %cst_67 = arith.constant 5.000000e-01 : f32
    %189 = vector.broadcast %cst_67 : f32 to vector<32x64xf32>
    %190 = arith.mulf %189, %188 : vector<32x64xf32>
    %cst_68 = arith.constant 4.471500e-02 : f32
    %191 = vector.broadcast %cst_68 : f32 to vector<32x64xf32>
    %192 = arith.mulf %191, %188 : vector<32x64xf32>
    %193 = arith.mulf %192, %188 : vector<32x64xf32>
    %194 = arith.mulf %193, %188 : vector<32x64xf32>
    %195 = arith.addf %188, %194 : vector<32x64xf32>
    %cst_69 = arith.constant 0.797884583 : f32
    %196 = vector.broadcast %cst_69 : f32 to vector<32x64xf32>
    %197 = arith.mulf %196, %195 : vector<32x64xf32>
    %198 = math.tanh %197 : vector<32x64xf32>
    %cst_70 = arith.constant 1.000000e+00 : f32
    %199 = vector.broadcast %cst_70 : f32 to vector<32x64xf32>
    %200 = arith.addf %199, %198 : vector<32x64xf32>
    %201 = arith.mulf %190, %200 : vector<32x64xf32>
    %cst_71 = arith.constant dense<0.000000e+00> : vector<32x32xf32>
    %202 = tpu.matmul %201, %88, %cst_71 {dimension_numbers = #tpu.dot_dimension_numbers<[1], [0], [0], [1], [0, 0, 1, 1], [], []>} : vector<32x64xf32>, vector<64x32xf32>, vector<32x32xf32> -> vector<32x32xf32>
    %203 = vector.broadcast %93 : vector<1x32xf32> to vector<32x32xf32>
    %204 = arith.addf %202, %203 : vector<32x32xf32>
    %205 = arith.addf %204, %163 : vector<32x32xf32>
    %cst_72 = arith.constant dense<0.000000e+00> : vector<32xf32>
    %206 = vector.multi_reduction <add>, %205, %cst_72 [1] : vector<32x32xf32> to vector<32xf32>
    %207 = vector.shape_cast %206 : vector<32xf32> to vector<32x1xf32>
    %cst_73 = arith.constant 3.200000e+01 : f32
    %208 = vector.broadcast %cst_73 : f32 to vector<32x1xf32>
    %209 = arith.divf %207, %208 : vector<32x1xf32>
    %210 = vector.broadcast %209 : vector<32x1xf32> to vector<32x32xf32>
    %211 = arith.subf %205, %210 : vector<32x32xf32>
    %212 = arith.mulf %211, %211 : vector<32x32xf32>
    %cst_74 = arith.constant dense<0.000000e+00> : vector<32xf32>
    %213 = vector.multi_reduction <add>, %212, %cst_74 [1] : vector<32x32xf32> to vector<32xf32>
    %214 = vector.shape_cast %213 : vector<32xf32> to vector<32x1xf32>
    %cst_75 = arith.constant 3.200000e+01 : f32
    %215 = vector.broadcast %cst_75 : f32 to vector<32x1xf32>
    %216 = arith.divf %214, %215 : vector<32x1xf32>
    %217 = vector.broadcast %209 : vector<32x1xf32> to vector<32x32xf32>
    %218 = arith.subf %205, %217 : vector<32x32xf32>
    %cst_76 = arith.constant 9.99999974E-6 : f32
    %219 = vector.broadcast %cst_76 : f32 to vector<32x1xf32>
    %220 = arith.addf %216, %219 : vector<32x1xf32>
    %221 = math.rsqrt %220 : vector<32x1xf32>
    %222 = vector.broadcast %221 : vector<32x1xf32> to vector<32x32xf32>
    %223 = arith.mulf %218, %222 : vector<32x32xf32>
    %224 = vector.broadcast %5 : vector<1x32xf32> to vector<32x32xf32>
    %225 = arith.mulf %223, %224 : vector<32x32xf32>
    %226 = vector.broadcast %6 : vector<1x32xf32> to vector<32x32xf32>
    %227 = arith.addf %225, %226 : vector<32x32xf32>
    %228 = vector.extract_strided_slice %227 {offsets = [0, 0], sizes = [16, 32], strides = [1, 1]} : vector<32x32xf32> to vector<16x32xf32>
    %229 = vector.extract_strided_slice %227 {offsets = [16, 0], sizes = [16, 32], strides = [1, 1]} : vector<32x32xf32> to vector<16x32xf32>
    %230 = arith.subf %228, %229 : vector<16x32xf32>
    %231 = arith.mulf %230, %230 : vector<16x32xf32>
    %232 = vector.broadcast %94 : vector<1x32xf32> to vector<16x32xf32>
    %233 = arith.mulf %231, %232 : vector<16x32xf32>
    %cst_77 = arith.constant dense<0.000000e+00> : vector<16xf32>
    %234 = vector.multi_reduction <add>, %233, %cst_77 [1] : vector<16x32xf32> to vector<16xf32>
    %235 = vector.shape_cast %234 : vector<16xf32> to vector<16x1xf32>
    %236 = vector.broadcast %95 : vector<1x1xf32> to vector<16x1xf32>
    %237 = arith.addf %235, %236 : vector<16x1xf32>
    %238 = arith.negf %237 : vector<16x1xf32>
    %239 = math.exp %238 : vector<16x1xf32>
    %cst_78 = arith.constant 1.000000e+00 : f32
    %240 = vector.broadcast %cst_78 : f32 to vector<16x1xf32>
    %241 = arith.addf %240, %239 : vector<16x1xf32>
    %242 = arith.divf %240, %241 : vector<16x1xf32>
    %243 = vector.broadcast %242 : vector<16x1xf32> to vector<16x16xf32>
    %244 = arith.mulf %243, %28 : vector<16x16xf32>
    %cst_79 = arith.constant dense<0.000000e+00> : vector<16xf32>
    %245 = vector.multi_reduction <add>, %244, %cst_79 [0] : vector<16x16xf32> to vector<16xf32>
    %246 = vector.shape_cast %245 : vector<16xf32> to vector<1x16xf32>
    %247 = vector.broadcast %23 : vector<32x1xf32> to vector<32x32xf32>
    %248 = arith.mulf %205, %247 : vector<32x32xf32>
    %249 = arith.addf %248, %86 : vector<32x32xf32>
    %c192 = arith.constant 192 : index
    %c0_80 = arith.constant 0 : index
    %250 = vector.load %arg3[%c192, %c0_80] : memref<504x32xf32, #tpu.memory_space<vmem>>, vector<32x32xf32>
    %c224 = arith.constant 224 : index
    %c0_81 = arith.constant 0 : index
    %251 = vector.load %arg3[%c224, %c0_81] : memref<504x32xf32, #tpu.memory_space<vmem>>, vector<64x32xf32>
    %c288 = arith.constant 288 : index
    %c0_82 = arith.constant 0 : index
    %252 = vector.load %arg3[%c288, %c0_82] : memref<504x32xf32, #tpu.memory_space<vmem>>, vector<1x32xf32>
    %c289 = arith.constant 289 : index
    %c0_83 = arith.constant 0 : index
    %253 = vector.load %arg3[%c289, %c0_83] : memref<504x32xf32, #tpu.memory_space<vmem>>, vector<1x32xf32>
    %c290 = arith.constant 290 : index
    %c0_84 = arith.constant 0 : index
    %254 = vector.load %arg3[%c290, %c0_84] : memref<504x32xf32, #tpu.memory_space<vmem>>, vector<1x32xf32>
    %c291 = arith.constant 291 : index
    %c0_85 = arith.constant 0 : index
    %255 = vector.load %arg3[%c291, %c0_85] : memref<504x32xf32, #tpu.memory_space<vmem>>, vector<1x32xf32>
    %c292 = arith.constant 292 : index
    %c0_86 = arith.constant 0 : index
    %256 = vector.load %arg3[%c292, %c0_86] : memref<504x32xf32, #tpu.memory_space<vmem>>, vector<1x32xf32>
    %c293 = arith.constant 293 : index
    %c0_87 = arith.constant 0 : index
    %257 = vector.load %arg3[%c293, %c0_87] : memref<504x32xf32, #tpu.memory_space<vmem>>, vector<1x32xf32>
    %c294 = arith.constant 294 : index
    %c0_88 = arith.constant 0 : index
    %258 = vector.load %arg3[%c294, %c0_88] : memref<504x32xf32, #tpu.memory_space<vmem>>, vector<1x1xf32>
    %c40_89 = arith.constant 40 : index
    %c0_90 = arith.constant 0 : index
    %259 = vector.load %arg4[%c40_89, %c0_90] : memref<160x64xf32, #tpu.memory_space<vmem>>, vector<32x64xf32>
    %c72 = arith.constant 72 : index
    %c0_91 = arith.constant 0 : index
    %260 = vector.load %arg4[%c72, %c0_91] : memref<160x64xf32, #tpu.memory_space<vmem>>, vector<1x64xf32>
    %c32_92 = arith.constant 32 : index
    %c0_93 = arith.constant 0 : index
    %261 = vector.load %arg5[%c32_92, %c0_93] : memref<161x128xf32, #tpu.memory_space<vmem>>, vector<32x128xf32>
    %cst_94 = arith.constant dense<0.000000e+00> : vector<32xf32>
    %262 = vector.multi_reduction <add>, %249, %cst_94 [1] : vector<32x32xf32> to vector<32xf32>
    %263 = vector.shape_cast %262 : vector<32xf32> to vector<32x1xf32>
    %cst_95 = arith.constant 3.200000e+01 : f32
    %264 = vector.broadcast %cst_95 : f32 to vector<32x1xf32>
    %265 = arith.divf %263, %264 : vector<32x1xf32>
    %266 = vector.broadcast %265 : vector<32x1xf32> to vector<32x32xf32>
    %267 = arith.subf %249, %266 : vector<32x32xf32>
    %268 = arith.mulf %267, %267 : vector<32x32xf32>
    %cst_96 = arith.constant dense<0.000000e+00> : vector<32xf32>
    %269 = vector.multi_reduction <add>, %268, %cst_96 [1] : vector<32x32xf32> to vector<32xf32>
    %270 = vector.shape_cast %269 : vector<32xf32> to vector<32x1xf32>
    %cst_97 = arith.constant 3.200000e+01 : f32
    %271 = vector.broadcast %cst_97 : f32 to vector<32x1xf32>
    %272 = arith.divf %270, %271 : vector<32x1xf32>
    %273 = vector.broadcast %265 : vector<32x1xf32> to vector<32x32xf32>
    %274 = arith.subf %249, %273 : vector<32x32xf32>
    %cst_98 = arith.constant 9.99999974E-6 : f32
    %275 = vector.broadcast %cst_98 : f32 to vector<32x1xf32>
    %276 = arith.addf %272, %275 : vector<32x1xf32>
    %277 = math.rsqrt %276 : vector<32x1xf32>
    %278 = vector.broadcast %277 : vector<32x1xf32> to vector<32x32xf32>
    %279 = arith.mulf %274, %278 : vector<32x32xf32>
    %280 = vector.broadcast %252 : vector<1x32xf32> to vector<32x32xf32>
    %281 = arith.mulf %279, %280 : vector<32x32xf32>
    %282 = vector.broadcast %253 : vector<1x32xf32> to vector<32x32xf32>
    %283 = arith.addf %281, %282 : vector<32x32xf32>
    %cst_99 = arith.constant dense<0.000000e+00> : vector<32x128xf32>
    %284 = tpu.matmul %283, %261, %cst_99 {dimension_numbers = #tpu.dot_dimension_numbers<[1], [0], [0], [1], [0, 0, 1, 1], [], []>} : vector<32x32xf32>, vector<32x128xf32>, vector<32x128xf32> -> vector<32x128xf32>
    %285 = vector.extract_strided_slice %284 {offsets = [0, 32], sizes = [16, 32], strides = [1, 1]} : vector<32x128xf32> to vector<16x32xf32>
    %286 = vector.extract_strided_slice %284 {offsets = [0, 64], sizes = [16, 32], strides = [1, 1]} : vector<32x128xf32> to vector<16x32xf32>
    %287 = vector.extract_strided_slice %284 {offsets = [0, 0], sizes = [16, 32], strides = [1, 1]} : vector<32x128xf32> to vector<16x32xf32>
    %288 = vector.extract_strided_slice %284 {offsets = [16, 96], sizes = [16, 32], strides = [1, 1]} : vector<32x128xf32> to vector<16x32xf32>
    %289 = tpu.concatenate %287, %288 in 0 : vector<16x32xf32>, vector<16x32xf32> -> vector<32x32xf32>
    %cst_100 = arith.constant 1.000000e+00 : f32
    %290 = vector.broadcast %cst_100 : f32 to vector<1x16xf32>
    %291 = arith.subf %290, %246 : vector<1x16xf32>
    %cst_101 = arith.constant 1.000000e+00 : f32
    %292 = vector.shape_cast %291 : vector<1x16xf32> to vector<1x16xf32>
    %293 = vector.broadcast %292 : vector<1x16xf32> to vector<32x16xf32>
    %294 = vector.broadcast %cst_101 : f32 to vector<32x16xf32>
    %295 = arith.select %18, %293, %294 : vector<32x16xi1>, vector<32x16xf32>
    %296 = arith.mulf %31, %295 : vector<32x16xf32>
    %297 = vector.extract_strided_slice %289 {offsets = [0, 0], sizes = [32, 16], strides = [1, 1]} : vector<32x32xf32> to vector<32x16xf32>
    %298 = vector.extract_strided_slice %285 {offsets = [0, 0], sizes = [16, 16], strides = [1, 1]} : vector<16x32xf32> to vector<16x16xf32>
    "tpu.trace_start"() <{level = 10 : i32, message = "nd,md->nm"}> : () -> ()
    %cst_102 = arith.constant dense<0.000000e+00> : vector<32x16xf32>
    %299 = tpu.matmul %297, %298, %cst_102 {dimension_numbers = #tpu.dot_dimension_numbers<[1], [1], [0], [0], [0, 0, 1, 0], [], []>} : vector<32x16xf32>, vector<16x16xf32>, vector<32x16xf32> -> vector<32x16xf32>
    "tpu.trace_stop"() : () -> ()
    %300 = arith.mulf %299, %296 : vector<32x16xf32>
    %cst_103 = arith.constant dense<0xFF800000> : vector<32xf32>
    %301 = vector.multi_reduction <maximumf>, %300, %cst_103 [1] : vector<32x16xf32> to vector<32xf32>
    %302 = vector.shape_cast %301 : vector<32xf32> to vector<32x1xf32>
    %303 = vector.broadcast %302 : vector<32x1xf32> to vector<32x16xf32>
    %304 = arith.subf %300, %303 : vector<32x16xf32>
    %305 = math.exp %304 : vector<32x16xf32>
    %cst_104 = arith.constant dense<0.000000e+00> : vector<32xf32>
    %306 = vector.multi_reduction <add>, %305, %cst_104 [1] : vector<32x16xf32> to vector<32xf32>
    %307 = vector.shape_cast %306 : vector<32xf32> to vector<32x1xf32>
    %308 = tpu.reciprocal %307 {approx = true} : vector<32x1xf32> -> vector<32x1xf32>
    %309 = vector.broadcast %308 : vector<32x1xf32> to vector<32x16xf32>
    %310 = arith.mulf %305, %309 : vector<32x16xf32>
    %311 = vector.extract_strided_slice %286 {offsets = [0, 0], sizes = [16, 16], strides = [1, 1]} : vector<16x32xf32> to vector<16x16xf32>
    %cst_105 = arith.constant dense<0.000000e+00> : vector<32x16xf32>
    %312 = tpu.matmul %310, %311, %cst_105 {dimension_numbers = #tpu.dot_dimension_numbers<[1], [0], [0], [1], [0, 0, 1, 1], [], []>} : vector<32x16xf32>, vector<16x16xf32>, vector<32x16xf32> -> vector<32x16xf32>
    %313 = vector.extract_strided_slice %289 {offsets = [0, 16], sizes = [32, 16], strides = [1, 1]} : vector<32x32xf32> to vector<32x16xf32>
    %314 = vector.extract_strided_slice %285 {offsets = [0, 16], sizes = [16, 16], strides = [1, 1]} : vector<16x32xf32> to vector<16x16xf32>
    "tpu.trace_start"() <{level = 10 : i32, message = "nd,md->nm"}> : () -> ()
    %cst_106 = arith.constant dense<0.000000e+00> : vector<32x16xf32>
    %315 = tpu.matmul %313, %314, %cst_106 {dimension_numbers = #tpu.dot_dimension_numbers<[1], [1], [0], [0], [0, 0, 1, 0], [], []>} : vector<32x16xf32>, vector<16x16xf32>, vector<32x16xf32> -> vector<32x16xf32>
    "tpu.trace_stop"() : () -> ()
    %316 = arith.mulf %315, %296 : vector<32x16xf32>
    %cst_107 = arith.constant dense<0xFF800000> : vector<32xf32>
    %317 = vector.multi_reduction <maximumf>, %316, %cst_107 [1] : vector<32x16xf32> to vector<32xf32>
    %318 = vector.shape_cast %317 : vector<32xf32> to vector<32x1xf32>
    %319 = vector.broadcast %318 : vector<32x1xf32> to vector<32x16xf32>
    %320 = arith.subf %316, %319 : vector<32x16xf32>
    %321 = math.exp %320 : vector<32x16xf32>
    %cst_108 = arith.constant dense<0.000000e+00> : vector<32xf32>
    %322 = vector.multi_reduction <add>, %321, %cst_108 [1] : vector<32x16xf32> to vector<32xf32>
    %323 = vector.shape_cast %322 : vector<32xf32> to vector<32x1xf32>
    %324 = tpu.reciprocal %323 {approx = true} : vector<32x1xf32> -> vector<32x1xf32>
    %325 = vector.broadcast %324 : vector<32x1xf32> to vector<32x16xf32>
    %326 = arith.mulf %321, %325 : vector<32x16xf32>
    %327 = vector.extract_strided_slice %286 {offsets = [0, 16], sizes = [16, 16], strides = [1, 1]} : vector<16x32xf32> to vector<16x16xf32>
    %cst_109 = arith.constant dense<0.000000e+00> : vector<32x16xf32>
    %328 = tpu.matmul %326, %327, %cst_109 {dimension_numbers = #tpu.dot_dimension_numbers<[1], [0], [0], [1], [0, 0, 1, 1], [], []>} : vector<32x16xf32>, vector<16x16xf32>, vector<32x16xf32> -> vector<32x16xf32>
    %329 = tpu.concatenate %312, %328 in 1 : vector<32x16xf32>, vector<32x16xf32> -> vector<32x32xf32>
    %cst_110 = arith.constant dense<0.000000e+00> : vector<32x32xf32>
    %330 = tpu.matmul %329, %250, %cst_110 {dimension_numbers = #tpu.dot_dimension_numbers<[1], [0], [0], [1], [0, 0, 1, 1], [], []>} : vector<32x32xf32>, vector<32x32xf32>, vector<32x32xf32> -> vector<32x32xf32>
    %331 = vector.broadcast %23 : vector<32x1xf32> to vector<32x32xf32>
    %332 = arith.mulf %249, %331 : vector<32x32xf32>
    %333 = arith.addf %330, %332 : vector<32x32xf32>
    %cst_111 = arith.constant dense<0.000000e+00> : vector<32xf32>
    %334 = vector.multi_reduction <add>, %333, %cst_111 [1] : vector<32x32xf32> to vector<32xf32>
    %335 = vector.shape_cast %334 : vector<32xf32> to vector<32x1xf32>
    %cst_112 = arith.constant 3.200000e+01 : f32
    %336 = vector.broadcast %cst_112 : f32 to vector<32x1xf32>
    %337 = arith.divf %335, %336 : vector<32x1xf32>
    %338 = vector.broadcast %337 : vector<32x1xf32> to vector<32x32xf32>
    %339 = arith.subf %333, %338 : vector<32x32xf32>
    %340 = arith.mulf %339, %339 : vector<32x32xf32>
    %cst_113 = arith.constant dense<0.000000e+00> : vector<32xf32>
    %341 = vector.multi_reduction <add>, %340, %cst_113 [1] : vector<32x32xf32> to vector<32xf32>
    %342 = vector.shape_cast %341 : vector<32xf32> to vector<32x1xf32>
    %cst_114 = arith.constant 3.200000e+01 : f32
    %343 = vector.broadcast %cst_114 : f32 to vector<32x1xf32>
    %344 = arith.divf %342, %343 : vector<32x1xf32>
    %345 = vector.broadcast %337 : vector<32x1xf32> to vector<32x32xf32>
    %346 = arith.subf %333, %345 : vector<32x32xf32>
    %cst_115 = arith.constant 9.99999974E-6 : f32
    %347 = vector.broadcast %cst_115 : f32 to vector<32x1xf32>
    %348 = arith.addf %344, %347 : vector<32x1xf32>
    %349 = math.rsqrt %348 : vector<32x1xf32>
    %350 = vector.broadcast %349 : vector<32x1xf32> to vector<32x32xf32>
    %351 = arith.mulf %346, %350 : vector<32x32xf32>
    %352 = vector.broadcast %254 : vector<1x32xf32> to vector<32x32xf32>
    %353 = arith.mulf %351, %352 : vector<32x32xf32>
    %354 = vector.broadcast %255 : vector<1x32xf32> to vector<32x32xf32>
    %355 = arith.addf %353, %354 : vector<32x32xf32>
    %cst_116 = arith.constant dense<0.000000e+00> : vector<32x64xf32>
    %356 = tpu.matmul %355, %259, %cst_116 {dimension_numbers = #tpu.dot_dimension_numbers<[1], [0], [0], [1], [0, 0, 1, 1], [], []>} : vector<32x32xf32>, vector<32x64xf32>, vector<32x64xf32> -> vector<32x64xf32>
    %357 = vector.broadcast %260 : vector<1x64xf32> to vector<32x64xf32>
    %358 = arith.addf %356, %357 : vector<32x64xf32>
    %cst_117 = arith.constant 5.000000e-01 : f32
    %359 = vector.broadcast %cst_117 : f32 to vector<32x64xf32>
    %360 = arith.mulf %359, %358 : vector<32x64xf32>
    %cst_118 = arith.constant 4.471500e-02 : f32
    %361 = vector.broadcast %cst_118 : f32 to vector<32x64xf32>
    %362 = arith.mulf %361, %358 : vector<32x64xf32>
    %363 = arith.mulf %362, %358 : vector<32x64xf32>
    %364 = arith.mulf %363, %358 : vector<32x64xf32>
    %365 = arith.addf %358, %364 : vector<32x64xf32>
    %cst_119 = arith.constant 0.797884583 : f32
    %366 = vector.broadcast %cst_119 : f32 to vector<32x64xf32>
    %367 = arith.mulf %366, %365 : vector<32x64xf32>
    %368 = math.tanh %367 : vector<32x64xf32>
    %cst_120 = arith.constant 1.000000e+00 : f32
    %369 = vector.broadcast %cst_120 : f32 to vector<32x64xf32>
    %370 = arith.addf %369, %368 : vector<32x64xf32>
    %371 = arith.mulf %360, %370 : vector<32x64xf32>
    %cst_121 = arith.constant dense<0.000000e+00> : vector<32x32xf32>
    %372 = tpu.matmul %371, %251, %cst_121 {dimension_numbers = #tpu.dot_dimension_numbers<[1], [0], [0], [1], [0, 0, 1, 1], [], []>} : vector<32x64xf32>, vector<64x32xf32>, vector<32x32xf32> -> vector<32x32xf32>
    %373 = vector.broadcast %256 : vector<1x32xf32> to vector<32x32xf32>
    %374 = arith.addf %372, %373 : vector<32x32xf32>
    %375 = arith.addf %374, %333 : vector<32x32xf32>
    %cst_122 = arith.constant dense<0.000000e+00> : vector<32xf32>
    %376 = vector.multi_reduction <add>, %375, %cst_122 [1] : vector<32x32xf32> to vector<32xf32>
    %377 = vector.shape_cast %376 : vector<32xf32> to vector<32x1xf32>
    %cst_123 = arith.constant 3.200000e+01 : f32
    %378 = vector.broadcast %cst_123 : f32 to vector<32x1xf32>
    %379 = arith.divf %377, %378 : vector<32x1xf32>
    %380 = vector.broadcast %379 : vector<32x1xf32> to vector<32x32xf32>
    %381 = arith.subf %375, %380 : vector<32x32xf32>
    %382 = arith.mulf %381, %381 : vector<32x32xf32>
    %cst_124 = arith.constant dense<0.000000e+00> : vector<32xf32>
    %383 = vector.multi_reduction <add>, %382, %cst_124 [1] : vector<32x32xf32> to vector<32xf32>
    %384 = vector.shape_cast %383 : vector<32xf32> to vector<32x1xf32>
    %cst_125 = arith.constant 3.200000e+01 : f32
    %385 = vector.broadcast %cst_125 : f32 to vector<32x1xf32>
    %386 = arith.divf %384, %385 : vector<32x1xf32>
    %387 = vector.broadcast %379 : vector<32x1xf32> to vector<32x32xf32>
    %388 = arith.subf %375, %387 : vector<32x32xf32>
    %cst_126 = arith.constant 9.99999974E-6 : f32
    %389 = vector.broadcast %cst_126 : f32 to vector<32x1xf32>
    %390 = arith.addf %386, %389 : vector<32x1xf32>
    %391 = math.rsqrt %390 : vector<32x1xf32>
    %392 = vector.broadcast %391 : vector<32x1xf32> to vector<32x32xf32>
    %393 = arith.mulf %388, %392 : vector<32x32xf32>
    %394 = vector.broadcast %5 : vector<1x32xf32> to vector<32x32xf32>
    %395 = arith.mulf %393, %394 : vector<32x32xf32>
    %396 = vector.broadcast %6 : vector<1x32xf32> to vector<32x32xf32>
    %397 = arith.addf %395, %396 : vector<32x32xf32>
    %398 = vector.extract_strided_slice %397 {offsets = [0, 0], sizes = [16, 32], strides = [1, 1]} : vector<32x32xf32> to vector<16x32xf32>
    %399 = vector.extract_strided_slice %397 {offsets = [16, 0], sizes = [16, 32], strides = [1, 1]} : vector<32x32xf32> to vector<16x32xf32>
    %400 = arith.subf %398, %399 : vector<16x32xf32>
    %401 = arith.mulf %400, %400 : vector<16x32xf32>
    %402 = vector.broadcast %257 : vector<1x32xf32> to vector<16x32xf32>
    %403 = arith.mulf %401, %402 : vector<16x32xf32>
    %cst_127 = arith.constant dense<0.000000e+00> : vector<16xf32>
    %404 = vector.multi_reduction <add>, %403, %cst_127 [1] : vector<16x32xf32> to vector<16xf32>
    %405 = vector.shape_cast %404 : vector<16xf32> to vector<16x1xf32>
    %406 = vector.broadcast %258 : vector<1x1xf32> to vector<16x1xf32>
    %407 = arith.addf %405, %406 : vector<16x1xf32>
    %408 = arith.negf %407 : vector<16x1xf32>
    %409 = math.exp %408 : vector<16x1xf32>
    %cst_128 = arith.constant 1.000000e+00 : f32
    %410 = vector.broadcast %cst_128 : f32 to vector<16x1xf32>
    %411 = arith.addf %410, %409 : vector<16x1xf32>
    %412 = arith.divf %410, %411 : vector<16x1xf32>
    %413 = vector.broadcast %412 : vector<16x1xf32> to vector<16x16xf32>
    %414 = arith.mulf %413, %28 : vector<16x16xf32>
    %cst_129 = arith.constant dense<0.000000e+00> : vector<16xf32>
    %415 = vector.multi_reduction <add>, %414, %cst_129 [0] : vector<16x16xf32> to vector<16xf32>
    %416 = vector.shape_cast %415 : vector<16xf32> to vector<1x16xf32>
    %417 = vector.broadcast %23 : vector<32x1xf32> to vector<32x32xf32>
    %418 = arith.mulf %375, %417 : vector<32x32xf32>
    %419 = arith.addf %418, %86 : vector<32x32xf32>
    %c296 = arith.constant 296 : index
    %c0_130 = arith.constant 0 : index
    %420 = vector.load %arg3[%c296, %c0_130] : memref<504x32xf32, #tpu.memory_space<vmem>>, vector<32x32xf32>
    %c328 = arith.constant 328 : index
    %c0_131 = arith.constant 0 : index
    %421 = vector.load %arg3[%c328, %c0_131] : memref<504x32xf32, #tpu.memory_space<vmem>>, vector<64x32xf32>
    %c392 = arith.constant 392 : index
    %c0_132 = arith.constant 0 : index
    %422 = vector.load %arg3[%c392, %c0_132] : memref<504x32xf32, #tpu.memory_space<vmem>>, vector<1x32xf32>
    %c393 = arith.constant 393 : index
    %c0_133 = arith.constant 0 : index
    %423 = vector.load %arg3[%c393, %c0_133] : memref<504x32xf32, #tpu.memory_space<vmem>>, vector<1x32xf32>
    %c394 = arith.constant 394 : index
    %c0_134 = arith.constant 0 : index
    %424 = vector.load %arg3[%c394, %c0_134] : memref<504x32xf32, #tpu.memory_space<vmem>>, vector<1x32xf32>
    %c395 = arith.constant 395 : index
    %c0_135 = arith.constant 0 : index
    %425 = vector.load %arg3[%c395, %c0_135] : memref<504x32xf32, #tpu.memory_space<vmem>>, vector<1x32xf32>
    %c396 = arith.constant 396 : index
    %c0_136 = arith.constant 0 : index
    %426 = vector.load %arg3[%c396, %c0_136] : memref<504x32xf32, #tpu.memory_space<vmem>>, vector<1x32xf32>
    %c397 = arith.constant 397 : index
    %c0_137 = arith.constant 0 : index
    %427 = vector.load %arg3[%c397, %c0_137] : memref<504x32xf32, #tpu.memory_space<vmem>>, vector<1x32xf32>
    %c398 = arith.constant 398 : index
    %c0_138 = arith.constant 0 : index
    %428 = vector.load %arg3[%c398, %c0_138] : memref<504x32xf32, #tpu.memory_space<vmem>>, vector<1x1xf32>
    %c80 = arith.constant 80 : index
    %c0_139 = arith.constant 0 : index
    %429 = vector.load %arg4[%c80, %c0_139] : memref<160x64xf32, #tpu.memory_space<vmem>>, vector<32x64xf32>
    %c112 = arith.constant 112 : index
    %c0_140 = arith.constant 0 : index
    %430 = vector.load %arg4[%c112, %c0_140] : memref<160x64xf32, #tpu.memory_space<vmem>>, vector<1x64xf32>
    %c64 = arith.constant 64 : index
    %c0_141 = arith.constant 0 : index
    %431 = vector.load %arg5[%c64, %c0_141] : memref<161x128xf32, #tpu.memory_space<vmem>>, vector<32x128xf32>
    %cst_142 = arith.constant dense<0.000000e+00> : vector<32xf32>
    %432 = vector.multi_reduction <add>, %419, %cst_142 [1] : vector<32x32xf32> to vector<32xf32>
    %433 = vector.shape_cast %432 : vector<32xf32> to vector<32x1xf32>
    %cst_143 = arith.constant 3.200000e+01 : f32
    %434 = vector.broadcast %cst_143 : f32 to vector<32x1xf32>
    %435 = arith.divf %433, %434 : vector<32x1xf32>
    %436 = vector.broadcast %435 : vector<32x1xf32> to vector<32x32xf32>
    %437 = arith.subf %419, %436 : vector<32x32xf32>
    %438 = arith.mulf %437, %437 : vector<32x32xf32>
    %cst_144 = arith.constant dense<0.000000e+00> : vector<32xf32>
    %439 = vector.multi_reduction <add>, %438, %cst_144 [1] : vector<32x32xf32> to vector<32xf32>
    %440 = vector.shape_cast %439 : vector<32xf32> to vector<32x1xf32>
    %cst_145 = arith.constant 3.200000e+01 : f32
    %441 = vector.broadcast %cst_145 : f32 to vector<32x1xf32>
    %442 = arith.divf %440, %441 : vector<32x1xf32>
    %443 = vector.broadcast %435 : vector<32x1xf32> to vector<32x32xf32>
    %444 = arith.subf %419, %443 : vector<32x32xf32>
    %cst_146 = arith.constant 9.99999974E-6 : f32
    %445 = vector.broadcast %cst_146 : f32 to vector<32x1xf32>
    %446 = arith.addf %442, %445 : vector<32x1xf32>
    %447 = math.rsqrt %446 : vector<32x1xf32>
    %448 = vector.broadcast %447 : vector<32x1xf32> to vector<32x32xf32>
    %449 = arith.mulf %444, %448 : vector<32x32xf32>
    %450 = vector.broadcast %422 : vector<1x32xf32> to vector<32x32xf32>
    %451 = arith.mulf %449, %450 : vector<32x32xf32>
    %452 = vector.broadcast %423 : vector<1x32xf32> to vector<32x32xf32>
    %453 = arith.addf %451, %452 : vector<32x32xf32>
    %cst_147 = arith.constant dense<0.000000e+00> : vector<32x128xf32>
    %454 = tpu.matmul %453, %431, %cst_147 {dimension_numbers = #tpu.dot_dimension_numbers<[1], [0], [0], [1], [0, 0, 1, 1], [], []>} : vector<32x32xf32>, vector<32x128xf32>, vector<32x128xf32> -> vector<32x128xf32>
    %455 = vector.extract_strided_slice %454 {offsets = [0, 32], sizes = [16, 32], strides = [1, 1]} : vector<32x128xf32> to vector<16x32xf32>
    %456 = vector.extract_strided_slice %454 {offsets = [0, 64], sizes = [16, 32], strides = [1, 1]} : vector<32x128xf32> to vector<16x32xf32>
    %457 = vector.extract_strided_slice %454 {offsets = [0, 0], sizes = [16, 32], strides = [1, 1]} : vector<32x128xf32> to vector<16x32xf32>
    %458 = vector.extract_strided_slice %454 {offsets = [16, 96], sizes = [16, 32], strides = [1, 1]} : vector<32x128xf32> to vector<16x32xf32>
    %459 = tpu.concatenate %457, %458 in 0 : vector<16x32xf32>, vector<16x32xf32> -> vector<32x32xf32>
    %cst_148 = arith.constant 1.000000e+00 : f32
    %460 = vector.broadcast %cst_148 : f32 to vector<1x16xf32>
    %461 = arith.subf %460, %416 : vector<1x16xf32>
    %cst_149 = arith.constant 1.000000e+00 : f32
    %462 = vector.shape_cast %461 : vector<1x16xf32> to vector<1x16xf32>
    %463 = vector.broadcast %462 : vector<1x16xf32> to vector<32x16xf32>
    %464 = vector.broadcast %cst_149 : f32 to vector<32x16xf32>
    %465 = arith.select %18, %463, %464 : vector<32x16xi1>, vector<32x16xf32>
    %466 = arith.mulf %31, %465 : vector<32x16xf32>
    %467 = vector.extract_strided_slice %459 {offsets = [0, 0], sizes = [32, 16], strides = [1, 1]} : vector<32x32xf32> to vector<32x16xf32>
    %468 = vector.extract_strided_slice %455 {offsets = [0, 0], sizes = [16, 16], strides = [1, 1]} : vector<16x32xf32> to vector<16x16xf32>
    "tpu.trace_start"() <{level = 10 : i32, message = "nd,md->nm"}> : () -> ()
    %cst_150 = arith.constant dense<0.000000e+00> : vector<32x16xf32>
    %469 = tpu.matmul %467, %468, %cst_150 {dimension_numbers = #tpu.dot_dimension_numbers<[1], [1], [0], [0], [0, 0, 1, 0], [], []>} : vector<32x16xf32>, vector<16x16xf32>, vector<32x16xf32> -> vector<32x16xf32>
    "tpu.trace_stop"() : () -> ()
    %470 = arith.mulf %469, %466 : vector<32x16xf32>
    %cst_151 = arith.constant dense<0xFF800000> : vector<32xf32>
    %471 = vector.multi_reduction <maximumf>, %470, %cst_151 [1] : vector<32x16xf32> to vector<32xf32>
    %472 = vector.shape_cast %471 : vector<32xf32> to vector<32x1xf32>
    %473 = vector.broadcast %472 : vector<32x1xf32> to vector<32x16xf32>
    %474 = arith.subf %470, %473 : vector<32x16xf32>
    %475 = math.exp %474 : vector<32x16xf32>
    %cst_152 = arith.constant dense<0.000000e+00> : vector<32xf32>
    %476 = vector.multi_reduction <add>, %475, %cst_152 [1] : vector<32x16xf32> to vector<32xf32>
    %477 = vector.shape_cast %476 : vector<32xf32> to vector<32x1xf32>
    %478 = tpu.reciprocal %477 {approx = true} : vector<32x1xf32> -> vector<32x1xf32>
    %479 = vector.broadcast %478 : vector<32x1xf32> to vector<32x16xf32>
    %480 = arith.mulf %475, %479 : vector<32x16xf32>
    %481 = vector.extract_strided_slice %456 {offsets = [0, 0], sizes = [16, 16], strides = [1, 1]} : vector<16x32xf32> to vector<16x16xf32>
    %cst_153 = arith.constant dense<0.000000e+00> : vector<32x16xf32>
    %482 = tpu.matmul %480, %481, %cst_153 {dimension_numbers = #tpu.dot_dimension_numbers<[1], [0], [0], [1], [0, 0, 1, 1], [], []>} : vector<32x16xf32>, vector<16x16xf32>, vector<32x16xf32> -> vector<32x16xf32>
    %483 = vector.extract_strided_slice %459 {offsets = [0, 16], sizes = [32, 16], strides = [1, 1]} : vector<32x32xf32> to vector<32x16xf32>
    %484 = vector.extract_strided_slice %455 {offsets = [0, 16], sizes = [16, 16], strides = [1, 1]} : vector<16x32xf32> to vector<16x16xf32>
    "tpu.trace_start"() <{level = 10 : i32, message = "nd,md->nm"}> : () -> ()
    %cst_154 = arith.constant dense<0.000000e+00> : vector<32x16xf32>
    %485 = tpu.matmul %483, %484, %cst_154 {dimension_numbers = #tpu.dot_dimension_numbers<[1], [1], [0], [0], [0, 0, 1, 0], [], []>} : vector<32x16xf32>, vector<16x16xf32>, vector<32x16xf32> -> vector<32x16xf32>
    "tpu.trace_stop"() : () -> ()
    %486 = arith.mulf %485, %466 : vector<32x16xf32>
    %cst_155 = arith.constant dense<0xFF800000> : vector<32xf32>
    %487 = vector.multi_reduction <maximumf>, %486, %cst_155 [1] : vector<32x16xf32> to vector<32xf32>
    %488 = vector.shape_cast %487 : vector<32xf32> to vector<32x1xf32>
    %489 = vector.broadcast %488 : vector<32x1xf32> to vector<32x16xf32>
    %490 = arith.subf %486, %489 : vector<32x16xf32>
    %491 = math.exp %490 : vector<32x16xf32>
    %cst_156 = arith.constant dense<0.000000e+00> : vector<32xf32>
    %492 = vector.multi_reduction <add>, %491, %cst_156 [1] : vector<32x16xf32> to vector<32xf32>
    %493 = vector.shape_cast %492 : vector<32xf32> to vector<32x1xf32>
    %494 = tpu.reciprocal %493 {approx = true} : vector<32x1xf32> -> vector<32x1xf32>
    %495 = vector.broadcast %494 : vector<32x1xf32> to vector<32x16xf32>
    %496 = arith.mulf %491, %495 : vector<32x16xf32>
    %497 = vector.extract_strided_slice %456 {offsets = [0, 16], sizes = [16, 16], strides = [1, 1]} : vector<16x32xf32> to vector<16x16xf32>
    %cst_157 = arith.constant dense<0.000000e+00> : vector<32x16xf32>
    %498 = tpu.matmul %496, %497, %cst_157 {dimension_numbers = #tpu.dot_dimension_numbers<[1], [0], [0], [1], [0, 0, 1, 1], [], []>} : vector<32x16xf32>, vector<16x16xf32>, vector<32x16xf32> -> vector<32x16xf32>
    %499 = tpu.concatenate %482, %498 in 1 : vector<32x16xf32>, vector<32x16xf32> -> vector<32x32xf32>
    %cst_158 = arith.constant dense<0.000000e+00> : vector<32x32xf32>
    %500 = tpu.matmul %499, %420, %cst_158 {dimension_numbers = #tpu.dot_dimension_numbers<[1], [0], [0], [1], [0, 0, 1, 1], [], []>} : vector<32x32xf32>, vector<32x32xf32>, vector<32x32xf32> -> vector<32x32xf32>
    %501 = vector.broadcast %23 : vector<32x1xf32> to vector<32x32xf32>
    %502 = arith.mulf %419, %501 : vector<32x32xf32>
    %503 = arith.addf %500, %502 : vector<32x32xf32>
    %cst_159 = arith.constant dense<0.000000e+00> : vector<32xf32>
    %504 = vector.multi_reduction <add>, %503, %cst_159 [1] : vector<32x32xf32> to vector<32xf32>
    %505 = vector.shape_cast %504 : vector<32xf32> to vector<32x1xf32>
    %cst_160 = arith.constant 3.200000e+01 : f32
    %506 = vector.broadcast %cst_160 : f32 to vector<32x1xf32>
    %507 = arith.divf %505, %506 : vector<32x1xf32>
    %508 = vector.broadcast %507 : vector<32x1xf32> to vector<32x32xf32>
    %509 = arith.subf %503, %508 : vector<32x32xf32>
    %510 = arith.mulf %509, %509 : vector<32x32xf32>
    %cst_161 = arith.constant dense<0.000000e+00> : vector<32xf32>
    %511 = vector.multi_reduction <add>, %510, %cst_161 [1] : vector<32x32xf32> to vector<32xf32>
    %512 = vector.shape_cast %511 : vector<32xf32> to vector<32x1xf32>
    %cst_162 = arith.constant 3.200000e+01 : f32
    %513 = vector.broadcast %cst_162 : f32 to vector<32x1xf32>
    %514 = arith.divf %512, %513 : vector<32x1xf32>
    %515 = vector.broadcast %507 : vector<32x1xf32> to vector<32x32xf32>
    %516 = arith.subf %503, %515 : vector<32x32xf32>
    %cst_163 = arith.constant 9.99999974E-6 : f32
    %517 = vector.broadcast %cst_163 : f32 to vector<32x1xf32>
    %518 = arith.addf %514, %517 : vector<32x1xf32>
    %519 = math.rsqrt %518 : vector<32x1xf32>
    %520 = vector.broadcast %519 : vector<32x1xf32> to vector<32x32xf32>
    %521 = arith.mulf %516, %520 : vector<32x32xf32>
    %522 = vector.broadcast %424 : vector<1x32xf32> to vector<32x32xf32>
    %523 = arith.mulf %521, %522 : vector<32x32xf32>
    %524 = vector.broadcast %425 : vector<1x32xf32> to vector<32x32xf32>
    %525 = arith.addf %523, %524 : vector<32x32xf32>
    %cst_164 = arith.constant dense<0.000000e+00> : vector<32x64xf32>
    %526 = tpu.matmul %525, %429, %cst_164 {dimension_numbers = #tpu.dot_dimension_numbers<[1], [0], [0], [1], [0, 0, 1, 1], [], []>} : vector<32x32xf32>, vector<32x64xf32>, vector<32x64xf32> -> vector<32x64xf32>
    %527 = vector.broadcast %430 : vector<1x64xf32> to vector<32x64xf32>
    %528 = arith.addf %526, %527 : vector<32x64xf32>
    %cst_165 = arith.constant 5.000000e-01 : f32
    %529 = vector.broadcast %cst_165 : f32 to vector<32x64xf32>
    %530 = arith.mulf %529, %528 : vector<32x64xf32>
    %cst_166 = arith.constant 4.471500e-02 : f32
    %531 = vector.broadcast %cst_166 : f32 to vector<32x64xf32>
    %532 = arith.mulf %531, %528 : vector<32x64xf32>
    %533 = arith.mulf %532, %528 : vector<32x64xf32>
    %534 = arith.mulf %533, %528 : vector<32x64xf32>
    %535 = arith.addf %528, %534 : vector<32x64xf32>
    %cst_167 = arith.constant 0.797884583 : f32
    %536 = vector.broadcast %cst_167 : f32 to vector<32x64xf32>
    %537 = arith.mulf %536, %535 : vector<32x64xf32>
    %538 = math.tanh %537 : vector<32x64xf32>
    %cst_168 = arith.constant 1.000000e+00 : f32
    %539 = vector.broadcast %cst_168 : f32 to vector<32x64xf32>
    %540 = arith.addf %539, %538 : vector<32x64xf32>
    %541 = arith.mulf %530, %540 : vector<32x64xf32>
    %cst_169 = arith.constant dense<0.000000e+00> : vector<32x32xf32>
    %542 = tpu.matmul %541, %421, %cst_169 {dimension_numbers = #tpu.dot_dimension_numbers<[1], [0], [0], [1], [0, 0, 1, 1], [], []>} : vector<32x64xf32>, vector<64x32xf32>, vector<32x32xf32> -> vector<32x32xf32>
    %543 = vector.broadcast %426 : vector<1x32xf32> to vector<32x32xf32>
    %544 = arith.addf %542, %543 : vector<32x32xf32>
    %545 = arith.addf %544, %503 : vector<32x32xf32>
    %cst_170 = arith.constant dense<0.000000e+00> : vector<32xf32>
    %546 = vector.multi_reduction <add>, %545, %cst_170 [1] : vector<32x32xf32> to vector<32xf32>
    %547 = vector.shape_cast %546 : vector<32xf32> to vector<32x1xf32>
    %cst_171 = arith.constant 3.200000e+01 : f32
    %548 = vector.broadcast %cst_171 : f32 to vector<32x1xf32>
    %549 = arith.divf %547, %548 : vector<32x1xf32>
    %550 = vector.broadcast %549 : vector<32x1xf32> to vector<32x32xf32>
    %551 = arith.subf %545, %550 : vector<32x32xf32>
    %552 = arith.mulf %551, %551 : vector<32x32xf32>
    %cst_172 = arith.constant dense<0.000000e+00> : vector<32xf32>
    %553 = vector.multi_reduction <add>, %552, %cst_172 [1] : vector<32x32xf32> to vector<32xf32>
    %554 = vector.shape_cast %553 : vector<32xf32> to vector<32x1xf32>
    %cst_173 = arith.constant 3.200000e+01 : f32
    %555 = vector.broadcast %cst_173 : f32 to vector<32x1xf32>
    %556 = arith.divf %554, %555 : vector<32x1xf32>
    %557 = vector.broadcast %549 : vector<32x1xf32> to vector<32x32xf32>
    %558 = arith.subf %545, %557 : vector<32x32xf32>
    %cst_174 = arith.constant 9.99999974E-6 : f32
    %559 = vector.broadcast %cst_174 : f32 to vector<32x1xf32>
    %560 = arith.addf %556, %559 : vector<32x1xf32>
    %561 = math.rsqrt %560 : vector<32x1xf32>
    %562 = vector.broadcast %561 : vector<32x1xf32> to vector<32x32xf32>
    %563 = arith.mulf %558, %562 : vector<32x32xf32>
    %564 = vector.broadcast %5 : vector<1x32xf32> to vector<32x32xf32>
    %565 = arith.mulf %563, %564 : vector<32x32xf32>
    %566 = vector.broadcast %6 : vector<1x32xf32> to vector<32x32xf32>
    %567 = arith.addf %565, %566 : vector<32x32xf32>
    %568 = vector.extract_strided_slice %567 {offsets = [0, 0], sizes = [16, 32], strides = [1, 1]} : vector<32x32xf32> to vector<16x32xf32>
    %569 = vector.extract_strided_slice %567 {offsets = [16, 0], sizes = [16, 32], strides = [1, 1]} : vector<32x32xf32> to vector<16x32xf32>
    %570 = arith.subf %568, %569 : vector<16x32xf32>
    %571 = arith.mulf %570, %570 : vector<16x32xf32>
    %572 = vector.broadcast %427 : vector<1x32xf32> to vector<16x32xf32>
    %573 = arith.mulf %571, %572 : vector<16x32xf32>
    %cst_175 = arith.constant dense<0.000000e+00> : vector<16xf32>
    %574 = vector.multi_reduction <add>, %573, %cst_175 [1] : vector<16x32xf32> to vector<16xf32>
    %575 = vector.shape_cast %574 : vector<16xf32> to vector<16x1xf32>
    %576 = vector.broadcast %428 : vector<1x1xf32> to vector<16x1xf32>
    %577 = arith.addf %575, %576 : vector<16x1xf32>
    %578 = arith.negf %577 : vector<16x1xf32>
    %579 = math.exp %578 : vector<16x1xf32>
    %cst_176 = arith.constant 1.000000e+00 : f32
    %580 = vector.broadcast %cst_176 : f32 to vector<16x1xf32>
    %581 = arith.addf %580, %579 : vector<16x1xf32>
    %582 = arith.divf %580, %581 : vector<16x1xf32>
    %583 = vector.broadcast %582 : vector<16x1xf32> to vector<16x16xf32>
    %584 = arith.mulf %583, %28 : vector<16x16xf32>
    %cst_177 = arith.constant dense<0.000000e+00> : vector<16xf32>
    %585 = vector.multi_reduction <add>, %584, %cst_177 [0] : vector<16x16xf32> to vector<16xf32>
    %586 = vector.shape_cast %585 : vector<16xf32> to vector<1x16xf32>
    %587 = vector.broadcast %23 : vector<32x1xf32> to vector<32x32xf32>
    %588 = arith.mulf %545, %587 : vector<32x32xf32>
    %589 = arith.addf %588, %86 : vector<32x32xf32>
    %c400 = arith.constant 400 : index
    %c0_178 = arith.constant 0 : index
    %590 = vector.load %arg3[%c400, %c0_178] : memref<504x32xf32, #tpu.memory_space<vmem>>, vector<32x32xf32>
    %c432 = arith.constant 432 : index
    %c0_179 = arith.constant 0 : index
    %591 = vector.load %arg3[%c432, %c0_179] : memref<504x32xf32, #tpu.memory_space<vmem>>, vector<64x32xf32>
    %c496 = arith.constant 496 : index
    %c0_180 = arith.constant 0 : index
    %592 = vector.load %arg3[%c496, %c0_180] : memref<504x32xf32, #tpu.memory_space<vmem>>, vector<1x32xf32>
    %c497 = arith.constant 497 : index
    %c0_181 = arith.constant 0 : index
    %593 = vector.load %arg3[%c497, %c0_181] : memref<504x32xf32, #tpu.memory_space<vmem>>, vector<1x32xf32>
    %c498 = arith.constant 498 : index
    %c0_182 = arith.constant 0 : index
    %594 = vector.load %arg3[%c498, %c0_182] : memref<504x32xf32, #tpu.memory_space<vmem>>, vector<1x32xf32>
    %c499 = arith.constant 499 : index
    %c0_183 = arith.constant 0 : index
    %595 = vector.load %arg3[%c499, %c0_183] : memref<504x32xf32, #tpu.memory_space<vmem>>, vector<1x32xf32>
    %c500 = arith.constant 500 : index
    %c0_184 = arith.constant 0 : index
    %596 = vector.load %arg3[%c500, %c0_184] : memref<504x32xf32, #tpu.memory_space<vmem>>, vector<1x32xf32>
    %c501 = arith.constant 501 : index
    %c0_185 = arith.constant 0 : index
    %597 = vector.load %arg3[%c501, %c0_185] : memref<504x32xf32, #tpu.memory_space<vmem>>, vector<1x32xf32>
    %c502 = arith.constant 502 : index
    %c0_186 = arith.constant 0 : index
    %598 = vector.load %arg3[%c502, %c0_186] : memref<504x32xf32, #tpu.memory_space<vmem>>, vector<1x1xf32>
    %c120_187 = arith.constant 120 : index
    %c0_188 = arith.constant 0 : index
    %599 = vector.load %arg4[%c120_187, %c0_188] : memref<160x64xf32, #tpu.memory_space<vmem>>, vector<32x64xf32>
    %c152 = arith.constant 152 : index
    %c0_189 = arith.constant 0 : index
    %600 = vector.load %arg4[%c152, %c0_189] : memref<160x64xf32, #tpu.memory_space<vmem>>, vector<1x64xf32>
    %c96 = arith.constant 96 : index
    %c0_190 = arith.constant 0 : index
    %601 = vector.load %arg5[%c96, %c0_190] : memref<161x128xf32, #tpu.memory_space<vmem>>, vector<32x128xf32>
    %cst_191 = arith.constant dense<0.000000e+00> : vector<32xf32>
    %602 = vector.multi_reduction <add>, %589, %cst_191 [1] : vector<32x32xf32> to vector<32xf32>
    %603 = vector.shape_cast %602 : vector<32xf32> to vector<32x1xf32>
    %cst_192 = arith.constant 3.200000e+01 : f32
    %604 = vector.broadcast %cst_192 : f32 to vector<32x1xf32>
    %605 = arith.divf %603, %604 : vector<32x1xf32>
    %606 = vector.broadcast %605 : vector<32x1xf32> to vector<32x32xf32>
    %607 = arith.subf %589, %606 : vector<32x32xf32>
    %608 = arith.mulf %607, %607 : vector<32x32xf32>
    %cst_193 = arith.constant dense<0.000000e+00> : vector<32xf32>
    %609 = vector.multi_reduction <add>, %608, %cst_193 [1] : vector<32x32xf32> to vector<32xf32>
    %610 = vector.shape_cast %609 : vector<32xf32> to vector<32x1xf32>
    %cst_194 = arith.constant 3.200000e+01 : f32
    %611 = vector.broadcast %cst_194 : f32 to vector<32x1xf32>
    %612 = arith.divf %610, %611 : vector<32x1xf32>
    %613 = vector.broadcast %605 : vector<32x1xf32> to vector<32x32xf32>
    %614 = arith.subf %589, %613 : vector<32x32xf32>
    %cst_195 = arith.constant 9.99999974E-6 : f32
    %615 = vector.broadcast %cst_195 : f32 to vector<32x1xf32>
    %616 = arith.addf %612, %615 : vector<32x1xf32>
    %617 = math.rsqrt %616 : vector<32x1xf32>
    %618 = vector.broadcast %617 : vector<32x1xf32> to vector<32x32xf32>
    %619 = arith.mulf %614, %618 : vector<32x32xf32>
    %620 = vector.broadcast %592 : vector<1x32xf32> to vector<32x32xf32>
    %621 = arith.mulf %619, %620 : vector<32x32xf32>
    %622 = vector.broadcast %593 : vector<1x32xf32> to vector<32x32xf32>
    %623 = arith.addf %621, %622 : vector<32x32xf32>
    %cst_196 = arith.constant dense<0.000000e+00> : vector<32x128xf32>
    %624 = tpu.matmul %623, %601, %cst_196 {dimension_numbers = #tpu.dot_dimension_numbers<[1], [0], [0], [1], [0, 0, 1, 1], [], []>} : vector<32x32xf32>, vector<32x128xf32>, vector<32x128xf32> -> vector<32x128xf32>
    %625 = vector.extract_strided_slice %624 {offsets = [0, 32], sizes = [16, 32], strides = [1, 1]} : vector<32x128xf32> to vector<16x32xf32>
    %626 = vector.extract_strided_slice %624 {offsets = [0, 64], sizes = [16, 32], strides = [1, 1]} : vector<32x128xf32> to vector<16x32xf32>
    %627 = vector.extract_strided_slice %624 {offsets = [0, 0], sizes = [16, 32], strides = [1, 1]} : vector<32x128xf32> to vector<16x32xf32>
    %628 = vector.extract_strided_slice %624 {offsets = [16, 96], sizes = [16, 32], strides = [1, 1]} : vector<32x128xf32> to vector<16x32xf32>
    %629 = tpu.concatenate %627, %628 in 0 : vector<16x32xf32>, vector<16x32xf32> -> vector<32x32xf32>
    %cst_197 = arith.constant 1.000000e+00 : f32
    %630 = vector.broadcast %cst_197 : f32 to vector<1x16xf32>
    %631 = arith.subf %630, %586 : vector<1x16xf32>
    %cst_198 = arith.constant 1.000000e+00 : f32
    %632 = vector.shape_cast %631 : vector<1x16xf32> to vector<1x16xf32>
    %633 = vector.broadcast %632 : vector<1x16xf32> to vector<32x16xf32>
    %634 = vector.broadcast %cst_198 : f32 to vector<32x16xf32>
    %635 = arith.select %18, %633, %634 : vector<32x16xi1>, vector<32x16xf32>
    %636 = arith.mulf %31, %635 : vector<32x16xf32>
    %637 = vector.extract_strided_slice %629 {offsets = [0, 0], sizes = [32, 16], strides = [1, 1]} : vector<32x32xf32> to vector<32x16xf32>
    %638 = vector.extract_strided_slice %625 {offsets = [0, 0], sizes = [16, 16], strides = [1, 1]} : vector<16x32xf32> to vector<16x16xf32>
    "tpu.trace_start"() <{level = 10 : i32, message = "nd,md->nm"}> : () -> ()
    %cst_199 = arith.constant dense<0.000000e+00> : vector<32x16xf32>
    %639 = tpu.matmul %637, %638, %cst_199 {dimension_numbers = #tpu.dot_dimension_numbers<[1], [1], [0], [0], [0, 0, 1, 0], [], []>} : vector<32x16xf32>, vector<16x16xf32>, vector<32x16xf32> -> vector<32x16xf32>
    "tpu.trace_stop"() : () -> ()
    %640 = arith.mulf %639, %636 : vector<32x16xf32>
    %cst_200 = arith.constant dense<0xFF800000> : vector<32xf32>
    %641 = vector.multi_reduction <maximumf>, %640, %cst_200 [1] : vector<32x16xf32> to vector<32xf32>
    %642 = vector.shape_cast %641 : vector<32xf32> to vector<32x1xf32>
    %643 = vector.broadcast %642 : vector<32x1xf32> to vector<32x16xf32>
    %644 = arith.subf %640, %643 : vector<32x16xf32>
    %645 = math.exp %644 : vector<32x16xf32>
    %cst_201 = arith.constant dense<0.000000e+00> : vector<32xf32>
    %646 = vector.multi_reduction <add>, %645, %cst_201 [1] : vector<32x16xf32> to vector<32xf32>
    %647 = vector.shape_cast %646 : vector<32xf32> to vector<32x1xf32>
    %648 = tpu.reciprocal %647 {approx = true} : vector<32x1xf32> -> vector<32x1xf32>
    %649 = vector.broadcast %648 : vector<32x1xf32> to vector<32x16xf32>
    %650 = arith.mulf %645, %649 : vector<32x16xf32>
    %651 = vector.extract_strided_slice %626 {offsets = [0, 0], sizes = [16, 16], strides = [1, 1]} : vector<16x32xf32> to vector<16x16xf32>
    %cst_202 = arith.constant dense<0.000000e+00> : vector<32x16xf32>
    %652 = tpu.matmul %650, %651, %cst_202 {dimension_numbers = #tpu.dot_dimension_numbers<[1], [0], [0], [1], [0, 0, 1, 1], [], []>} : vector<32x16xf32>, vector<16x16xf32>, vector<32x16xf32> -> vector<32x16xf32>
    %653 = vector.extract_strided_slice %629 {offsets = [0, 16], sizes = [32, 16], strides = [1, 1]} : vector<32x32xf32> to vector<32x16xf32>
    %654 = vector.extract_strided_slice %625 {offsets = [0, 16], sizes = [16, 16], strides = [1, 1]} : vector<16x32xf32> to vector<16x16xf32>
    "tpu.trace_start"() <{level = 10 : i32, message = "nd,md->nm"}> : () -> ()
    %cst_203 = arith.constant dense<0.000000e+00> : vector<32x16xf32>
    %655 = tpu.matmul %653, %654, %cst_203 {dimension_numbers = #tpu.dot_dimension_numbers<[1], [1], [0], [0], [0, 0, 1, 0], [], []>} : vector<32x16xf32>, vector<16x16xf32>, vector<32x16xf32> -> vector<32x16xf32>
    "tpu.trace_stop"() : () -> ()
    %656 = arith.mulf %655, %636 : vector<32x16xf32>
    %cst_204 = arith.constant dense<0xFF800000> : vector<32xf32>
    %657 = vector.multi_reduction <maximumf>, %656, %cst_204 [1] : vector<32x16xf32> to vector<32xf32>
    %658 = vector.shape_cast %657 : vector<32xf32> to vector<32x1xf32>
    %659 = vector.broadcast %658 : vector<32x1xf32> to vector<32x16xf32>
    %660 = arith.subf %656, %659 : vector<32x16xf32>
    %661 = math.exp %660 : vector<32x16xf32>
    %cst_205 = arith.constant dense<0.000000e+00> : vector<32xf32>
    %662 = vector.multi_reduction <add>, %661, %cst_205 [1] : vector<32x16xf32> to vector<32xf32>
    %663 = vector.shape_cast %662 : vector<32xf32> to vector<32x1xf32>
    %664 = tpu.reciprocal %663 {approx = true} : vector<32x1xf32> -> vector<32x1xf32>
    %665 = vector.broadcast %664 : vector<32x1xf32> to vector<32x16xf32>
    %666 = arith.mulf %661, %665 : vector<32x16xf32>
    %667 = vector.extract_strided_slice %626 {offsets = [0, 16], sizes = [16, 16], strides = [1, 1]} : vector<16x32xf32> to vector<16x16xf32>
    %cst_206 = arith.constant dense<0.000000e+00> : vector<32x16xf32>
    %668 = tpu.matmul %666, %667, %cst_206 {dimension_numbers = #tpu.dot_dimension_numbers<[1], [0], [0], [1], [0, 0, 1, 1], [], []>} : vector<32x16xf32>, vector<16x16xf32>, vector<32x16xf32> -> vector<32x16xf32>
    %669 = tpu.concatenate %652, %668 in 1 : vector<32x16xf32>, vector<32x16xf32> -> vector<32x32xf32>
    %cst_207 = arith.constant dense<0.000000e+00> : vector<32x32xf32>
    %670 = tpu.matmul %669, %590, %cst_207 {dimension_numbers = #tpu.dot_dimension_numbers<[1], [0], [0], [1], [0, 0, 1, 1], [], []>} : vector<32x32xf32>, vector<32x32xf32>, vector<32x32xf32> -> vector<32x32xf32>
    %671 = vector.broadcast %23 : vector<32x1xf32> to vector<32x32xf32>
    %672 = arith.mulf %589, %671 : vector<32x32xf32>
    %673 = arith.addf %670, %672 : vector<32x32xf32>
    %cst_208 = arith.constant dense<0.000000e+00> : vector<32xf32>
    %674 = vector.multi_reduction <add>, %673, %cst_208 [1] : vector<32x32xf32> to vector<32xf32>
    %675 = vector.shape_cast %674 : vector<32xf32> to vector<32x1xf32>
    %cst_209 = arith.constant 3.200000e+01 : f32
    %676 = vector.broadcast %cst_209 : f32 to vector<32x1xf32>
    %677 = arith.divf %675, %676 : vector<32x1xf32>
    %678 = vector.broadcast %677 : vector<32x1xf32> to vector<32x32xf32>
    %679 = arith.subf %673, %678 : vector<32x32xf32>
    %680 = arith.mulf %679, %679 : vector<32x32xf32>
    %cst_210 = arith.constant dense<0.000000e+00> : vector<32xf32>
    %681 = vector.multi_reduction <add>, %680, %cst_210 [1] : vector<32x32xf32> to vector<32xf32>
    %682 = vector.shape_cast %681 : vector<32xf32> to vector<32x1xf32>
    %cst_211 = arith.constant 3.200000e+01 : f32
    %683 = vector.broadcast %cst_211 : f32 to vector<32x1xf32>
    %684 = arith.divf %682, %683 : vector<32x1xf32>
    %685 = vector.broadcast %677 : vector<32x1xf32> to vector<32x32xf32>
    %686 = arith.subf %673, %685 : vector<32x32xf32>
    %cst_212 = arith.constant 9.99999974E-6 : f32
    %687 = vector.broadcast %cst_212 : f32 to vector<32x1xf32>
    %688 = arith.addf %684, %687 : vector<32x1xf32>
    %689 = math.rsqrt %688 : vector<32x1xf32>
    %690 = vector.broadcast %689 : vector<32x1xf32> to vector<32x32xf32>
    %691 = arith.mulf %686, %690 : vector<32x32xf32>
    %692 = vector.broadcast %594 : vector<1x32xf32> to vector<32x32xf32>
    %693 = arith.mulf %691, %692 : vector<32x32xf32>
    %694 = vector.broadcast %595 : vector<1x32xf32> to vector<32x32xf32>
    %695 = arith.addf %693, %694 : vector<32x32xf32>
    %cst_213 = arith.constant dense<0.000000e+00> : vector<32x64xf32>
    %696 = tpu.matmul %695, %599, %cst_213 {dimension_numbers = #tpu.dot_dimension_numbers<[1], [0], [0], [1], [0, 0, 1, 1], [], []>} : vector<32x32xf32>, vector<32x64xf32>, vector<32x64xf32> -> vector<32x64xf32>
    %697 = vector.broadcast %600 : vector<1x64xf32> to vector<32x64xf32>
    %698 = arith.addf %696, %697 : vector<32x64xf32>
    %cst_214 = arith.constant 5.000000e-01 : f32
    %699 = vector.broadcast %cst_214 : f32 to vector<32x64xf32>
    %700 = arith.mulf %699, %698 : vector<32x64xf32>
    %cst_215 = arith.constant 4.471500e-02 : f32
    %701 = vector.broadcast %cst_215 : f32 to vector<32x64xf32>
    %702 = arith.mulf %701, %698 : vector<32x64xf32>
    %703 = arith.mulf %702, %698 : vector<32x64xf32>
    %704 = arith.mulf %703, %698 : vector<32x64xf32>
    %705 = arith.addf %698, %704 : vector<32x64xf32>
    %cst_216 = arith.constant 0.797884583 : f32
    %706 = vector.broadcast %cst_216 : f32 to vector<32x64xf32>
    %707 = arith.mulf %706, %705 : vector<32x64xf32>
    %708 = math.tanh %707 : vector<32x64xf32>
    %cst_217 = arith.constant 1.000000e+00 : f32
    %709 = vector.broadcast %cst_217 : f32 to vector<32x64xf32>
    %710 = arith.addf %709, %708 : vector<32x64xf32>
    %711 = arith.mulf %700, %710 : vector<32x64xf32>
    %cst_218 = arith.constant dense<0.000000e+00> : vector<32x32xf32>
    %712 = tpu.matmul %711, %591, %cst_218 {dimension_numbers = #tpu.dot_dimension_numbers<[1], [0], [0], [1], [0, 0, 1, 1], [], []>} : vector<32x64xf32>, vector<64x32xf32>, vector<32x32xf32> -> vector<32x32xf32>
    %713 = vector.broadcast %596 : vector<1x32xf32> to vector<32x32xf32>
    %714 = arith.addf %712, %713 : vector<32x32xf32>
    %715 = arith.addf %714, %673 : vector<32x32xf32>
    %cst_219 = arith.constant dense<0.000000e+00> : vector<32xf32>
    %716 = vector.multi_reduction <add>, %715, %cst_219 [1] : vector<32x32xf32> to vector<32xf32>
    %717 = vector.shape_cast %716 : vector<32xf32> to vector<32x1xf32>
    %cst_220 = arith.constant 3.200000e+01 : f32
    %718 = vector.broadcast %cst_220 : f32 to vector<32x1xf32>
    %719 = arith.divf %717, %718 : vector<32x1xf32>
    %720 = vector.broadcast %719 : vector<32x1xf32> to vector<32x32xf32>
    %721 = arith.subf %715, %720 : vector<32x32xf32>
    %722 = arith.mulf %721, %721 : vector<32x32xf32>
    %cst_221 = arith.constant dense<0.000000e+00> : vector<32xf32>
    %723 = vector.multi_reduction <add>, %722, %cst_221 [1] : vector<32x32xf32> to vector<32xf32>
    %724 = vector.shape_cast %723 : vector<32xf32> to vector<32x1xf32>
    %cst_222 = arith.constant 3.200000e+01 : f32
    %725 = vector.broadcast %cst_222 : f32 to vector<32x1xf32>
    %726 = arith.divf %724, %725 : vector<32x1xf32>
    %727 = vector.broadcast %719 : vector<32x1xf32> to vector<32x32xf32>
    %728 = arith.subf %715, %727 : vector<32x32xf32>
    %cst_223 = arith.constant 9.99999974E-6 : f32
    %729 = vector.broadcast %cst_223 : f32 to vector<32x1xf32>
    %730 = arith.addf %726, %729 : vector<32x1xf32>
    %731 = math.rsqrt %730 : vector<32x1xf32>
    %732 = vector.broadcast %731 : vector<32x1xf32> to vector<32x32xf32>
    %733 = arith.mulf %728, %732 : vector<32x32xf32>
    %734 = vector.broadcast %5 : vector<1x32xf32> to vector<32x32xf32>
    %735 = arith.mulf %733, %734 : vector<32x32xf32>
    %736 = vector.broadcast %6 : vector<1x32xf32> to vector<32x32xf32>
    %737 = arith.addf %735, %736 : vector<32x32xf32>
    %738 = vector.extract_strided_slice %737 {offsets = [0, 0], sizes = [16, 32], strides = [1, 1]} : vector<32x32xf32> to vector<16x32xf32>
    %739 = vector.extract_strided_slice %737 {offsets = [16, 0], sizes = [16, 32], strides = [1, 1]} : vector<32x32xf32> to vector<16x32xf32>
    %740 = arith.subf %738, %739 : vector<16x32xf32>
    %741 = arith.mulf %740, %740 : vector<16x32xf32>
    %742 = vector.broadcast %597 : vector<1x32xf32> to vector<16x32xf32>
    %743 = arith.mulf %741, %742 : vector<16x32xf32>
    %cst_224 = arith.constant dense<0.000000e+00> : vector<16xf32>
    %744 = vector.multi_reduction <add>, %743, %cst_224 [1] : vector<16x32xf32> to vector<16xf32>
    %745 = vector.shape_cast %744 : vector<16xf32> to vector<16x1xf32>
    %746 = vector.broadcast %598 : vector<1x1xf32> to vector<16x1xf32>
    %747 = arith.addf %745, %746 : vector<16x1xf32>
    %748 = arith.negf %747 : vector<16x1xf32>
    %749 = math.exp %748 : vector<16x1xf32>
    %cst_225 = arith.constant 1.000000e+00 : f32
    %750 = vector.broadcast %cst_225 : f32 to vector<16x1xf32>
    %751 = arith.addf %750, %749 : vector<16x1xf32>
    %752 = arith.divf %750, %751 : vector<16x1xf32>
    %cst_226 = arith.constant dense<0.000000e+00> : vector<32x128xf32>
    %753 = tpu.matmul %737, %10, %cst_226 {dimension_numbers = #tpu.dot_dimension_numbers<[1], [0], [0], [1], [0, 0, 1, 1], [], []>} : vector<32x32xf32>, vector<32x128xf32>, vector<32x128xf32> -> vector<32x128xf32>
    %754 = vector.broadcast %11 : vector<1x128xf32> to vector<32x128xf32>
    %755 = arith.addf %753, %754 : vector<32x128xf32>
    %756 = tpu.concatenate %752, %582 in 0 : vector<16x1xf32>, vector<16x1xf32> -> vector<32x1xf32>
    %757 = tpu.iota {dimensions = array<i32: 1>} : vector<32x128xi32>
    %c8_i32 = arith.constant 8 : i32
    %758 = vector.broadcast %c8_i32 : i32 to vector<32x128xi32>
    %759 = arith.cmpi eq, %757, %758 : vector<32x128xi32>
    %cst_227 = arith.constant 0.000000e+00 : f32
    %760 = vector.shape_cast %756 : vector<32x1xf32> to vector<32x1xf32>
    %761 = vector.broadcast %760 : vector<32x1xf32> to vector<32x128xf32>
    %762 = vector.broadcast %cst_227 : f32 to vector<32x128xf32>
    %763 = arith.select %759, %761, %762 : vector<32x128xi1>, vector<32x128xf32>
    %764 = arith.addf %755, %763 : vector<32x128xf32>
    %c0_228 = arith.constant 0 : index
    %c0_229 = arith.constant 0 : index
    %c0_230 = arith.constant 0 : index
    %765 = vector.load %arg6[%c0_228, %c0_229, %c0_230] : memref<1x32x128xf32, #tpu.memory_space<vmem>>, vector<1x32x128xf32>
    %766 = vector.shape_cast %765 : vector<1x32x128xf32> to vector<32x128xf32>
    %767 = vector.shape_cast %764 : vector<32x128xf32> to vector<1x32x128xf32>
    tpu.vector_store %arg6[%c0_228, %c0_229, %c0_230], %767 {strides = array<i32>} : memref<1x32x128xf32, #tpu.memory_space<vmem>>, vector<1x32x128xf32>,
    return
  }
  func.func @transform_0(%arg0: i32) -> (i32, i32, i32) {
    %c0_i32 = arith.constant 0 : i32
    %c0_i32_0 = arith.constant 0 : i32
    %c0_i32_1 = arith.constant 0 : i32
    return %arg0, %c0_i32, %c0_i32_0 : i32, i32, i32
  }
  func.func @transform_1(%arg0: i32) -> (i32, i32) {
    %c0_i32 = arith.constant 0 : i32
    %c0_i32_0 = arith.constant 0 : i32
    %c0_i32_1 = arith.constant 0 : i32
    return %c0_i32, %c0_i32_0 : i32, i32
  }
  func.func @transform_2(%arg0: i32) -> (i32, i32) {
    %c0_i32 = arith.constant 0 : i32
    %c0_i32_0 = arith.constant 0 : i32
    %c0_i32_1 = arith.constant 0 : i32
    return %c0_i32, %c0_i32_0 : i32, i32
  }
  func.func @transform_3(%arg0: i32) -> (i32, i32) {
    %c0_i32 = arith.constant 0 : i32
    %c0_i32_0 = arith.constant 0 : i32
    %c0_i32_1 = arith.constant 0 : i32
    return %c0_i32, %c0_i32_0 : i32, i32
  }
  func.func @transform_4(%arg0: i32) -> (i32, i32) {
    %c0_i32 = arith.constant 0 : i32
    %c0_i32_0 = arith.constant 0 : i32
    %c0_i32_1 = arith.constant 0 : i32
    return %c0_i32, %c0_i32_0 : i32, i32
  }
  func.func @transform_5(%arg0: i32) -> (i32, i32, i32) {
    %c0_i32 = arith.constant 0 : i32
    %c0_i32_0 = arith.constant 0 : i32
    %c0_i32_1 = arith.constant 0 : i32
    return %arg0, %c0_i32, %c0_i32_0 : i32, i32, i32
  }
}

</mosaic_0001>

<bundles_post_ra>
// kernel: tpu_custom_call.1
= control target key start
LH: loop header
LB: loop body
LE: loop exit
PB: predicated region body
PF: predicated region fallthrough
CT: control target
= control target key end

     0   :  { %10 = vsyncpa [#allocation3], 0  ;;  %s6693_s0 = inlined_call_operand.vmem [shape: f32[2,16,48], index: 0, kind: input, shape index: {}]   ;;  %s6694_s1 = inlined_call_operand.vmem [shape: f32[2,48], index: 1, kind: input, shape index: {}]   ;;  %s6695_s2 = inlined_call_operand.vmem [shape: f32[504,32], index: 2, kind: input, shape index: {}]   ;;  %s6696_s3 = inlined_call_operand.vmem [shape: f32[160,64], index: 3, kind: input, shape index: {}]   ;;  %s6697_s4 = inlined_call_operand.vmem [shape: f32[161,128], index: 4, kind: input, shape index: {}]   ;;  %s6698_s5 = inlined_call_operand.hbm [shape: f32[2,32,128], index: 5, kind: output, shape index: {}]  }
   0x1   :  { %12 = vsyncpa [#allocation3 + $0x1], 0  ;;  %s5043_s18 = smov 0   ;;  %s5045_s19 = smov 0  }
   0x2   :  { %s5047_s20 = smov 0   ;;  %s5049_s21 = smov 0  }
   0x3 LB: > { %s5064_s22 = sadd.s32 4294967295, %s4997_s21   ;;  %s4303_s23 = sadd.s32 4294967294, %s4997_s21   ;;  %s4997_s21 = sphi %s5049_s21, %s6712_s21   ;;  %s4993_s20 = sphi %s5047_s20, %s6711_s20   ;;  %s4989_s19 = sphi %s5045_s19, %s6710_s19   ;;  %s4985_s18 = sphi %s5043_s18, %s6709_s18  }
   0x4   : > { %s5068_s24 = sadd.s32 1, %s4997_s21   ;;  %s135_s25 = sadd.s32 1, %s4993_s20 }
   0x5   : > { %s132_s26 = ssub.s32 %s4997_s21, %s5068_s24  ;;  %p145_p0 = scmp.ne.s32.totalorder %s4993_s20, %s4989_s19 }
   0x6   : > { %p133_p1 = scmp.eq.s32.totalorder %s132_s26, 0  ;;  %p146_p2 = scmp.eq.s32.totalorder %s5064_s22, 1 }
   0x7   : > { %p151_p3 = scmp.ne.s32.totalorder %s4989_s19, %s4985_s18  ;;  %p152_p4 = scmp.eq.s32.totalorder %s4303_s23, 1 }
   0x8   : > { %s5079_s27 = scalar_select %p133_p1, %s4993_s20, %s135_s25  }
   0x9   : > { %p5081_p5 = por %p146_p2, %p145_p0  ;;  %p5085_p6 = por %p152_p4, %p151_p3 }
   0xa   : > { %p4306_p7 = scmp.ge.s32.totalorder %s4997_s21, 1  ;;  %p190_p8 = scmp.lt.s32.totalorder %s4997_s21, 3 }
   0xc   : > { %p191_p9 = pnand %p4306_p7, %p190_p8 }
   0xd   : > { %p218_p10 = scmp.lt.s32.totalorder (!%p191_p9), %s5064_s22, 1  ;;  %s5001_s26 = smov (!%p191_p9), 96  }
   0xe   : > { %194 = sbr.rel (%p191_p9) target bundleno = 9283 (0x2443), region = 40  ;;  %s5004_s7 = smov (!%p191_p9), 112  }
   0xf   : > { %s6701_s8 = smov (!%p191_p9), 64   ;;  %s6699_s10 = smov (!%p191_p9), 16  }
  0x10   : > { %s6706_s17 = smov (!%p191_p9), 16   ;;  %s6707_s14 = smov (!%p191_p9), 64  }
  0x13   : > { %s219_s30 = scalar_select %p218_p10, %s5064_s22, 1  ;;  %vm286_vm0 = vcmask 392192   ;;  %v4999_v4 = vmov 48.0   ;;  %v239_v21 = vld [vmem:[%s6695_s2 + $0x50] sm:$0xff]  ;;  %v238_v22 = vld [vmem:[%s6695_s2 + $0x48] sm:$0xff]  ;;  %v237_v23 = vld [vmem:[%s6695_s2 + $0x40] sm:$0xff] }
  0x14   : > { %4623 = vrcp.f32 %v4999_v4  ;;  %361 = vmatpush.msra.mxu0 %v239_v21  ;;  %4480 = vmatpush.msra.mxu2 %v239_v21  ;;  %v236_v24 = vld [vmem:[%s6695_s2 + $0x38] sm:$0xff]  ;;  %v235_v25 = vld [vmem:[%s6695_s2 + $0x30] sm:$0xff]  ;;  %v234_v26 = vld [vmem:[%s6695_s2 + $0x28] sm:$0xff]  ;;  %vm374_vm8 = vcmask 261120   ;;  %v5000_v62 = vmov 32.0  }
  0x15   : > { %s4478_s6 = sshll.u32 %s219_s30, 4  ;;  %v4583_v41 = vld [vmem:[%s6694_s1] ss:$0 sm:$0xff]  ;;  %v4584_v45 = vld [vmem:[%s6694_s1 + $0x1] ss:$0 sm:$0xff]  ;;  %s5002_s30 = smov 80  }
  0x16   : > { %s222_s9 = scalar_lea.vmem %s6693_s0, %s4478_s6  ;;  %362 = vmatpush.msra.mxu0 %v238_v22  ;;  %4481 = vmatpush.msra.mxu2 %v238_v22  ;;  %v4585_v55 = vld [vmem:[%s6695_s2] ss:$0 sm:$0xff]  ;;  %s5003_s6 = smov 32  }
  0x17   : > { %v284_v0 = vld [vmem:[%s222_s9] sm:$0xff]  ;;  %v285_v2 = vld [vmem:[%s222_s9 + $0x8] sm:$0xff]  ;;  %s6703_s9 = smov 48  }
  0x18   : > { %v287_v1 = vsel %vm286_vm0, %v284_v0, 0.0  ;;  %v290_v3 = vsel %vm286_vm0, %v285_v2, 0.0  ;;  %363 = vmatpush.msra.mxu0 %v237_v23  ;;  %4482 = vmatpush.msra.mxu2 %v237_v23 }
  0x19   : > { %288 = vadd.xlane.f32.xlu0 %v287_v1 }
  0x1a   : > { %v4624_v5 = vpop.eup %4623  ;;  %364 = vmatpush.msra.mxu0 %v236_v24  ;;  %4483 = vmatpush.msra.mxu2 %v236_v24 }
  0x1b   : > { %v294_v6 = vmul.f32 48.0, %v4624_v5  ;;  %vm298_vm1 = vweird.f32 %v4624_v5 }
  0x1c   : > { %365 = vmatpush.msra.mxu0 %v235_v25  ;;  %4484 = vmatpush.msra.mxu2 %v235_v25 }
  0x1d   : > { %v295_v7 = vsub.f32 1.0, %v294_v6 }
  0x1e   : > { %366 = vmatpush.msra.mxu0 %v234_v26  ;;  %4485 = vmatpush.msra.mxu2 %v234_v26 }
  0x1f   : > { %v296_v8 = vmul.f32 %v4624_v5, %v295_v7 }
  0x21   : > { %291 = vadd.xlane.f32.xlu0 %v290_v3  ;;  %v297_v9 = vadd.f32 %v4624_v5, %v296_v8 }
  0x23   : > { %v299_v10 = vsel %vm298_vm1, %v4624_v5, %v297_v9 }
  0x8c   : > { %v289_v11 = vpop.xlane.xlu0 %288 }
  0x8d   : > { %v300_v12 = vmul.f32 %v299_v10, %v289_v11 }
  0x8f   : > { %v302_v13 = vsub.f32 %v284_v0, %v300_v12 }
  0x91   : > { %v304_v14 = vmul.f32 %v302_v13, %v302_v13 }
  0x93   : > { %v306_v15 = vsel %vm286_vm0, %v304_v14, 0.0 }
  0x94   : > { %307 = vadd.xlane.f32.xlu1 %v306_v15  ;;  %v292_v16 = vpop.xlane.xlu0 %291  ;;  %v5140_v15 = vld [vmem:[%s6695_s2 + $0x18] sm:$0xff] }
  0x95   : > { %v301_v17 = vmul.f32 %v299_v10, %v292_v16  ;;  %v476_v16 = vsel %vm374_vm8, %v5140_v15, 0.0 }
  0x97   : > { %v303_v18 = vsub.f32 %v285_v2, %v301_v17 }
  0x99   : > { %v305_v19 = vmul.f32 %v303_v18, %v303_v18 }
  0x9b   : > { %v309_v20 = vsel %vm286_vm0, %v305_v19, 0.0 }
  0x9c   : > { %310 = vadd.xlane.f32.xlu1 %v309_v20 }
 0x107   : > { %v308_v27 = vpop.xlane.xlu1 %307 }
 0x108   : > { %v312_v28 = vmul.f32 %v308_v27, %v299_v10 }
 0x10a   : > { %v314_v29 = vadd.f32 1e-05, %v312_v28 }
 0x10c   : > { %4625 = vrsqrt.f32 %v314_v29  ;;  %vm322_vm3 = vweird.f32 %v314_v29 }
 0x10f   : > { %v311_v30 = vpop.xlane.xlu1 %310 }
 0x110   : > { %v313_v31 = vmul.f32 %v311_v30, %v299_v10 }
 0x112   : > { %v4626_v32 = vpop.eup %4625  ;;  %v315_v33 = vadd.f32 1e-05, %v313_v31 }
 0x113   : > { %v317_v34 = vmul.f32 %v4626_v32, %v314_v29  ;;  %vm323_vm2 = vweird.f32 %v4626_v32  ;;  %v4586_v29 = vld [vmem:[%s6695_s2 + $0x1] ss:$0 sm:$0xff] }
 0x114   : > { %4627 = vrsqrt.f32 %v315_v33  ;;  %vm324_vm4 = vmor %vm322_vm3, %vm323_vm2  ;;  %vm332_vm6 = vweird.f32 %v315_v33 }
 0x115   : > { %v318_v35 = vmul.f32 %v4626_v32, %v317_v34  ;;  %4629 = vrcp.f32 %v5000_v62 }
 0x117   : > { %v319_v36 = vmul.f32 0.5, %v318_v35 }
 0x119   : > { %v320_v37 = vsub.f32 1.5, %v319_v36  ;;  %v230_v36 = vld [vmem:[%s6695_s2 + $0x8] sm:$0xff] }
 0x11a   : > { %v4628_v38 = vpop.eup %4627 }
 0x11b   : > { %v321_v39 = vmul.f32 %v4626_v32, %v320_v37  ;;  %v327_v40 = vmul.f32 %v4628_v38, %v315_v33  ;;  %vm333_vm5 = vweird.f32 %v4628_v38  ;;  %v4630_v63 = vpop.eup %4629 }
 0x11c   : > { %vm334_vm7 = vmor %vm332_vm6, %vm333_vm5  ;;  %v382_v0 = vmul.f32 32.0, %v4630_v63  ;;  %vm386_vm9 = vweird.f32 %v4630_v63 }
 0x11d   : > { %v328_v42 = vmul.f32 %v4628_v38, %v327_v40  ;;  %v325_v43 = vsel %vm324_vm4, %v4626_v32, %v321_v39  ;;  %v4587_v32 = vld [vmem:[%s6695_s2 + $0x2] ss:$0 sm:$0xff] }
 0x11e   : > { %v336_v44 = vmul.f32 %v325_v43, %v302_v13  ;;  %v383_v1 = vsub.f32 1.0, %v382_v0 }
 0x11f   : > { %v329_v46 = vmul.f32 0.5, %v328_v42 }
 0x120   : > { %v339_v47 = vmul.f32 %v4583_v41, %v336_v44  ;;  %v384_v2 = vmul.f32 %v4630_v63, %v383_v1 }
 0x121   : > { %v330_v48 = vsub.f32 1.5, %v329_v46  ;;  %v5163_v46 = vld [vmem:[%s6695_s2 + $0x20] sm:$0xff] }
 0x122   : > { %v342_v49 = vadd.f32 %v4584_v45, %v339_v47  ;;  %v385_v3 = vadd.f32 %v4630_v63, %v384_v2 }
 0x123   : > { %v331_v50 = vmul.f32 %v4628_v38, %v330_v48 }
 0x124   : > { %4315 = vmatmul.msk.f32.vlgmr.msra.gmra.mxu0 %vm286_vm0, %v342_v49  ;;  %v5131_v4 = vsel %vm386_vm9, %v4630_v63, %v385_v3 }
 0x125   : > { %v335_v51 = vsel %vm334_vm7, %v4628_v38, %v331_v50  ;;  %v479_v50 = vsel %vm374_vm8, %v5163_v46, 0.0 }
 0x126   : > { %v337_v52 = vmul.f32 %v335_v51, %v303_v18 }
 0x128   : > { %v340_v53 = vmul.f32 %v4583_v41, %v337_v52  ;;  %v231_v52 = vld [vmem:[%s6695_s2 + $0x10] sm:$0xff] }
 0x12a   : > { %v343_v54 = vadd.f32 %v4584_v45, %v340_v53 }
 0x12c   : > { %4316 = vmatmul.msk.f32.vlgmr.msra.gmra.mxu2 %vm286_vm0, %v343_v54 }
 0x1a1   : > { %v368_v56 = vpop.f32.mrf.mxu0 }
 0x1a2   : > { %v369_v57 = vadd.f32 %v4585_v55, %v368_v56 }
 0x1a4   : > { %v375_v58 = vsel %vm374_vm8, %v369_v57, 0.0 }
 0x1a5   : > { %376 = vadd.xlane.f32.xlu2 %v375_v58 }
 0x1af   : > { %v371_v59 = vpop.f32.mrf.mxu2 }
 0x1b0   : > { %v372_v60 = vadd.f32 %v4585_v55, %v371_v59 }
 0x1b2   : > { %v378_v61 = vsel %vm374_vm8, %v372_v60, 0.0 }
 0x1b3   : > { %379 = vadd.xlane.f32.xlu2 %v378_v61 }
 0x218   : > { %v377_v5 = vpop.xlane.xlu2 %376 }
 0x219   : > { %v388_v6 = vmul.f32 %v5131_v4, %v377_v5 }
 0x21b   : > { %v390_v7 = vsub.f32 %v369_v57, %v388_v6 }
 0x21d   : > { %v392_v8 = vmul.f32 %v390_v7, %v390_v7 }
 0x21f   : > { %v394_v9 = vsel %vm374_vm8, %v392_v8, 0.0 }
 0x220   : > { %395 = vadd.xlane.f32.xlu0 %v394_v9 }
 0x226   : > { %v380_v10 = vpop.xlane.xlu2 %379 }
 0x227   : > { %v389_v11 = vmul.f32 %v5131_v4, %v380_v10  ;;  %v469_v10 = vld [vmem:[%s6697_s4 + $0x18] sm:$0xff] }
 0x228   : > { %592 = vmatpush.msra.mxu1 %v469_v10 }
 0x229   : > { %v391_v12 = vsub.f32 %v372_v60, %v389_v11  ;;  %v468_v11 = vld [vmem:[%s6697_s4 + $0x10] sm:$0xff] }
 0x22a   : > { %593 = vmatpush.msra.mxu1 %v468_v11 }
 0x22b   : > { %v393_v13 = vmul.f32 %v391_v12, %v391_v12 }
 0x22d   : > { %v397_v14 = vsel %vm374_vm8, %v393_v13, 0.0  ;;  %v466_v13 = vld [vmem:[%s6697_s4] sm:$0xff] }
 0x22e   : > { %398 = vadd.xlane.f32.xlu1 %v397_v14 }
 0x236   : > { %477 = vadd.xlane.f32.xlu1 %v476_v16 }
 0x293   : > { %v396_v17 = vpop.xlane.xlu0 %395 }
 0x294   : > { %v400_v18 = vmul.f32 %v396_v17, %v5131_v4 }
 0x296   : > { %v402_v19 = vadd.f32 1e-05, %v400_v18 }
 0x298   : > { %4631 = vrsqrt.f32 %v402_v19  ;;  %vm410_vm11 = vweird.f32 %v402_v19 }
 0x29e   : > { %v4632_v20 = vpop.eup %4631 }
 0x29f   : > { %v405_v21 = vmul.f32 %v4632_v20, %v402_v19  ;;  %vm411_vm10 = vweird.f32 %v4632_v20 }
 0x2a0   : > { %vm412_vm12 = vmor %vm410_vm11, %vm411_vm10 }
 0x2a1   : > { %v406_v22 = vmul.f32 %v4632_v20, %v405_v21  ;;  %v399_v23 = vpop.xlane.xlu1 %398 }
 0x2a2   : > { %v401_v24 = vmul.f32 %v399_v23, %v5131_v4 }
 0x2a3   : > { %v407_v25 = vmul.f32 0.5, %v406_v22 }
 0x2a4   : > { %v403_v26 = vadd.f32 1e-05, %v401_v24 }
 0x2a5   : > { %v408_v27 = vsub.f32 1.5, %v407_v25 }
 0x2a6   : > { %4633 = vrsqrt.f32 %v403_v26  ;;  %vm420_vm14 = vweird.f32 %v403_v26 }
 0x2a7   : > { %v409_v28 = vmul.f32 %v4632_v20, %v408_v27 }
 0x2a9   : > { %v413_v30 = vsel %vm412_vm12, %v4632_v20, %v409_v28  ;;  %v478_v41 = vpop.xlane.xlu1 %477 }
 0x2aa   : > { %v424_v31 = vmul.f32 %v413_v30, %v390_v7  ;;  %v484_v44 = vmul.f32 %v478_v41, %v5131_v4 }
 0x2ac   : > { %v4634_v33 = vpop.eup %4633  ;;  %v427_v34 = vmul.f32 %v4586_v29, %v424_v31  ;;  %v5166_v49 = vsub.f32 %v5140_v15, %v484_v44 }
 0x2ad   : > { %v415_v35 = vmul.f32 %v4634_v33, %v403_v26  ;;  %vm421_vm13 = vweird.f32 %v4634_v33 }
 0x2ae   : > { %v430_v37 = vadd.f32 %v4587_v32, %v427_v34  ;;  %vm422_vm15 = vmor %vm420_vm14, %vm421_vm13  ;;  %v492_v54 = vmul.f32 %v5166_v49, %v5166_v49  ;;  %vm621_vm13 = vcmask 130048  }
 0x2af   : > { %v416_v38 = vmul.f32 %v4634_v33, %v415_v35 }
 0x2b0   : > { %v5155_v39 = vadd.f32 %v430_v37, %v230_v36  ;;  %v500_v57 = vsel %vm374_vm8, %v492_v54, 0.0 }
 0x2b1   : > { %v417_v40 = vmul.f32 0.5, %v416_v38 }
 0x2b2   : > { %v470_v42 = vsel %vm374_vm8, %v5155_v39, 0.0 }
 0x2b3   : > { %v418_v43 = vsub.f32 1.5, %v417_v40  ;;  %471 = vadd.xlane.f32.xlu2 %v470_v42  ;;  %v4588_v40 = vld [vmem:[%s6695_s2 + $0xb8] ss:$0 sm:$0xff] }
 0x2b5   : > { %v419_v45 = vmul.f32 %v4634_v33, %v418_v43  ;;  %v4589_v43 = vld [vmem:[%s6695_s2 + $0xb9] ss:$0 sm:$0xff] }
 0x2b7   : > { %v423_v47 = vsel %vm422_vm15, %v4634_v33, %v419_v45 }
 0x2b8   : > { %v425_v48 = vmul.f32 %v423_v47, %v391_v12  ;;  %v467_v12 = vld [vmem:[%s6697_s4 + $0x8] sm:$0xff] }
 0x2b9   : > { %594 = vmatpush.msra.mxu1 %v467_v12 }
 0x2ba   : > { %v428_v51 = vmul.f32 %v4586_v29, %v425_v48 }
 0x2bb   : > { %480 = vadd.xlane.f32.xlu2 %v479_v50  ;;  %595 = vmatpush.msra.mxu1 %v466_v13 }
 0x2bc   : > { %v431_v53 = vadd.f32 %v4587_v32, %v428_v51 }
 0x2be   : > { %v5175_v55 = vadd.f32 %v431_v53, %v231_v52 }
 0x2c0   : > { %v473_v56 = vsel %vm374_vm8, %v5175_v55, 0.0 }
 0x2c1   : > { %474 = vadd.xlane.f32.xlu0 %v473_v56 }
 0x2c3   : > { %501 = vadd.xlane.f32.xlu2 %v500_v57 }
 0x326   : > { %v472_v58 = vpop.xlane.xlu2 %471 }
 0x327   : > { %v482_v59 = vmul.f32 %v472_v58, %v5131_v4 }
 0x329   : > { %v486_v60 = vsub.f32 %v5155_v39, %v482_v59 }
 0x32b   : > { %v490_v61 = vmul.f32 %v486_v60, %v486_v60 }
 0x32d   : > { %v494_v62 = vsel %vm374_vm8, %v490_v61, 0.0 }
 0x32e   : > { %495 = vadd.xlane.f32.xlu0 %v494_v62  ;;  %v481_v63 = vpop.xlane.xlu2 %480 }
 0x32f   : > { %v485_v0 = vmul.f32 %v481_v63, %v5131_v4 }
 0x331   : > { %v5185_v1 = vsub.f32 %v5163_v46, %v485_v0 }
 0x333   : > { %v493_v2 = vmul.f32 %v5185_v1, %v5185_v1 }
 0x334   : > { %v475_v3 = vpop.xlane.xlu0 %474 }
 0x335   : > { %v483_v5 = vmul.f32 %v475_v3, %v5131_v4  ;;  %v503_v6 = vsel %vm374_vm8, %v493_v2, 0.0 }
 0x336   : > { %504 = vadd.xlane.f32.xlu0 %v503_v6  ;;  %v502_v14 = vpop.xlane.xlu2 %501 }
 0x337   : > { %v5192_v7 = vsub.f32 %v5175_v55, %v483_v5  ;;  %v508_v17 = vmul.f32 %v502_v14, %v5131_v4 }
 0x339   : > { %v491_v8 = vmul.f32 %v5192_v7, %v5192_v7  ;;  %v512_v20 = vadd.f32 1e-05, %v508_v17 }
 0x33b   : > { %v497_v9 = vsel %vm374_vm8, %v491_v8, 0.0  ;;  %vm540_vm3 = vweird.f32 %v512_v20 }
 0x33c   : > { %498 = vadd.xlane.f32.xlu1 %v497_v9 }
 0x3a1   : > { %v496_v16 = vpop.xlane.xlu0 %495 }
 0x3a2   : > { %v506_v18 = vmul.f32 %v496_v16, %v5131_v4 }
 0x3a4   : > { %v510_v19 = vadd.f32 1e-05, %v506_v18 }
 0x3a6   : > { %4635 = vrsqrt.f32 %v510_v19  ;;  %vm520_vm1 = vweird.f32 %v510_v19 }
 0x3a7   : > { %4637 = vrsqrt.f32 %v512_v20 }
 0x3a9   : > { %v505_v21 = vpop.xlane.xlu0 %504 }
 0x3aa   : > { %v509_v22 = vmul.f32 %v505_v21, %v5131_v4 }
 0x3ac   : > { %v4636_v23 = vpop.eup %4635  ;;  %v513_v25 = vadd.f32 1e-05, %v509_v22 }
 0x3ad   : > { %v515_v24 = vmul.f32 %v4636_v23, %v510_v19  ;;  %v4638_v28 = vpop.eup %4637  ;;  %vm521_vm0 = vweird.f32 %v4636_v23 }
 0x3ae   : > { %4639 = vrsqrt.f32 %v513_v25  ;;  %v535_v32 = vmul.f32 %v4638_v28, %v512_v20  ;;  %vm522_vm2 = vmor %vm520_vm1, %vm521_vm0  ;;  %vm541_vm4 = vweird.f32 %v4638_v28  ;;  %vm550_vm10 = vweird.f32 %v513_v25 }
 0x3af   : > { %v516_v26 = vmul.f32 %v4636_v23, %v515_v24  ;;  %v499_v27 = vpop.xlane.xlu1 %498  ;;  %vm542_vm6 = vmor %vm540_vm3, %vm541_vm4 }
 0x3b0   : > { %v507_v29 = vmul.f32 %v499_v27, %v5131_v4  ;;  %v536_v35 = vmul.f32 %v4638_v28, %v535_v32 }
 0x3b1   : > { %v517_v30 = vmul.f32 0.5, %v516_v26 }
 0x3b2   : > { %v511_v31 = vadd.f32 1e-05, %v507_v29  ;;  %v537_v44 = vmul.f32 0.5, %v536_v35 }
 0x3b3   : > { %v518_v33 = vsub.f32 1.5, %v517_v30 }
 0x3b4   : > { %4641 = vrsqrt.f32 %v511_v31  ;;  %v4640_v37 = vpop.eup %4639  ;;  %v538_v51 = vsub.f32 1.5, %v537_v44  ;;  %vm530_vm7 = vweird.f32 %v511_v31 }
 0x3b5   : > { %v519_v34 = vmul.f32 %v4636_v23, %v518_v33  ;;  %v545_v45 = vmul.f32 %v4640_v37, %v513_v25  ;;  %vm551_vm11 = vweird.f32 %v4640_v37  ;;  %v245_v25 = vlaneseq }
 0x3b6   : > { %v539_v56 = vmul.f32 %v4638_v28, %v538_v51  ;;  %vm552_vm12 = vmor %vm550_vm10, %vm551_vm11  ;;  %v5005_v33 = vmov 0.25  }
 0x3b7   : > { %v523_v36 = vsel %vm522_vm2, %v4636_v23, %v519_v34  ;;  %v546_v52 = vmul.f32 %v4640_v37, %v545_v45  ;;  %v5262_v29 = vand.u32 127, %v245_v25 }
 0x3b8   : > { %v554_v38 = vmul.f32 %v523_v36, %v486_v60  ;;  %v543_v62 = vsel %vm542_vm6, %v4638_v28, %v539_v56  ;;  %v5260_v28 = vshrl.u32 %v245_v25, 7 }
 0x3b9   : > { %v547_v57 = vmul.f32 0.5, %v546_v52  ;;  %v556_v2 = vmul.f32 %v543_v62, %v5166_v49 }
 0x3ba   : > { %v4642_v41 = vpop.eup %4641  ;;  %v559_v42 = vmul.f32 %v4588_v40, %v554_v38  ;;  %vm257_vm14 = vcmp.eq.s32.totalorder %v5260_v28, %v5262_v29  ;;  %v249_v32 = vadd.s32 24, %v5260_v28 }
 0x3bb   : > { %v525_v47 = vmul.f32 %v4642_v41, %v511_v31  ;;  %vm531_vm5 = vweird.f32 %v4642_v41  ;;  %v548_v61 = vsub.f32 1.5, %v547_v57  ;;  %v561_v5 = vmul.f32 %v4588_v40, %v556_v2 }
 0x3bc   : > { %v564_v48 = vadd.f32 %v4589_v43, %v559_v42  ;;  %vm532_vm9 = vmor %vm530_vm7, %vm531_vm5  ;;  %v5271_v34 = vsel %vm257_vm14, 0.0, %v5005_v33  ;;  %v4312_v35 = vadd.s32 4294967280, %v249_v32 }
 0x3bd   : > { %v526_v50 = vmul.f32 %v4642_v41, %v525_v47  ;;  %v549_v3 = vmul.f32 %v4640_v37, %v548_v61  ;;  %v566_v8 = vadd.f32 %v4589_v43, %v561_v5 }
 0x3be   : > { %4317 = vmatmul.msk.f32.vlgmr.msra.gmra.mxu1 %vm374_vm8, %v564_v48  ;;  %vm258_vm15 = vcmp.eq.s32.totalorder %v4312_v35, %v5262_v29 }
 0x3bf   : > { %v527_v53 = vmul.f32 0.5, %v526_v50  ;;  %v553_v6 = vsel %vm552_vm12, %v4640_v37, %v549_v3 }
 0x3c0   : > { %v557_v9 = vmul.f32 %v553_v6, %v5185_v1 }
 0x3c1   : > { %v528_v54 = vsub.f32 1.5, %v527_v53 }
 0x3c3   : > { %v529_v58 = vmul.f32 %v4642_v41, %v528_v54 }
 0x3c5   : > { %v533_v59 = vsel %vm532_vm9, %v4642_v41, %v529_v58  ;;  %v5276_v41 = vsel %vm258_vm15, 0.0, %v5005_v33  ;;  %vm1148_vm15 = vcmask 523264  }
 0x3c6   : > { %v555_v60 = vmul.f32 %v533_v59, %v5192_v7  ;;  %v562_v7 = vmul.f32 %v4588_v40, %v557_v9 }
 0x3c8   : > { %v560_v63 = vmul.f32 %v4588_v40, %v555_v60  ;;  %v567_v10 = vadd.f32 %v4589_v43, %v562_v7 }
 0x3ca   : > { %v565_v0 = vadd.f32 %v4589_v43, %v560_v63 }
 0x3cc   : > { %4318 = vmatmul.msk.f32.gmra.mxu1 %vm374_vm8, %v565_v0 }
 0x3d4   : > { %4319 = vmatmul.msk.f32.gmra.mxu1 %vm374_vm8, %v566_v8 }
 0x3dc   : > { %4320 = vmatmul.msk.f32.gmra.mxu1 %vm374_vm8, %v567_v10 }
 0x43b   : > { %v5226_v11 = vpop.f32.mrf.mxu1 }
 0x43c   : > { %617 = vrot.lane.b32.xlu2 %v5226_v11, %s5001_s26 }
 0x449   : > { %v5230_v49 = vpop.f32.mrf.mxu1 }
 0x44a   : > { %619 = vrot.lane.b32.xlu1 %v5230_v49, %s5001_s26  ;;  %v4541_v59 = vpack.i.bf16 %v5226_v11, %v5230_v49 }
 0x451   : > { %v603_v12 = vpop.f32.mrf.mxu1 }
 0x452   : > { %768 = vrot.lane.b32.xlu1 %v5230_v49, %s5002_s30  ;;  %611 = vrot.lane.b32.xlu0 %v603_v12, %s5003_s6 }
 0x459   : > { %v606_v1 = vpop.f32.mrf.mxu1 }
 0x45a   : > { %760 = vrot.lane.b32.xlu1 %v5230_v49, %s5004_s7  ;;  %766 = vrot.lane.b32.xlu0 %v5226_v11, %s5002_s30 }
 0x45b   : > { %613 = vrot.lane.b32.xlu2 %v606_v1, %s5003_s6 }
 0x463   : > { %758 = vrot.lane.b32.xlu2 %v5226_v11, %s5004_s7 }
 0x496   : > { %v618_v13 = vpop.permute.xlu2 %617 }
 0x4b5   : > { %v614_v14 = vpop.permute.xlu2 %613 }
 0x4b6   : > { %764 = vrot.lane.b32.xlu2 %v614_v14, %s5004_s7 }
 0x4bc   : > { %v620_v16 = vpop.permute.xlu1 %619 }
 0x4bd   : > { %4321 = vmatpush.xpose.msk.msrb.mxu2 %vm621_vm13, %v620_v16  ;;  %v759_v20 = vpop.permute.xlu2 %758 }
 0x4c1   : > { %4322 = vmatpush.xpose.msk.msrb.mxu2 %vm621_vm13, %v618_v13 }
 0x4c4   : > { %4323 = vmatmul.msk.f32.vlgmr.msrb.gmra.mxu2 %vm621_vm13, %v5226_v11  ;;  %v769_v17 = vpop.permute.xlu1 %768  ;;  %v612_v18 = vpop.permute.xlu0 %611 }
 0x4c5   : > { %4331 = vmatpush.xpose.msk.msrb.mxu0 %vm621_vm13, %v769_v17  ;;  %762 = vrot.lane.b32.xlu0 %v612_v18, %s5004_s7 }
 0x4cc   : > { %4324 = vmatmul.msk.f32.gmra.mxu2 %vm621_vm13, %v5230_v49  ;;  %v767_v19 = vpop.permute.xlu0 %766  ;;  %v761_v21 = vpop.permute.xlu1 %760 }
 0x4cd   : > { %4332 = vmatpush.xpose.msk.msrb.mxu0 %vm621_vm13, %v767_v19 }
 0x4d0   : > { %4333 = vmatmul.msk.f32.vlgmr.msrb.gmra.mxu0 %vm621_vm13, %v759_v20 }
 0x4d4   : > { %4325 = vmatmul.msk.f32.gmra.mxu2 %vm621_vm13, %v612_v18 }
 0x4d8   : > { %4334 = vmatmul.msk.f32.gmra.mxu0 %vm621_vm13, %v761_v21 }
 0x4dc   : > { %4326 = vmatmul.msk.f32.gmra.mxu2 %vm621_vm13, %v614_v14 }
 0x510   : > { %v765_v23 = vpop.permute.xlu2 %764 }
 0x537   : > { %v763_v22 = vpop.permute.xlu0 %762 }
 0x538   : > { %4335 = vmatmul.msk.f32.gmra.mxu0 %vm621_vm13, %v763_v22 }
 0x540   : > { %4336 = vmatmul.msk.f32.gmra.mxu0 %vm621_vm13, %v765_v23 }
 0x547   : > { %v651_v24 = vpop.f32.mrf.mxu2 }
 0x548   : > { %v663_v9 = vmul.f32 0.25, %v651_v24 }
 0x54a   : > { %v667_v11 = vsel %vm621_vm13, %v663_v9, -inf }
 0x54d   : > { %v799_v26 = vpop.f32.mrf.mxu0 }
 0x54e   : > { %v811_v27 = vmul.f32 0.25, %v799_v26 }
 0x54f   : > { %v654_v30 = vpop.f32.mrf.mxu2 }
 0x550   : > { %v815_v31 = vsel %vm621_vm13, %v811_v27, -inf  ;;  %v664_v1 = vmul.f32 0.25, %v654_v30 }
 0x551   : > { %816 = vmax.xlane.f32.xlu2 %v815_v31 }
 0x552   : > { %v670_v14 = vsel %vm621_vm13, %v664_v1, -inf }
 0x555   : > { %v802_v40 = vpop.f32.mrf.mxu0 }
 0x556   : > { %v812_v42 = vmul.f32 0.25, %v802_v40 }
 0x557   : > { %v657_v36 = vpop.f32.mrf.mxu2 }
 0x558   : > { %v665_v37 = vmul.f32 %v657_v36, %v5271_v34  ;;  %v818_v47 = vsel %vm621_vm13, %v812_v42, -inf }
 0x55a   : > { %v673_v38 = vsel %vm621_vm13, %v665_v37, -inf }
 0x55b   : > { %674 = vmax.xlane.f32.xlu1 %v673_v38 }
 0x55f   : > { %v660_v43 = vpop.f32.mrf.mxu2 }
 0x560   : > { %v666_v44 = vmul.f32 %v660_v43, %v5276_v41 }
 0x562   : > { %v676_v45 = vsel %vm621_vm13, %v666_v44, -inf }
 0x563   : > { %677 = vmax.xlane.f32.xlu0 %v676_v45  ;;  %819 = vmax.xlane.f32.xlu1 %v818_v47 }
 0x5b5   : > { %v805_v48 = vpop.f32.mrf.mxu0 }
 0x5b6   : > { %v813_v50 = vmul.f32 %v805_v48, %v5271_v34 }
 0x5b8   : > { %v821_v51 = vsel %vm621_vm13, %v813_v50, -inf }
 0x5b9   : > { %822 = vmax.xlane.f32.xlu0 %v821_v51 }
 0x5bd   : > { %v808_v52 = vpop.f32.mrf.mxu0 }
 0x5be   : > { %v814_v53 = vmul.f32 %v808_v52, %v5276_v41 }
 0x5c0   : > { %v824_v54 = vsel %vm621_vm13, %v814_v53, -inf }
 0x5c1   : > { %825 = vmax.xlane.f32.xlu2 %v824_v54 }
 0x5c4   : > { %v817_v56 = vpop.xlane.xlu2 %816 }
 0x5c5   : > { %v827_v57 = vsub.f32 %v811_v27, %v817_v56 }
 0x5c7   : > { %v831_v58 = vmul.f32 1.442695, %v827_v57 }
 0x5c9   : > { %4643 = vpow2.f32 %v831_v58 }
 0x5cd   : > { %4542 = vrot.lane.b32.xlu0 %v4541_v59, %s6701_s8 }
 0x5ce   : > { %v675_v60 = vpop.xlane.xlu1 %674 }
 0x5cf   : > { %v5288_v61 = vpop.eup %4643  ;;  %v681_v62 = vsub.f32 %v665_v37, %v675_v60 }
 0x5d0   : > { %v839_v63 = vsel %vm621_vm13, %v5288_v61, 0.0 }
 0x5d1   : > { %v687_v0 = vmul.f32 1.442695, %v681_v62  ;;  %840 = vadd.xlane.f32.xlu2 %v839_v63 }
 0x5d3   : > { %4645 = vpow2.f32 %v687_v0 }
 0x5d6   : > { %v678_v2 = vpop.xlane.xlu0 %677  ;;  %v820_v10 = vpop.xlane.xlu1 %819 }
 0x5d7   : > { %v682_v3 = vsub.f32 %v666_v44, %v678_v2  ;;  %v828_v12 = vsub.f32 %v812_v42, %v820_v10 }
 0x5d9   : > { %v4646_v5 = vpop.eup %4645  ;;  %v689_v6 = vmul.f32 1.442695, %v682_v3  ;;  %v833_v13 = vmul.f32 1.442695, %v828_v12 }
 0x5da   : > { %v697_v8 = vsel %vm621_vm13, %v4646_v5, 0.0 }
 0x5db   : > { %698 = vadd.xlane.f32.xlu1 %v697_v8  ;;  %4647 = vpow2.f32 %v689_v6 }
 0x5dc   : > { %4649 = vpow2.f32 %v833_v13 }
 0x5e1   : > { %v4648_v7 = vpop.eup %4647 }
 0x5e2   : > { %v700_v49 = vsel %vm621_vm13, %v4648_v7, 0.0  ;;  %v5296_v16 = vpop.eup %4649 }
 0x5e3   : > { %668 = vmax.xlane.f32.xlu1 %v667_v11  ;;  %701 = vadd.xlane.f32.xlu2 %v700_v49  ;;  %v842_v17 = vsel %vm621_vm13, %v5296_v16, 0.0 }
 0x5eb   : > { %671 = vmax.xlane.f32.xlu1 %v670_v14 }
 0x5f7   : > { %843 = vadd.xlane.f32.xlu0 %v842_v17  ;;  %v445_v17 = vld [vmem:[%s6695_s2 + $0x70] sm:$0xff] }
 0x5fb   : > { %4547 = vrot.lane.b32.xlu2 %v4541_v59, %s6703_s9 }
 0x62c   : > { %v823_v18 = vpop.xlane.xlu0 %822 }
 0x62d   : > { %v829_v19 = vsub.f32 %v813_v50, %v823_v18  ;;  %v444_v18 = vld [vmem:[%s6695_s2 + $0x68] sm:$0xff] }
 0x62f   : > { %v835_v20 = vmul.f32 1.442695, %v829_v19 }
 0x631   : > { %4651 = vpow2.f32 %v835_v20  ;;  %v443_v20 = vld [vmem:[%s6695_s2 + $0x60] sm:$0xff] }
 0x634   : > { %v826_v21 = vpop.xlane.xlu2 %825 }
 0x635   : > { %v830_v22 = vsub.f32 %v814_v53, %v826_v21  ;;  %v442_v21 = vld [vmem:[%s6695_s2 + $0x58] sm:$0xff] }
 0x637   : > { %v4652_v23 = vpop.eup %4651  ;;  %v837_v24 = vmul.f32 1.442695, %v830_v22 }
 0x638   : > { %v845_v25 = vsel %vm621_vm13, %v4652_v23, 0.0 }
 0x639   : > { %4653 = vpow2.f32 %v837_v24  ;;  %846 = vadd.xlane.f32.xlu1 %v845_v25 }
 0x63f   : > { %v4654_v26 = vpop.eup %4653  ;;  %v4543_v27 = vpop.permute.xlu0 %4542 }
 0x640   : > { %v848_v30 = vsel %vm621_vm13, %v4654_v26, 0.0  ;;  %v4544_v31 = vunpack.i.l.bf16 %v4543_v27  ;;  %v4545_v32 = vunpack.i.h.bf16 %v4543_v27 }
 0x641   : > { %849 = vadd.xlane.f32.xlu1 %v848_v30 }
 0x642   : > { %743 = vmatpush.msrb.mxu1 %v4544_v31  ;;  %4486 = vmatpush.msra.mxu3 %v4544_v31 }
 0x644   : > { %744 = vmatpush.msrb.mxu1 %v4545_v32  ;;  %4487 = vmatpush.msra.mxu3 %v4545_v32  ;;  %v841_v35 = vpop.xlane.xlu2 %840 }
 0x646   : > { %954 = vmatpush.msra.mxu1 %v445_v17 }
 0x648   : > { %955 = vmatpush.msra.mxu1 %v444_v18 }
 0x64a   : > { %956 = vmatpush.msra.mxu1 %v443_v20 }
 0x64c   : > { %957 = vmatpush.msra.mxu1 %v442_v21 }
 0x64e   : > { %v699_v33 = vpop.xlane.xlu1 %698 }
 0x64f   : > { %4655 = vrcp.f32 %v699_v33 }
 0x655   : > { %v4656_v36 = vpop.eup %4655 }
 0x656   : > { %v669_v37 = vpop.xlane.xlu1 %668  ;;  %v709_v38 = vmul.f32 %v4656_v36, %v4646_v5  ;;  %v702_v42 = vpop.xlane.xlu2 %701 }
 0x657   : > { %v679_v40 = vsub.f32 %v663_v9, %v669_v37  ;;  %4657 = vrcp.f32 %v702_v42 }
 0x658   : > { %4329 = vmatmul.msk.f32.vlgmr.msra.gmra.mxu3 %vm621_vm13, %v709_v38 }
 0x659   : > { %v683_v43 = vmul.f32 1.442695, %v679_v40 }
 0x65b   : > { %4659 = vpow2.f32 %v683_v43 }
 0x65c   : > { %4661 = vrcp.f32 %v841_v35 }
 0x65d   : > { %v4658_v44 = vpop.eup %4657 }
 0x65e   : > { %v672_v45 = vpop.xlane.xlu1 %671  ;;  %v4548_v48 = vpop.permute.xlu2 %4547  ;;  %v710_v50 = vmul.f32 %v4658_v44, %v4648_v7  ;;  %v928_v44 = vmul.f32 0.0, %v5140_v15 }
 0x65f   : > { %v680_v47 = vsub.f32 %v664_v1, %v672_v45  ;;  %v4549_v51 = vunpack.i.l.bf16 %v4548_v48  ;;  %v4550_v56 = vunpack.i.h.bf16 %v4548_v48 }
 0x660   : > { %4330 = vmatmul.msk.f32.gmra.mxu3 %vm621_vm13, %v710_v50  ;;  %v929_v50 = vmul.f32 0.0, %v5163_v46 }
 0x661   : > { %v4660_v52 = vpop.eup %4659  ;;  %v685_v53 = vmul.f32 1.442695, %v680_v47  ;;  %891 = vmatpush.msrb.mxu3 %v4549_v51 }
 0x662   : > { %v691_v54 = vsel %vm621_vm13, %v4660_v52, 0.0  ;;  %v4662_v57 = vpop.eup %4661 }
 0x663   : > { %4663 = vpow2.f32 %v685_v53  ;;  %692 = vadd.xlane.f32.xlu1 %v691_v54  ;;  %892 = vmatpush.msrb.mxu3 %v4550_v56  ;;  %v855_v58 = vmul.f32 %v4662_v57, %v5288_v61 }
 0x668   : > { %4337 = vmatmul.msk.f32.vlgmr.msrb.gmra.mxu3 %vm621_vm13, %v855_v58 }
 0x669   : > { %v4664_v59 = vpop.eup %4663 }
 0x66a   : > { %v844_v60 = vpop.xlane.xlu0 %843  ;;  %v694_v62 = vsel %vm621_vm13, %v4664_v59, 0.0 }
 0x66b   : > { %4665 = vrcp.f32 %v844_v60  ;;  %695 = vadd.xlane.f32.xlu2 %v694_v62 }
 0x671   : > { %v4666_v63 = vpop.eup %4665 }
 0x672   : > { %v856_v0 = vmul.f32 %v4666_v63, %v5296_v16 }
 0x674   : > { %4338 = vmatmul.msk.f32.gmra.mxu3 %vm621_vm13, %v856_v0 }
 0x6ac   : > { %v847_v2 = vpop.xlane.xlu1 %846 }
 0x6ad   : > { %4667 = vrcp.f32 %v847_v2 }
 0x6b3   : > { %v4668_v3 = vpop.eup %4667 }
 0x6b4   : > { %v850_v5 = vpop.xlane.xlu1 %849  ;;  %v857_v6 = vmul.f32 %v4668_v3, %v4652_v23 }
 0x6b5   : > { %4669 = vrcp.f32 %v850_v5 }
 0x6b6   : > { %4339 = vmatmul.msk.f32.gmra.mxu3 %vm621_vm13, %v857_v6 }
 0x6bb   : > { %v4670_v61 = vpop.eup %4669 }
 0x6bc   : > { %v858_v8 = vmul.f32 %v4670_v61, %v4654_v26 }
 0x6be   : > { %4340 = vmatmul.msk.f32.gmra.mxu3 %vm621_vm13, %v858_v8 }
 0x6d6   : > { %v693_v9 = vpop.xlane.xlu1 %692 }
 0x6d7   : > { %4671 = vrcp.f32 %v693_v9 }
 0x6db   : > { %v752_v7 = vpop.f32.mrf.mxu3 }
 0x6dd   : > { %v4672_v10 = vpop.eup %4671 }
 0x6de   : > { %v696_v11 = vpop.xlane.xlu2 %695  ;;  %v707_v49 = vmul.f32 %v4672_v10, %v4660_v52 }
 0x6df   : > { %4673 = vrcp.f32 %v696_v11  ;;  %v464_v11 = vld [vmem:[%s6696_s3 + $0x18] sm:$0xff] }
 0x6e0   : > { %4327 = vmatmul.msk.f32.vlgmr.msrb.gmra.mxu1 %vm621_vm13, %v707_v49  ;;  %1094 = vmatpush.msra.mxu2 %v464_v11  ;;  %v463_v49 = vld [vmem:[%s6696_s3 + $0x10] sm:$0xff] }
 0x6e2   : > { %1095 = vmatpush.msra.mxu2 %v463_v49 }
 0x6e3   : > { %v755_v12 = vpop.f32.mrf.mxu3 }
 0x6e5   : > { %v4674_v1 = vpop.eup %4673 }
 0x6e6   : > { %v708_v13 = vmul.f32 %v4674_v1, %v4664_v59  ;;  %v461_v1 = vld [vmem:[%s6696_s3] sm:$0xff] }
 0x6e8   : > { %4328 = vmatmul.msk.f32.gmra.mxu1 %vm621_vm13, %v708_v13 }
 0x6eb   : > { %v894_v14 = vpop.f32.mrf.mxu3 }
 0x6ec   : > { %910 = vrot.lane.b32.xlu1 %v894_v14, %s6699_s10 }
 0x6f7   : > { %v897_v16 = vpop.f32.mrf.mxu3 }
 0x6f8   : > { %912 = vrot.lane.b32.xlu0 %v897_v16, %s6699_s10 }
 0x739   : > { %v900_v19 = vpop.f32.mrf.mxu3 }
 0x73a   : > { %914 = vrot.lane.b32.xlu1 %v900_v19, %s6699_s10 }
 0x741   : > { %v903_v22 = vpop.f32.mrf.mxu3 }
 0x742   : > { %916 = vrot.lane.b32.xlu1 %v903_v22, %s6699_s10 }
 0x75d   : > { %v746_v23 = vpop.f32.mrf.mxu1 }
 0x75e   : > { %v911_v24 = vpop.permute.xlu1 %910 }
 0x75f   : > { %v922_v25 = vsel %vm621_vm13, %v746_v23, %v911_v24 }
 0x760   : > { %4341 = vmatmul.msk.f32.vlgmr.msra.gmra.mxu1 %vm374_vm8, %v922_v25 }
 0x765   : > { %v749_v26 = vpop.f32.mrf.mxu1 }
 0x76a   : > { %v913_v27 = vpop.permute.xlu0 %912 }
 0x76b   : > { %v923_v30 = vsel %vm621_vm13, %v749_v26, %v913_v27  ;;  %v4590_v26 = vld [vmem:[%s6695_s2 + $0xba] ss:$0 sm:$0xff] }
 0x76c   : > { %4342 = vmatmul.msk.f32.gmra.mxu1 %vm374_vm8, %v923_v30 }
 0x7ac   : > { %v915_v31 = vpop.permute.xlu1 %914 }
 0x7ad   : > { %v924_v32 = vsel %vm621_vm13, %v752_v7, %v915_v31 }
 0x7ae   : > { %4343 = vmatmul.msk.f32.gmra.mxu1 %vm374_vm8, %v924_v32 }
 0x7b4   : > { %v917_v33 = vpop.permute.xlu1 %916 }
 0x7b5   : > { %v925_v35 = vsel %vm621_vm13, %v755_v12, %v917_v33  ;;  %v462_v12 = vld [vmem:[%s6696_s3 + $0x8] sm:$0xff]  ;;  %v4591_v33 = vld [vmem:[%s6695_s2 + $0xbb] ss:$0 sm:$0xff] }
 0x7b6   : > { %4344 = vmatmul.msk.f32.gmra.mxu1 %vm374_vm8, %v925_v35  ;;  %1096 = vmatpush.msra.mxu2 %v462_v12 }
 0x7b8   : > { %1097 = vmatpush.msra.mxu2 %v461_v1 }
 0x7dd   : > { %v959_v36 = vpop.f32.mrf.mxu1 }
 0x7de   : > { %v5340_v37 = vadd.f32 %v959_v36, %v5155_v39 }
 0x7e0   : > { %v971_v38 = vsel %vm374_vm8, %v5340_v37, 0.0 }
 0x7e1   : > { %972 = vadd.xlane.f32.xlu0 %v971_v38 }
 0x7e9   : > { %v962_v40 = vpop.f32.mrf.mxu1 }
 0x7ea   : > { %v5345_v42 = vadd.f32 %v962_v40, %v5175_v55 }
 0x7ec   : > { %v974_v43 = vsel %vm374_vm8, %v5345_v42, 0.0 }
 0x7ed   : > { %975 = vadd.xlane.f32.xlu2 %v974_v43 }
 0x82b   : > { %v965_v45 = vpop.f32.mrf.mxu1 }
 0x82c   : > { %v5350_v47 = vadd.f32 %v965_v45, %v928_v44 }
 0x82e   : > { %v977_v48 = vsel %vm374_vm8, %v5350_v47, 0.0 }
 0x82f   : > { %978 = vadd.xlane.f32.xlu1 %v977_v48 }
 0x833   : > { %v968_v51 = vpop.f32.mrf.mxu1 }
 0x834   : > { %v5355_v52 = vadd.f32 %v968_v51, %v929_v50 }
 0x836   : > { %v980_v53 = vsel %vm374_vm8, %v5355_v52, 0.0 }
 0x837   : > { %981 = vadd.xlane.f32.xlu2 %v980_v53 }
 0x854   : > { %v973_v54 = vpop.xlane.xlu0 %972 }
 0x855   : > { %v983_v56 = vmul.f32 %v973_v54, %v5131_v4 }
 0x857   : > { %v987_v15 = vsub.f32 %v5340_v37, %v983_v56 }
 0x859   : > { %v991_v57 = vmul.f32 %v987_v15, %v987_v15 }
 0x85b   : > { %v995_v58 = vsel %vm374_vm8, %v991_v57, 0.0 }
 0x85c   : > { %996 = vadd.xlane.f32.xlu2 %v995_v58 }
 0x860   : > { %v976_v59 = vpop.xlane.xlu2 %975 }
 0x861   : > { %v984_v60 = vmul.f32 %v976_v59, %v5131_v4 }
 0x863   : > { %v988_v46 = vsub.f32 %v5345_v42, %v984_v60 }
 0x865   : > { %v992_v62 = vmul.f32 %v988_v46, %v988_v46 }
 0x867   : > { %v998_v63 = vsel %vm374_vm8, %v992_v62, 0.0 }
 0x868   : > { %999 = vadd.xlane.f32.xlu2 %v998_v63 }
 0x8a2   : > { %v979_v0 = vpop.xlane.xlu1 %978 }
 0x8a3   : > { %v985_v2 = vmul.f32 %v979_v0, %v5131_v4 }
 0x8a5   : > { %v5367_v3 = vsub.f32 %v5350_v47, %v985_v2 }
 0x8a7   : > { %v993_v5 = vmul.f32 %v5367_v3, %v5367_v3 }
 0x8a9   : > { %v1001_v6 = vsel %vm374_vm8, %v993_v5, 0.0 }
 0x8aa   : > { %1002 = vadd.xlane.f32.xlu2 %v1001_v6  ;;  %v982_v61 = vpop.xlane.xlu2 %981 }
 0x8ab   : > { %v986_v8 = vmul.f32 %v982_v61, %v5131_v4 }
 0x8ad   : > { %v5374_v9 = vsub.f32 %v5355_v52, %v986_v8 }
 0x8af   : > { %v994_v7 = vmul.f32 %v5374_v9, %v5374_v9 }
 0x8b1   : > { %v1004_v10 = vsel %vm374_vm8, %v994_v7, 0.0 }
 0x8b2   : > { %1005 = vadd.xlane.f32.xlu0 %v1004_v10 }
 0x8cf   : > { %v997_v13 = vpop.xlane.xlu2 %996 }
 0x8d0   : > { %v1007_v14 = vmul.f32 %v997_v13, %v5131_v4 }
 0x8d2   : > { %v1011_v16 = vadd.f32 1e-05, %v1007_v14 }
 0x8d4   : > { %4675 = vrsqrt.f32 %v1011_v16  ;;  %vm1021_vm1 = vweird.f32 %v1011_v16 }
 0x8da   : > { %v4676_v17 = vpop.eup %4675 }
 0x8db   : > { %v1000_v18 = vpop.xlane.xlu2 %999  ;;  %v1016_v19 = vmul.f32 %v4676_v17, %v1011_v16  ;;  %vm1022_vm0 = vweird.f32 %v4676_v17 }
 0x8dc   : > { %v1008_v20 = vmul.f32 %v1000_v18, %v5131_v4  ;;  %vm1023_vm2 = vmor %vm1021_vm1, %vm1022_vm0  ;;  %v451_v18 = vld [vmem:[%s6695_s2 + $0xa0] sm:$0xff] }
 0x8dd   : > { %v1017_v21 = vmul.f32 %v4676_v17, %v1016_v19  ;;  %v449_v19 = vld [vmem:[%s6695_s2 + $0x90] sm:$0xff] }
 0x8de   : > { %v1012_v22 = vadd.f32 1e-05, %v1008_v20  ;;  %v448_v20 = vld [vmem:[%s6695_s2 + $0x88] sm:$0xff] }
 0x8df   : > { %v1018_v23 = vmul.f32 0.5, %v1017_v21  ;;  %v447_v21 = vld [vmem:[%s6695_s2 + $0x80] sm:$0xff] }
 0x8e0   : > { %4677 = vrsqrt.f32 %v1012_v22  ;;  %vm1031_vm4 = vweird.f32 %v1012_v22 }
 0x8e1   : > { %v1019_v24 = vsub.f32 1.5, %v1018_v23  ;;  %v4592_v23 = vld [vmem:[%s6696_s3 + $0x20] ss:$0 sm:$0xff] }
 0x8e3   : > { %v1020_v25 = vmul.f32 %v4676_v17, %v1019_v24 }
 0x8e5   : > { %v1024_v30 = vsel %vm1023_vm2, %v4676_v17, %v1020_v25  ;;  %v452_v17 = vld [vmem:[%s6695_s2 + $0xa8] sm:$0xff] }
 0x8e6   : > { %v4678_v27 = vpop.eup %4677  ;;  %v1055_v31 = vmul.f32 %v1024_v30, %v987_v15 }
 0x8e7   : > { %v1026_v32 = vmul.f32 %v4678_v27, %v1012_v22  ;;  %vm1032_vm3 = vweird.f32 %v4678_v27  ;;  %v446_v22 = vld [vmem:[%s6695_s2 + $0x78] sm:$0xff] }
 0x8e8   : > { %v1060_v35 = vmul.f32 %v4590_v26, %v1055_v31  ;;  %vm1033_vm5 = vmor %vm1031_vm4, %vm1032_vm3 }
 0x8e9   : > { %v1027_v36 = vmul.f32 %v4678_v27, %v1026_v32 }
 0x8ea   : > { %v1065_v40 = vadd.f32 %v4591_v33, %v1060_v35 }
 0x8eb   : > { %v1028_v38 = vmul.f32 0.5, %v1027_v36 }
 0x8ec   : > { %4345 = vmatmul.msk.f32.vlgmr.msra.gmra.mxu2 %vm374_vm8, %v1065_v40 }
 0x8ed   : > { %v1029_v43 = vsub.f32 1.5, %v1028_v38 }
 0x8ef   : > { %v1030_v44 = vmul.f32 %v4678_v27, %v1029_v43 }
 0x8f1   : > { %v1034_v45 = vsel %vm1033_vm5, %v4678_v27, %v1030_v44 }
 0x8f2   : > { %v1056_v48 = vmul.f32 %v1034_v45, %v988_v46 }
 0x8f4   : > { %v1061_v50 = vmul.f32 %v4590_v26, %v1056_v48 }
 0x8f6   : > { %v1066_v51 = vadd.f32 %v4591_v33, %v1061_v50 }
 0x8f8   : > { %4346 = vmatmul.msk.f32.gmra.mxu2 %vm374_vm8, %v1066_v51 }
 0x91d   : > { %v1003_v53 = vpop.xlane.xlu2 %1002 }
 0x91e   : > { %v1009_v54 = vmul.f32 %v1003_v53, %v5131_v4 }
 0x920   : > { %v1013_v56 = vadd.f32 1e-05, %v1009_v54 }
 0x922   : > { %4679 = vrsqrt.f32 %v1013_v56  ;;  %vm1041_vm7 = vweird.f32 %v1013_v56 }
 0x925   : > { %v1006_v15 = vpop.xlane.xlu0 %1005 }
 0x926   : > { %v1010_v57 = vmul.f32 %v1006_v15, %v5131_v4 }
 0x928   : > { %v4680_v58 = vpop.eup %4679  ;;  %v1014_v59 = vadd.f32 1e-05, %v1010_v57 }
 0x929   : > { %v1036_v60 = vmul.f32 %v4680_v58, %v1013_v56  ;;  %vm1042_vm6 = vweird.f32 %v4680_v58 }
 0x92a   : > { %4681 = vrsqrt.f32 %v1014_v59  ;;  %vm1043_vm9 = vmor %vm1041_vm7, %vm1042_vm6  ;;  %vm1051_vm11 = vweird.f32 %v1014_v59 }
 0x92b   : > { %v1037_v62 = vmul.f32 %v4680_v58, %v1036_v60 }
 0x92d   : > { %v1038_v63 = vmul.f32 0.5, %v1037_v62 }
 0x92f   : > { %v1039_v0 = vsub.f32 1.5, %v1038_v63 }
 0x930   : > { %v4682_v46 = vpop.eup %4681 }
 0x931   : > { %v1040_v2 = vmul.f32 %v4680_v58, %v1039_v0  ;;  %v1046_v5 = vmul.f32 %v4682_v46, %v1014_v59  ;;  %vm1052_vm10 = vweird.f32 %v4682_v46 }
 0x932   : > { %vm1053_vm12 = vmor %vm1051_vm11, %vm1052_vm10 }
 0x933   : > { %v1047_v6 = vmul.f32 %v4682_v46, %v1046_v5  ;;  %v1044_v61 = vsel %vm1043_vm9, %v4680_v58, %v1040_v2 }
 0x934   : > { %v1057_v8 = vmul.f32 %v1044_v61, %v5367_v3  ;;  %v453_v3 = vld [vmem:[%s6695_s2 + $0xb0] sm:$0xff] }
 0x935   : > { %v1048_v7 = vmul.f32 0.5, %v1047_v6  ;;  %1169 = vmatpush.msra.mxu0 %v453_v3  ;;  %v4593_v3 = vld [vmem:[%s6695_s2 + $0xbc] ss:$0 sm:$0xff] }
 0x936   : > { %v1062_v10 = vmul.f32 %v4590_v26, %v1057_v8 }
 0x937   : > { %v1049_v11 = vsub.f32 1.5, %v1048_v7  ;;  %1170 = vmatpush.msra.mxu0 %v452_v17 }
 0x938   : > { %v1067_v49 = vadd.f32 %v4591_v33, %v1062_v10 }
 0x939   : > { %v1050_v12 = vmul.f32 %v4682_v46, %v1049_v11  ;;  %1171 = vmatpush.msra.mxu0 %v451_v18 }
 0x93a   : > { %4347 = vmatmul.msk.f32.gmra.mxu2 %vm374_vm8, %v1067_v49 }
 0x93b   : > { %v1054_v1 = vsel %vm1053_vm12, %v4682_v46, %v1050_v12 }
 0x93c   : > { %v1058_v13 = vmul.f32 %v1054_v1, %v5374_v9  ;;  %v450_v9 = vld [vmem:[%s6695_s2 + $0x98] sm:$0xff] }
 0x93d   : > { %1172 = vmatpush.msra.mxu0 %v450_v9 }
 0x93e   : > { %v1063_v14 = vmul.f32 %v4590_v26, %v1058_v13 }
 0x93f   : > { %1173 = vmatpush.msra.mxu0 %v449_v19  ;;  %v5445_v19 = vmul.f32 0.0, %v5155_v39 }
 0x940   : > { %v1068_v16 = vadd.f32 %v4591_v33, %v1063_v14 }
 0x941   : > { %1174 = vmatpush.msra.mxu0 %v448_v20 }
 0x942   : > { %4348 = vmatmul.msk.f32.gmra.mxu2 %vm374_vm8, %v1068_v16 }
 0x943   : > { %1175 = vmatpush.msra.mxu0 %v447_v21 }
 0x945   : > { %1176 = vmatpush.msra.mxu0 %v446_v22 }
 0x96f   : > { %v1099_v24 = vpop.f32.mrf.mxu2 }
 0x970   : > { %v1100_v25 = vadd.f32 %v4592_v23, %v1099_v24 }
 0x972   : > { %v1115_v26 = vmul.f32 0.044715, %v1100_v25  ;;  %v1111_v44 = vmul.f32 0.5, %v1100_v25 }
 0x974   : > { %v1119_v27 = vmul.f32 %v1115_v26, %v1100_v25 }
 0x976   : > { %v1123_v30 = vmul.f32 %v1119_v27, %v1100_v25 }
 0x978   : > { %v1127_v31 = vadd.f32 %v1123_v30, %v1100_v25  ;;  %v5457_v25 = vmul.f32 0.0, %v5175_v55  ;;  %v4923_v55 = vld [vmem:[%s6695_s2 + $0x18] sm:$0xff] }
 0x97a   : > { %v1131_v32 = vmul.f32 0.7978846, %v1127_v31 }
 0x97b   : > { %v1102_v33 = vpop.f32.mrf.mxu2 }
 0x97c   : > { %v1103_v35 = vadd.f32 %v4592_v23, %v1102_v33  ;;  %4683 = vtanh.f32 %v1131_v32 }
 0x97e   : > { %v1116_v36 = vmul.f32 0.044715, %v1103_v35  ;;  %v1112_v54 = vmul.f32 0.5, %v1103_v35 }
 0x980   : > { %v1120_v38 = vmul.f32 %v1116_v36, %v1103_v35 }
 0x982   : > { %v1124_v40 = vmul.f32 %v1120_v38, %v1103_v35  ;;  %v4684_v43 = vpop.eup %4683  ;;  %v4924_v38 = vld [vmem:[%s6695_s2 + $0x20] sm:$0xff] }
 0x983   : > { %v1139_v45 = vadd.f32 1.0, %v4684_v43 }
 0x984   : > { %v1128_v48 = vadd.f32 %v1124_v40, %v1103_v35 }
 0x985   : > { %v1143_v50 = vmul.f32 %v1139_v45, %v1111_v44 }
 0x986   : > { %v1132_v51 = vmul.f32 0.7978846, %v1128_v48 }
 0x987   : > { %4349 = vmatmul.msk.f32.vlgmr.msra.gmra.mxu0 %vm1148_vm15, %v1143_v50 }
 0x988   : > { %4685 = vtanh.f32 %v1132_v51 }
 0x98e   : > { %v4686_v53 = vpop.eup %4685 }
 0x98f   : > { %v1140_v56 = vadd.f32 1.0, %v4686_v53 }
 0x991   : > { %v1144_v15 = vmul.f32 %v1140_v56, %v1112_v54 }
 0x993   : > { %4350 = vmatmul.msk.f32.gmra.mxu0 %vm1148_vm15, %v1144_v15 }
 0x9bd   : > { %v1105_v57 = vpop.f32.mrf.mxu2 }
 0x9be   : > { %v1106_v58 = vadd.f32 %v4592_v23, %v1105_v57 }
 0x9c0   : > { %v1117_v59 = vmul.f32 0.044715, %v1106_v58  ;;  %v1113_v11 = vmul.f32 0.5, %v1106_v58 }
 0x9c2   : > { %v1121_v60 = vmul.f32 %v1117_v59, %v1106_v58 }
 0x9c4   : > { %v1125_v62 = vmul.f32 %v1121_v60, %v1106_v58 }
 0x9c5   : > { %v1108_v63 = vpop.f32.mrf.mxu2 }
 0x9c6   : > { %v1109_v0 = vadd.f32 %v4592_v23, %v1108_v63  ;;  %v1129_v46 = vadd.f32 %v1125_v62, %v1106_v58 }
 0x9c8   : > { %v1118_v2 = vmul.f32 0.044715, %v1109_v0  ;;  %v1133_v5 = vmul.f32 0.7978846, %v1129_v46  ;;  %v1114_v13 = vmul.f32 0.5, %v1109_v0 }
 0x9ca   : > { %4687 = vtanh.f32 %v1133_v5  ;;  %v1122_v6 = vmul.f32 %v1118_v2, %v1109_v0 }
 0x9cc   : > { %v1126_v61 = vmul.f32 %v1122_v6, %v1109_v0 }
 0x9ce   : > { %v1130_v8 = vadd.f32 %v1126_v61, %v1109_v0 }
 0x9d0   : > { %v4688_v7 = vpop.eup %4687  ;;  %v1134_v10 = vmul.f32 0.7978846, %v1130_v8 }
 0x9d1   : > { %v1141_v49 = vadd.f32 1.0, %v4688_v7 }
 0x9d2   : > { %4689 = vtanh.f32 %v1134_v10  ;;  %v1402_v10 = vld [vmem:[%s6697_s4 + $0x38] sm:$0xff] }
 0x9d3   : > { %v1145_v12 = vmul.f32 %v1141_v49, %v1113_v11  ;;  %1525 = vmatpush.msra.mxu3 %v1402_v10  ;;  %v1401_v11 = vld [vmem:[%s6697_s4 + $0x30] sm:$0xff]  ;;  %v1400_v49 = vld [vmem:[%s6697_s4 + $0x28] sm:$0xff] }
 0x9d5   : > { %4351 = vmatmul.msk.f32.gmra.mxu0 %vm1148_vm15, %v1145_v12  ;;  %1526 = vmatpush.msra.mxu3 %v1401_v11  ;;  %v1399_v12 = vld [vmem:[%s6697_s4 + $0x20] sm:$0xff] }
 0x9d7   : > { %1527 = vmatpush.msra.mxu3 %v1400_v49 }
 0x9d8   : > { %v4690_v1 = vpop.eup %4689 }
 0x9d9   : > { %v1142_v14 = vadd.f32 1.0, %v4690_v1  ;;  %1528 = vmatpush.msra.mxu3 %v1399_v12 }
 0x9db   : > { %v1146_v16 = vmul.f32 %v1142_v14, %v1114_v13 }
 0x9dd   : > { %4352 = vmatmul.msk.f32.gmra.mxu0 %vm1148_vm15, %v1146_v16 }
 0xa04   : > { %v1178_v17 = vpop.f32.mrf.mxu0 }
 0xa05   : > { %v1179_v18 = vadd.f32 %v4593_v3, %v1178_v17 }
 0xa07   : > { %v5442_v9 = vadd.f32 %v1179_v18, %v5340_v37 }
 0xa09   : > { %v5449_v20 = vadd.f32 %v5442_v9, %v5445_v19  ;;  %v1194_v57 = vsel %vm374_vm8, %v5442_v9, 0.0 }
 0xa0b   : > { %v1403_v21 = vsel %vm374_vm8, %v5449_v20, 0.0 }
 0xa0c   : > { %1404 = vadd.xlane.f32.xlu2 %v1403_v21 }
 0xa10   : > { %v1181_v22 = vpop.f32.mrf.mxu0 }
 0xa11   : > { %v1182_v23 = vadd.f32 %v4593_v3, %v1181_v22 }
 0xa13   : > { %v5454_v24 = vadd.f32 %v1182_v23, %v5345_v42 }
 0xa15   : > { %v5461_v39 = vadd.f32 %v5454_v24, %v5457_v25  ;;  %v1197_v61 = vsel %vm374_vm8, %v5454_v24, 0.0 }
 0xa17   : > { %v1406_v37 = vsel %vm374_vm8, %v5461_v39, 0.0 }
 0xa18   : > { %1407 = vadd.xlane.f32.xlu1 %v1406_v37 }
 0xa52   : > { %v1184_v26 = vpop.f32.mrf.mxu0 }
 0xa53   : > { %v1185_v27 = vadd.f32 %v4593_v3, %v1184_v26 }
 0xa55   : > { %v5466_v30 = vadd.f32 %v1185_v27, %v5350_v47 }
 0xa57   : > { %v1369_v31 = vmul.f32 0.0, %v5466_v30  ;;  %v1200_v7 = vsel %vm374_vm8, %v5466_v30, 0.0 }
 0xa59   : > { %v5472_v42 = vadd.f32 %v4923_v55, %v1369_v31  ;;  %v5537_v55 = vld [vmem:[%s6695_s2 + $0x120] ss:$0 sm:$0xff] }
 0xa5a   : > { %v1187_v32 = vpop.f32.mrf.mxu0 }
 0xa5b   : > { %v1188_v33 = vadd.f32 %v4593_v3, %v1187_v32  ;;  %v1409_v35 = vsel %vm374_vm8, %v5472_v42, 0.0 }
 0xa5c   : > { %1410 = vadd.xlane.f32.xlu0 %v1409_v35 }
 0xa5d   : > { %v5477_v36 = vadd.f32 %v1188_v33, %v5355_v52 }
 0xa5f   : > { %v1370_v47 = vmul.f32 0.0, %v5477_v36  ;;  %v1203_v58 = vsel %vm374_vm8, %v5477_v36, 0.0 }
 0xa61   : > { %v5483_v40 = vadd.f32 %v4924_v38, %v1370_v47 }
 0xa63   : > { %v1412_v43 = vsel %vm374_vm8, %v5483_v40, 0.0 }
 0xa64   : > { %1413 = vadd.xlane.f32.xlu2 %v1412_v43  ;;  %v5545_v43 = vld [vmem:[%s6695_s2 + $0x121] ss:$0 sm:$0xff] }
 0xa7f   : > { %v1405_v44 = vpop.xlane.xlu2 %1404 }
 0xa80   : > { %v1415_v45 = vmul.f32 %v1405_v44, %v5131_v4 }
 0xa82   : > { %v1419_v48 = vsub.f32 %v5449_v20, %v1415_v45 }
 0xa84   : > { %v1423_v50 = vmul.f32 %v1419_v48, %v1419_v48 }
 0xa86   : > { %v1427_v52 = vsel %vm374_vm8, %v1423_v50, 0.0 }
 0xa87   : > { %1428 = vadd.xlane.f32.xlu1 %v1427_v52 }
 0xa8b   : > { %v1408_v51 = vpop.xlane.xlu1 %1407 }
 0xa8c   : > { %v1416_v53 = vmul.f32 %v1408_v51, %v5131_v4 }
 0xa8e   : > { %v5492_v54 = vsub.f32 %v5461_v39, %v1416_v53 }
 0xa90   : > { %v1424_v56 = vmul.f32 %v5492_v54, %v5492_v54 }
 0xa92   : > { %v1430_v15 = vsel %vm374_vm8, %v1424_v56, 0.0 }
 0xa93   : > { %1431 = vadd.xlane.f32.xlu0 %v1430_v15 }
 0xa9b   : > { %1195 = vadd.xlane.f32.xlu0 %v1194_v57 }
 0xaa3   : > { %1204 = vadd.xlane.f32.xlu0 %v1203_v58 }
 0xacf   : > { %v1411_v59 = vpop.xlane.xlu0 %1410 }
 0xad0   : > { %v1417_v60 = vmul.f32 %v1411_v59, %v5131_v4 }
 0xad2   : > { %v5503_v62 = vsub.f32 %v5472_v42, %v1417_v60 }
 0xad4   : > { %v1425_v63 = vmul.f32 %v5503_v62, %v5503_v62 }
 0xad6   : > { %v1433_v0 = vsel %vm374_vm8, %v1425_v63, 0.0 }
 0xad7   : > { %1434 = vadd.xlane.f32.xlu2 %v1433_v0  ;;  %v1414_v46 = vpop.xlane.xlu2 %1413 }
 0xad8   : > { %v1418_v2 = vmul.f32 %v1414_v46, %v5131_v4 }
 0xada   : > { %v5510_v5 = vsub.f32 %v5483_v40, %v1418_v2 }
 0xadc   : > { %v1426_v6 = vmul.f32 %v5510_v5, %v5510_v5 }
 0xade   : > { %v1436_v8 = vsel %vm374_vm8, %v1426_v6, 0.0 }
 0xadf   : > { %1198 = vadd.xlane.f32.xlu2 %v1197_v61  ;;  %1437 = vadd.xlane.f32.xlu1 %v1436_v8 }
 0xae7   : > { %1201 = vadd.xlane.f32.xlu1 %v1200_v7 }
 0xafa   : > { %v1429_v1 = vpop.xlane.xlu1 %1428 }
 0xafb   : > { %v1439_v13 = vmul.f32 %v1429_v1, %v5131_v4 }
 0xafd   : > { %v1443_v14 = vadd.f32 1e-05, %v1439_v13 }
 0xaff   : > { %4691 = vrsqrt.f32 %v1443_v14  ;;  %vm1453_vm1 = vweird.f32 %v1443_v14 }
 0xb05   : > { %v4692_v16 = vpop.eup %4691 }
 0xb06   : > { %v1432_v3 = vpop.xlane.xlu0 %1431  ;;  %v1448_v17 = vmul.f32 %v4692_v16, %v1443_v14  ;;  %vm1454_vm0 = vweird.f32 %v4692_v16 }
 0xb07   : > { %v1440_v18 = vmul.f32 %v1432_v3, %v5131_v4  ;;  %vm1455_vm2 = vmor %vm1453_vm1, %vm1454_vm0 }
 0xb08   : > { %v1449_v21 = vmul.f32 %v4692_v16, %v1448_v17 }
 0xb09   : > { %v1444_v22 = vadd.f32 1e-05, %v1440_v18 }
 0xb0a   : > { %v1450_v23 = vmul.f32 0.5, %v1449_v21 }
 0xb0b   : > { %4693 = vrsqrt.f32 %v1444_v22  ;;  %vm1463_vm4 = vweird.f32 %v1444_v22 }
 0xb0c   : > { %v1451_v37 = vsub.f32 1.5, %v1450_v23 }
 0xb0e   : > { %v1196_v26 = vpop.xlane.xlu0 %1195  ;;  %v1452_v27 = vmul.f32 %v4692_v16, %v1451_v37 }
 0xb0f   : > { %v1206_v31 = vmul.f32 %v1196_v26, %v5131_v4 }
 0xb10   : > { %v1456_v33 = vsel %vm1455_vm2, %v4692_v16, %v1452_v27 }
 0xb11   : > { %v4694_v32 = vpop.eup %4693  ;;  %v5540_v35 = vsub.f32 %v5442_v9, %v1206_v31  ;;  %v1487_v47 = vmul.f32 %v1456_v33, %v1419_v48 }
 0xb12   : > { %v1458_v38 = vmul.f32 %v4694_v32, %v1444_v22  ;;  %vm1464_vm3 = vweird.f32 %v4694_v32 }
 0xb13   : > { %v1214_v44 = vmul.f32 %v5540_v35, %v5540_v35  ;;  %v1492_v45 = vmul.f32 %v5537_v55, %v1487_v47  ;;  %vm1465_vm5 = vmor %vm1463_vm4, %vm1464_vm3 }
 0xb14   : > { %v1459_v50 = vmul.f32 %v4694_v32, %v1458_v38 }
 0xb15   : > { %v1218_v52 = vsel %vm374_vm8, %v1214_v44, 0.0  ;;  %v1497_v9 = vadd.f32 %v5545_v43, %v1492_v45 }
 0xb16   : > { %v1460_v51 = vmul.f32 0.5, %v1459_v50  ;;  %1219 = vadd.xlane.f32.xlu2 %v1218_v52  ;;  %v1205_v53 = vpop.xlane.xlu0 %1204 }
 0xb17   : > { %v1209_v48 = vmul.f32 %v1205_v53, %v5131_v4  ;;  %4355 = vmatmul.msk.f32.vlgmr.msra.gmra.mxu3 %vm374_vm8, %v1497_v9 }
 0xb18   : > { %v1461_v56 = vsub.f32 1.5, %v1460_v51 }
 0xb19   : > { %v5555_v15 = vsub.f32 %v5477_v36, %v1209_v48 }
 0xb1a   : > { %v1462_v57 = vmul.f32 %v4694_v32, %v1461_v56 }
 0xb1b   : > { %v1217_v58 = vmul.f32 %v5555_v15, %v5555_v15 }
 0xb1c   : > { %v1466_v59 = vsel %vm1465_vm5, %v4694_v32, %v1462_v57 }
 0xb1d   : > { %v1227_v60 = vsel %vm374_vm8, %v1217_v58, 0.0  ;;  %v1488_v63 = vmul.f32 %v1466_v59, %v5492_v54 }
 0xb1e   : > { %1228 = vadd.xlane.f32.xlu2 %v1227_v60 }
 0xb1f   : > { %v1493_v0 = vmul.f32 %v5537_v55, %v1488_v63 }
 0xb21   : > { %v1498_v46 = vadd.f32 %v5545_v43, %v1493_v0 }
 0xb23   : > { %4356 = vmatmul.msk.f32.gmra.mxu3 %vm374_vm8, %v1498_v46 }
 0xb4a   : > { %v1435_v36 = vpop.xlane.xlu2 %1434 }
 0xb4b   : > { %v1441_v2 = vmul.f32 %v1435_v36, %v5131_v4 }
 0xb4d   : > { %v1445_v6 = vadd.f32 1e-05, %v1441_v2 }
 0xb4f   : > { %4695 = vrsqrt.f32 %v1445_v6  ;;  %vm1473_vm7 = vweird.f32 %v1445_v6 }
 0xb52   : > { %v1438_v61 = vpop.xlane.xlu1 %1437  ;;  %v1199_v8 = vpop.xlane.xlu2 %1198 }
 0xb53   : > { %v1442_v7 = vmul.f32 %v1438_v61, %v5131_v4  ;;  %v1207_v10 = vmul.f32 %v1199_v8, %v5131_v4 }
 0xb55   : > { %v4696_v11 = vpop.eup %4695  ;;  %v1446_v54 = vadd.f32 1e-05, %v1442_v7  ;;  %v5568_v49 = vsub.f32 %v5454_v24, %v1207_v10 }
 0xb56   : > { %v1468_v12 = vmul.f32 %v4696_v11, %v1445_v6  ;;  %vm1474_vm6 = vweird.f32 %v4696_v11 }
 0xb57   : > { %4697 = vrsqrt.f32 %v1446_v54  ;;  %v1215_v1 = vmul.f32 %v5568_v49, %v5568_v49  ;;  %vm1475_vm9 = vmor %vm1473_vm7, %vm1474_vm6  ;;  %vm1483_vm11 = vweird.f32 %v1446_v54 }
 0xb58   : > { %v1469_v13 = vmul.f32 %v4696_v11, %v1468_v12 }
 0xb59   : > { %v1221_v14 = vsel %vm374_vm8, %v1215_v1, 0.0 }
 0xb5a   : > { %v1470_v16 = vmul.f32 0.5, %v1469_v13  ;;  %v1202_v3 = vpop.xlane.xlu1 %1201  ;;  %1222 = vadd.xlane.f32.xlu1 %v1221_v14 }
 0xb5b   : > { %v1208_v17 = vmul.f32 %v1202_v3, %v5131_v4 }
 0xb5c   : > { %v1471_v18 = vsub.f32 1.5, %v1470_v16  ;;  %v4597_v16 = vld [vmem:[%s6695_s2 + $0x4] ss:$0 sm:$0xff] }
 0xb5d   : > { %v4698_v21 = vpop.eup %4697  ;;  %v5575_v22 = vsub.f32 %v5466_v30, %v1208_v17 }
 0xb5e   : > { %v1472_v24 = vmul.f32 %v4696_v11, %v1471_v18  ;;  %v1478_v23 = vmul.f32 %v4698_v21, %v1446_v54  ;;  %vm1484_vm10 = vweird.f32 %v4698_v21  ;;  %v5604_v54 = vld [vmem:[%s6695_s2 + $0x3] ss:$0 sm:$0xff] }
 0xb5f   : > { %v1216_v37 = vmul.f32 %v5575_v22, %v5575_v22  ;;  %vm1485_vm12 = vmor %vm1483_vm11, %vm1484_vm10 }
 0xb60   : > { %v1479_v26 = vmul.f32 %v4698_v21, %v1478_v23  ;;  %v1476_v27 = vsel %vm1475_vm9, %v4696_v11, %v1472_v24 }
 0xb61   : > { %v1224_v31 = vsel %vm374_vm8, %v1216_v37, 0.0  ;;  %v1489_v32 = vmul.f32 %v1476_v27, %v5503_v62 }
 0xb62   : > { %v1480_v33 = vmul.f32 0.5, %v1479_v26  ;;  %1225 = vadd.xlane.f32.xlu0 %v1224_v31 }
 0xb63   : > { %v1494_v47 = vmul.f32 %v5537_v55, %v1489_v32 }
 0xb64   : > { %v1481_v38 = vsub.f32 1.5, %v1480_v33 }
 0xb65   : > { %v1499_v30 = vadd.f32 %v5545_v43, %v1494_v47 }
 0xb66   : > { %v1482_v44 = vmul.f32 %v4698_v21, %v1481_v38 }
 0xb67   : > { %4357 = vmatmul.msk.f32.gmra.mxu3 %vm374_vm8, %v1499_v30 }
 0xb68   : > { %v1486_v45 = vsel %vm1485_vm12, %v4698_v21, %v1482_v44  ;;  %v4598_v21 = vld [vmem:[%s6695_s2 + $0xbd] ss:$0 sm:$0xff] }
 0xb69   : > { %v1490_v50 = vmul.f32 %v1486_v45, %v5510_v5 }
 0xb6b   : > { %v1495_v52 = vmul.f32 %v5537_v55, %v1490_v50 }
 0xb6d   : > { %v1500_v62 = vadd.f32 %v5545_v43, %v1495_v52 }
 0xb6f   : > { %4358 = vmatmul.msk.f32.gmra.mxu3 %vm374_vm8, %v1500_v62 }
 0xb89   : > { %v1220_v9 = vpop.xlane.xlu2 %1219 }
 0xb8a   : > { %v1230_v47 = vmul.f32 %v1220_v9, %v5131_v4 }
 0xb8c   : > { %v1234_v30 = vadd.f32 1e-05, %v1230_v47 }
 0xb8e   : > { %vm1244_vm11 = vweird.f32 %v1234_v30 }
 0xb91   : > { %v1229_v48 = vpop.xlane.xlu2 %1228 }
 0xb92   : > { %v1233_v5 = vmul.f32 %v1229_v48, %v5131_v4 }
 0xb94   : > { %v1237_v55 = vadd.f32 1e-05, %v1233_v5 }
 0xb96   : > { %4699 = vrsqrt.f32 %v1237_v55  ;;  %vm1274_vm1 = vweird.f32 %v1237_v55 }
 0xb9a   : > { %v5588_v51 = vpop.f32.mrf.mxu3 }
 0xb9c   : > { %v4700_v43 = vpop.eup %4699 }
 0xb9d   : > { %v1269_v56 = vmul.f32 %v4700_v43, %v1237_v55  ;;  %vm1275_vm0 = vweird.f32 %v4700_v43 }
 0xb9e   : > { %vm1276_vm2 = vmor %vm1274_vm1, %vm1275_vm0 }
 0xb9f   : > { %v1270_v57 = vmul.f32 %v4700_v43, %v1269_v56 }
 0xba1   : > { %v1271_v63 = vmul.f32 0.5, %v1270_v57 }
 0xba3   : > { %v1272_v0 = vsub.f32 1.5, %v1271_v63 }
 0xba5   : > { %v1273_v36 = vmul.f32 %v4700_v43, %v1272_v0 }
 0xba6   : > { %v5590_v53 = vpop.f32.mrf.mxu3 }
 0xba7   : > { %1709 = vrot.lane.b32.xlu2 %v5590_v53, %s5002_s30  ;;  %v1277_v61 = vsel %vm1276_vm2, %v4700_v43, %v1273_v36 }
 0xba8   : > { %v1281_v10 = vmul.f32 %v1277_v61, %v5555_v15 }
 0xbaa   : > { %v1286_v13 = vmul.f32 %v5604_v54, %v1281_v10 }
 0xbac   : > { %v1291_v3 = vadd.f32 %v4597_v16, %v1286_v13 }
 0xbaf   : > { %1701 = vrot.lane.b32.xlu2 %v5590_v53, %s5004_s7 }
 0xbb7   : > { %1561 = vrot.lane.b32.xlu2 %v5590_v53, %s5001_s26 }
 0xbcd   : > { %v1223_v58 = vpop.xlane.xlu1 %1222 }
 0xbce   : > { %v1231_v59 = vmul.f32 %v1223_v58, %v5131_v4 }
 0xbd0   : > { %v1235_v60 = vadd.f32 1e-05, %v1231_v59 }
 0xbd2   : > { %4701 = vrsqrt.f32 %v1235_v60  ;;  %vm1254_vm4 = vweird.f32 %v1235_v60 }
 0xbd5   : > { %v1226_v32 = vpop.xlane.xlu0 %1225 }
 0xbd6   : > { %v1232_v33 = vmul.f32 %v1226_v32, %v5131_v4 }
 0xbd8   : > { %v4702_v46 = vpop.eup %4701  ;;  %v1236_v38 = vadd.f32 1e-05, %v1232_v33 }
 0xbd9   : > { %v1249_v2 = vmul.f32 %v4702_v46, %v1235_v60  ;;  %vm1255_vm3 = vweird.f32 %v4702_v46 }
 0xbda   : > { %vm1256_vm5 = vmor %vm1254_vm4, %vm1255_vm3  ;;  %4703 = vrsqrt.f32 %v1236_v38  ;;  %vm1264_vm9 = vweird.f32 %v1236_v38 }
 0xbdb   : > { %v1250_v6 = vmul.f32 %v4702_v46, %v1249_v2  ;;  %4705 = vrsqrt.f32 %v1234_v30 }
 0xbdd   : > { %v1251_v8 = vmul.f32 0.5, %v1250_v6 }
 0xbdf   : > { %v1252_v7 = vsub.f32 1.5, %v1251_v8 }
 0xbe0   : > { %v4704_v44 = vpop.eup %4703 }
 0xbe1   : > { %v1253_v11 = vmul.f32 %v4702_v46, %v1252_v7  ;;  %v4706_v50 = vpop.eup %4705  ;;  %v1259_v52 = vmul.f32 %v4704_v44, %v1236_v38  ;;  %vm1265_vm6 = vweird.f32 %v4704_v44 }
 0xbe2   : > { %v1239_v62 = vmul.f32 %v4706_v50, %v1234_v30  ;;  %vm1245_vm7 = vweird.f32 %v4706_v50  ;;  %vm1266_vm10 = vmor %vm1264_vm9, %vm1265_vm6 }
 0xbe3   : > { %v1257_v12 = vsel %vm1256_vm5, %v4702_v46, %v1253_v11  ;;  %v1260_v48 = vmul.f32 %v4704_v44, %v1259_v52  ;;  %vm1246_vm12 = vmor %vm1244_vm11, %vm1245_vm7 }
 0xbe4   : > { %v1279_v1 = vmul.f32 %v1257_v12, %v5568_v49  ;;  %v1240_v55 = vmul.f32 %v4706_v50, %v1239_v62 }
 0xbe5   : > { %v1261_v9 = vmul.f32 0.5, %v1260_v48 }
 0xbe6   : > { %v1284_v14 = vmul.f32 %v5604_v54, %v1279_v1  ;;  %v1241_v43 = vmul.f32 0.5, %v1240_v55 }
 0xbe7   : > { %v1262_v56 = vsub.f32 1.5, %v1261_v9 }
 0xbe8   : > { %v1289_v15 = vadd.f32 %v4597_v16, %v1284_v14  ;;  %v1242_v58 = vsub.f32 1.5, %v1241_v43 }
 0xbe9   : > { %v1263_v59 = vmul.f32 %v4704_v44, %v1262_v56 }
 0xbea   : > { %v1536_v17 = vpop.f32.mrf.mxu3  ;;  %v1293_v18 = vsub.f32 %v1289_v15, %v1291_v3  ;;  %v1243_v63 = vmul.f32 %v4706_v50, %v1242_v58 }
 0xbeb   : > { %1544 = vrot.lane.b32.xlu1 %v1536_v17, %s5003_s6  ;;  %v1267_v0 = vsel %vm1266_vm10, %v4704_v44, %v1263_v59 }
 0xbec   : > { %v1295_v24 = vmul.f32 %v1293_v18, %v1293_v18  ;;  %v1247_v46 = vsel %vm1246_vm12, %v4706_v50, %v1243_v63  ;;  %v1280_v36 = vmul.f32 %v1267_v0, %v5575_v22 }
 0xbed   : > { %v1278_v2 = vmul.f32 %v1247_v46, %v5540_v35 }
 0xbee   : > { %v1298_v49 = vmul.f32 %v4598_v21, %v1295_v24  ;;  %v1285_v6 = vmul.f32 %v5604_v54, %v1280_v36 }
 0xbef   : > { %v1283_v61 = vmul.f32 %v5604_v54, %v1278_v2  ;;  %v5009_v54 = vmov 0  }
 0xbf0   : > { %v1302_v23 = vsel %vm374_vm8, %v1298_v49, 0.0  ;;  %v1290_v8 = vadd.f32 %v4597_v16, %v1285_v6  ;;  %4551 = vset.pattern.permute.xlu0 %v5009_v54  ;;  %4572 = vset.pattern.permute.xlu1 %v5009_v54 }
 0xbf1   : > { %1303 = vadd.xlane.f32.xlu2 %v1302_v23  ;;  %v1288_v7 = vadd.f32 %v4597_v16, %v1283_v61  ;;  %v4599_v16 = vld [vmem:[%s6695_s2 + $0xbe] ss:$0 sm:$0xff] }
 0xbf2   : > { %v1539_v37 = vpop.f32.mrf.mxu3 }
 0xbf3   : > { %1546 = vrot.lane.b32.xlu0 %v1539_v37, %s5003_s6  ;;  %1699 = vrot.lane.b32.xlu1 %v5588_v51, %s5004_s7  ;;  %v1292_v10 = vsub.f32 %v1288_v7, %v1290_v8 }
 0xbf5   : > { %v1294_v11 = vmul.f32 %v1292_v10, %v1292_v10 }
 0xbf7   : > { %v1297_v12 = vmul.f32 %v4598_v21, %v1294_v11 }
 0xbf9   : > { %v1299_v1 = vsel %vm374_vm8, %v1297_v12, 0.0  ;;  %v247_v12 = vadd.s32 8, %v5260_v28 }
 0xbfb   : > { %1707 = vrot.lane.b32.xlu0 %v5588_v51, %s5002_s30  ;;  %vm275_vm9 = vcmp.eq.s32.totalorder %v247_v12, %v5262_v29 }
 0xc01   : > { %v1710_v26 = vpop.permute.xlu2 %1709 }
 0xc02   : > { %4369 = vmatpush.xpose.msk.msrb.mxu0 %vm621_vm13, %v1710_v26 }
 0xc09   : > { %v1702_v27 = vpop.permute.xlu2 %1701 }
 0xc11   : > { %v1562_v31 = vpop.permute.xlu2 %1561 }
 0xc12   : > { %4359 = vmatpush.xpose.msk.msrb.mxu1 %vm621_vm13, %v1562_v31 }
 0xc5d   : > { %v1545_v45 = vpop.permute.xlu1 %1544 }
 0xc5e   : > { %1703 = vrot.lane.b32.xlu0 %v1545_v45, %s5004_s7 }
 0xc64   : > { %v1304_v15 = vpop.xlane.xlu2 %1303 }
 0xc65   : > { %v1547_v5 = vpop.permute.xlu0 %1546  ;;  %v1700_v60 = vpop.permute.xlu1 %1699  ;;  %v1307_v18 = vadd.f32 %v4599_v16, %v1304_v15 }
 0xc66   : > { %1705 = vrot.lane.b32.xlu1 %v1547_v5, %s5004_s7  ;;  %1559 = vrot.lane.b32.xlu0 %v5588_v51, %s5001_s26 }
 0xc67   : > { %v4354_v24 = vmul.f32 -1.442695, %v1307_v18 }
 0xc69   : > { %4707 = vpow2.f32 %v4354_v24 }
 0xc6d   : > { %v1708_v57 = vpop.permute.xlu0 %1707 }
 0xc6e   : > { %4370 = vmatpush.xpose.msk.msrb.mxu0 %vm621_vm13, %v1708_v57 }
 0xc6f   : > { %v4708_v37 = vpop.eup %4707 }
 0xc71   : > { %4371 = vmatmul.msk.f32.vlgmr.msrb.gmra.mxu0 %vm621_vm13, %v1700_v60 }
 0xc79   : > { %4372 = vmatmul.msk.f32.gmra.mxu0 %vm621_vm13, %v1702_v27  ;;  %v1315_v27 = vadd.f32 1.0, %v4708_v37 }
 0xc7b   : > { %v1342_v57 = vand.u32 2147483648, %v1315_v27  ;;  %vm1336_vm5 = vweird.f32 %v1315_v27  ;;  %v1340_v58 = vand.u32 2147483647, %v1315_v27 }
 0xc7d   : > { %v1343_v60 = vor.u32 1.1754944e-38, %v1342_v57  ;;  %vm1341_vm7 = vcmp.eq.f32.partialorder %v1340_v58, 8.507059e+37 }
 0xc90   : > { %1300 = vadd.xlane.f32.xlu1 %v1299_v1 }
 0xcd0   : > { %v1704_v13 = vpop.permute.xlu0 %1703 }
 0xcd1   : > { %4373 = vmatmul.msk.f32.gmra.mxu0 %vm621_vm13, %v1704_v13  ;;  %v5010_v13 = vmov 0.0  }
 0xcd8   : > { %v1560_v22 = vpop.permute.xlu0 %1559  ;;  %v1706_v14 = vpop.permute.xlu1 %1705 }
 0xcd9   : > { %4360 = vmatpush.xpose.msk.msrb.mxu1 %vm621_vm13, %v1560_v22  ;;  %4374 = vmatmul.msk.f32.gmra.mxu0 %vm621_vm13, %v1706_v14  ;;  %v5665_v22 = vsel %vm257_vm14, 1.0, %v5010_v13  ;;  %v5667_v14 = vsel %vm275_vm9, 1.0, %v5010_v13 }
 0xcdc   : > { %4361 = vmatmul.msk.f32.vlgmr.msrb.gmra.mxu1 %vm621_vm13, %v5588_v51 }
 0xce4   : > { %4362 = vmatmul.msk.f32.gmra.mxu1 %vm621_vm13, %v5590_v53 }
 0xcec   : > { %4363 = vmatmul.msk.f32.gmra.mxu1 %vm621_vm13, %v1545_v45 }
 0xcee   : > { %v1740_v35 = vpop.f32.mrf.mxu0 }
 0xcef   : > { %v1752_v0 = vmul.f32 0.25, %v1740_v35 }
 0xcf1   : > { %v1756_v46 = vsel %vm621_vm13, %v1752_v0, -inf }
 0xcf4   : > { %4364 = vmatmul.msk.f32.gmra.mxu1 %vm621_vm13, %v1547_v5 }
 0xcf6   : > { %v1743_v3 = vpop.f32.mrf.mxu0 }
 0xcf7   : > { %v1753_v17 = vmul.f32 0.25, %v1743_v3 }
 0xcf9   : > { %v1759_v21 = vsel %vm621_vm13, %v1753_v17, -inf }
 0xcfa   : > { %1760 = vmax.xlane.f32.xlu1 %v1759_v21 }
 0xd03   : > { %v1301_v49 = vpop.xlane.xlu1 %1300 }
 0xd04   : > { %v1306_v23 = vadd.f32 %v4599_v16, %v1301_v49 }
 0xd06   : > { %v4353_v26 = vmul.f32 -1.442695, %v1306_v23 }
 0xd08   : > { %4709 = vpow2.f32 %v4353_v26 }
 0xd09   : > { %4711 = vrcp.f32 %v1315_v27 }
 0xd0e   : > { %v4710_v31 = vpop.eup %4709 }
 0xd0f   : > { %v1314_v32 = vadd.f32 1.0, %v4710_v31  ;;  %v4712_v33 = vpop.eup %4711 }
 0xd10   : > { %v1332_v47 = vmul.f32 %v4712_v33, %v1315_v27  ;;  %vm1337_vm4 = vweird.f32 %v4712_v33 }
 0xd11   : > { %4713 = vrcp.f32 %v1314_v32  ;;  %v1327_v50 = vand.u32 2147483648, %v1314_v32  ;;  %v1325_v62 = vand.u32 2147483647, %v1314_v32  ;;  %vm1321_vm1 = vweird.f32 %v1314_v32  ;;  %vm1338_vm6 = vmor %vm1336_vm5, %vm1337_vm4 }
 0xd12   : > { %v1333_v45 = vsub.f32 1.0, %v1332_v47 }
 0xd13   : > { %v1328_v55 = vor.u32 1.1754944e-38, %v1327_v50  ;;  %vm1326_vm3 = vcmp.eq.f32.partialorder %v1325_v62, 8.507059e+37 }
 0xd14   : > { %v1334_v5 = vmul.f32 %v4712_v33, %v1333_v45 }
 0xd16   : > { %v1335_v56 = vadd.f32 %v4712_v33, %v1334_v5 }
 0xd17   : > { %v4714_v38 = vpop.eup %4713 }
 0xd18   : > { %v1317_v30 = vmul.f32 %v4714_v38, %v1314_v32  ;;  %vm1322_vm0 = vweird.f32 %v4714_v38  ;;  %v1339_v59 = vsel %vm1338_vm6, %v4712_v33, %v1335_v56 }
 0xd19   : > { %vm1323_vm2 = vmor %vm1321_vm1, %vm1322_vm0  ;;  %v1344_v63 = vsel %vm1341_vm7, %v1343_v60, %v1339_v59  ;;  %v4552_v60 = vpack.i.bf16 %v5588_v51, %v5590_v53 }
 0xd1a   : > { %v1318_v44 = vsub.f32 1.0, %v1317_v30 }
 0xd1c   : > { %v1319_v52 = vmul.f32 %v4714_v38, %v1318_v44 }
 0xd1e   : > { %v1320_v48 = vadd.f32 %v4714_v38, %v1319_v52 }
 0xd20   : > { %v1324_v9 = vsel %vm1323_vm2, %v4714_v38, %v1320_v48 }
 0xd21   : > { %v1329_v43 = vsel %vm1326_vm3, %v1328_v55, %v1324_v9 }
 0xd22   : > { %1348 = vperm.xlu0 %4551, %v1329_v43  }
 0xd2a   : > { %1353 = vperm.xlu0 %4551, %v1344_v63  }
 0xd4e   : > { %v1746_v49 = vpop.f32.mrf.mxu0 }
 0xd54   : > { %1757 = vmax.xlane.f32.xlu0 %v1756_v46 }
 0xd56   : > { %v1749_v32 = vpop.f32.mrf.mxu0 }
 0xd59   : > { %v1592_v36 = vpop.f32.mrf.mxu1 }
 0xd5a   : > { %v5652_v2 = vmul.f32 0.25, %v1592_v36 }
 0xd5c   : > { %v1608_v6 = vsel %vm621_vm13, %v5652_v2, -inf }
 0xd5d   : > { %1609 = vmax.xlane.f32.xlu2 %v1608_v6 }
 0xd61   : > { %v1595_v38 = vpop.f32.mrf.mxu1 }
 0xd62   : > { %v1605_v45 = vmul.f32 0.25, %v1595_v38 }
 0xd64   : > { %v1611_v50 = vsel %vm621_vm13, %v1605_v45, -inf }
 0xd69   : > { %v1598_v52 = vpop.f32.mrf.mxu1 }
 0xd6d   : > { %v1761_v61 = vpop.xlane.xlu1 %1760 }
 0xd6e   : > { %v1769_v8 = vsub.f32 %v1753_v17, %v1761_v61 }
 0xd70   : > { %v1774_v7 = vmul.f32 1.442695, %v1769_v8 }
 0xd71   : > { %v1601_v5 = vpop.f32.mrf.mxu1 }
 0xd72   : > { %4715 = vpow2.f32 %v1774_v7 }
 0xd78   : > { %v5656_v10 = vpop.eup %4715 }
 0xd79   : > { %v1783_v11 = vsel %vm621_vm13, %v5656_v10, 0.0 }
 0xd7a   : > { %1784 = vadd.xlane.f32.xlu0 %v1783_v11 }
 0xd94   : > { %v1349_v1 = vpop.permute.xlu0 %1348 }
 0xd95   : > { %v1356_v35 = vmul.f32 %v5665_v22, %v1349_v1 }
 0xd97   : > { %v1358_v15 = vsel %vm621_vm13, %v1356_v35, 0.0 }
 0xd9c   : > { %v1354_v54 = vpop.permute.xlu0 %1353 }
 0xd9d   : > { %v1357_v16 = vmul.f32 %v5667_v14, %v1354_v54 }
 0xd9f   : > { %v1359_v3 = vsel %vm621_vm13, %v1357_v16, 0.0 }
 0xda0   : > { %v1360_v17 = vadd.f32 %v1359_v3, %v1358_v15 }
 0xda2   : > { %v1361_v18 = vrot.slane %v1360_v17, 4 }
 0xda4   : > { %v1362_v21 = vadd.f32 %v1361_v18, %v1360_v17 }
 0xda6   : > { %v1363_v24 = vrot.slane %v1362_v21, 2 }
 0xda8   : > { %v1364_v23 = vadd.f32 %v1363_v24, %v1362_v21 }
 0xdaa   : > { %v1365_v28 = vrot.slane %v1364_v23, 1 }
 0xdac   : > { %v1366_v37 = vadd.f32 %v1365_v28, %v1364_v23 }
 0xdae   : > { %v1548_v26 = vsub.f32 1.0, %v1366_v37 }
 0xdb0   : > { %v1556_v27 = vmul.f32 %v1548_v26, %v5276_v41  ;;  %v1555_v31 = vmul.f32 %v1548_v26, %v5271_v34 }
 0xdb2   : > { %v1755_v33 = vmul.f32 %v1749_v32, %v1556_v27  ;;  %v1754_v47 = vmul.f32 %v1746_v49, %v1555_v31  ;;  %v1606_v62 = vmul.f32 %v1598_v52, %v1555_v31  ;;  %v1607_v43 = vmul.f32 %v1601_v5, %v1556_v27 }
 0xdb4   : > { %v1765_v30 = vsel %vm621_vm13, %v1755_v33, -inf  ;;  %v1762_v44 = vsel %vm621_vm13, %v1754_v47, -inf  ;;  %v1614_v48 = vsel %vm621_vm13, %v1606_v62, -inf  ;;  %v1617_v57 = vsel %vm621_vm13, %v1607_v43, -inf }
 0xdb5   : > { %1766 = vmax.xlane.f32.xlu1 %v1765_v30  ;;  %1763 = vmax.xlane.f32.xlu2 %v1762_v44 }
 0xdbd   : > { %1612 = vmax.xlane.f32.xlu1 %v1611_v50 }
 0xdc5   : > { %1615 = vmax.xlane.f32.xlu1 %v1614_v48 }
 0xdc7   : > { %v1758_v55 = vpop.xlane.xlu0 %1757 }
 0xdc8   : > { %v1768_v9 = vsub.f32 %v1752_v0, %v1758_v55 }
 0xdca   : > { %v1772_v56 = vmul.f32 1.442695, %v1768_v9 }
 0xdcc   : > { %4717 = vpow2.f32 %v1772_v56 }
 0xdcd   : > { %1618 = vmax.xlane.f32.xlu1 %v1617_v57 }
 0xdd0   : > { %v1610_v63 = vpop.xlane.xlu2 %1609 }
 0xdd1   : > { %v1620_v7 = vsub.f32 %v5652_v2, %v1610_v63 }
 0xdd2   : > { %v4718_v58 = vpop.eup %4717 }
 0xdd3   : > { %v1780_v59 = vsel %vm621_vm13, %v4718_v58, 0.0  ;;  %v1624_v11 = vmul.f32 1.442695, %v1620_v7 }
 0xdd4   : > { %1781 = vadd.xlane.f32.xlu2 %v1780_v59 }
 0xdec   : > { %4553 = vrot.lane.b32.xlu2 %v4552_v60, %s6703_s9 }
 0xded   : > { %v1785_v32 = vpop.xlane.xlu0 %1784 }
 0xe28   : > { %v1767_v46 = vpop.xlane.xlu1 %1766  ;;  %v1764_v36 = vpop.xlane.xlu2 %1763 }
 0xe29   : > { %v1771_v6 = vsub.f32 %v1755_v33, %v1767_v46  ;;  %v1770_v0 = vsub.f32 %v1754_v47, %v1764_v36 }
 0xe2b   : > { %v1778_v61 = vmul.f32 1.442695, %v1771_v6  ;;  %v1776_v8 = vmul.f32 1.442695, %v1770_v0 }
 0xe2d   : > { %4719 = vpow2.f32 %v1778_v61 }
 0xe2e   : > { %4721 = vpow2.f32 %v1776_v8 }
 0xe2f   : > { %4723 = vpow2.f32 %v1624_v11 }
 0xe30   : > { %v1613_v12 = vpop.xlane.xlu1 %1612 }
 0xe31   : > { %v1621_v1 = vsub.f32 %v1605_v45, %v1613_v12 }
 0xe33   : > { %v4720_v13 = vpop.eup %4719  ;;  %v1626_v35 = vmul.f32 1.442695, %v1621_v1  ;;  %v1378_v1 = vld [vmem:[%s6695_s2 + $0xd8] sm:$0xff] }
 0xe34   : > { %v4722_v54 = vpop.eup %4721  ;;  %v1789_v51 = vsel %vm621_vm13, %v4720_v13, 0.0  ;;  %1895 = vmatpush.msra.mxu1 %v1378_v1 }
 0xe35   : > { %4725 = vpow2.f32 %v1626_v35  ;;  %1790 = vadd.xlane.f32.xlu1 %v1789_v51  ;;  %v1786_v53 = vsel %vm621_vm13, %v4722_v54, 0.0  ;;  %v4724_v3 = vpop.eup %4723  ;;  %v1376_v35 = vld [vmem:[%s6695_s2 + $0xc8] sm:$0xff] }
 0xe36   : > { %1787 = vadd.xlane.f32.xlu0 %v1786_v53  ;;  %v1632_v21 = vsel %vm621_vm13, %v4724_v3, 0.0 }
 0xe38   : > { %v1616_v16 = vpop.xlane.xlu1 %1615 }
 0xe39   : > { %v1622_v15 = vsub.f32 %v1606_v62, %v1616_v16 }
 0xe3b   : > { %v4726_v2 = vpop.eup %4725  ;;  %v1628_v17 = vmul.f32 1.442695, %v1622_v15 }
 0xe3c   : > { %v1635_v18 = vsel %vm621_vm13, %v4726_v2, 0.0 }
 0xe3d   : > { %4727 = vpow2.f32 %v1628_v17  ;;  %1636 = vadd.xlane.f32.xlu2 %v1635_v18 }
 0xe3e   : > { %1633 = vadd.xlane.f32.xlu0 %v1632_v21 }
 0xe40   : > { %v1619_v24 = vpop.xlane.xlu1 %1618 }
 0xe41   : > { %v1623_v49 = vsub.f32 %v1607_v43, %v1619_v24 }
 0xe43   : > { %v4728_v23 = vpop.eup %4727  ;;  %v1630_v28 = vmul.f32 1.442695, %v1623_v49 }
 0xe44   : > { %v1638_v37 = vsel %vm621_vm13, %v4728_v23, 0.0 }
 0xe45   : > { %4729 = vpow2.f32 %v1630_v28 }
 0xe46   : > { %1639 = vadd.xlane.f32.xlu0 %v1638_v37 }
 0xe47   : > { %v1782_v26 = vpop.xlane.xlu2 %1781 }
 0xe48   : > { %4731 = vrcp.f32 %v1782_v26 }
 0xe49   : > { %4733 = vrcp.f32 %v1785_v32 }
 0xe4b   : > { %v4730_v27 = vpop.eup %4729 }
 0xe4c   : > { %v1641_v31 = vsel %vm621_vm13, %v4730_v27, 0.0 }
 0xe4e   : > { %1642 = vadd.xlane.f32.xlu0 %v1641_v31  ;;  %4558 = vrot.lane.b32.xlu1 %v4552_v60, %s6701_s8  ;;  %v4732_v47 = vpop.eup %4731 }
 0xe4f   : > { %v4554_v33 = vpop.permute.xlu2 %4553  ;;  %v1796_v44 = vmul.f32 %v4732_v47, %v4718_v58  ;;  %v4734_v45 = vpop.eup %4733 }
 0xe50   : > { %v4555_v38 = vunpack.i.l.bf16 %v4554_v33  ;;  %v4556_v30 = vunpack.i.h.bf16 %v4554_v33  ;;  %v1797_v50 = vmul.f32 %v4734_v45, %v5656_v10  ;;  %v1870_v45 = vmul.f32 0.0, %v5483_v40 }
 0xe52   : > { %1832 = vmatpush.msrb.mxu3 %v4555_v38  ;;  %v1869_v38 = vmul.f32 0.0, %v5472_v42 }
 0xe54   : > { %1833 = vmatpush.msrb.mxu3 %v4556_v30 }
 0xe55   : > { %4375 = vmatmul.msk.f32.vlgmr.msrb.gmra.mxu3 %vm621_vm13, %v1796_v44 }
 0xe5d   : > { %4376 = vmatmul.msk.f32.gmra.mxu3 %vm621_vm13, %v1797_v50 }
 0xea8   : > { %v1791_v62 = vpop.xlane.xlu1 %1790 }
 0xea9   : > { %v1788_v52 = vpop.xlane.xlu0 %1787 }
 0xeaa   : > { %4735 = vrcp.f32 %v1788_v52 }
 0xeab   : > { %4737 = vrcp.f32 %v1791_v62 }
 0xeb0   : > { %v4736_v48 = vpop.eup %4735  ;;  %v1637_v56 = vpop.xlane.xlu2 %1636 }
 0xeb1   : > { %v1798_v5 = vmul.f32 %v4736_v48, %v4722_v54  ;;  %v4738_v55 = vpop.eup %4737  ;;  %v1634_v9 = vpop.xlane.xlu0 %1633  ;;  %v1375_v54 = vld [vmem:[%s6695_s2 + $0xc0] sm:$0xff] }
 0xeb2   : > { %v1799_v43 = vmul.f32 %v4738_v55, %v4720_v13  ;;  %4739 = vrcp.f32 %v1634_v9  ;;  %v1377_v13 = vld [vmem:[%s6695_s2 + $0xd0] sm:$0xff] }
 0xeb3   : > { %4377 = vmatmul.msk.f32.gmra.mxu3 %vm621_vm13, %v1798_v5  ;;  %4741 = vrcp.f32 %v1637_v56  ;;  %1896 = vmatpush.msra.mxu1 %v1377_v13 }
 0xeb5   : > { %1897 = vmatpush.msra.mxu1 %v1376_v35 }
 0xeb7   : > { %1898 = vmatpush.msra.mxu1 %v1375_v54 }
 0xeb8   : > { %v4740_v58 = vpop.eup %4739 }
 0xeb9   : > { %v1648_v60 = vmul.f32 %v4740_v58, %v4724_v3  ;;  %v1640_v63 = vpop.xlane.xlu0 %1639  ;;  %v4742_v46 = vpop.eup %4741 }
 0xeba   : > { %4743 = vrcp.f32 %v1640_v63  ;;  %v1649_v36 = vmul.f32 %v4742_v46, %v4726_v2 }
 0xebb   : > { %4378 = vmatmul.msk.f32.gmra.mxu3 %vm621_vm13, %v1799_v43 }
 0xec0   : > { %v4559_v57 = vpop.permute.xlu1 %4558  ;;  %v4744_v0 = vpop.eup %4743 }
 0xec1   : > { %v4560_v10 = vunpack.i.l.bf16 %v4559_v57  ;;  %v4561_v59 = vunpack.i.h.bf16 %v4559_v57  ;;  %v1643_v6 = vpop.xlane.xlu0 %1642  ;;  %v1650_v61 = vmul.f32 %v4744_v0, %v4728_v23 }
 0xec2   : > { %4745 = vrcp.f32 %v1643_v6 }
 0xec3   : > { %1684 = vmatpush.msrb.mxu2 %v4560_v10 }
 0xec5   : > { %1685 = vmatpush.msrb.mxu2 %v4561_v59 }
 0xec6   : > { %4365 = vmatmul.msk.f32.vlgmr.msrb.gmra.mxu2 %vm621_vm13, %v1648_v60 }
 0xec8   : > { %v4746_v7 = vpop.eup %4745 }
 0xec9   : > { %v1651_v11 = vmul.f32 %v4746_v7, %v4730_v27  ;;  %v1396_v7 = vld [vmem:[%s6696_s3 + $0x38] sm:$0xff] }
 0xece   : > { %4366 = vmatmul.msk.f32.gmra.mxu2 %vm621_vm13, %v1649_v36 }
 0xed6   : > { %4367 = vmatmul.msk.f32.gmra.mxu2 %vm621_vm13, %v1650_v61 }
 0xed8   : > { %v1835_v8 = vpop.f32.mrf.mxu3 }
 0xed9   : > { %1851 = vrot.lane.b32.xlu0 %v1835_v8, %s6706_s17  ;;  %v1397_v8 = vld [vmem:[%s6696_s3 + $0x40] sm:$0xff] }
 0xeda   : > { %2035 = vmatpush.msra.mxu2 %v1397_v8 }
 0xedc   : > { %2036 = vmatpush.msra.mxu2 %v1396_v7 }
 0xede   : > { %4368 = vmatmul.msk.f32.gmra.mxu2 %vm621_vm13, %v1651_v11  ;;  %v1395_v11 = vld [vmem:[%s6696_s3 + $0x30] sm:$0xff] }
 0xedf   : > { %2037 = vmatpush.msra.mxu2 %v1395_v11 }
 0xee0   : > { %v1838_v12 = vpop.f32.mrf.mxu3 }
 0xee1   : > { %1853 = vrot.lane.b32.xlu1 %v1838_v12, %s6706_s17  ;;  %v1394_v12 = vld [vmem:[%s6696_s3 + $0x28] sm:$0xff] }
 0xee2   : > { %2038 = vmatpush.msra.mxu2 %v1394_v12 }
 0xf36   : > { %v1841_v51 = vpop.f32.mrf.mxu3 }
 0xf37   : > { %1855 = vrot.lane.b32.xlu1 %v1841_v51, %s6706_s17 }
 0xf3e   : > { %v1844_v53 = vpop.f32.mrf.mxu3 }
 0xf3f   : > { %1857 = vrot.lane.b32.xlu1 %v1844_v53, %s6706_s17 }
 0xf49   : > { %v1687_v16 = vpop.f32.mrf.mxu2 }
 0xf4b   : > { %v1852_v15 = vpop.permute.xlu0 %1851 }
 0xf4c   : > { %v1863_v3 = vsel %vm621_vm13, %v1687_v16, %v1852_v15 }
 0xf4d   : > { %4379 = vmatmul.msk.f32.vlgmr.msra.gmra.mxu1 %vm374_vm8, %v1863_v3 }
 0xf51   : > { %v1690_v2 = vpop.f32.mrf.mxu2 }
 0xf53   : > { %v1854_v17 = vpop.permute.xlu1 %1853 }
 0xf54   : > { %v1864_v18 = vsel %vm621_vm13, %v1690_v2, %v1854_v17 }
 0xf55   : > { %4380 = vmatmul.msk.f32.gmra.mxu1 %vm374_vm8, %v1864_v18 }
 0xf59   : > { %v1693_v21 = vpop.f32.mrf.mxu2 }
 0xf61   : > { %v1696_v23 = vpop.f32.mrf.mxu2 }
 0xfa9   : > { %v1856_v24 = vpop.permute.xlu1 %1855 }
 0xfaa   : > { %v1865_v49 = vsel %vm621_vm13, %v1693_v21, %v1856_v24 }
 0xfab   : > { %4381 = vmatmul.msk.f32.gmra.mxu1 %vm374_vm8, %v1865_v49  ;;  %v4600_v49 = vld [vmem:[%s6695_s2 + $0x122] ss:$0 sm:$0xff] }
 0xfb1   : > { %v1858_v28 = vpop.permute.xlu1 %1857 }
 0xfb2   : > { %v1866_v37 = vsel %vm621_vm13, %v1696_v23, %v1858_v28 }
 0xfb3   : > { %4382 = vmatmul.msk.f32.gmra.mxu1 %vm374_vm8, %v1866_v37 }
 0xfca   : > { %v1900_v26 = vpop.f32.mrf.mxu1 }
 0xfcb   : > { %v5726_v27 = vadd.f32 %v1900_v26, %v5449_v20  ;;  %v4601_v26 = vld [vmem:[%s6695_s2 + $0x123] ss:$0 sm:$0xff] }
 0xfcd   : > { %v1912_v31 = vsel %vm374_vm8, %v5726_v27, 0.0 }
 0xfce   : > { %1913 = vadd.xlane.f32.xlu0 %v1912_v31 }
 0xfd2   : > { %v1903_v32 = vpop.f32.mrf.mxu1 }
 0xfd3   : > { %v5731_v33 = vadd.f32 %v1903_v32, %v5461_v39 }
 0xfd5   : > { %v1915_v47 = vsel %vm374_vm8, %v5731_v33, 0.0 }
 0xfd6   : > { %1916 = vadd.xlane.f32.xlu2 %v1915_v47 }
0x1028   : > { %v1906_v30 = vpop.f32.mrf.mxu1 }
0x1029   : > { %v5736_v44 = vadd.f32 %v1906_v30, %v1869_v38 }
0x102b   : > { %v1918_v20 = vsel %vm374_vm8, %v5736_v44, 0.0 }
0x102c   : > { %1919 = vadd.xlane.f32.xlu1 %v1918_v20 }
0x1030   : > { %v1909_v50 = vpop.f32.mrf.mxu1 }
0x1031   : > { %v5741_v52 = vadd.f32 %v1909_v50, %v1870_v45 }
0x1033   : > { %v1921_v39 = vsel %vm374_vm8, %v5741_v52, 0.0 }
0x1034   : > { %1922 = vadd.xlane.f32.xlu2 %v1921_v39 }
0x1041   : > { %v1914_v62 = vpop.xlane.xlu0 %1913 }
0x1042   : > { %v1924_v48 = vmul.f32 %v1914_v62, %v5131_v4 }
0x1044   : > { %v1928_v42 = vsub.f32 %v5726_v27, %v1924_v48 }
0x1046   : > { %v1932_v5 = vmul.f32 %v1928_v42, %v1928_v42 }
0x1048   : > { %v1936_v55 = vsel %vm374_vm8, %v1932_v5, 0.0 }
0x1049   : > { %v1917_v9 = vpop.xlane.xlu2 %1916  ;;  %1937 = vadd.xlane.f32.xlu2 %v1936_v55 }
0x104a   : > { %v1925_v43 = vmul.f32 %v1917_v9, %v5131_v4 }
0x104c   : > { %v1929_v40 = vsub.f32 %v5731_v33, %v1925_v43 }
0x104e   : > { %v1933_v56 = vmul.f32 %v1929_v40, %v1929_v40 }
0x1050   : > { %v1939_v57 = vsel %vm374_vm8, %v1933_v56, 0.0 }
0x1051   : > { %1940 = vadd.xlane.f32.xlu2 %v1939_v57 }
0x109f   : > { %v1920_v58 = vpop.xlane.xlu1 %1919 }
0x10a0   : > { %v1926_v10 = vmul.f32 %v1920_v58, %v5131_v4 }
0x10a2   : > { %v5753_v59 = vsub.f32 %v5736_v44, %v1926_v10 }
0x10a4   : > { %v1934_v60 = vmul.f32 %v5753_v59, %v5753_v59 }
0x10a6   : > { %v1942_v63 = vsel %vm374_vm8, %v1934_v60, 0.0 }
0x10a7   : > { %v1923_v46 = vpop.xlane.xlu2 %1922  ;;  %1943 = vadd.xlane.f32.xlu2 %v1942_v63 }
0x10a8   : > { %v1927_v36 = vmul.f32 %v1923_v46, %v5131_v4 }
0x10aa   : > { %v5760_v6 = vsub.f32 %v5741_v52, %v1927_v36 }
0x10ac   : > { %v1935_v0 = vmul.f32 %v5760_v6, %v5760_v6 }
0x10ae   : > { %v1945_v61 = vsel %vm374_vm8, %v1935_v0, 0.0 }
0x10af   : > { %1946 = vadd.xlane.f32.xlu2 %v1945_v61 }
0x10bc   : > { %v1938_v1 = vpop.xlane.xlu2 %1937 }
0x10bd   : > { %v1948_v13 = vmul.f32 %v1938_v1, %v5131_v4 }
0x10bf   : > { %v1952_v35 = vadd.f32 1e-05, %v1948_v13 }
0x10c1   : > { %4747 = vrsqrt.f32 %v1952_v35  ;;  %vm1962_vm10 = vweird.f32 %v1952_v35 }
0x10c4   : > { %v1941_v54 = vpop.xlane.xlu2 %1940 }
0x10c5   : > { %v1949_v51 = vmul.f32 %v1941_v54, %v5131_v4 }
0x10c7   : > { %v4748_v53 = vpop.eup %4747  ;;  %v1953_v16 = vadd.f32 1e-05, %v1949_v51  ;;  %v1385_v51 = vld [vmem:[%s6695_s2 + $0x110] sm:$0xff] }
0x10c8   : > { %v1957_v15 = vmul.f32 %v4748_v53, %v1952_v35  ;;  %vm1963_vm14 = vweird.f32 %v4748_v53 }
0x10c9   : > { %4749 = vrsqrt.f32 %v1953_v16  ;;  %vm1964_vm11 = vmor %vm1962_vm10, %vm1963_vm14  ;;  %vm1972_vm0 = vweird.f32 %v1953_v16 }
0x10ca   : > { %v1958_v3 = vmul.f32 %v4748_v53, %v1957_v15  ;;  %v1381_v15 = vld [vmem:[%s6695_s2 + $0xf0] sm:$0xff] }
0x10cc   : > { %v1959_v2 = vmul.f32 0.5, %v1958_v3  ;;  %v1380_v3 = vld [vmem:[%s6695_s2 + $0xe8] sm:$0xff] }
0x10ce   : > { %v1960_v17 = vsub.f32 1.5, %v1959_v2  ;;  %v1379_v2 = vld [vmem:[%s6695_s2 + $0xe0] sm:$0xff] }
0x10cf   : > { %v4750_v18 = vpop.eup %4749 }
0x10d0   : > { %v1961_v21 = vmul.f32 %v4748_v53, %v1960_v17  ;;  %v1967_v24 = vmul.f32 %v4750_v18, %v1953_v16  ;;  %vm1973_vm12 = vweird.f32 %v4750_v18  ;;  %v1382_v16 = vld [vmem:[%s6695_s2 + $0xf8] sm:$0xff]  ;;  %v4602_v17 = vld [vmem:[%s6696_s3 + $0x48] ss:$0 sm:$0xff] }
0x10d1   : > { %vm1974_vm1 = vmor %vm1972_vm0, %vm1973_vm12 }
0x10d2   : > { %v1965_v23 = vsel %vm1964_vm11, %v4748_v53, %v1961_v21  ;;  %v1968_v28 = vmul.f32 %v4750_v18, %v1967_v24  ;;  %v1384_v53 = vld [vmem:[%s6695_s2 + $0x108] sm:$0xff] }
0x10d3   : > { %v1996_v37 = vmul.f32 %v1965_v23, %v1928_v42 }
0x10d4   : > { %v1969_v31 = vmul.f32 0.5, %v1968_v28 }
0x10d5   : > { %v2001_v32 = vmul.f32 %v4600_v49, %v1996_v37 }
0x10d6   : > { %v1970_v47 = vsub.f32 1.5, %v1969_v31 }
0x10d7   : > { %v2006_v38 = vadd.f32 %v4601_v26, %v2001_v32 }
0x10d8   : > { %v1971_v30 = vmul.f32 %v4750_v18, %v1970_v47 }
0x10d9   : > { %4383 = vmatmul.msk.f32.vlgmr.msra.gmra.mxu2 %vm374_vm8, %v2006_v38 }
0x10da   : > { %v1975_v20 = vsel %vm1974_vm1, %v4750_v18, %v1971_v30 }
0x10db   : > { %v1997_v45 = vmul.f32 %v1975_v20, %v1929_v40 }
0x10dd   : > { %v2002_v50 = vmul.f32 %v4600_v49, %v1997_v45 }
0x10df   : > { %v2007_v39 = vadd.f32 %v4601_v26, %v2002_v50 }
0x10e1   : > { %4384 = vmatmul.msk.f32.gmra.mxu2 %vm374_vm8, %v2007_v39 }
0x111a   : > { %v1944_v62 = vpop.xlane.xlu2 %1943 }
0x111b   : > { %v1950_v48 = vmul.f32 %v1944_v62, %v5131_v4 }
0x111d   : > { %v1954_v42 = vadd.f32 1e-05, %v1950_v48 }
0x111f   : > { %4751 = vrsqrt.f32 %v1954_v42  ;;  %vm1982_vm3 = vweird.f32 %v1954_v42 }
0x1122   : > { %v1947_v5 = vpop.xlane.xlu2 %1946 }
0x1123   : > { %v1951_v55 = vmul.f32 %v1947_v5, %v5131_v4 }
0x1125   : > { %v4752_v9 = vpop.eup %4751  ;;  %v1955_v43 = vadd.f32 1e-05, %v1951_v55 }
0x1126   : > { %v1977_v56 = vmul.f32 %v4752_v9, %v1954_v42  ;;  %vm1983_vm2 = vweird.f32 %v4752_v9 }
0x1127   : > { %4753 = vrsqrt.f32 %v1955_v43  ;;  %vm1984_vm4 = vmor %vm1982_vm3, %vm1983_vm2  ;;  %vm1992_vm6 = vweird.f32 %v1955_v43 }
0x1128   : > { %v1978_v57 = vmul.f32 %v4752_v9, %v1977_v56 }
0x112a   : > { %v1979_v58 = vmul.f32 0.5, %v1978_v57 }
0x112c   : > { %v1980_v10 = vsub.f32 1.5, %v1979_v58 }
0x112d   : > { %v4754_v40 = vpop.eup %4753 }
0x112e   : > { %v1981_v60 = vmul.f32 %v4752_v9, %v1980_v10  ;;  %v1987_v63 = vmul.f32 %v4754_v40, %v1955_v43  ;;  %vm1993_vm5 = vweird.f32 %v4754_v40 }
0x112f   : > { %vm1994_vm7 = vmor %vm1992_vm6, %vm1993_vm5 }
0x1130   : > { %v1985_v46 = vsel %vm1984_vm4, %v4752_v9, %v1981_v60  ;;  %v1988_v36 = vmul.f32 %v4754_v40, %v1987_v63 }
0x1131   : > { %v1998_v0 = vmul.f32 %v1985_v46, %v5753_v59  ;;  %v1386_v59 = vld [vmem:[%s6695_s2 + $0x118] sm:$0xff] }
0x1132   : > { %v1989_v61 = vmul.f32 0.5, %v1988_v36  ;;  %2109 = vmatpush.msra.mxu0 %v1386_v59 }
0x1133   : > { %v2003_v8 = vmul.f32 %v4600_v49, %v1998_v0 }
0x1134   : > { %v1990_v7 = vsub.f32 1.5, %v1989_v61  ;;  %2110 = vmatpush.msra.mxu0 %v1385_v51  ;;  %v4603_v51 = vld [vmem:[%s6695_s2 + $0x124] ss:$0 sm:$0xff] }
0x1135   : > { %v2008_v11 = vadd.f32 %v4601_v26, %v2003_v8 }
0x1136   : > { %v1991_v12 = vmul.f32 %v4754_v40, %v1990_v7  ;;  %2111 = vmatpush.msra.mxu0 %v1384_v53 }
0x1137   : > { %4385 = vmatmul.msk.f32.gmra.mxu2 %vm374_vm8, %v2008_v11 }
0x1138   : > { %v1995_v1 = vsel %vm1994_vm7, %v4754_v40, %v1991_v12 }
0x1139   : > { %v1999_v13 = vmul.f32 %v1995_v1, %v5760_v6  ;;  %v1383_v6 = vld [vmem:[%s6695_s2 + $0x100] sm:$0xff] }
0x113a   : > { %2112 = vmatpush.msra.mxu0 %v1383_v6 }
0x113b   : > { %v2004_v35 = vmul.f32 %v4600_v49, %v1999_v13 }
0x113c   : > { %2113 = vmatpush.msra.mxu0 %v1382_v16 }
0x113d   : > { %v2009_v54 = vadd.f32 %v4601_v26, %v2004_v35 }
0x113e   : > { %2114 = vmatpush.msra.mxu0 %v1381_v15 }
0x113f   : > { %4386 = vmatmul.msk.f32.gmra.mxu2 %vm374_vm8, %v2009_v54 }
0x1140   : > { %2115 = vmatpush.msra.mxu0 %v1380_v3 }
0x1142   : > { %2116 = vmatpush.msra.mxu0 %v1379_v2 }
0x115c   : > { %v2040_v18 = vpop.f32.mrf.mxu2 }
0x115d   : > { %v2041_v21 = vadd.f32 %v4602_v17, %v2040_v18 }
0x115f   : > { %v2056_v24 = vmul.f32 0.044715, %v2041_v21  ;;  %v2052_v50 = vmul.f32 0.5, %v2041_v21 }
0x1161   : > { %v2060_v49 = vmul.f32 %v2056_v24, %v2041_v21 }
0x1163   : > { %v2064_v23 = vmul.f32 %v2060_v49, %v2041_v21 }
0x1164   : > { %v2043_v28 = vpop.f32.mrf.mxu2 }
0x1165   : > { %v2068_v37 = vadd.f32 %v2064_v23, %v2041_v21  ;;  %v2044_v26 = vadd.f32 %v4602_v17, %v2043_v28 }
0x1167   : > { %v2072_v31 = vmul.f32 0.7978846, %v2068_v37  ;;  %v2057_v32 = vmul.f32 0.044715, %v2044_v26  ;;  %v2053_v42 = vmul.f32 0.5, %v2044_v26 }
0x1169   : > { %4755 = vtanh.f32 %v2072_v31  ;;  %v2061_v47 = vmul.f32 %v2057_v32, %v2044_v26 }
0x116b   : > { %v2065_v38 = vmul.f32 %v2061_v47, %v2044_v26 }
0x116d   : > { %v2069_v30 = vadd.f32 %v2065_v38, %v2044_v26  ;;  %v4926_v38 = vld [vmem:[%s6695_s2 + $0x20] sm:$0xff] }
0x116f   : > { %v4756_v20 = vpop.eup %4755  ;;  %v2073_v45 = vmul.f32 0.7978846, %v2069_v30 }
0x1170   : > { %v2080_v39 = vadd.f32 1.0, %v4756_v20 }
0x1171   : > { %4757 = vtanh.f32 %v2073_v45 }
0x1172   : > { %v2084_v62 = vmul.f32 %v2080_v39, %v2052_v50 }
0x1174   : > { %4387 = vmatmul.msk.f32.vlgmr.msra.gmra.mxu0 %vm1148_vm15, %v2084_v62 }
0x1177   : > { %v4758_v48 = vpop.eup %4757 }
0x1178   : > { %v2081_v5 = vadd.f32 1.0, %v4758_v48 }
0x117a   : > { %v2085_v55 = vmul.f32 %v2081_v5, %v2053_v42 }
0x117c   : > { %4388 = vmatmul.msk.f32.gmra.mxu0 %vm1148_vm15, %v2085_v55 }
0x11ba   : > { %v2046_v9 = vpop.f32.mrf.mxu2 }
0x11bb   : > { %v2047_v43 = vadd.f32 %v4602_v17, %v2046_v9 }
0x11bd   : > { %v2058_v56 = vmul.f32 0.044715, %v2047_v43  ;;  %v2054_v11 = vmul.f32 0.5, %v2047_v43 }
0x11bf   : > { %v2062_v57 = vmul.f32 %v2058_v56, %v2047_v43 }
0x11c1   : > { %v2066_v58 = vmul.f32 %v2062_v57, %v2047_v43 }
0x11c2   : > { %v2049_v10 = vpop.f32.mrf.mxu2 }
0x11c3   : > { %v2050_v40 = vadd.f32 %v4602_v17, %v2049_v10  ;;  %v2070_v60 = vadd.f32 %v2066_v58, %v2047_v43 }
0x11c5   : > { %v2059_v63 = vmul.f32 0.044715, %v2050_v40  ;;  %v2074_v46 = vmul.f32 0.7978846, %v2070_v60  ;;  %v2055_v35 = vmul.f32 0.5, %v2050_v40 }
0x11c7   : > { %4759 = vtanh.f32 %v2074_v46  ;;  %v2063_v36 = vmul.f32 %v2059_v63, %v2050_v40 }
0x11c9   : > { %v2067_v0 = vmul.f32 %v2063_v36, %v2050_v40 }
0x11cb   : > { %v2071_v61 = vadd.f32 %v2067_v0, %v2050_v40 }
0x11cd   : > { %v4760_v8 = vpop.eup %4759  ;;  %v2075_v7 = vmul.f32 0.7978846, %v2071_v61 }
0x11ce   : > { %v2082_v12 = vadd.f32 1.0, %v4760_v8 }
0x11cf   : > { %4761 = vtanh.f32 %v2075_v7  ;;  %v2340_v7 = vld [vmem:[%s6697_s4 + $0x58] sm:$0xff] }
0x11d0   : > { %v2086_v1 = vmul.f32 %v2082_v12, %v2054_v11  ;;  %2463 = vmatpush.msra.mxu3 %v2340_v7  ;;  %v2339_v11 = vld [vmem:[%s6697_s4 + $0x50] sm:$0xff]  ;;  %v2338_v12 = vld [vmem:[%s6697_s4 + $0x48] sm:$0xff] }
0x11d2   : > { %4389 = vmatmul.msk.f32.gmra.mxu0 %vm1148_vm15, %v2086_v1  ;;  %2464 = vmatpush.msra.mxu3 %v2339_v11 }
0x11d4   : > { %2465 = vmatpush.msra.mxu3 %v2338_v12 }
0x11d5   : > { %v4762_v13 = vpop.eup %4761 }
0x11d6   : > { %v2083_v54 = vadd.f32 1.0, %v4762_v13  ;;  %v2337_v13 = vld [vmem:[%s6697_s4 + $0x40] sm:$0xff] }
0x11d7   : > { %2466 = vmatpush.msra.mxu3 %v2337_v13 }
0x11d8   : > { %v2087_v59 = vmul.f32 %v2083_v54, %v2055_v35 }
0x11da   : > { %4390 = vmatmul.msk.f32.gmra.mxu0 %vm1148_vm15, %v2087_v59 }
0x11f1   : > { %v2118_v53 = vpop.f32.mrf.mxu0 }
0x11f2   : > { %v2119_v6 = vadd.f32 %v4603_v51, %v2118_v53 }
0x11f4   : > { %v5828_v16 = vadd.f32 %v2119_v6, %v5726_v27 }
0x11f6   : > { %v5832_v15 = vadd.f32 %v5828_v16, %v5445_v19  ;;  %v2134_v43 = vsel %vm374_vm8, %v5828_v16, 0.0 }
0x11f8   : > { %v2341_v3 = vsel %vm374_vm8, %v5832_v15, 0.0 }
0x11f9   : > { %2342 = vadd.xlane.f32.xlu0 %v2341_v3  ;;  %v2121_v2 = vpop.f32.mrf.mxu0 }
0x11fa   : > { %v2122_v17 = vadd.f32 %v4603_v51, %v2121_v2 }
0x11fc   : > { %v5837_v18 = vadd.f32 %v2122_v17, %v5731_v33  ;;  %v4925_v33 = vld [vmem:[%s6695_s2 + $0x18] sm:$0xff] }
0x11fe   : > { %v5841_v21 = vadd.f32 %v5837_v18, %v5457_v25  ;;  %v2137_v8 = vsel %vm374_vm8, %v5837_v18, 0.0 }
0x1200   : > { %v2344_v27 = vsel %vm374_vm8, %v5841_v21, 0.0 }
0x1201   : > { %2345 = vadd.xlane.f32.xlu1 %v2344_v27 }
0x124f   : > { %v2124_v24 = vpop.f32.mrf.mxu0 }
0x1250   : > { %v2125_v49 = vadd.f32 %v4603_v51, %v2124_v24 }
0x1252   : > { %v5846_v23 = vadd.f32 %v2125_v49, %v5736_v44 }
0x1254   : > { %v2307_v28 = vmul.f32 0.0, %v5846_v23  ;;  %v2140_v1 = vsel %vm374_vm8, %v5846_v23, 0.0 }
0x1256   : > { %v5852_v37 = vadd.f32 %v4925_v33, %v2307_v28 }
0x1257   : > { %v2127_v26 = vpop.f32.mrf.mxu0 }
0x1258   : > { %v2128_v31 = vadd.f32 %v4603_v51, %v2127_v26  ;;  %v2347_v32 = vsel %vm374_vm8, %v5852_v37, 0.0 }
0x1259   : > { %2348 = vadd.xlane.f32.xlu2 %v2347_v32 }
0x125a   : > { %v5857_v47 = vadd.f32 %v2128_v31, %v5741_v52 }
0x125c   : > { %v2308_v44 = vmul.f32 0.0, %v5857_v47  ;;  %v2143_v56 = vsel %vm374_vm8, %v5857_v47, 0.0 }
0x125e   : > { %v5863_v30 = vadd.f32 %v4926_v38, %v2308_v44  ;;  %v5924_v44 = vld [vmem:[%s6695_s2 + $0x188] ss:$0 sm:$0xff] }
0x1260   : > { %v2350_v20 = vsel %vm374_vm8, %v5863_v30, 0.0 }
0x1261   : > { %2351 = vadd.xlane.f32.xlu0 %v2350_v20 }
0x126c   : > { %v2343_v45 = vpop.xlane.xlu0 %2342 }
0x126d   : > { %v2353_v50 = vmul.f32 %v2343_v45, %v5131_v4 }
0x126f   : > { %v5869_v39 = vsub.f32 %v5832_v15, %v2353_v50 }
0x1271   : > { %v2361_v52 = vmul.f32 %v5869_v39, %v5869_v39 }
0x1273   : > { %v2365_v62 = vsel %vm374_vm8, %v2361_v52, 0.0 }
0x1274   : > { %2366 = vadd.xlane.f32.xlu1 %v2365_v62  ;;  %v2346_v48 = vpop.xlane.xlu1 %2345 }
0x1275   : > { %v2354_v42 = vmul.f32 %v2346_v48, %v5131_v4 }
0x1277   : > { %v5876_v5 = vsub.f32 %v5841_v21, %v2354_v42 }
0x1279   : > { %v2362_v55 = vmul.f32 %v5876_v5, %v5876_v5 }
0x127b   : > { %v2368_v9 = vsel %vm374_vm8, %v2362_v55, 0.0 }
0x127c   : > { %2369 = vadd.xlane.f32.xlu2 %v2368_v9 }
0x1284   : > { %2135 = vadd.xlane.f32.xlu2 %v2134_v43 }
0x128c   : > { %2144 = vadd.xlane.f32.xlu2 %v2143_v56 }
0x12cc   : > { %v2349_v57 = vpop.xlane.xlu2 %2348 }
0x12cd   : > { %v2355_v58 = vmul.f32 %v2349_v57, %v5131_v4 }
0x12cf   : > { %v5887_v10 = vsub.f32 %v5852_v37, %v2355_v58 }
0x12d1   : > { %v2363_v40 = vmul.f32 %v5887_v10, %v5887_v10 }
0x12d3   : > { %v2371_v60 = vsel %vm374_vm8, %v2363_v40, 0.0 }
0x12d4   : > { %v2352_v63 = vpop.xlane.xlu0 %2351  ;;  %2372 = vadd.xlane.f32.xlu0 %v2371_v60 }
0x12d5   : > { %v2356_v46 = vmul.f32 %v2352_v63, %v5131_v4 }
0x12d7   : > { %v5894_v36 = vsub.f32 %v5863_v30, %v2356_v46 }
0x12d9   : > { %v2364_v0 = vmul.f32 %v5894_v36, %v5894_v36 }
0x12db   : > { %v2374_v61 = vsel %vm374_vm8, %v2364_v0, 0.0 }
0x12dc   : > { %2375 = vadd.xlane.f32.xlu1 %v2374_v61  ;;  %2138 = vadd.xlane.f32.xlu0 %v2137_v8 }
0x12e4   : > { %2141 = vadd.xlane.f32.xlu1 %v2140_v1 }
0x12e7   : > { %v2367_v35 = vpop.xlane.xlu1 %2366 }
0x12e8   : > { %v2377_v54 = vmul.f32 %v2367_v35, %v5131_v4 }
0x12ea   : > { %v2381_v59 = vadd.f32 1e-05, %v2377_v54 }
0x12ec   : > { %4763 = vrsqrt.f32 %v2381_v59  ;;  %vm2391_vm14 = vweird.f32 %v2381_v59 }
0x12ef   : > { %v2370_v51 = vpop.xlane.xlu2 %2369 }
0x12f0   : > { %v2378_v53 = vmul.f32 %v2370_v51, %v5131_v4 }
0x12f2   : > { %v4764_v6 = vpop.eup %4763  ;;  %v2382_v3 = vadd.f32 1e-05, %v2378_v53 }
0x12f3   : > { %v2386_v2 = vmul.f32 %v4764_v6, %v2381_v59  ;;  %vm2392_vm9 = vweird.f32 %v4764_v6 }
0x12f4   : > { %4765 = vrsqrt.f32 %v2382_v3  ;;  %vm2393_vm10 = vmor %vm2391_vm14, %vm2392_vm9  ;;  %vm2401_vm12 = vweird.f32 %v2382_v3 }
0x12f5   : > { %v2387_v17 = vmul.f32 %v4764_v6, %v2386_v2 }
0x12f7   : > { %v2388_v27 = vmul.f32 0.5, %v2387_v17  ;;  %v2136_v24 = vpop.xlane.xlu2 %2135 }
0x12f8   : > { %v2146_v49 = vmul.f32 %v2136_v24, %v5131_v4 }
0x12f9   : > { %v2389_v28 = vsub.f32 1.5, %v2388_v27 }
0x12fa   : > { %v4766_v33 = vpop.eup %4765  ;;  %v5919_v26 = vsub.f32 %v5828_v16, %v2146_v49  ;;  %v5933_v16 = vld [vmem:[%s6695_s2 + $0x189] ss:$0 sm:$0xff] }
0x12fb   : > { %v2390_v31 = vmul.f32 %v4764_v6, %v2389_v28  ;;  %v2396_v32 = vmul.f32 %v4766_v33, %v2382_v3  ;;  %vm2402_vm11 = vweird.f32 %v4766_v33 }
0x12fc   : > { %v2154_v38 = vmul.f32 %v5919_v26, %v5919_v26  ;;  %vm2403_vm0 = vmor %vm2401_vm12, %vm2402_vm11 }
0x12fd   : > { %v2394_v20 = vsel %vm2393_vm10, %v4764_v6, %v2390_v31  ;;  %v2397_v45 = vmul.f32 %v4766_v33, %v2396_v32 }
0x12fe   : > { %v2425_v50 = vmul.f32 %v2394_v20, %v5869_v39  ;;  %v2158_v52 = vsel %vm374_vm8, %v2154_v38, 0.0 }
0x12ff   : > { %v2398_v62 = vmul.f32 0.5, %v2397_v45  ;;  %2159 = vadd.xlane.f32.xlu0 %v2158_v52  ;;  %v2145_v48 = vpop.xlane.xlu2 %2144 }
0x1300   : > { %v2430_v42 = vmul.f32 %v5924_v44, %v2425_v50  ;;  %v2149_v55 = vmul.f32 %v2145_v48, %v5131_v4 }
0x1301   : > { %v2399_v9 = vsub.f32 1.5, %v2398_v62 }
0x1302   : > { %v5938_v43 = vsub.f32 %v5857_v47, %v2149_v55  ;;  %v2435_v39 = vadd.f32 %v5933_v16, %v2430_v42 }
0x1303   : > { %v2400_v56 = vmul.f32 %v4766_v33, %v2399_v9 }
0x1304   : > { %4393 = vmatmul.msk.f32.vlgmr.msra.gmra.mxu3 %vm374_vm8, %v2435_v39  ;;  %v2157_v57 = vmul.f32 %v5938_v43, %v5938_v43 }
0x1305   : > { %v2404_v58 = vsel %vm2403_vm0, %v4766_v33, %v2400_v56 }
0x1306   : > { %v2167_v40 = vsel %vm374_vm8, %v2157_v57, 0.0  ;;  %v2426_v60 = vmul.f32 %v2404_v58, %v5876_v5 }
0x1307   : > { %2168 = vadd.xlane.f32.xlu0 %v2167_v40 }
0x1308   : > { %v2431_v63 = vmul.f32 %v5924_v44, %v2426_v60 }
0x130a   : > { %v2436_v47 = vadd.f32 %v5933_v16, %v2431_v63 }
0x130c   : > { %4394 = vmatmul.msk.f32.gmra.mxu3 %vm374_vm8, %v2436_v47 }
0x1347   : > { %v2373_v46 = vpop.xlane.xlu0 %2372 }
0x1348   : > { %v2379_v0 = vmul.f32 %v2373_v46, %v5131_v4 }
0x134a   : > { %v2383_v61 = vadd.f32 1e-05, %v2379_v0 }
0x134c   : > { %4767 = vrsqrt.f32 %v2383_v61  ;;  %vm2411_vm2 = vweird.f32 %v2383_v61 }
0x134f   : > { %v2139_v8 = vpop.xlane.xlu0 %2138  ;;  %v2376_v7 = vpop.xlane.xlu1 %2375 }
0x1350   : > { %v2147_v11 = vmul.f32 %v2139_v8, %v5131_v4  ;;  %v2380_v12 = vmul.f32 %v2376_v7, %v5131_v4 }
0x1352   : > { %v4768_v1 = vpop.eup %4767  ;;  %v5953_v5 = vsub.f32 %v5837_v18, %v2147_v11  ;;  %v2384_v13 = vadd.f32 1e-05, %v2380_v12 }
0x1353   : > { %v2406_v35 = vmul.f32 %v4768_v1, %v2383_v61  ;;  %vm2412_vm1 = vweird.f32 %v4768_v1 }
0x1354   : > { %4769 = vrsqrt.f32 %v2384_v13  ;;  %v2155_v54 = vmul.f32 %v5953_v5, %v5953_v5  ;;  %vm2413_vm3 = vmor %vm2411_vm2, %vm2412_vm1  ;;  %vm2421_vm5 = vweird.f32 %v2384_v13 }
0x1355   : > { %v2407_v59 = vmul.f32 %v4768_v1, %v2406_v35 }
0x1356   : > { %v2161_v51 = vsel %vm374_vm8, %v2155_v54, 0.0 }
0x1357   : > { %v2408_v53 = vmul.f32 0.5, %v2407_v59  ;;  %2162 = vadd.xlane.f32.xlu1 %v2161_v51  ;;  %v2142_v6 = vpop.xlane.xlu1 %2141 }
0x1358   : > { %v2148_v3 = vmul.f32 %v2142_v6, %v5131_v4 }
0x1359   : > { %v2409_v2 = vsub.f32 1.5, %v2408_v53 }
0x135a   : > { %v4770_v17 = vpop.eup %4769  ;;  %v5960_v18 = vsub.f32 %v5846_v23, %v2148_v3 }
0x135b   : > { %v2410_v27 = vmul.f32 %v4768_v1, %v2409_v2  ;;  %v2416_v24 = vmul.f32 %v4770_v17, %v2384_v13  ;;  %vm2422_vm4 = vweird.f32 %v4770_v17 }
0x135c   : > { %v2156_v49 = vmul.f32 %v5960_v18, %v5960_v18  ;;  %vm2423_vm6 = vmor %vm2421_vm5, %vm2422_vm4 }
0x135d   : > { %v2414_v28 = vsel %vm2413_vm3, %v4768_v1, %v2410_v27  ;;  %v2417_v33 = vmul.f32 %v4770_v17, %v2416_v24 }
0x135e   : > { %v2164_v31 = vsel %vm374_vm8, %v2156_v49, 0.0  ;;  %v2427_v32 = vmul.f32 %v2414_v28, %v5887_v10 }
0x135f   : > { %v2418_v38 = vmul.f32 0.5, %v2417_v33  ;;  %2165 = vadd.xlane.f32.xlu2 %v2164_v31 }
0x1360   : > { %v2432_v20 = vmul.f32 %v5924_v44, %v2427_v32 }
0x1361   : > { %v2419_v45 = vsub.f32 1.5, %v2418_v38  ;;  %v4606_v38 = vld [vmem:[%s6695_s2 + $0x125] ss:$0 sm:$0xff] }
0x1362   : > { %v2437_v23 = vadd.f32 %v5933_v16, %v2432_v20 }
0x1363   : > { %v2420_v50 = vmul.f32 %v4770_v17, %v2419_v45 }
0x1364   : > { %4395 = vmatmul.msk.f32.gmra.mxu3 %vm374_vm8, %v2437_v23 }
0x1365   : > { %v2424_v52 = vsel %vm2423_vm6, %v4770_v17, %v2420_v50  ;;  %v4927_v17 = vld [vmem:[%s6695_s2 + $0x3] ss:$0 sm:$0xff] }
0x1366   : > { %v2428_v62 = vmul.f32 %v2424_v52, %v5894_v36 }
0x1368   : > { %v2433_v48 = vmul.f32 %v5924_v44, %v2428_v62 }
0x136a   : > { %v2438_v10 = vadd.f32 %v5933_v16, %v2433_v48 }
0x136c   : > { %4396 = vmatmul.msk.f32.gmra.mxu3 %vm374_vm8, %v2438_v10 }
0x1372   : > { %v2160_v9 = vpop.xlane.xlu0 %2159 }
0x1373   : > { %v2170_v39 = vmul.f32 %v2160_v9, %v5131_v4 }
0x1375   : > { %v2174_v36 = vadd.f32 1e-05, %v2170_v39 }
0x1377   : > { %4771 = vrsqrt.f32 %v2174_v36  ;;  %vm2184_vm9 = vweird.f32 %v2174_v36 }
0x137a   : > { %v2169_v8 = vpop.xlane.xlu0 %2168 }
0x137b   : > { %v2173_v13 = vmul.f32 %v2169_v8, %v5131_v4 }
0x137d   : > { %v4772_v44 = vpop.eup %4771  ;;  %v2177_v53 = vadd.f32 1e-05, %v2173_v13 }
0x137e   : > { %v2179_v56 = vmul.f32 %v4772_v44, %v2174_v36  ;;  %vm2185_vm7 = vweird.f32 %v4772_v44 }
0x137f   : > { %vm2186_vm14 = vmor %vm2184_vm9, %vm2185_vm7  ;;  %vm2214_vm4 = vweird.f32 %v2177_v53 }
0x1380   : > { %v2180_v16 = vmul.f32 %v4772_v44, %v2179_v56 }
0x1382   : > { %v2181_v60 = vmul.f32 0.5, %v2180_v16 }
0x1384   : > { %v2182_v63 = vsub.f32 1.5, %v2181_v60 }
0x1386   : > { %v2183_v46 = vmul.f32 %v4772_v44, %v2182_v63 }
0x1387   : > { %v5973_v42 = vpop.f32.mrf.mxu3 }
0x1388   : > { %v2187_v12 = vsel %vm2186_vm14, %v4772_v44, %v2183_v46 }
0x1389   : > { %v2218_v54 = vmul.f32 %v2187_v12, %v5919_v26  ;;  %v4928_v26 = vld [vmem:[%s6695_s2 + $0x4] ss:$0 sm:$0xff] }
0x138b   : > { %v2222_v27 = vmul.f32 %v4927_v17, %v2218_v54 }
0x138d   : > { %v2226_v49 = vadd.f32 %v4928_v26, %v2222_v27 }
0x138f   : > { %v5975_v55 = vpop.f32.mrf.mxu3 }
0x1390   : > { %2647 = vrot.lane.b32.xlu0 %v5975_v55, %s5002_s30 }
0x1398   : > { %2645 = vrot.lane.b32.xlu0 %v5973_v42, %s5002_s30 }
0x13ca   : > { %v2163_v0 = vpop.xlane.xlu1 %2162 }
0x13cb   : > { %v2171_v11 = vmul.f32 %v2163_v0, %v5131_v4 }
0x13cd   : > { %v2175_v59 = vadd.f32 1e-05, %v2171_v11 }
0x13cf   : > { %vm2194_vm2 = vweird.f32 %v2175_v59 }
0x13d2   : > { %v2166_v57 = vpop.xlane.xlu2 %2165 }
0x13d3   : > { %v2172_v58 = vmul.f32 %v2166_v57, %v5131_v4 }
0x13d5   : > { %v2176_v40 = vadd.f32 1e-05, %v2172_v58 }
0x13d7   : > { %4773 = vrsqrt.f32 %v2176_v40  ;;  %vm2204_vm11 = vweird.f32 %v2176_v40 }
0x13d8   : > { %4775 = vrsqrt.f32 %v2175_v59 }
0x13d9   : > { %4777 = vrsqrt.f32 %v2177_v53 }
0x13dd   : > { %v4774_v47 = vpop.eup %4773 }
0x13de   : > { %v2199_v61 = vmul.f32 %v4774_v47, %v2176_v40  ;;  %vm2205_vm10 = vweird.f32 %v4774_v47  ;;  %v4776_v33 = vpop.eup %4775 }
0x13df   : > { %vm2206_vm12 = vmor %vm2204_vm11, %vm2205_vm10  ;;  %v2189_v45 = vmul.f32 %v4776_v33, %v2175_v59  ;;  %vm2195_vm0 = vweird.f32 %v4776_v33 }
0x13e0   : > { %v2200_v7 = vmul.f32 %v4774_v47, %v2199_v61  ;;  %vm2196_vm3 = vmor %vm2194_vm2, %vm2195_vm0 }
0x13e1   : > { %v2190_v52 = vmul.f32 %v4776_v33, %v2189_v45 }
0x13e2   : > { %v2201_v1 = vmul.f32 0.5, %v2200_v7 }
0x13e3   : > { %v2191_v48 = vmul.f32 0.5, %v2190_v52 }
0x13e4   : > { %v2202_v35 = vsub.f32 1.5, %v2201_v1 }
0x13e5   : > { %v2192_v9 = vsub.f32 1.5, %v2191_v48 }
0x13e6   : > { %v2203_v51 = vmul.f32 %v4774_v47, %v2202_v35 }
0x13e7   : > { %v2474_v6 = vpop.f32.mrf.mxu3  ;;  %v2193_v36 = vmul.f32 %v4776_v33, %v2192_v9 }
0x13e8   : > { %v2207_v3 = vsel %vm2206_vm12, %v4774_v47, %v2203_v51  ;;  %2482 = vrot.lane.b32.xlu1 %v2474_v6, %s5003_s6 }
0x13e9   : > { %v2220_v2 = vmul.f32 %v2207_v3, %v5960_v18  ;;  %v4778_v18 = vpop.eup %4777  ;;  %v2197_v16 = vsel %vm2196_vm3, %v4776_v33, %v2193_v36 }
0x13ea   : > { %v2209_v50 = vmul.f32 %v4778_v18, %v2177_v53  ;;  %vm2215_vm1 = vweird.f32 %v4778_v18  ;;  %v2219_v58 = vmul.f32 %v2197_v16, %v5953_v5  ;;  %v4607_v53 = vld [vmem:[%s6695_s2 + $0x126] ss:$0 sm:$0xff] }
0x13eb   : > { %v2224_v24 = vmul.f32 %v4927_v17, %v2220_v2  ;;  %vm2216_vm5 = vmor %vm2214_vm4, %vm2215_vm1 }
0x13ec   : > { %v2210_v62 = vmul.f32 %v4778_v18, %v2209_v50  ;;  %v2223_v63 = vmul.f32 %v4927_v17, %v2219_v58 }
0x13ed   : > { %v2228_v28 = vadd.f32 %v4928_v26, %v2224_v24 }
0x13ee   : > { %v2211_v10 = vmul.f32 0.5, %v2210_v62  ;;  %v2227_v46 = vadd.f32 %v4928_v26, %v2223_v63 }
0x13ef   : > { %v2477_v31 = vpop.f32.mrf.mxu3  ;;  %v2230_v32 = vsub.f32 %v2226_v49, %v2228_v28 }
0x13f0   : > { %2639 = vrot.lane.b32.xlu1 %v5975_v55, %s5004_s7  ;;  %2484 = vrot.lane.b32.xlu2 %v2477_v31, %s5003_s6  ;;  %v2212_v39 = vsub.f32 1.5, %v2211_v10 }
0x13f1   : > { %v2232_v20 = vmul.f32 %v2230_v32, %v2230_v32 }
0x13f2   : > { %v2213_v56 = vmul.f32 %v4778_v18, %v2212_v39 }
0x13f3   : > { %v2235_v23 = vmul.f32 %v4606_v38, %v2232_v20 }
0x13f4   : > { %v2217_v57 = vsel %vm2216_vm5, %v4778_v18, %v2213_v56 }
0x13f5   : > { %v2221_v60 = vmul.f32 %v2217_v57, %v5938_v43  ;;  %v2237_v35 = vsel %vm374_vm8, %v2235_v23, 0.0 }
0x13f7   : > { %v2225_v47 = vmul.f32 %v4927_v17, %v2221_v60 }
0x13f8   : > { %2499 = vrot.lane.b32.xlu1 %v5975_v55, %s5001_s26  ;;  %2637 = vrot.lane.b32.xlu2 %v5973_v42, %s5004_s7 }
0x13f9   : > { %v2229_v0 = vadd.f32 %v4928_v26, %v2225_v47 }
0x13fb   : > { %v2231_v61 = vsub.f32 %v2227_v46, %v2229_v0 }
0x13fd   : > { %v2233_v8 = vmul.f32 %v2231_v61, %v2231_v61 }
0x13ff   : > { %v2236_v7 = vmul.f32 %v4606_v38, %v2233_v8 }
0x1401   : > { %v2240_v11 = vsel %vm374_vm8, %v2236_v7, 0.0 }
0x1402   : > { %v2648_v44 = vpop.permute.xlu0 %2647 }
0x1403   : > { %4407 = vmatpush.xpose.msk.msrb.mxu0 %vm621_vm13, %v2648_v44 }
0x140a   : > { %v2646_v40 = vpop.permute.xlu0 %2645 }
0x140b   : > { %4408 = vmatpush.xpose.msk.msrb.mxu0 %vm621_vm13, %v2646_v40 }
0x1422   : > { %2241 = vadd.xlane.f32.xlu1 %v2240_v11 }
0x144a   : > { %v2485_v12 = vpop.permute.xlu2 %2484 }
0x144b   : > { %2643 = vrot.lane.b32.xlu2 %v2485_v12, %s5004_s7 }
0x1452   : > { %v2638_v1 = vpop.permute.xlu2 %2637 }
0x1453   : > { %4409 = vmatmul.msk.f32.vlgmr.msrb.gmra.mxu0 %vm621_vm13, %v2638_v1 }
0x145a   : > { %v2483_v5 = vpop.permute.xlu1 %2482 }
0x145b   : > { %2641 = vrot.lane.b32.xlu0 %v2483_v5, %s5004_s7 }
0x1462   : > { %v2640_v43 = vpop.permute.xlu1 %2639 }
0x1463   : > { %2497 = vrot.lane.b32.xlu0 %v5973_v42, %s5001_s26  ;;  %4410 = vmatmul.msk.f32.gmra.mxu0 %vm621_vm13, %v2640_v43 }
0x146a   : > { %v2500_v13 = vpop.permute.xlu1 %2499 }
0x146b   : > { %4397 = vmatpush.xpose.msk.msrb.mxu1 %vm621_vm13, %v2500_v13 }
0x1474   : > { %2238 = vadd.xlane.f32.xlu2 %v2237_v35 }
0x1495   : > { %v2242_v3 = vpop.xlane.xlu1 %2241 }
0x1496   : > { %v2245_v2 = vadd.f32 %v4607_v53, %v2242_v3 }
0x1498   : > { %v4392_v17 = vmul.f32 -1.442695, %v2245_v2 }
0x149a   : > { %4779 = vpow2.f32 %v4392_v17 }
0x14a0   : > { %v4780_v33 = vpop.eup %4779 }
0x14a1   : > { %v2253_v32 = vadd.f32 1.0, %v4780_v33 }
0x14a3   : > { %v2280_v58 = vand.u32 2147483648, %v2253_v32  ;;  %vm2274_vm11 = vweird.f32 %v2253_v32  ;;  %v2278_v40 = vand.u32 2147483647, %v2253_v32 }
0x14a5   : > { %v2644_v59 = vpop.permute.xlu2 %2643  ;;  %v2281_v63 = vor.u32 1.1754944e-38, %v2280_v58  ;;  %vm2279_vm0 = vcmp.eq.f32.partialorder %v2278_v40, 8.507059e+37 }
0x14cd   : > { %v2642_v54 = vpop.permute.xlu0 %2641 }
0x14ce   : > { %4411 = vmatmul.msk.f32.gmra.mxu0 %vm621_vm13, %v2642_v54 }
0x14d0   : > { %v2678_v6 = vpop.f32.mrf.mxu0 }
0x14d1   : > { %v2690_v46 = vmul.f32 0.25, %v2678_v6 }
0x14d3   : > { %v2694_v0 = vsel %vm621_vm13, %v2690_v46, -inf }
0x14d5   : > { %v2498_v51 = vpop.permute.xlu0 %2497 }
0x14d6   : > { %4398 = vmatpush.xpose.msk.msrb.mxu1 %vm621_vm13, %v2498_v51  ;;  %4412 = vmatmul.msk.f32.gmra.mxu0 %vm621_vm13, %v2644_v59 }
0x14d9   : > { %4399 = vmatmul.msk.f32.vlgmr.msrb.gmra.mxu1 %vm621_vm13, %v5973_v42 }
0x14e0   : > { %v2681_v27 = vpop.f32.mrf.mxu0 }
0x14e1   : > { %v6025_v24 = vmul.f32 0.25, %v2681_v27  ;;  %4400 = vmatmul.msk.f32.gmra.mxu1 %vm621_vm13, %v5975_v55 }
0x14e3   : > { %v2697_v26 = vsel %vm621_vm13, %v6025_v24, -inf }
0x14e4   : > { %2698 = vmax.xlane.f32.xlu2 %v2697_v26 }
0x14e7   : > { %v2239_v49 = vpop.xlane.xlu2 %2238 }
0x14e8   : > { %v2244_v28 = vadd.f32 %v4607_v53, %v2239_v49 }
0x14e9   : > { %4401 = vmatmul.msk.f32.gmra.mxu1 %vm621_vm13, %v2483_v5 }
0x14ea   : > { %v4391_v31 = vmul.f32 -1.442695, %v2244_v28 }
0x14ec   : > { %4781 = vpow2.f32 %v4391_v31 }
0x14ed   : > { %4783 = vrcp.f32 %v2253_v32 }
0x14f1   : > { %4402 = vmatmul.msk.f32.gmra.mxu1 %vm621_vm13, %v2485_v12 }
0x14f2   : > { %v4782_v18 = vpop.eup %4781 }
0x14f3   : > { %v2252_v38 = vadd.f32 1.0, %v4782_v18  ;;  %v4784_v20 = vpop.eup %4783 }
0x14f4   : > { %v2270_v45 = vmul.f32 %v4784_v20, %v2253_v32  ;;  %vm2275_vm10 = vweird.f32 %v4784_v20 }
0x14f5   : > { %4785 = vrcp.f32 %v2252_v38  ;;  %v2265_v48 = vand.u32 2147483648, %v2252_v38  ;;  %v2263_v9 = vand.u32 2147483647, %v2252_v38  ;;  %vm2259_vm7 = vweird.f32 %v2252_v38  ;;  %vm2276_vm12 = vmor %vm2274_vm11, %vm2275_vm10 }
0x14f6   : > { %v2271_v62 = vsub.f32 1.0, %v2270_v45 }
0x14f7   : > { %v2266_v44 = vor.u32 1.1754944e-38, %v2265_v48  ;;  %vm2264_vm14 = vcmp.eq.f32.partialorder %v2263_v9, 8.507059e+37 }
0x14f8   : > { %v2272_v36 = vmul.f32 %v4784_v20, %v2271_v62 }
0x14fa   : > { %v2273_v57 = vadd.f32 %v4784_v20, %v2272_v36 }
0x14fb   : > { %v4786_v23 = vpop.eup %4785 }
0x14fc   : > { %v2255_v50 = vmul.f32 %v4786_v23, %v2252_v38  ;;  %vm2260_vm6 = vweird.f32 %v4786_v23  ;;  %v2277_v60 = vsel %vm2276_vm12, %v4784_v20, %v2273_v57 }
0x14fd   : > { %vm2261_vm9 = vmor %vm2259_vm7, %vm2260_vm6  ;;  %v2282_v47 = vsel %vm2279_vm0, %v2281_v63, %v2277_v60 }
0x14fe   : > { %v2256_v52 = vsub.f32 1.0, %v2255_v50 }
0x1500   : > { %v2257_v10 = vmul.f32 %v4786_v23, %v2256_v52 }
0x1502   : > { %v2258_v39 = vadd.f32 %v4786_v23, %v2257_v10 }
0x1504   : > { %v2262_v56 = vsel %vm2261_vm9, %v4786_v23, %v2258_v39 }
0x1505   : > { %v2267_v16 = vsel %vm2264_vm14, %v2266_v44, %v2262_v56  ;;  %v4562_v56 = vpack.i.bf16 %v5973_v42, %v5975_v55 }
0x1506   : > { %2286 = vperm.xlu0 %4551, %v2267_v16  }
0x150e   : > { %2291 = vperm.xlu0 %4551, %v2282_v47  }
0x1538   : > { %2695 = vmax.xlane.f32.xlu0 %v2694_v0 }
0x154b   : > { %v2684_v6 = vpop.f32.mrf.mxu0 }
0x1553   : > { %v2687_v33 = vpop.f32.mrf.mxu0 }
0x1556   : > { %v2530_v61 = vpop.f32.mrf.mxu1 }
0x1557   : > { %v2542_v23 = vmul.f32 0.25, %v2530_v61  ;;  %v2699_v10 = vpop.xlane.xlu2 %2698 }
0x1558   : > { %v2707_v36 = vsub.f32 %v6025_v24, %v2699_v10 }
0x1559   : > { %v2546_v62 = vsel %vm621_vm13, %v2542_v23, -inf }
0x155a   : > { %v2712_v16 = vmul.f32 1.442695, %v2707_v36 }
0x155e   : > { %v2533_v8 = vpop.f32.mrf.mxu1 }
0x155f   : > { %v2543_v7 = vmul.f32 0.25, %v2533_v8 }
0x1561   : > { %v2549_v11 = vsel %vm621_vm13, %v2543_v7, -inf }
0x1562   : > { %2550 = vmax.xlane.f32.xlu2 %v2549_v11 }
0x1566   : > { %v2536_v27 = vpop.f32.mrf.mxu1 }
0x156e   : > { %v2539_v50 = vpop.f32.mrf.mxu1 }
0x1578   : > { %v2287_v12 = vpop.permute.xlu0 %2286 }
0x1579   : > { %v2294_v1 = vmul.f32 %v5665_v22, %v2287_v12 }
0x157b   : > { %v2296_v13 = vsel %vm621_vm13, %v2294_v1, 0.0 }
0x1580   : > { %v2292_v5 = vpop.permute.xlu0 %2291 }
0x1581   : > { %v2295_v43 = vmul.f32 %v5667_v14, %v2292_v5 }
0x1583   : > { %v2297_v35 = vsel %vm621_vm13, %v2295_v43, 0.0 }
0x1584   : > { %v2298_v54 = vadd.f32 %v2297_v35, %v2296_v13 }
0x1586   : > { %v2299_v59 = vrot.slane %v2298_v54, 4 }
0x1588   : > { %v2300_v51 = vadd.f32 %v2299_v59, %v2298_v54 }
0x158a   : > { %v2301_v53 = vrot.slane %v2300_v51, 2 }
0x158c   : > { %v2302_v3 = vadd.f32 %v2301_v53, %v2300_v51 }
0x158e   : > { %v2303_v2 = vrot.slane %v2302_v3, 1 }
0x1590   : > { %v2304_v17 = vadd.f32 %v2303_v2, %v2302_v3 }
0x1592   : > { %v2486_v26 = vsub.f32 1.0, %v2304_v17 }
0x1594   : > { %v2494_v49 = vmul.f32 %v2486_v26, %v5276_v41  ;;  %v2493_v28 = vmul.f32 %v2486_v26, %v5271_v34 }
0x1596   : > { %v2693_v31 = vmul.f32 %v2687_v33, %v2494_v49  ;;  %v2692_v32 = vmul.f32 %v2684_v6, %v2493_v28  ;;  %v2544_v18 = vmul.f32 %v2536_v27, %v2493_v28  ;;  %v2545_v52 = vmul.f32 %v2539_v50, %v2494_v49 }
0x1598   : > { %v2703_v38 = vsel %vm621_vm13, %v2693_v31, -inf  ;;  %v2700_v20 = vsel %vm621_vm13, %v2692_v32, -inf  ;;  %v2552_v45 = vsel %vm621_vm13, %v2544_v18, -inf  ;;  %v2555_v48 = vsel %vm621_vm13, %v2545_v52, -inf }
0x1599   : > { %2704 = vmax.xlane.f32.xlu2 %v2703_v38  ;;  %2701 = vmax.xlane.f32.xlu1 %v2700_v20 }
0x159a   : > { %2553 = vmax.xlane.f32.xlu0 %v2552_v45 }
0x15a1   : > { %2547 = vmax.xlane.f32.xlu1 %v2546_v62 }
0x15a2   : > { %2556 = vmax.xlane.f32.xlu0 %v2555_v48 }
0x15ab   : > { %v2696_v9 = vpop.xlane.xlu0 %2695 }
0x15ac   : > { %v2706_v39 = vsub.f32 %v2690_v46, %v2696_v9 }
0x15ae   : > { %v2710_v44 = vmul.f32 1.442695, %v2706_v39 }
0x15b0   : > { %4787 = vpow2.f32 %v2710_v44 }
0x15b1   : > { %4563 = vrot.lane.b32.xlu2 %v4562_v56, %s6703_s9  ;;  %4789 = vpow2.f32 %v2712_v16  ;;  %s4955_s9 = scalar_lea.hbm %s6698_s5, 64 }
0x15b6   : > { %v4788_v57 = vpop.eup %4787 }
0x15b7   : > { %v2718_v58 = vsel %vm621_vm13, %v4788_v57, 0.0  ;;  %v4790_v40 = vpop.eup %4789 }
0x15b8   : > { %2719 = vadd.xlane.f32.xlu1 %v2718_v58  ;;  %v2721_v60 = vsel %vm621_vm13, %v4790_v40, 0.0 }
0x15c0   : > { %2722 = vadd.xlane.f32.xlu1 %v2721_v60 }
0x15d5   : > { %v2551_v63 = vpop.xlane.xlu2 %2550 }
0x15d6   : > { %v2559_v47 = vsub.f32 %v2543_v7, %v2551_v63 }
0x15d8   : > { %v2564_v24 = vmul.f32 1.442695, %v2559_v47 }
0x15da   : > { %4791 = vpow2.f32 %v2564_v24 }
0x15e0   : > { %v6052_v46 = vpop.eup %4791 }
0x15e1   : > { %v2573_v42 = vsel %vm621_vm13, %v6052_v46, 0.0 }
0x15e2   : > { %2574 = vadd.xlane.f32.xlu2 %v2573_v42 }
0x160c   : > { %v2705_v55 = vpop.xlane.xlu2 %2704  ;;  %v2702_v0 = vpop.xlane.xlu1 %2701 }
0x160d   : > { %v2709_v61 = vsub.f32 %v2693_v31, %v2705_v55  ;;  %v2708_v8 = vsub.f32 %v2692_v32, %v2702_v0  ;;  %v2554_v1 = vpop.xlane.xlu0 %2553 }
0x160e   : > { %v2560_v53 = vsub.f32 %v2544_v18, %v2554_v1  ;;  %v2315_v1 = vld [vmem:[%s6695_s2 + $0x138] sm:$0xff] }
0x160f   : > { %v2716_v11 = vmul.f32 1.442695, %v2709_v61  ;;  %v2714_v12 = vmul.f32 1.442695, %v2708_v8 }
0x1610   : > { %v2566_v2 = vmul.f32 1.442695, %v2560_v53 }
0x1611   : > { %4793 = vpow2.f32 %v2716_v11 }
0x1612   : > { %4795 = vpow2.f32 %v2714_v12 }
0x1614   : > { %v4564_v5 = vpop.permute.xlu2 %4563  ;;  %v2548_v43 = vpop.xlane.xlu1 %2547 }
0x1615   : > { %v4565_v7 = vunpack.i.l.bf16 %v4564_v5  ;;  %v2558_v13 = vsub.f32 %v2542_v23, %v2548_v43  ;;  %v4566_v54 = vunpack.i.h.bf16 %v4564_v5  ;;  %v2557_v17 = vpop.xlane.xlu0 %2556  ;;  %v2314_v5 = vld [vmem:[%s6695_s2 + $0x130] sm:$0xff]  ;;  %v2313_v43 = vld [vmem:[%s6695_s2 + $0x128] sm:$0xff] }
0x1616   : > { %v2561_v26 = vsub.f32 %v2545_v52, %v2557_v17 }
0x1617   : > { %v4794_v35 = vpop.eup %4793  ;;  %v2562_v59 = vmul.f32 1.442695, %v2558_v13  ;;  %2770 = vmatpush.msrb.mxu3 %v4565_v7 }
0x1618   : > { %v4796_v51 = vpop.eup %4795  ;;  %v2727_v6 = vsel %vm621_vm13, %v4794_v35, 0.0  ;;  %v2568_v28 = vmul.f32 1.442695, %v2561_v26 }
0x1619   : > { %4797 = vpow2.f32 %v2562_v59  ;;  %2771 = vmatpush.msrb.mxu3 %v4566_v54  ;;  %2728 = vadd.xlane.f32.xlu0 %v2727_v6  ;;  %v2724_v3 = vsel %vm621_vm13, %v4796_v51, 0.0 }
0x161a   : > { %2725 = vadd.xlane.f32.xlu1 %v2724_v3  ;;  %4799 = vpow2.f32 %v2566_v2 }
0x161b   : > { %4801 = vpow2.f32 %v2568_v28 }
0x161f   : > { %v4798_v27 = vpop.eup %4797 }
0x1620   : > { %v2570_v49 = vsel %vm621_vm13, %v4798_v27, 0.0  ;;  %v4800_v33 = vpop.eup %4799 }
0x1621   : > { %v2576_v31 = vsel %vm621_vm13, %v4800_v33, 0.0  ;;  %v4802_v18 = vpop.eup %4801 }
0x1622   : > { %2571 = vadd.xlane.f32.xlu1 %v2570_v49  ;;  %v2579_v38 = vsel %vm621_vm13, %v4802_v18, 0.0 }
0x162a   : > { %2577 = vadd.xlane.f32.xlu1 %v2576_v31 }
0x162b   : > { %v2720_v32 = vpop.xlane.xlu1 %2719 }
0x162c   : > { %4803 = vrcp.f32 %v2720_v32 }
0x162d   : > { %4568 = vrot.lane.b32.xlu0 %v4562_v56, %s6707_s14 }
0x1632   : > { %v4804_v20 = vpop.eup %4803  ;;  %2580 = vadd.xlane.f32.xlu1 %v2579_v38 }
0x1633   : > { %v2734_v45 = vmul.f32 %v4804_v20, %v4788_v57  ;;  %v2723_v23 = vpop.xlane.xlu1 %2722  ;;  %v2807_v20 = vmul.f32 0.0, %v5852_v37 }
0x1634   : > { %4805 = vrcp.f32 %v2723_v23 }
0x1635   : > { %4413 = vmatmul.msk.f32.vlgmr.msrb.gmra.mxu3 %vm621_vm13, %v2734_v45 }
0x163a   : > { %v4806_v50 = vpop.eup %4805 }
0x163b   : > { %v2735_v52 = vmul.f32 %v4806_v50, %v4790_v40  ;;  %v2808_v50 = vmul.f32 0.0, %v5863_v30 }
0x163d   : > { %4414 = vmatmul.msk.f32.gmra.mxu3 %vm621_vm13, %v2735_v52 }
0x1655   : > { %v2575_v56 = vpop.xlane.xlu2 %2574 }
0x168c   : > { %v2729_v48 = vpop.xlane.xlu0 %2728 }
0x168d   : > { %v2726_v62 = vpop.xlane.xlu1 %2725 }
0x168e   : > { %4807 = vrcp.f32 %v2726_v62 }
0x168f   : > { %4809 = vrcp.f32 %v2729_v48 }
0x1694   : > { %v4808_v10 = vpop.eup %4807 }
0x1695   : > { %v2736_v9 = vmul.f32 %v4808_v10, %v4796_v51  ;;  %v2572_v39 = vpop.xlane.xlu1 %2571  ;;  %v4810_v36 = vpop.eup %4809 }
0x1696   : > { %4811 = vrcp.f32 %v2572_v39  ;;  %v2737_v44 = vmul.f32 %v4810_v36, %v4794_v35 }
0x1697   : > { %4415 = vmatmul.msk.f32.gmra.mxu3 %vm621_vm13, %v2736_v9  ;;  %4813 = vrcp.f32 %v2575_v56 }
0x169c   : > { %v4812_v57 = vpop.eup %4811 }
0x169d   : > { %v2586_v60 = vmul.f32 %v4812_v57, %v4798_v27  ;;  %v2578_v63 = vpop.xlane.xlu1 %2577  ;;  %v4814_v47 = vpop.eup %4813 }
0x169e   : > { %4815 = vrcp.f32 %v2578_v63  ;;  %v2587_v24 = vmul.f32 %v4814_v47, %v6052_v46  ;;  %v2316_v46 = vld [vmem:[%s6695_s2 + $0x140] sm:$0xff] }
0x169f   : > { %4416 = vmatmul.msk.f32.gmra.mxu3 %vm621_vm13, %v2737_v44  ;;  %v4569_v16 = vpop.permute.xlu0 %4568  ;;  %2833 = vmatpush.msra.mxu1 %v2316_v46 }
0x16a0   : > { %v4570_v58 = vunpack.i.l.bf16 %v4569_v16  ;;  %v4571_v40 = vunpack.i.h.bf16 %v4569_v16 }
0x16a1   : > { %2834 = vmatpush.msra.mxu1 %v2315_v1 }
0x16a2   : > { %2622 = vmatpush.msrb.mxu2 %v4570_v58 }
0x16a3   : > { %2835 = vmatpush.msra.mxu1 %v2314_v5 }
0x16a4   : > { %2623 = vmatpush.msrb.mxu2 %v4571_v40  ;;  %v4816_v55 = vpop.eup %4815 }
0x16a5   : > { %4403 = vmatmul.msk.f32.vlgmr.msrb.gmra.mxu2 %vm621_vm13, %v2586_v60  ;;  %v2581_v42 = vpop.xlane.xlu1 %2580  ;;  %v2588_v0 = vmul.f32 %v4816_v55, %v4800_v33  ;;  %2836 = vmatpush.msra.mxu1 %v2313_v43 }
0x16a6   : > { %4817 = vrcp.f32 %v2581_v42 }
0x16ac   : > { %v4818_v61 = vpop.eup %4817 }
0x16ad   : > { %4404 = vmatmul.msk.f32.gmra.mxu2 %vm621_vm13, %v2587_v24  ;;  %v2589_v11 = vmul.f32 %v4818_v61, %v4802_v18  ;;  %v2335_v61 = vld [vmem:[%s6696_s3 + $0x68] sm:$0xff] }
0x16ae   : > { %2973 = vmatpush.msra.mxu2 %v2335_v61 }
0x16b5   : > { %4405 = vmatmul.msk.f32.gmra.mxu2 %vm621_vm13, %v2588_v0 }
0x16b8   : > { %v2773_v8 = vpop.f32.mrf.mxu3 }
0x16b9   : > { %2789 = vrot.lane.b32.xlu1 %v2773_v8, %s6706_s17  ;;  %v2334_v8 = vld [vmem:[%s6696_s3 + $0x60] sm:$0xff] }
0x16ba   : > { %2974 = vmatpush.msra.mxu2 %v2334_v8 }
0x16bd   : > { %4406 = vmatmul.msk.f32.gmra.mxu2 %vm621_vm13, %v2589_v11  ;;  %v2333_v11 = vld [vmem:[%s6696_s3 + $0x58] sm:$0xff] }
0x16be   : > { %2975 = vmatpush.msra.mxu2 %v2333_v11 }
0x16c0   : > { %v2776_v12 = vpop.f32.mrf.mxu3 }
0x16c1   : > { %2791 = vrot.lane.b32.xlu0 %v2776_v12, %s6706_s17  ;;  %v2332_v12 = vld [vmem:[%s6696_s3 + $0x50] sm:$0xff] }
0x16c2   : > { %2976 = vmatpush.msra.mxu2 %v2332_v12 }
0x171a   : > { %v2779_v7 = vpop.f32.mrf.mxu3 }
0x171b   : > { %2793 = vrot.lane.b32.xlu0 %v2779_v7, %s6706_s17 }
0x1722   : > { %v2782_v13 = vpop.f32.mrf.mxu3 }
0x1723   : > { %2795 = vrot.lane.b32.xlu0 %v2782_v13, %s6706_s17 }
0x1728   : > { %v2625_v35 = vpop.f32.mrf.mxu2 }
0x172b   : > { %v2790_v54 = vpop.permute.xlu1 %2789 }
0x172c   : > { %v2801_v59 = vsel %vm621_vm13, %v2625_v35, %v2790_v54 }
0x172d   : > { %4417 = vmatmul.msk.f32.vlgmr.msra.gmra.mxu1 %vm374_vm8, %v2801_v59 }
0x1730   : > { %v2628_v51 = vpop.f32.mrf.mxu2 }
0x1733   : > { %v2792_v53 = vpop.permute.xlu0 %2791 }
0x1734   : > { %v2802_v6 = vsel %vm621_vm13, %v2628_v51, %v2792_v53 }
0x1735   : > { %4418 = vmatmul.msk.f32.gmra.mxu1 %vm374_vm8, %v2802_v6 }
0x1738   : > { %v2631_v3 = vpop.f32.mrf.mxu2 }
0x1740   : > { %v2634_v27 = vpop.f32.mrf.mxu2 }
0x178d   : > { %v2794_v2 = vpop.permute.xlu0 %2793 }
0x178e   : > { %v2803_v17 = vsel %vm621_vm13, %v2631_v3, %v2794_v2 }
0x178f   : > { %4419 = vmatmul.msk.f32.gmra.mxu1 %vm374_vm8, %v2803_v17  ;;  %v4608_v17 = vld [vmem:[%s6695_s2 + $0x18a] ss:$0 sm:$0xff] }
0x1795   : > { %v2796_v26 = vpop.permute.xlu0 %2795 }
0x1796   : > { %v2804_v49 = vsel %vm621_vm13, %v2634_v27, %v2796_v26 }
0x1797   : > { %4420 = vmatmul.msk.f32.gmra.mxu1 %vm374_vm8, %v2804_v49 }
0x17aa   : > { %v2838_v28 = vpop.f32.mrf.mxu1 }
0x17ab   : > { %v6096_v33 = vadd.f32 %v2838_v28, %v5832_v15  ;;  %v4609_v28 = vld [vmem:[%s6695_s2 + $0x18b] ss:$0 sm:$0xff] }
0x17ad   : > { %v2850_v31 = vsel %vm374_vm8, %v6096_v33, 0.0 }
0x17ae   : > { %2851 = vadd.xlane.f32.xlu2 %v2850_v31 }
0x17b2   : > { %v2841_v32 = vpop.f32.mrf.mxu1 }
0x17b3   : > { %v6101_v18 = vadd.f32 %v2841_v32, %v5841_v21 }
0x17b5   : > { %v2853_v38 = vsel %vm374_vm8, %v6101_v18, 0.0 }
0x17b6   : > { %2854 = vadd.xlane.f32.xlu0 %v2853_v38 }
0x180c   : > { %v2844_v45 = vpop.f32.mrf.mxu1 }
0x180d   : > { %v6106_v23 = vadd.f32 %v2844_v45, %v2807_v20 }
0x180f   : > { %v2856_v15 = vsel %vm374_vm8, %v6106_v23, 0.0 }
0x1810   : > { %2857 = vadd.xlane.f32.xlu1 %v2856_v15 }
0x1814   : > { %v2847_v52 = vpop.f32.mrf.mxu1 }
0x1815   : > { %v6111_v62 = vadd.f32 %v2847_v52, %v2808_v50 }
0x1817   : > { %v2859_v21 = vsel %vm374_vm8, %v6111_v62, 0.0 }
0x1818   : > { %2860 = vadd.xlane.f32.xlu2 %v2859_v21 }
0x1821   : > { %v2852_v48 = vpop.xlane.xlu2 %2851 }
0x1822   : > { %v2862_v10 = vmul.f32 %v2852_v48, %v5131_v4 }
0x1824   : > { %v2866_v37 = vsub.f32 %v6096_v33, %v2862_v10 }
0x1826   : > { %v2870_v9 = vmul.f32 %v2866_v37, %v2866_v37 }
0x1828   : > { %v2874_v39 = vsel %vm374_vm8, %v2870_v9, 0.0 }
0x1829   : > { %v2855_v36 = vpop.xlane.xlu0 %2854  ;;  %2875 = vadd.xlane.f32.xlu2 %v2874_v39 }
0x182a   : > { %v2863_v44 = vmul.f32 %v2855_v36, %v5131_v4 }
0x182c   : > { %v2867_v30 = vsub.f32 %v6101_v18, %v2863_v44 }
0x182e   : > { %v2871_v56 = vmul.f32 %v2867_v30, %v2867_v30 }
0x1830   : > { %v2877_v16 = vsel %vm374_vm8, %v2871_v56, 0.0 }
0x1831   : > { %2878 = vadd.xlane.f32.xlu2 %v2877_v16 }
0x1883   : > { %v2858_v57 = vpop.xlane.xlu1 %2857 }
0x1884   : > { %v2864_v58 = vmul.f32 %v2858_v57, %v5131_v4 }
0x1886   : > { %v6123_v40 = vsub.f32 %v6106_v23, %v2864_v58 }
0x1888   : > { %v2872_v60 = vmul.f32 %v6123_v40, %v6123_v40 }
0x188a   : > { %v2880_v63 = vsel %vm374_vm8, %v2872_v60, 0.0 }
0x188b   : > { %2881 = vadd.xlane.f32.xlu2 %v2880_v63  ;;  %v2861_v47 = vpop.xlane.xlu2 %2860 }
0x188c   : > { %v2865_v24 = vmul.f32 %v2861_v47, %v5131_v4 }
0x188e   : > { %v6130_v42 = vsub.f32 %v6111_v62, %v2865_v24 }
0x1890   : > { %v2873_v55 = vmul.f32 %v6130_v42, %v6130_v42 }
0x1892   : > { %v2883_v0 = vsel %vm374_vm8, %v2873_v55, 0.0 }
0x1893   : > { %2884 = vadd.xlane.f32.xlu2 %v2883_v0 }
0x189c   : > { %v2876_v46 = vpop.xlane.xlu2 %2875 }
0x189d   : > { %v2886_v1 = vmul.f32 %v2876_v46, %v5131_v4 }
0x189f   : > { %v2890_v5 = vadd.f32 1e-05, %v2886_v1 }
0x18a1   : > { %4819 = vrsqrt.f32 %v2890_v5  ;;  %vm2900_vm2 = vweird.f32 %v2890_v5 }
0x18a4   : > { %v2879_v43 = vpop.xlane.xlu2 %2878 }
0x18a5   : > { %v2887_v7 = vmul.f32 %v2879_v43, %v5131_v4 }
0x18a7   : > { %v4820_v13 = vpop.eup %4819  ;;  %v2891_v35 = vadd.f32 1e-05, %v2887_v7  ;;  %v2323_v7 = vld [vmem:[%s6695_s2 + $0x178] sm:$0xff] }
0x18a8   : > { %v2895_v54 = vmul.f32 %v4820_v13, %v2890_v5  ;;  %vm2901_vm1 = vweird.f32 %v4820_v13 }
0x18a9   : > { %4821 = vrsqrt.f32 %v2891_v35  ;;  %vm2902_vm3 = vmor %vm2900_vm2, %vm2901_vm1  ;;  %vm2910_vm5 = vweird.f32 %v2891_v35 }
0x18aa   : > { %v2896_v59 = vmul.f32 %v4820_v13, %v2895_v54  ;;  %v2319_v54 = vld [vmem:[%s6695_s2 + $0x158] sm:$0xff] }
0x18ac   : > { %v2897_v51 = vmul.f32 0.5, %v2896_v59  ;;  %v2318_v59 = vld [vmem:[%s6695_s2 + $0x150] sm:$0xff] }
0x18ae   : > { %v2898_v53 = vsub.f32 1.5, %v2897_v51  ;;  %v2317_v51 = vld [vmem:[%s6695_s2 + $0x148] sm:$0xff] }
0x18af   : > { %v4822_v6 = vpop.eup %4821 }
0x18b0   : > { %v2899_v3 = vmul.f32 %v4820_v13, %v2898_v53  ;;  %v2905_v2 = vmul.f32 %v4822_v6, %v2891_v35  ;;  %vm2911_vm4 = vweird.f32 %v4822_v6  ;;  %v2320_v35 = vld [vmem:[%s6695_s2 + $0x160] sm:$0xff]  ;;  %v4610_v53 = vld [vmem:[%s6696_s3 + $0x70] ss:$0 sm:$0xff] }
0x18b1   : > { %vm2912_vm6 = vmor %vm2910_vm5, %vm2911_vm4 }
0x18b2   : > { %v2903_v27 = vsel %vm2902_vm3, %v4820_v13, %v2899_v3  ;;  %v2906_v26 = vmul.f32 %v4822_v6, %v2905_v2  ;;  %v2322_v13 = vld [vmem:[%s6695_s2 + $0x170] sm:$0xff] }
0x18b3   : > { %v2934_v49 = vmul.f32 %v2903_v27, %v2866_v37 }
0x18b4   : > { %v2907_v31 = vmul.f32 0.5, %v2906_v26 }
0x18b5   : > { %v2939_v32 = vmul.f32 %v4608_v17, %v2934_v49 }
0x18b6   : > { %v2908_v38 = vsub.f32 1.5, %v2907_v31 }
0x18b7   : > { %v2944_v20 = vadd.f32 %v4609_v28, %v2939_v32 }
0x18b8   : > { %v2909_v45 = vmul.f32 %v4822_v6, %v2908_v38 }
0x18b9   : > { %4421 = vmatmul.msk.f32.vlgmr.msra.gmra.mxu2 %vm374_vm8, %v2944_v20 }
0x18ba   : > { %v2913_v15 = vsel %vm2912_vm6, %v4822_v6, %v2909_v45 }
0x18bb   : > { %v2935_v50 = vmul.f32 %v2913_v15, %v2867_v30 }
0x18bd   : > { %v2940_v52 = vmul.f32 %v4608_v17, %v2935_v50 }
0x18bf   : > { %v2945_v21 = vadd.f32 %v4609_v28, %v2940_v52 }
0x18c1   : > { %4422 = vmatmul.msk.f32.gmra.mxu2 %vm374_vm8, %v2945_v21 }
0x18fe   : > { %v2882_v48 = vpop.xlane.xlu2 %2881 }
0x18ff   : > { %v2888_v10 = vmul.f32 %v2882_v48, %v5131_v4 }
0x1901   : > { %v2892_v37 = vadd.f32 1e-05, %v2888_v10 }
0x1903   : > { %4823 = vrsqrt.f32 %v2892_v37  ;;  %vm2920_vm9 = vweird.f32 %v2892_v37 }
0x1906   : > { %v2885_v9 = vpop.xlane.xlu2 %2884 }
0x1907   : > { %v2889_v39 = vmul.f32 %v2885_v9, %v5131_v4 }
0x1909   : > { %v4824_v36 = vpop.eup %4823  ;;  %v2893_v44 = vadd.f32 1e-05, %v2889_v39 }
0x190a   : > { %v2915_v56 = vmul.f32 %v4824_v36, %v2892_v37  ;;  %vm2921_vm7 = vweird.f32 %v4824_v36 }
0x190b   : > { %4825 = vrsqrt.f32 %v2893_v44  ;;  %vm2922_vm14 = vmor %vm2920_vm9, %vm2921_vm7  ;;  %vm2930_vm11 = vweird.f32 %v2893_v44 }
0x190c   : > { %v2916_v16 = vmul.f32 %v4824_v36, %v2915_v56 }
0x190e   : > { %v2917_v57 = vmul.f32 0.5, %v2916_v16 }
0x1910   : > { %v2918_v58 = vsub.f32 1.5, %v2917_v57 }
0x1911   : > { %v4826_v30 = vpop.eup %4825 }
0x1912   : > { %v2919_v60 = vmul.f32 %v4824_v36, %v2918_v58  ;;  %v2925_v63 = vmul.f32 %v4826_v30, %v2893_v44  ;;  %vm2931_vm10 = vweird.f32 %v4826_v30 }
0x1913   : > { %vm2932_vm12 = vmor %vm2930_vm11, %vm2931_vm10 }
0x1914   : > { %v2923_v47 = vsel %vm2922_vm14, %v4824_v36, %v2919_v60  ;;  %v2926_v24 = vmul.f32 %v4826_v30, %v2925_v63 }
0x1915   : > { %v2936_v55 = vmul.f32 %v2923_v47, %v6123_v40  ;;  %v2324_v40 = vld [vmem:[%s6695_s2 + $0x180] sm:$0xff] }
0x1916   : > { %v2927_v0 = vmul.f32 0.5, %v2926_v24  ;;  %3047 = vmatpush.msra.mxu0 %v2324_v40 }
0x1917   : > { %v2941_v61 = vmul.f32 %v4608_v17, %v2936_v55 }
0x1918   : > { %v2928_v8 = vsub.f32 1.5, %v2927_v0  ;;  %3048 = vmatpush.msra.mxu0 %v2323_v7  ;;  %v4611_v7 = vld [vmem:[%s6695_s2 + $0x18c] ss:$0 sm:$0xff] }
0x1919   : > { %v2946_v11 = vadd.f32 %v4609_v28, %v2941_v61 }
0x191a   : > { %v2929_v12 = vmul.f32 %v4826_v30, %v2928_v8  ;;  %3049 = vmatpush.msra.mxu0 %v2322_v13 }
0x191b   : > { %4423 = vmatmul.msk.f32.gmra.mxu2 %vm374_vm8, %v2946_v11 }
0x191c   : > { %v2933_v46 = vsel %vm2932_vm12, %v4826_v30, %v2929_v12 }
0x191d   : > { %v2937_v1 = vmul.f32 %v2933_v46, %v6130_v42  ;;  %v2321_v42 = vld [vmem:[%s6695_s2 + $0x168] sm:$0xff] }
0x191e   : > { %3050 = vmatpush.msra.mxu0 %v2321_v42 }
0x191f   : > { %v2942_v5 = vmul.f32 %v4608_v17, %v2937_v1 }
0x1920   : > { %3051 = vmatpush.msra.mxu0 %v2320_v35 }
0x1921   : > { %v2947_v43 = vadd.f32 %v4609_v28, %v2942_v5 }
0x1922   : > { %3052 = vmatpush.msra.mxu0 %v2319_v54 }
0x1923   : > { %4424 = vmatmul.msk.f32.gmra.mxu2 %vm374_vm8, %v2947_v43 }
0x1924   : > { %3053 = vmatpush.msra.mxu0 %v2318_v59 }
0x1926   : > { %3054 = vmatpush.msra.mxu0 %v2317_v51 }
0x193c   : > { %v2978_v6 = vpop.f32.mrf.mxu2 }
0x193d   : > { %v2979_v3 = vadd.f32 %v4610_v53, %v2978_v6 }
0x193f   : > { %v2994_v2 = vmul.f32 0.044715, %v2979_v3  ;;  %v2990_v52 = vmul.f32 0.5, %v2979_v3 }
0x1941   : > { %v2998_v17 = vmul.f32 %v2994_v2, %v2979_v3 }
0x1943   : > { %v3002_v27 = vmul.f32 %v2998_v17, %v2979_v3 }
0x1944   : > { %v2981_v26 = vpop.f32.mrf.mxu2 }
0x1945   : > { %v3006_v49 = vadd.f32 %v3002_v27, %v2979_v3  ;;  %v2982_v28 = vadd.f32 %v4610_v53, %v2981_v26 }
0x1947   : > { %v3010_v31 = vmul.f32 0.7978846, %v3006_v49  ;;  %v2995_v32 = vmul.f32 0.044715, %v2982_v28  ;;  %v2991_v37 = vmul.f32 0.5, %v2982_v28 }
0x1949   : > { %4827 = vtanh.f32 %v3010_v31  ;;  %v2999_v38 = vmul.f32 %v2995_v32, %v2982_v28  ;;  %v4930_v32 = vld [vmem:[%s6695_s2 + $0x20] sm:$0xff] }
0x194b   : > { %v3003_v20 = vmul.f32 %v2999_v38, %v2982_v28 }
0x194d   : > { %v3007_v45 = vadd.f32 %v3003_v20, %v2982_v28 }
0x194f   : > { %v4828_v15 = vpop.eup %4827  ;;  %v3011_v50 = vmul.f32 0.7978846, %v3007_v45 }
0x1950   : > { %v3018_v21 = vadd.f32 1.0, %v4828_v15 }
0x1951   : > { %4829 = vtanh.f32 %v3011_v50 }
0x1952   : > { %v3022_v48 = vmul.f32 %v3018_v21, %v2990_v52 }
0x1954   : > { %4425 = vmatmul.msk.f32.vlgmr.msra.gmra.mxu0 %vm1148_vm15, %v3022_v48 }
0x1957   : > { %v4830_v10 = vpop.eup %4829 }
0x1958   : > { %v3019_v9 = vadd.f32 1.0, %v4830_v10 }
0x195a   : > { %v3023_v39 = vmul.f32 %v3019_v9, %v2991_v37 }
0x195c   : > { %4426 = vmatmul.msk.f32.gmra.mxu0 %vm1148_vm15, %v3023_v39 }
0x199e   : > { %v2984_v36 = vpop.f32.mrf.mxu2 }
0x199f   : > { %v2985_v44 = vadd.f32 %v4610_v53, %v2984_v36 }
0x19a1   : > { %v2996_v56 = vmul.f32 0.044715, %v2985_v44  ;;  %v2992_v11 = vmul.f32 0.5, %v2985_v44 }
0x19a3   : > { %v3000_v16 = vmul.f32 %v2996_v56, %v2985_v44 }
0x19a5   : > { %v3004_v57 = vmul.f32 %v3000_v16, %v2985_v44 }
0x19a6   : > { %v2987_v58 = vpop.f32.mrf.mxu2 }
0x19a7   : > { %v2988_v30 = vadd.f32 %v4610_v53, %v2987_v58  ;;  %v3008_v60 = vadd.f32 %v3004_v57, %v2985_v44 }
0x19a9   : > { %v2997_v63 = vmul.f32 0.044715, %v2988_v30  ;;  %v3012_v47 = vmul.f32 0.7978846, %v3008_v60  ;;  %v2993_v5 = vmul.f32 0.5, %v2988_v30 }
0x19ab   : > { %v3001_v24 = vmul.f32 %v2997_v63, %v2988_v30  ;;  %4831 = vtanh.f32 %v3012_v47 }
0x19ad   : > { %v3005_v55 = vmul.f32 %v3001_v24, %v2988_v30  ;;  %v3278_v24 = vld [vmem:[%s6697_s4 + $0x78] sm:$0xff] }
0x19ae   : > { %3401 = vmatpush.msra.mxu3 %v3278_v24 }
0x19af   : > { %v3009_v0 = vadd.f32 %v3005_v55, %v2988_v30 }
0x19b1   : > { %v4832_v61 = vpop.eup %4831  ;;  %v3013_v8 = vmul.f32 0.7978846, %v3009_v0 }
0x19b2   : > { %v3020_v12 = vadd.f32 1.0, %v4832_v61  ;;  %v3277_v61 = vld [vmem:[%s6697_s4 + $0x70] sm:$0xff] }
0x19b3   : > { %4833 = vtanh.f32 %v3013_v8  ;;  %3402 = vmatpush.msra.mxu3 %v3277_v61  ;;  %v3276_v8 = vld [vmem:[%s6697_s4 + $0x68] sm:$0xff] }
0x19b4   : > { %v3024_v46 = vmul.f32 %v3020_v12, %v2992_v11  ;;  %v3275_v11 = vld [vmem:[%s6697_s4 + $0x60] sm:$0xff] }
0x19b5   : > { %3403 = vmatpush.msra.mxu3 %v3276_v8 }
0x19b6   : > { %4427 = vmatmul.msk.f32.gmra.mxu0 %vm1148_vm15, %v3024_v46 }
0x19b7   : > { %3404 = vmatpush.msra.mxu3 %v3275_v11 }
0x19b9   : > { %v4834_v1 = vpop.eup %4833 }
0x19ba   : > { %v3021_v43 = vadd.f32 1.0, %v4834_v1 }
0x19bc   : > { %v3025_v40 = vmul.f32 %v3021_v43, %v2993_v5 }
0x19be   : > { %4428 = vmatmul.msk.f32.gmra.mxu0 %vm1148_vm15, %v3025_v40 }
0x19d1   : > { %v3056_v13 = vpop.f32.mrf.mxu0 }
0x19d2   : > { %v3057_v42 = vadd.f32 %v4611_v7, %v3056_v13 }
0x19d4   : > { %v6198_v35 = vadd.f32 %v3057_v42, %v6096_v33 }
0x19d6   : > { %v6202_v54 = vadd.f32 %v6198_v35, %v5445_v19  ;;  %v3072_v39 = vsel %vm374_vm8, %v6198_v35, 0.0 }
0x19d8   : > { %v3279_v59 = vsel %vm374_vm8, %v6202_v54, 0.0 }
0x19d9   : > { %3280 = vadd.xlane.f32.xlu0 %v3279_v59  ;;  %v3059_v51 = vpop.f32.mrf.mxu0 }
0x19da   : > { %v3060_v53 = vadd.f32 %v4611_v7, %v3059_v51 }
0x19dc   : > { %v6207_v6 = vadd.f32 %v3060_v53, %v6101_v18  ;;  %v4929_v18 = vld [vmem:[%s6695_s2 + $0x18] sm:$0xff] }
0x19de   : > { %v6211_v3 = vadd.f32 %v6207_v6, %v5457_v25  ;;  %v3075_v0 = vsel %vm374_vm8, %v6207_v6, 0.0 }
0x19e0   : > { %v3282_v33 = vsel %vm374_vm8, %v6211_v3, 0.0 }
0x19e1   : > { %3283 = vadd.xlane.f32.xlu1 %v3282_v33 }
0x1a33   : > { %v3062_v2 = vpop.f32.mrf.mxu0 }
0x1a34   : > { %v3063_v19 = vadd.f32 %v4611_v7, %v3062_v2 }
0x1a36   : > { %v6216_v17 = vadd.f32 %v3063_v19, %v6106_v23 }
0x1a38   : > { %v3245_v27 = vmul.f32 0.0, %v6216_v17  ;;  %v3078_v46 = vsel %vm374_vm8, %v6216_v17, 0.0 }
0x1a3a   : > { %v6222_v26 = vadd.f32 %v4929_v18, %v3245_v27 }
0x1a3b   : > { %v3065_v49 = vpop.f32.mrf.mxu0 }
0x1a3c   : > { %v3066_v25 = vadd.f32 %v4611_v7, %v3065_v49  ;;  %v3285_v28 = vsel %vm374_vm8, %v6222_v26, 0.0 }
0x1a3d   : > { %3286 = vadd.xlane.f32.xlu2 %v3285_v28 }
0x1a3e   : > { %v6227_v31 = vadd.f32 %v3066_v25, %v6111_v62  ;;  %v6294_v25 = vld [vmem:[%s6695_s2 + $0x1f0] ss:$0 sm:$0xff] }
0x1a40   : > { %v3246_v23 = vmul.f32 0.0, %v6227_v31  ;;  %v3081_v36 = vsel %vm374_vm8, %v6227_v31, 0.0 }
0x1a42   : > { %v6233_v38 = vadd.f32 %v4930_v32, %v3246_v23 }
0x1a44   : > { %v3288_v20 = vsel %vm374_vm8, %v6233_v38, 0.0 }
0x1a45   : > { %3289 = vadd.xlane.f32.xlu0 %v3288_v20 }
0x1a4c   : > { %v3281_v45 = vpop.xlane.xlu0 %3280 }
0x1a4d   : > { %v3291_v15 = vmul.f32 %v3281_v45, %v5131_v4 }
0x1a4f   : > { %v6239_v50 = vsub.f32 %v6202_v54, %v3291_v15 }
0x1a51   : > { %v3299_v62 = vmul.f32 %v6239_v50, %v6239_v50 }
0x1a53   : > { %v3303_v52 = vsel %vm374_vm8, %v3299_v62, 0.0 }
0x1a54   : > { %3304 = vadd.xlane.f32.xlu1 %v3303_v52  ;;  %v3284_v21 = vpop.xlane.xlu1 %3283 }
0x1a55   : > { %v3292_v48 = vmul.f32 %v3284_v21, %v5131_v4 }
0x1a57   : > { %v6246_v10 = vsub.f32 %v6211_v3, %v3292_v48 }
0x1a59   : > { %v3300_v37 = vmul.f32 %v6246_v10, %v6246_v10 }
0x1a5b   : > { %v3306_v9 = vsel %vm374_vm8, %v3300_v37, 0.0 }
0x1a5c   : > { %3307 = vadd.xlane.f32.xlu2 %v3306_v9 }
0x1a64   : > { %3073 = vadd.xlane.f32.xlu2 %v3072_v39 }
0x1a6c   : > { %3082 = vadd.xlane.f32.xlu2 %v3081_v36 }
0x1ab0   : > { %v3287_v44 = vpop.xlane.xlu2 %3286 }
0x1ab1   : > { %v3293_v56 = vmul.f32 %v3287_v44, %v5131_v4 }
0x1ab3   : > { %v6257_v16 = vsub.f32 %v6222_v26, %v3293_v56 }
0x1ab5   : > { %v3301_v57 = vmul.f32 %v6257_v16, %v6257_v16 }
0x1ab7   : > { %v3309_v58 = vsel %vm374_vm8, %v3301_v57, 0.0 }
0x1ab8   : > { %v3290_v30 = vpop.xlane.xlu0 %3289  ;;  %3310 = vadd.xlane.f32.xlu0 %v3309_v58 }
0x1ab9   : > { %v3294_v60 = vmul.f32 %v3290_v30, %v5131_v4 }
0x1abb   : > { %v6264_v63 = vsub.f32 %v6233_v38, %v3294_v60 }
0x1abd   : > { %v3302_v47 = vmul.f32 %v6264_v63, %v6264_v63 }
0x1abf   : > { %v3312_v55 = vsel %vm374_vm8, %v3302_v47, 0.0 }
0x1ac0   : > { %3313 = vadd.xlane.f32.xlu1 %v3312_v55  ;;  %3076 = vadd.xlane.f32.xlu0 %v3075_v0 }
0x1ac7   : > { %v3305_v12 = vpop.xlane.xlu1 %3304 }
0x1ac8   : > { %v3315_v1 = vmul.f32 %v3305_v12, %v5131_v4  ;;  %3079 = vadd.xlane.f32.xlu1 %v3078_v46 }
0x1aca   : > { %v3319_v5 = vadd.f32 1e-05, %v3315_v1 }
0x1acc   : > { %4835 = vrsqrt.f32 %v3319_v5  ;;  %vm3329_vm1 = vweird.f32 %v3319_v5 }
0x1acf   : > { %v3308_v43 = vpop.xlane.xlu2 %3307 }
0x1ad0   : > { %v3316_v40 = vmul.f32 %v3308_v43, %v5131_v4 }
0x1ad2   : > { %v4836_v7 = vpop.eup %4835  ;;  %v3320_v13 = vadd.f32 1e-05, %v3316_v40 }
0x1ad3   : > { %v3324_v42 = vmul.f32 %v4836_v7, %v3319_v5  ;;  %vm3330_vm0 = vweird.f32 %v4836_v7 }
0x1ad4   : > { %4837 = vrsqrt.f32 %v3320_v13  ;;  %vm3331_vm2 = vmor %vm3329_vm1, %vm3330_vm0  ;;  %vm3339_vm4 = vweird.f32 %v3320_v13 }
0x1ad5   : > { %v3325_v59 = vmul.f32 %v4836_v7, %v3324_v42 }
0x1ad7   : > { %v3326_v51 = vmul.f32 0.5, %v3325_v59  ;;  %v3074_v53 = vpop.xlane.xlu2 %3073 }
0x1ad8   : > { %v3084_v33 = vmul.f32 %v3074_v53, %v5131_v4 }
0x1ad9   : > { %v3327_v2 = vsub.f32 1.5, %v3326_v51 }
0x1ada   : > { %v4838_v19 = vpop.eup %4837  ;;  %v6289_v27 = vsub.f32 %v6198_v35, %v3084_v33  ;;  %v6303_v35 = vld [vmem:[%s6695_s2 + $0x1f1] ss:$0 sm:$0xff] }
0x1adb   : > { %v3328_v18 = vmul.f32 %v4836_v7, %v3327_v2  ;;  %v3334_v49 = vmul.f32 %v4838_v19, %v3320_v13  ;;  %vm3340_vm3 = vweird.f32 %v4838_v19 }
0x1adc   : > { %v3092_v28 = vmul.f32 %v6289_v27, %v6289_v27  ;;  %vm3341_vm5 = vmor %vm3339_vm4, %vm3340_vm3 }
0x1add   : > { %v3332_v23 = vsel %vm3331_vm2, %v4836_v7, %v3328_v18  ;;  %v3335_v32 = vmul.f32 %v4838_v19, %v3334_v49 }
0x1ade   : > { %v3363_v20 = vmul.f32 %v3332_v23, %v6239_v50  ;;  %v3096_v45 = vsel %vm374_vm8, %v3092_v28, 0.0 }
0x1adf   : > { %v3336_v15 = vmul.f32 0.5, %v3335_v32  ;;  %3097 = vadd.xlane.f32.xlu0 %v3096_v45  ;;  %v3083_v62 = vpop.xlane.xlu2 %3082 }
0x1ae0   : > { %v3368_v52 = vmul.f32 %v6294_v25, %v3363_v20  ;;  %v3087_v21 = vmul.f32 %v3083_v62, %v5131_v4 }
0x1ae1   : > { %v3337_v48 = vsub.f32 1.5, %v3336_v15 }
0x1ae2   : > { %v6308_v37 = vsub.f32 %v6227_v31, %v3087_v21  ;;  %v3373_v50 = vadd.f32 %v6303_v35, %v3368_v52 }
0x1ae3   : > { %v3338_v9 = vmul.f32 %v4838_v19, %v3337_v48 }
0x1ae4   : > { %4431 = vmatmul.msk.f32.vlgmr.msra.gmra.mxu3 %vm374_vm8, %v3373_v50  ;;  %v3095_v39 = vmul.f32 %v6308_v37, %v6308_v37 }
0x1ae5   : > { %v3342_v36 = vsel %vm3341_vm5, %v4838_v19, %v3338_v9 }
0x1ae6   : > { %v3105_v44 = vsel %vm374_vm8, %v3095_v39, 0.0  ;;  %v3364_v56 = vmul.f32 %v3342_v36, %v6246_v10 }
0x1ae7   : > { %3106 = vadd.xlane.f32.xlu0 %v3105_v44 }
0x1ae8   : > { %v3369_v57 = vmul.f32 %v6294_v25, %v3364_v56 }
0x1aea   : > { %v3374_v31 = vadd.f32 %v6303_v35, %v3369_v57 }
0x1aec   : > { %4432 = vmatmul.msk.f32.gmra.mxu3 %vm374_vm8, %v3374_v31 }
0x1b2b   : > { %v3311_v58 = vpop.xlane.xlu0 %3310 }
0x1b2c   : > { %v3317_v30 = vmul.f32 %v3311_v58, %v5131_v4 }
0x1b2e   : > { %v3321_v60 = vadd.f32 1e-05, %v3317_v30 }
0x1b30   : > { %4839 = vrsqrt.f32 %v3321_v60  ;;  %vm3349_vm7 = vweird.f32 %v3321_v60 }
0x1b33   : > { %v3314_v47 = vpop.xlane.xlu1 %3313  ;;  %v3077_v24 = vpop.xlane.xlu0 %3076 }
0x1b34   : > { %v3318_v55 = vmul.f32 %v3314_v47, %v5131_v4  ;;  %v3085_v0 = vmul.f32 %v3077_v24, %v5131_v4 }
0x1b36   : > { %v4840_v61 = vpop.eup %4839  ;;  %v3322_v10 = vadd.f32 1e-05, %v3318_v55  ;;  %v6323_v8 = vsub.f32 %v6207_v6, %v3085_v0 }
0x1b37   : > { %v3344_v11 = vmul.f32 %v4840_v61, %v3321_v60  ;;  %vm3350_vm6 = vweird.f32 %v4840_v61 }
0x1b38   : > { %4841 = vrsqrt.f32 %v3322_v10  ;;  %v3093_v12 = vmul.f32 %v6323_v8, %v6323_v8  ;;  %vm3351_vm9 = vmor %vm3349_vm7, %vm3350_vm6  ;;  %vm3359_vm10 = vweird.f32 %v3322_v10 }
0x1b39   : > { %v3345_v46 = vmul.f32 %v4840_v61, %v3344_v11 }
0x1b3a   : > { %v3099_v1 = vsel %vm374_vm8, %v3093_v12, 0.0 }
0x1b3b   : > { %v3346_v5 = vmul.f32 0.5, %v3345_v46  ;;  %v3080_v43 = vpop.xlane.xlu1 %3079  ;;  %3100 = vadd.xlane.f32.xlu1 %v3099_v1  ;;  %v4931_v1 = vld [vmem:[%s6695_s2 + $0x3] ss:$0 sm:$0xff] }
0x1b3c   : > { %v3086_v40 = vmul.f32 %v3080_v43, %v5131_v4 }
0x1b3d   : > { %v3347_v7 = vsub.f32 1.5, %v3346_v5 }
0x1b3e   : > { %v4842_v13 = vpop.eup %4841  ;;  %v6330_v42 = vsub.f32 %v6216_v17, %v3086_v40 }
0x1b3f   : > { %v3348_v6 = vmul.f32 %v4840_v61, %v3347_v7  ;;  %v3354_v59 = vmul.f32 %v4842_v13, %v3322_v10  ;;  %vm3360_vm14 = vweird.f32 %v4842_v13  ;;  %v4932_v7 = vld [vmem:[%s6695_s2 + $0x4] ss:$0 sm:$0xff] }
0x1b40   : > { %v3094_v51 = vmul.f32 %v6330_v42, %v6330_v42  ;;  %vm3361_vm11 = vmor %vm3359_vm10, %vm3360_vm14 }
0x1b41   : > { %v3352_v53 = vsel %vm3351_vm9, %v4840_v61, %v3348_v6  ;;  %v3355_v33 = vmul.f32 %v4842_v13, %v3354_v59 }
0x1b42   : > { %v3365_v2 = vmul.f32 %v3352_v53, %v6257_v16  ;;  %v3102_v19 = vsel %vm374_vm8, %v3094_v51, 0.0 }
0x1b43   : > { %v3356_v18 = vmul.f32 0.5, %v3355_v33  ;;  %3103 = vadd.xlane.f32.xlu2 %v3102_v19 }
0x1b44   : > { %v3370_v49 = vmul.f32 %v6294_v25, %v3365_v2 }
0x1b45   : > { %v3357_v28 = vsub.f32 1.5, %v3356_v18 }
0x1b46   : > { %v3375_v17 = vadd.f32 %v6303_v35, %v3370_v49 }
0x1b47   : > { %v3358_v23 = vmul.f32 %v4842_v13, %v3357_v28 }
0x1b48   : > { %4433 = vmatmul.msk.f32.gmra.mxu3 %vm374_vm8, %v3375_v17 }
0x1b49   : > { %v3362_v32 = vsel %vm3361_vm11, %v4842_v13, %v3358_v23 }
0x1b4a   : > { %v3366_v20 = vmul.f32 %v3362_v32, %v6264_v63 }
0x1b4c   : > { %v3371_v16 = vmul.f32 %v6294_v25, %v3366_v20 }
0x1b4e   : > { %v3376_v45 = vadd.f32 %v6303_v35, %v3371_v16 }
0x1b50   : > { %4434 = vmatmul.msk.f32.gmra.mxu3 %vm374_vm8, %v3376_v45 }
0x1b52   : > { %v3098_v52 = vpop.xlane.xlu0 %3097 }
0x1b53   : > { %v3108_v21 = vmul.f32 %v3098_v52, %v5131_v4 }
0x1b55   : > { %v3112_v63 = vadd.f32 1e-05, %v3108_v21 }
0x1b57   : > { %4843 = vrsqrt.f32 %v3112_v63  ;;  %vm3122_vm0 = vweird.f32 %v3112_v63 }
0x1b5a   : > { %v3107_v61 = vpop.xlane.xlu0 %3106 }
0x1b5d   : > { %v4844_v25 = vpop.eup %4843 }
0x1b5e   : > { %v3117_v48 = vmul.f32 %v4844_v25, %v3112_v63  ;;  %vm3123_vm12 = vweird.f32 %v4844_v25 }
0x1b5f   : > { %vm3124_vm1 = vmor %vm3122_vm0, %vm3123_vm12 }
0x1b60   : > { %v3118_v35 = vmul.f32 %v4844_v25, %v3117_v48 }
0x1b62   : > { %v3119_v36 = vmul.f32 0.5, %v3118_v35 }
0x1b64   : > { %v3120_v44 = vsub.f32 1.5, %v3119_v36 }
0x1b66   : > { %v3121_v57 = vmul.f32 %v4844_v25, %v3120_v44 }
0x1b67   : > { %v6343_v15 = vpop.f32.mrf.mxu3 }
0x1b68   : > { %v3125_v30 = vsel %vm3124_vm1, %v4844_v25, %v3121_v57 }
0x1b69   : > { %v3156_v24 = vmul.f32 %v3125_v30, %v6289_v27  ;;  %v3111_v27 = vmul.f32 %v3107_v61, %v5131_v4 }
0x1b6b   : > { %v3160_v5 = vmul.f32 %v4931_v1, %v3156_v24  ;;  %v3115_v59 = vadd.f32 1e-05, %v3111_v27 }
0x1b6d   : > { %v3164_v13 = vadd.f32 %v4932_v7, %v3160_v5  ;;  %vm3152_vm14 = vweird.f32 %v3115_v59 }
0x1b6f   : > { %v6345_v62 = vpop.f32.mrf.mxu3 }
0x1b70   : > { %3585 = vrot.lane.b32.xlu0 %v6345_v62, %s5002_s30 }
0x1b78   : > { %3575 = vrot.lane.b32.xlu0 %v6343_v15, %s5004_s7 }
0x1bae   : > { %v3101_v55 = vpop.xlane.xlu1 %3100 }
0x1baf   : > { %v3109_v11 = vmul.f32 %v3101_v55, %v5131_v4 }
0x1bb1   : > { %v3113_v40 = vadd.f32 1e-05, %v3109_v11  ;;  %v4615_v11 = vld [vmem:[%s6695_s2 + $0x18e] ss:$0 sm:$0xff] }
0x1bb3   : > { %vm3132_vm7 = vweird.f32 %v3113_v40 }
0x1bb6   : > { %v3104_v50 = vpop.xlane.xlu2 %3103 }
0x1bb7   : > { %v3110_v9 = vmul.f32 %v3104_v50, %v5131_v4 }
0x1bb9   : > { %v3114_v39 = vadd.f32 1e-05, %v3110_v9 }
0x1bbb   : > { %4845 = vrsqrt.f32 %v3114_v39  ;;  %vm3142_vm3 = vweird.f32 %v3114_v39 }
0x1bbc   : > { %4847 = vrsqrt.f32 %v3113_v40 }
0x1bbd   : > { %4849 = vrsqrt.f32 %v3115_v59 }
0x1bc1   : > { %v4846_v56 = vpop.eup %4845 }
0x1bc2   : > { %v3137_v31 = vmul.f32 %v4846_v56, %v3114_v39  ;;  %vm3143_vm2 = vweird.f32 %v4846_v56  ;;  %v4848_v19 = vpop.eup %4847 }
0x1bc3   : > { %vm3144_vm4 = vmor %vm3142_vm3, %vm3143_vm2  ;;  %v4850_v18 = vpop.eup %4849  ;;  %v3127_v49 = vmul.f32 %v4848_v19, %v3113_v40  ;;  %vm3133_vm5 = vweird.f32 %v4848_v19 }
0x1bc4   : > { %v3138_v58 = vmul.f32 %v4846_v56, %v3137_v31  ;;  %v3147_v28 = vmul.f32 %v4850_v18, %v3115_v59  ;;  %vm3153_vm6 = vweird.f32 %v4850_v18  ;;  %vm3134_vm9 = vmor %vm3132_vm7, %vm3133_vm5 }
0x1bc5   : > { %v3128_v17 = vmul.f32 %v4848_v19, %v3127_v49  ;;  %vm3154_vm10 = vmor %vm3152_vm14, %vm3153_vm6 }
0x1bc6   : > { %v3139_v60 = vmul.f32 0.5, %v3138_v58  ;;  %v3148_v32 = vmul.f32 %v4850_v18, %v3147_v28 }
0x1bc7   : > { %v3129_v20 = vmul.f32 0.5, %v3128_v17 }
0x1bc8   : > { %v3140_v47 = vsub.f32 1.5, %v3139_v60  ;;  %v3149_v16 = vmul.f32 0.5, %v3148_v32 }
0x1bc9   : > { %v3130_v45 = vsub.f32 1.5, %v3129_v20 }
0x1bca   : > { %v3141_v0 = vmul.f32 %v4846_v56, %v3140_v47  ;;  %v3150_v52 = vsub.f32 1.5, %v3149_v16 }
0x1bcb   : > { %v3412_v10 = vpop.f32.mrf.mxu3  ;;  %v3131_v21 = vmul.f32 %v4848_v19, %v3130_v45 }
0x1bcc   : > { %v3145_v12 = vsel %vm3144_vm4, %v4846_v56, %v3141_v0  ;;  %3420 = vrot.lane.b32.xlu1 %v3412_v10, %s5003_s6  ;;  %v3151_v63 = vmul.f32 %v4850_v18, %v3150_v52 }
0x1bcd   : > { %v3158_v46 = vmul.f32 %v3145_v12, %v6330_v42  ;;  %v4614_v42 = vld [vmem:[%s6695_s2 + $0x18d] ss:$0 sm:$0xff]  ;;  %v3135_v25 = vsel %vm3134_vm9, %v4848_v19, %v3131_v21 }
0x1bce   : > { %v3155_v48 = vsel %vm3154_vm10, %v4850_v18, %v3151_v63  ;;  %v3157_v35 = vmul.f32 %v3135_v25, %v6323_v8 }
0x1bcf   : > { %v3162_v43 = vmul.f32 %v4931_v1, %v3158_v46  ;;  %v3159_v50 = vmul.f32 %v3155_v48, %v6308_v37 }
0x1bd0   : > { %v3161_v9 = vmul.f32 %v4931_v1, %v3157_v35 }
0x1bd1   : > { %v3166_v6 = vadd.f32 %v4932_v7, %v3162_v43  ;;  %v3163_v39 = vmul.f32 %v4931_v1, %v3159_v50 }
0x1bd2   : > { %v3165_v36 = vadd.f32 %v4932_v7, %v3161_v9 }
0x1bd3   : > { %v3415_v51 = vpop.f32.mrf.mxu3  ;;  %v3168_v53 = vsub.f32 %v3164_v13, %v3166_v6  ;;  %v3167_v44 = vadd.f32 %v4932_v7, %v3163_v39 }
0x1bd4   : > { %3583 = vrot.lane.b32.xlu1 %v6343_v15, %s5002_s30  ;;  %3422 = vrot.lane.b32.xlu2 %v3415_v51, %s5003_s6  ;;  %s6708_s6 = smov 48  }
0x1bd5   : > { %v3170_v33 = vmul.f32 %v3168_v53, %v3168_v53  ;;  %v3169_v56 = vsub.f32 %v3165_v36, %v3167_v44 }
0x1bd7   : > { %v3173_v2 = vmul.f32 %v4614_v42, %v3170_v33  ;;  %v3171_v57 = vmul.f32 %v3169_v56, %v3169_v56 }
0x1bd9   : > { %v3174_v31 = vmul.f32 %v4614_v42, %v3171_v57  ;;  %v3175_v55 = vsel %vm374_vm8, %v3173_v2, 0.0 }
0x1bdb   : > { %v3178_v58 = vsel %vm374_vm8, %v3174_v31, 0.0 }
0x1bdc   : > { %3577 = vrot.lane.b32.xlu2 %v6345_v62, %s5004_s7 }
0x1be2   : > { %v3586_v23 = vpop.permute.xlu0 %3585 }
0x1be3   : > { %4445 = vmatpush.xpose.msk.msrb.mxu0 %vm621_vm13, %v3586_v23 }
0x1be4   : > { %3437 = vrot.lane.b32.xlu2 %v6345_v62, %s5001_s26 }
0x1bea   : > { %v3576_v8 = vpop.permute.xlu0 %3575 }
0x1c0d   : > { %3179 = vadd.xlane.f32.xlu2 %v3178_v58 }
0x1c2e   : > { %v3423_v30 = vpop.permute.xlu2 %3422 }
0x1c2f   : > { %3581 = vrot.lane.b32.xlu0 %v3423_v30, %s5004_s7 }
0x1c36   : > { %v3578_v60 = vpop.permute.xlu2 %3577 }
0x1c3e   : > { %v3421_v47 = vpop.permute.xlu1 %3420  ;;  %v3438_v24 = vpop.permute.xlu2 %3437 }
0x1c3f   : > { %3579 = vrot.lane.b32.xlu1 %v3421_v47, %s5004_s7  ;;  %4435 = vmatpush.xpose.msk.msrb.mxu1 %vm621_vm13, %v3438_v24 }
0x1c46   : > { %v3584_v37 = vpop.permute.xlu1 %3583 }
0x1c47   : > { %3435 = vrot.lane.b32.xlu1 %v6343_v15, %s5001_s26  ;;  %4446 = vmatpush.xpose.msk.msrb.mxu0 %vm621_vm13, %v3584_v37  ;;  %s4479_s26 = sshll.u32 %s5064_s22, 5 }
0x1c48   : > { %s4237_s7 = scalar_lea.hbm %s6698_s5, %s4479_s26 }
0x1c49   : > { %s4240_s25 = sshll.u32 %s4237_s7, 4  ;;  %s4241_s25 = int_to_ptr.hbm [resolvable:$true] %s4240_s25 }
0x1c4a   : > { %4447 = vmatmul.msk.f32.vlgmr.msrb.gmra.mxu0 %vm621_vm13, %v3576_v8  ;;  %s4949_s10 = sshra.s32 %s4241_s25, 4  ;;  %s4950_s10 = int_to_ptr.hbm [resolvable:$true] %s4949_s10 }
0x1c4b   : > { %s4951_s11 = scalar_lea.hbm %s4950_s10, 32  ;;  %p4956_p0 = scmp.lt.s32.totalorder %s4950_s10, %s6698_s5 }
0x1c4c   : > { %p4952_p11 = scmp.ne.s32.totalorder %s4950_s10, %s4951_s11  ;;  %p4957_p1 = scmp.lt.s32.totalorder %s4955_s9, %s4951_s11 }
0x1c4e   : > { %p4953_p12 = pnand %p4952_p11, %p5081_p5  ;;  %p4958_p2 = por %p4957_p1, %p4956_p0 }
0x1c50   : > { %p4954_p13 = pneg %p4953_p12 }
0x1c52   : > { %4448 = vmatmul.msk.f32.gmra.mxu0 %vm621_vm13, %v3578_v60  ;;  %p4959_p3 = pnand %p4958_p2, %p4954_p13 }
0x1c59   : > { %3176 = vadd.xlane.f32.xlu0 %v3175_v55 }
0x1c80   : > { %v3180_v12 = vpop.xlane.xlu2 %3179 }
0x1c81   : > { %v3183_v46 = vadd.f32 %v4615_v11, %v3180_v12 }
0x1c83   : > { %v4430_v1 = vmul.f32 -1.442695, %v3183_v46 }
0x1c85   : > { %4851 = vpow2.f32 %v4430_v1 }
0x1c8b   : > { %v4852_v40 = vpop.eup %4851 }
0x1c8c   : > { %v3191_v59 = vadd.f32 1.0, %v4852_v40 }
0x1c8e   : > { %v3218_v25 = vand.u32 2147483648, %v3191_v59  ;;  %vm3212_vm3 = vweird.f32 %v3191_v59  ;;  %v3216_v48 = vand.u32 2147483647, %v3191_v59 }
0x1c90   : > { %v3219_v50 = vor.u32 1.1754944e-38, %v3218_v25  ;;  %vm3217_vm5 = vcmp.eq.f32.partialorder %v3216_v48, 8.507059e+37 }
0x1ca1   : > { %v3582_v61 = vpop.permute.xlu0 %3581 }
0x1cb1   : > { %v3580_v0 = vpop.permute.xlu1 %3579 }
0x1cb2   : > { %4449 = vmatmul.msk.f32.gmra.mxu0 %vm621_vm13, %v3580_v0 }
0x1cb9   : > { %v3436_v10 = vpop.permute.xlu1 %3435 }
0x1cba   : > { %4436 = vmatpush.xpose.msk.msrb.mxu1 %vm621_vm13, %v3436_v10  ;;  %4450 = vmatmul.msk.f32.gmra.mxu0 %vm621_vm13, %v3582_v61 }
0x1cbd   : > { %4437 = vmatmul.msk.f32.vlgmr.msrb.gmra.mxu1 %vm621_vm13, %v6343_v15 }
0x1cc5   : > { %4438 = vmatmul.msk.f32.gmra.mxu1 %vm621_vm13, %v6345_v62 }
0x1cc7   : > { %v3616_v5 = vpop.f32.mrf.mxu0 }
0x1cc8   : > { %v3628_v39 = vmul.f32 0.25, %v3616_v5 }
0x1cca   : > { %v3632_v36 = vsel %vm621_vm13, %v3628_v39, -inf }
0x1ccc   : > { %v3177_v27 = vpop.xlane.xlu0 %3176 }
0x1ccd   : > { %v3182_v43 = vadd.f32 %v4615_v11, %v3177_v27  ;;  %4439 = vmatmul.msk.f32.gmra.mxu1 %vm621_vm13, %v3421_v47 }
0x1ccf   : > { %v4429_v7 = vmul.f32 -1.442695, %v3182_v43  ;;  %v3619_v13 = vpop.f32.mrf.mxu0 }
0x1cd0   : > { %v6398_v6 = vmul.f32 0.25, %v3619_v13 }
0x1cd1   : > { %4853 = vpow2.f32 %v4429_v7 }
0x1cd2   : > { %v3635_v51 = vsel %vm621_vm13, %v6398_v6, -inf  ;;  %4855 = vrcp.f32 %v3191_v59 }
0x1cd3   : > { %3636 = vmax.xlane.f32.xlu2 %v3635_v51 }
0x1cd5   : > { %4440 = vmatmul.msk.f32.gmra.mxu1 %vm621_vm13, %v3423_v30 }
0x1cd7   : > { %v4854_v53 = vpop.eup %4853 }
0x1cd8   : > { %v3190_v42 = vadd.f32 1.0, %v4854_v53  ;;  %v4856_v33 = vpop.eup %4855 }
0x1cd9   : > { %v3208_v2 = vmul.f32 %v4856_v33, %v3191_v59  ;;  %vm3213_vm2 = vweird.f32 %v4856_v33 }
0x1cda   : > { %4857 = vrcp.f32 %v3190_v42  ;;  %v3203_v17 = vand.u32 2147483648, %v3190_v42  ;;  %v3201_v32 = vand.u32 2147483647, %v3190_v42  ;;  %vm3197_vm12 = vweird.f32 %v3190_v42  ;;  %vm3214_vm4 = vmor %vm3212_vm3, %vm3213_vm2 }
0x1cdb   : > { %v3209_v28 = vsub.f32 1.0, %v3208_v2 }
0x1cdc   : > { %v3204_v45 = vor.u32 1.1754944e-38, %v3203_v17  ;;  %vm3202_vm1 = vcmp.eq.f32.partialorder %v3201_v32, 8.507059e+37  ;;  %v4573_v17 = vpack.i.bf16 %v6343_v15, %v6345_v62 }
0x1cdd   : > { %v3210_v16 = vmul.f32 %v4856_v33, %v3209_v28 }
0x1cdf   : > { %v3211_v63 = vadd.f32 %v4856_v33, %v3210_v16 }
0x1ce0   : > { %v4858_v19 = vpop.eup %4857 }
0x1ce1   : > { %v3193_v18 = vmul.f32 %v4858_v19, %v3190_v42  ;;  %vm3198_vm11 = vweird.f32 %v4858_v19  ;;  %v3215_v35 = vsel %vm3214_vm4, %v4856_v33, %v3211_v63 }
0x1ce2   : > { %vm3199_vm0 = vmor %vm3197_vm12, %vm3198_vm11  ;;  %v3220_v9 = vsel %vm3217_vm5, %v3219_v50, %v3215_v35 }
0x1ce3   : > { %v3194_v49 = vsub.f32 1.0, %v3193_v18 }
0x1ce5   : > { %v3195_v23 = vmul.f32 %v4858_v19, %v3194_v49 }
0x1ce7   : > { %v3196_v20 = vadd.f32 %v4858_v19, %v3195_v23 }
0x1ce9   : > { %v3200_v52 = vsel %vm3199_vm0, %v4858_v19, %v3196_v20 }
0x1cea   : > { %v3205_v21 = vsel %vm3202_vm1, %v3204_v45, %v3200_v52 }
0x1ceb   : > { %3224 = vperm.xlu1 %4572, %v3205_v21  }
0x1cf3   : > { %3229 = vperm.xlu1 %4572, %v3220_v9  }
0x1d1d   : > { %3633 = vmax.xlane.f32.xlu1 %v3632_v36 }
0x1d2f   : > { %v3622_v10 = vpop.f32.mrf.mxu0 }
0x1d37   : > { %v3625_v43 = vpop.f32.mrf.mxu0 }
0x1d3a   : > { %v3468_v44 = vpop.f32.mrf.mxu1 }
0x1d3b   : > { %v3480_v53 = vmul.f32 0.25, %v3468_v44 }
0x1d42   : > { %v3471_v56 = vpop.f32.mrf.mxu1 }
0x1d43   : > { %v3481_v57 = vmul.f32 0.25, %v3471_v56 }
0x1d45   : > { %v3487_v31 = vsel %vm621_vm13, %v3481_v57, -inf }
0x1d46   : > { %3488 = vmax.xlane.f32.xlu2 %v3487_v31  ;;  %v3637_v2 = vpop.xlane.xlu2 %3636 }
0x1d47   : > { %v3645_v49 = vsub.f32 %v6398_v6, %v3637_v2 }
0x1d49   : > { %v3650_v23 = vmul.f32 1.442695, %v3645_v49 }
0x1d4a   : > { %v3474_v1 = vpop.f32.mrf.mxu1 }
0x1d52   : > { %v3477_v42 = vpop.f32.mrf.mxu1 }
0x1d5d   : > { %v6405_v58 = vpop.permute.xlu1 %3224 }
0x1d5e   : > { %v3232_v30 = vmul.f32 %v5665_v22, %v6405_v58 }
0x1d60   : > { %v3234_v24 = vsel %vm621_vm13, %v3232_v30, 0.0 }
0x1d65   : > { %v6409_v60 = vpop.permute.xlu1 %3229 }
0x1d66   : > { %v3233_v47 = vmul.f32 %v5667_v14, %v6409_v60 }
0x1d68   : > { %v3235_v37 = vsel %vm621_vm13, %v3233_v47, 0.0 }
0x1d69   : > { %v3236_v8 = vadd.f32 %v3235_v37, %v3234_v24 }
0x1d6b   : > { %v3237_v55 = vrot.slane %v3236_v8, 4 }
0x1d6d   : > { %v3238_v0 = vadd.f32 %v3237_v55, %v3236_v8 }
0x1d6f   : > { %v3239_v61 = vrot.slane %v3238_v0, 2 }
0x1d71   : > { %v3240_v11 = vadd.f32 %v3239_v61, %v3238_v0 }
0x1d73   : > { %v3241_v12 = vrot.slane %v3240_v11, 1 }
0x1d75   : > { %v3242_v46 = vadd.f32 %v3241_v12, %v3240_v11 }
0x1d77   : > { %v3424_v5 = vsub.f32 1.0, %v3242_v46 }
0x1d79   : > { %v3432_v22 = vmul.f32 %v3424_v5, %v5276_v41  ;;  %v3431_v27 = vmul.f32 %v3424_v5, %v5271_v34  ;;  %v3484_v41 = vsel %vm621_vm13, %v3480_v53, -inf }
0x1d7b   : > { %v3631_v14 = vmul.f32 %v3625_v43, %v3432_v22  ;;  %v3630_v40 = vmul.f32 %v3622_v10, %v3431_v27  ;;  %v3482_v7 = vmul.f32 %v3474_v1, %v3431_v27  ;;  %v3483_v33 = vmul.f32 %v3477_v42, %v3432_v22 }
0x1d7d   : > { %v3641_v13 = vsel %vm621_vm13, %v3631_v14, -inf  ;;  %v3638_v59 = vsel %vm621_vm13, %v3630_v40, -inf  ;;  %v3490_v51 = vsel %vm621_vm13, %v3482_v7, -inf  ;;  %v3493_v34 = vsel %vm621_vm13, %v3483_v33, -inf }
0x1d7e   : > { %3642 = vmax.xlane.f32.xlu2 %v3641_v13  ;;  %3639 = vmax.xlane.f32.xlu0 %v3638_v59 }
0x1d7f   : > { %3491 = vmax.xlane.f32.xlu1 %v3490_v51 }
0x1d86   : > { %3485 = vmax.xlane.f32.xlu0 %v3484_v41 }
0x1d87   : > { %3494 = vmax.xlane.f32.xlu1 %v3493_v34 }
0x1d90   : > { %v3634_v19 = vpop.xlane.xlu1 %3633 }
0x1d91   : > { %v3644_v18 = vsub.f32 %v3628_v39, %v3634_v19 }
0x1d93   : > { %v3648_v28 = vmul.f32 1.442695, %v3644_v18 }
0x1d95   : > { %4859 = vpow2.f32 %v3648_v28 }
0x1d96   : > { %4574 = vrot.lane.b32.xlu2 %v4573_v17, %s6708_s6  ;;  %4861 = vpow2.f32 %v3650_v23 }
0x1d9b   : > { %v4860_v32 = vpop.eup %4859 }
0x1d9c   : > { %v3656_v20 = vsel %vm621_vm13, %v4860_v32, 0.0  ;;  %v4862_v16 = vpop.eup %4861 }
0x1d9d   : > { %3657 = vadd.xlane.f32.xlu0 %v3656_v20  ;;  %v3659_v45 = vsel %vm621_vm13, %v4862_v16, 0.0 }
0x1da5   : > { %3660 = vadd.xlane.f32.xlu0 %v3659_v45 }
0x1db9   : > { %v3489_v52 = vpop.xlane.xlu2 %3488 }
0x1dba   : > { %v3497_v21 = vsub.f32 %v3481_v57, %v3489_v52 }
0x1dbc   : > { %v3502_v6 = vmul.f32 1.442695, %v3497_v21 }
0x1dbe   : > { %4863 = vpow2.f32 %v3502_v6 }
0x1dc4   : > { %v6428_v63 = vpop.eup %4863 }
0x1dc5   : > { %v3511_v15 = vsel %vm621_vm13, %v6428_v63, 0.0 }
0x1dc6   : > { %3512 = vadd.xlane.f32.xlu2 %v3511_v15 }
0x1df1   : > { %v3640_v62 = vpop.xlane.xlu0 %3639  ;;  %v3643_v25 = vpop.xlane.xlu2 %3642 }
0x1df2   : > { %v3646_v48 = vsub.f32 %v3630_v40, %v3640_v62  ;;  %v3647_v35 = vsub.f32 %v3631_v14, %v3643_v25  ;;  %v3492_v39 = vpop.xlane.xlu1 %3491 }
0x1df3   : > { %v3498_v30 = vsub.f32 %v3482_v7, %v3492_v39 }
0x1df4   : > { %v3652_v50 = vmul.f32 1.442695, %v3646_v48  ;;  %v3654_v9 = vmul.f32 1.442695, %v3647_v35  ;;  %v3253_v48 = vld [vmem:[%s6695_s2 + $0x1a0] sm:$0xff]  ;;  %v3252_v35 = vld [vmem:[%s6695_s2 + $0x198] sm:$0xff] }
0x1df5   : > { %v3504_v0 = vmul.f32 1.442695, %v3498_v30 }
0x1df6   : > { %4865 = vpow2.f32 %v3652_v50  ;;  %v3251_v50 = vld [vmem:[%s6695_s2 + $0x190] sm:$0xff] }
0x1df7   : > { %4867 = vpow2.f32 %v3654_v9 }
0x1df9   : > { %v3486_v36 = vpop.xlane.xlu0 %3485  ;;  %v4575_v44 = vpop.permute.xlu2 %4574 }
0x1dfa   : > { %v3496_v56 = vsub.f32 %v3480_v53, %v3486_v36  ;;  %v4576_v57 = vunpack.i.l.bf16 %v4575_v44  ;;  %v4577_v24 = vunpack.i.h.bf16 %v4575_v44  ;;  %v3495_v61 = vpop.xlane.xlu1 %3494 }
0x1dfb   : > { %v3499_v11 = vsub.f32 %v3483_v33, %v3495_v61 }
0x1dfc   : > { %v4866_v31 = vpop.eup %4865  ;;  %v3500_v47 = vmul.f32 1.442695, %v3496_v56  ;;  %3708 = vmatpush.msrb.mxu3 %v4576_v57 }
0x1dfd   : > { %v3662_v37 = vsel %vm621_vm13, %v4866_v31, 0.0  ;;  %v4868_v8 = vpop.eup %4867  ;;  %v3506_v46 = vmul.f32 1.442695, %v3499_v11 }
0x1dfe   : > { %4869 = vpow2.f32 %v3500_v47  ;;  %3663 = vadd.xlane.f32.xlu0 %v3662_v37  ;;  %3709 = vmatpush.msrb.mxu3 %v4577_v24  ;;  %v3665_v55 = vsel %vm621_vm13, %v4868_v8, 0.0 }
0x1dff   : > { %3666 = vadd.xlane.f32.xlu1 %v3665_v55  ;;  %4871 = vpow2.f32 %v3504_v0 }
0x1e00   : > { %4873 = vpow2.f32 %v3506_v46 }
0x1e04   : > { %v4870_v10 = vpop.eup %4869 }
0x1e05   : > { %v3508_v12 = vsel %vm621_vm13, %v4870_v10, 0.0  ;;  %v4872_v1 = vpop.eup %4871 }
0x1e06   : > { %3509 = vadd.xlane.f32.xlu0 %v3508_v12  ;;  %v3514_v5 = vsel %vm621_vm13, %v4872_v1, 0.0  ;;  %v4874_v27 = vpop.eup %4873 }
0x1e07   : > { %v3517_v43 = vsel %vm621_vm13, %v4874_v27, 0.0 }
0x1e0e   : > { %3515 = vadd.xlane.f32.xlu0 %v3514_v5  ;;  %v3745_v5 = vmul.f32 0.0, %v6222_v26 }
0x1e10   : > { %v3658_v22 = vpop.xlane.xlu0 %3657 }
0x1e11   : > { %4875 = vrcp.f32 %v3658_v22 }
0x1e16   : > { %3518 = vadd.xlane.f32.xlu0 %v3517_v43  ;;  %v3746_v43 = vmul.f32 0.0, %v6233_v38 }
0x1e17   : > { %v4876_v14 = vpop.eup %4875 }
0x1e18   : > { %v3672_v40 = vmul.f32 %v4876_v14, %v4860_v32  ;;  %v3661_v7 = vpop.xlane.xlu0 %3660  ;;  %4579 = vrot.lane.b32.xlu1 %v4573_v17, %s6707_s14 }
0x1e19   : > { %4877 = vrcp.f32 %v3661_v7 }
0x1e1a   : > { %4451 = vmatmul.msk.f32.vlgmr.msrb.gmra.mxu3 %vm621_vm13, %v3672_v40 }
0x1e1f   : > { %v4878_v13 = vpop.eup %4877 }
0x1e20   : > { %v3673_v59 = vmul.f32 %v4878_v13, %v4862_v16 }
0x1e22   : > { %4452 = vmatmul.msk.f32.gmra.mxu3 %vm621_vm13, %v3673_v59 }
0x1e39   : > { %v3513_v19 = vpop.xlane.xlu2 %3512 }
0x1e71   : > { %v3664_v51 = vpop.xlane.xlu0 %3663 }
0x1e72   : > { %4879 = vrcp.f32 %v3664_v51  ;;  %v3667_v53 = vpop.xlane.xlu1 %3666 }
0x1e73   : > { %4881 = vrcp.f32 %v3667_v53 }
0x1e78   : > { %v4880_v42 = vpop.eup %4879 }
0x1e79   : > { %v3674_v33 = vmul.f32 %v4880_v42, %v4866_v31  ;;  %v4882_v41 = vpop.eup %4881  ;;  %v3510_v2 = vpop.xlane.xlu0 %3509 }
0x1e7a   : > { %v3675_v34 = vmul.f32 %v4882_v41, %v4868_v8  ;;  %4883 = vrcp.f32 %v3510_v2 }
0x1e7b   : > { %4453 = vmatmul.msk.f32.gmra.mxu3 %vm621_vm13, %v3674_v33  ;;  %4885 = vrcp.f32 %v3513_v19 }
0x1e80   : > { %v4884_v49 = vpop.eup %4883 }
0x1e81   : > { %v3524_v23 = vmul.f32 %v4884_v49, %v4870_v10  ;;  %v3516_v32 = vpop.xlane.xlu0 %3515  ;;  %v4886_v20 = vpop.eup %4885 }
0x1e82   : > { %4887 = vrcp.f32 %v3516_v32  ;;  %v3525_v16 = vmul.f32 %v4886_v20, %v6428_v63  ;;  %v3254_v63 = vld [vmem:[%s6695_s2 + $0x1a8] sm:$0xff] }
0x1e83   : > { %4454 = vmatmul.msk.f32.gmra.mxu3 %vm621_vm13, %v3675_v34  ;;  %3771 = vmatpush.msra.mxu1 %v3254_v63 }
0x1e85   : > { %3772 = vmatpush.msra.mxu1 %v3253_v48 }
0x1e87   : > { %3773 = vmatpush.msra.mxu1 %v3252_v35 }
0x1e88   : > { %v4888_v52 = vpop.eup %4887 }
0x1e89   : > { %v3519_v45 = vpop.xlane.xlu0 %3518  ;;  %v3526_v6 = vmul.f32 %v4888_v52, %v4872_v1  ;;  %3774 = vmatpush.msra.mxu1 %v3251_v50  ;;  %v3271_v52 = vld [vmem:[%s6696_s3 + $0x80] sm:$0xff] }
0x1e8a   : > { %v4580_v18 = vpop.permute.xlu1 %4579  ;;  %4889 = vrcp.f32 %v3519_v45  ;;  %v3272_v45 = vld [vmem:[%s6696_s3 + $0x88] sm:$0xff] }
0x1e8b   : > { %v4581_v28 = vunpack.i.l.bf16 %v4580_v18  ;;  %v4582_v17 = vunpack.i.h.bf16 %v4580_v18 }
0x1e8d   : > { %3560 = vmatpush.msrb.mxu2 %v4581_v28 }
0x1e8f   : > { %3561 = vmatpush.msrb.mxu2 %v4582_v17 }
0x1e90   : > { %4441 = vmatmul.msk.f32.vlgmr.msrb.gmra.mxu2 %vm621_vm13, %v3524_v23  ;;  %v4890_v15 = vpop.eup %4889 }
0x1e91   : > { %v3527_v25 = vmul.f32 %v4890_v15, %v4874_v27 }
0x1e98   : > { %4442 = vmatmul.msk.f32.gmra.mxu2 %vm621_vm13, %v3525_v16  ;;  %v3273_v16 = vld [vmem:[%s6696_s3 + $0x90] sm:$0xff] }
0x1e99   : > { %3911 = vmatpush.msra.mxu2 %v3273_v16 }
0x1e9b   : > { %3912 = vmatpush.msra.mxu2 %v3272_v45 }
0x1e9d   : > { %v3711_v21 = vpop.f32.mrf.mxu3  ;;  %3913 = vmatpush.msra.mxu2 %v3271_v52 }
0x1e9e   : > { %3727 = vrot.lane.b32.xlu0 %v3711_v21, %s6706_s17  ;;  %v3270_v21 = vld [vmem:[%s6696_s3 + $0x78] sm:$0xff] }
0x1e9f   : > { %3914 = vmatpush.msra.mxu2 %v3270_v21 }
0x1ea0   : > { %4443 = vmatmul.msk.f32.gmra.mxu2 %vm621_vm13, %v3526_v6 }
0x1ea5   : > { %v3714_v62 = vpop.f32.mrf.mxu3 }
0x1ea6   : > { %3729 = vrot.lane.b32.xlu1 %v3714_v62, %s6706_s17 }
0x1ea8   : > { %4444 = vmatmul.msk.f32.gmra.mxu2 %vm621_vm13, %v3527_v25 }
0x1efe   : > { %v3717_v9 = vpop.f32.mrf.mxu3 }
0x1eff   : > { %3731 = vrot.lane.b32.xlu1 %v3717_v9, %s6706_s17 }
0x1f06   : > { %v3720_v39 = vpop.f32.mrf.mxu3 }
0x1f07   : > { %3733 = vrot.lane.b32.xlu0 %v3720_v39, %s6706_s17  ;;  %s215_s17 = sand.u32 1, %s4989_s19  }
0x1f08   : > { %s4307_s8 = sshll.u32 %s215_s17, 5  ;;  %s4226_s22 = scalar_lea.sflag [#allocation3], %s215_s17 }
0x1f09   : > { %s6645_s23 = scalar_lea.vmem [#allocation2], %s4307_s8 }
0x1f0a   : > { %s4238_s14 = sshll.u32 %s6645_s23, 4  ;;  %s4239_s14 = int_to_ptr.vmem [resolvable:$true] %s4238_s14 }
0x1f10   : > { %v3728_v36 = vpop.permute.xlu0 %3727 }
0x1f13   : > { %v3563_v44 = vpop.f32.mrf.mxu2 }
0x1f14   : > { %v3739_v56 = vsel %vm621_vm13, %v3563_v44, %v3728_v36 }
0x1f15   : > { %4455 = vmatmul.msk.f32.vlgmr.msra.gmra.mxu1 %vm374_vm8, %v3739_v56 }
0x1f18   : > { %v3730_v57 = vpop.permute.xlu1 %3729 }
0x1f1b   : > { %v3566_v31 = vpop.f32.mrf.mxu2 }
0x1f1c   : > { %v3740_v30 = vsel %vm621_vm13, %v3566_v31, %v3730_v57  ;;  %v4616_v31 = vld [vmem:[%s6695_s2 + $0x1f2] ss:$0 sm:$0xff] }
0x1f1d   : > { %4456 = vmatmul.msk.f32.gmra.mxu1 %vm374_vm8, %v3740_v30 }
0x1f23   : > { %v3569_v47 = vpop.f32.mrf.mxu2 }
0x1f2b   : > { %v3572_v8 = vpop.f32.mrf.mxu2 }
0x1f71   : > { %v3732_v24 = vpop.permute.xlu1 %3731 }
0x1f72   : > { %v3741_v37 = vsel %vm621_vm13, %v3569_v47, %v3732_v24  ;;  %v4617_v24 = vld [vmem:[%s6695_s2 + $0x1f3] ss:$0 sm:$0xff] }
0x1f73   : > { %4457 = vmatmul.msk.f32.gmra.mxu1 %vm374_vm8, %v3741_v37 }
0x1f79   : > { %v3734_v55 = vpop.permute.xlu0 %3733 }
0x1f7a   : > { %v3742_v0 = vsel %vm621_vm13, %v3572_v8, %v3734_v55 }
0x1f7b   : > { %4458 = vmatmul.msk.f32.gmra.mxu1 %vm374_vm8, %v3742_v0 }
0x1f92   : > { %v3776_v61 = vpop.f32.mrf.mxu1 }
0x1f93   : > { %v6472_v10 = vadd.f32 %v3776_v61, %v6202_v54 }
0x1f95   : > { %v3788_v11 = vsel %vm374_vm8, %v6472_v10, 0.0 }
0x1f96   : > { %3789 = vadd.xlane.f32.xlu1 %v3788_v11 }
0x1f9a   : > { %v3779_v12 = vpop.f32.mrf.mxu1 }
0x1f9b   : > { %v6477_v46 = vadd.f32 %v3779_v12, %v6211_v3 }
0x1f9d   : > { %v3791_v1 = vsel %vm374_vm8, %v6477_v46, 0.0 }
0x1f9e   : > { %3792 = vadd.xlane.f32.xlu2 %v3791_v1 }
0x1ff0   : > { %v3782_v22 = vpop.f32.mrf.mxu1 }
0x1ff1   : > { %v6482_v27 = vadd.f32 %v3782_v22, %v3745_v5 }
0x1ff3   : > { %v3794_v54 = vsel %vm374_vm8, %v6482_v27, 0.0 }
0x1ff4   : > { %3795 = vadd.xlane.f32.xlu0 %v3794_v54 }
0x1ff8   : > { %v3785_v14 = vpop.f32.mrf.mxu1 }
0x1ff9   : > { %v6487_v40 = vadd.f32 %v3785_v14, %v3746_v43 }
0x1ffb   : > { %v3797_v3 = vsel %vm374_vm8, %v6487_v40, 0.0 }
0x1ffc   : > { %3798 = vadd.xlane.f32.xlu2 %v3797_v3 }
0x2009   : > { %v3790_v7 = vpop.xlane.xlu1 %3789 }
0x200a   : > { %v3800_v13 = vmul.f32 %v3790_v7, %v5131_v4 }
0x200c   : > { %v3804_v26 = vsub.f32 %v6472_v10, %v3800_v13 }
0x200e   : > { %v3808_v59 = vmul.f32 %v3804_v26, %v3804_v26 }
0x2010   : > { %v3812_v51 = vsel %vm374_vm8, %v3808_v59, 0.0 }
0x2011   : > { %v3793_v53 = vpop.xlane.xlu2 %3792  ;;  %3813 = vadd.xlane.f32.xlu2 %v3812_v51 }
0x2012   : > { %v3801_v42 = vmul.f32 %v3793_v53, %v5131_v4 }
0x2014   : > { %v3805_v38 = vsub.f32 %v6477_v46, %v3801_v42 }
0x2016   : > { %v3809_v33 = vmul.f32 %v3805_v38, %v3805_v38 }
0x2018   : > { %v3815_v41 = vsel %vm374_vm8, %v3809_v33, 0.0 }
0x2019   : > { %3816 = vadd.xlane.f32.xlu2 %v3815_v41 }
0x2067   : > { %v3796_v34 = vpop.xlane.xlu0 %3795 }
0x2068   : > { %v3802_v2 = vmul.f32 %v3796_v34, %v5131_v4 }
0x206a   : > { %v6499_v19 = vsub.f32 %v6482_v27, %v3802_v2 }
0x206c   : > { %v3810_v18 = vmul.f32 %v6499_v19, %v6499_v19 }
0x206e   : > { %v3818_v49 = vsel %vm374_vm8, %v3810_v18, 0.0 }
0x206f   : > { %v3799_v28 = vpop.xlane.xlu2 %3798  ;;  %3819 = vadd.xlane.f32.xlu2 %v3818_v49 }
0x2070   : > { %v3803_v17 = vmul.f32 %v3799_v28, %v5131_v4 }
0x2072   : > { %v6506_v23 = vsub.f32 %v6487_v40, %v3803_v17 }
0x2074   : > { %v3811_v32 = vmul.f32 %v6506_v23, %v6506_v23 }
0x2076   : > { %v3821_v20 = vsel %vm374_vm8, %v3811_v32, 0.0 }
0x2077   : > { %3822 = vadd.xlane.f32.xlu1 %v3821_v20 }
0x2084   : > { %v3814_v6 = vpop.xlane.xlu2 %3813 }
0x2085   : > { %v3824_v15 = vmul.f32 %v3814_v6, %v5131_v4  ;;  %v3261_v6 = vld [vmem:[%s6695_s2 + $0x1e0] sm:$0xff] }
0x2087   : > { %v3828_v62 = vadd.f32 1e-05, %v3824_v15  ;;  %v3260_v15 = vld [vmem:[%s6695_s2 + $0x1d8] sm:$0xff] }
0x2089   : > { %4891 = vrsqrt.f32 %v3828_v62  ;;  %vm3838_vm6 = vweird.f32 %v3828_v62 }
0x208c   : > { %v3817_v25 = vpop.xlane.xlu2 %3816 }
0x208d   : > { %v3825_v63 = vmul.f32 %v3817_v25, %v5131_v4  ;;  %v3257_v25 = vld [vmem:[%s6695_s2 + $0x1c0] sm:$0xff] }
0x208f   : > { %v4892_v48 = vpop.eup %4891  ;;  %v3829_v35 = vadd.f32 1e-05, %v3825_v63  ;;  %v3256_v63 = vld [vmem:[%s6695_s2 + $0x1b8] sm:$0xff] }
0x2090   : > { %v3833_v50 = vmul.f32 %v4892_v48, %v3828_v62  ;;  %vm3839_vm13 = vweird.f32 %v4892_v48  ;;  %v3258_v62 = vld [vmem:[%s6695_s2 + $0x1c8] sm:$0xff] }
0x2091   : > { %4893 = vrsqrt.f32 %v3829_v35  ;;  %vm3840_vm7 = vmor %vm3838_vm6, %vm3839_vm13  ;;  %vm3848_vm14 = vweird.f32 %v3829_v35 }
0x2092   : > { %v3834_v9 = vmul.f32 %v4892_v48, %v3833_v50 }
0x2094   : > { %v3835_v39 = vmul.f32 0.5, %v3834_v9 }
0x2096   : > { %v3836_v36 = vsub.f32 1.5, %v3835_v39 }
0x2097   : > { %v4894_v44 = vpop.eup %4893 }
0x2098   : > { %v3837_v56 = vmul.f32 %v4892_v48, %v3836_v36  ;;  %v3843_v57 = vmul.f32 %v4894_v44, %v3829_v35  ;;  %vm3849_vm9 = vweird.f32 %v4894_v44  ;;  %v4618_v35 = vld [vmem:[%s6696_s3 + $0x98] ss:$0 sm:$0xff] }
0x2099   : > { %vm3850_vm10 = vmor %vm3848_vm14, %vm3849_vm9 }
0x209a   : > { %v3841_v30 = vsel %vm3840_vm7, %v4892_v48, %v3837_v56  ;;  %v3844_v47 = vmul.f32 %v4894_v44, %v3843_v57  ;;  %v3255_v48 = vld [vmem:[%s6695_s2 + $0x1b0] sm:$0xff] }
0x209b   : > { %v3872_v37 = vmul.f32 %v3841_v30, %v3804_v26 }
0x209c   : > { %v3845_v8 = vmul.f32 0.5, %v3844_v47 }
0x209d   : > { %v3877_v55 = vmul.f32 %v4616_v31, %v3872_v37 }
0x209e   : > { %v3846_v0 = vsub.f32 1.5, %v3845_v8 }
0x209f   : > { %v3882_v61 = vadd.f32 %v4617_v24, %v3877_v55 }
0x20a0   : > { %v3847_v11 = vmul.f32 %v4894_v44, %v3846_v0 }
0x20a1   : > { %4459 = vmatmul.msk.f32.vlgmr.msra.gmra.mxu2 %vm374_vm8, %v3882_v61 }
0x20a2   : > { %v3851_v12 = vsel %vm3850_vm10, %v4894_v44, %v3847_v11 }
0x20a3   : > { %v3873_v1 = vmul.f32 %v3851_v12, %v3805_v38 }
0x20a5   : > { %v3878_v5 = vmul.f32 %v4616_v31, %v3873_v1 }
0x20a7   : > { %v3883_v22 = vadd.f32 %v4617_v24, %v3878_v5 }
0x20a9   : > { %4460 = vmatmul.msk.f32.gmra.mxu2 %vm374_vm8, %v3883_v22 }
0x20e2   : > { %v3820_v54 = vpop.xlane.xlu2 %3819 }
0x20e3   : > { %v3826_v43 = vmul.f32 %v3820_v54, %v5131_v4 }
0x20e5   : > { %v3830_v14 = vadd.f32 1e-05, %v3826_v43 }
0x20e7   : > { %4895 = vrsqrt.f32 %v3830_v14  ;;  %vm3858_vm12 = vweird.f32 %v3830_v14 }
0x20ea   : > { %v3823_v3 = vpop.xlane.xlu1 %3822 }
0x20eb   : > { %v3827_v7 = vmul.f32 %v3823_v3, %v5131_v4 }
0x20ed   : > { %v4896_v13 = vpop.eup %4895  ;;  %v3831_v26 = vadd.f32 1e-05, %v3827_v7 }
0x20ee   : > { %v3853_v59 = vmul.f32 %v4896_v13, %v3830_v14  ;;  %vm3859_vm11 = vweird.f32 %v4896_v13 }
0x20ef   : > { %4897 = vrsqrt.f32 %v3831_v26  ;;  %vm3860_vm0 = vmor %vm3858_vm12, %vm3859_vm11  ;;  %vm3868_vm2 = vweird.f32 %v3831_v26 }
0x20f0   : > { %v3854_v51 = vmul.f32 %v4896_v13, %v3853_v59 }
0x20f2   : > { %v3855_v53 = vmul.f32 0.5, %v3854_v51 }
0x20f4   : > { %v3856_v42 = vsub.f32 1.5, %v3855_v53 }
0x20f5   : > { %v4898_v38 = vpop.eup %4897 }
0x20f6   : > { %v3857_v33 = vmul.f32 %v4896_v13, %v3856_v42  ;;  %v3863_v41 = vmul.f32 %v4898_v38, %v3831_v26  ;;  %vm3869_vm1 = vweird.f32 %v4898_v38 }
0x20f7   : > { %vm3870_vm3 = vmor %vm3868_vm2, %vm3869_vm1  ;;  %vm4202_vm1 = vcmp.eq.s32.totalorder %v5262_v29, 8 }
0x20f8   : > { %v3861_v34 = vsel %vm3860_vm0, %v4896_v13, %v3857_v33  ;;  %v3864_v2 = vmul.f32 %v4898_v38, %v3863_v41 }
0x20f9   : > { %v3874_v18 = vmul.f32 %v3861_v34, %v6499_v19  ;;  %v3262_v19 = vld [vmem:[%s6695_s2 + $0x1e8] sm:$0xff] }
0x20fa   : > { %v3865_v49 = vmul.f32 0.5, %v3864_v2  ;;  %3985 = vmatpush.msra.mxu0 %v3262_v19 }
0x20fb   : > { %v3879_v28 = vmul.f32 %v4616_v31, %v3874_v18 }
0x20fc   : > { %v3866_v17 = vsub.f32 1.5, %v3865_v49  ;;  %3986 = vmatpush.msra.mxu0 %v3261_v6 }
0x20fd   : > { %v3884_v32 = vadd.f32 %v4617_v24, %v3879_v28 }
0x20fe   : > { %v3867_v20 = vmul.f32 %v4898_v38, %v3866_v17  ;;  %3987 = vmatpush.msra.mxu0 %v3260_v15 }
0x20ff   : > { %4461 = vmatmul.msk.f32.gmra.mxu2 %vm374_vm8, %v3884_v32 }
0x2100   : > { %v3871_v16 = vsel %vm3870_vm3, %v4898_v38, %v3867_v20 }
0x2101   : > { %v3875_v45 = vmul.f32 %v3871_v16, %v6506_v23  ;;  %v3259_v23 = vld [vmem:[%s6695_s2 + $0x1d0] sm:$0xff] }
0x2102   : > { %3988 = vmatpush.msra.mxu0 %v3259_v23 }
0x2103   : > { %v3880_v52 = vmul.f32 %v4616_v31, %v3875_v45  ;;  %v4619_v45 = vld [vmem:[%s6695_s2 + $0x1f4] ss:$0 sm:$0xff] }
0x2104   : > { %3989 = vmatpush.msra.mxu0 %v3258_v62 }
0x2105   : > { %v3885_v21 = vadd.f32 %v4617_v24, %v3880_v52 }
0x2106   : > { %3990 = vmatpush.msra.mxu0 %v3257_v25 }
0x2107   : > { %4462 = vmatmul.msk.f32.gmra.mxu2 %vm374_vm8, %v3885_v21 }
0x2108   : > { %3991 = vmatpush.msra.mxu0 %v3256_v63 }
0x210a   : > { %3992 = vmatpush.msra.mxu0 %v3255_v48 }
0x2124   : > { %v3916_v50 = vpop.f32.mrf.mxu2 }
0x2125   : > { %v3917_v9 = vadd.f32 %v4618_v35, %v3916_v50 }
0x2127   : > { %v3932_v39 = vmul.f32 0.044715, %v3917_v9  ;;  %v3928_v61 = vmul.f32 0.5, %v3917_v9 }
0x2129   : > { %v3936_v36 = vmul.f32 %v3932_v39, %v3917_v9 }
0x212b   : > { %v3940_v44 = vmul.f32 %v3936_v36, %v3917_v9 }
0x212c   : > { %v3919_v56 = vpop.f32.mrf.mxu2 }
0x212d   : > { %v3944_v57 = vadd.f32 %v3940_v44, %v3917_v9  ;;  %v3920_v31 = vadd.f32 %v4618_v35, %v3919_v56 }
0x212f   : > { %v3948_v30 = vmul.f32 0.7978846, %v3944_v57  ;;  %v3933_v47 = vmul.f32 0.044715, %v3920_v31  ;;  %v3929_v5 = vmul.f32 0.5, %v3920_v31 }
0x2131   : > { %4899 = vtanh.f32 %v3948_v30  ;;  %v3937_v24 = vmul.f32 %v3933_v47, %v3920_v31 }
0x2133   : > { %v3941_v37 = vmul.f32 %v3937_v24, %v3920_v31 }
0x2135   : > { %v3945_v8 = vadd.f32 %v3941_v37, %v3920_v31 }
0x2137   : > { %v4900_v55 = vpop.eup %4899  ;;  %v3949_v0 = vmul.f32 0.7978846, %v3945_v8 }
0x2138   : > { %v3956_v11 = vadd.f32 1.0, %v4900_v55 }
0x2139   : > { %4901 = vtanh.f32 %v3949_v0 }
0x213a   : > { %v3960_v12 = vmul.f32 %v3956_v11, %v3928_v61 }
0x213c   : > { %4463 = vmatmul.msk.f32.vlgmr.msra.gmra.mxu0 %vm1148_vm15, %v3960_v12 }
0x213f   : > { %v4902_v1 = vpop.eup %4901 }
0x2140   : > { %v3957_v22 = vadd.f32 1.0, %v4902_v1 }
0x2142   : > { %v3961_v54 = vmul.f32 %v3957_v22, %v3929_v5 }
0x2144   : > { %4464 = vmatmul.msk.f32.gmra.mxu0 %vm1148_vm15, %v3961_v54  ;;  %v243_v54 = vld [vmem:[%s6697_s4 + $0x98] sm:$0xff] }
0x2145   : > { %4185 = vmatpush.msra.mxu3 %v243_v54 }
0x2182   : > { %v3922_v43 = vpop.f32.mrf.mxu2 }
0x2183   : > { %v3923_v14 = vadd.f32 %v4618_v35, %v3922_v43  ;;  %v242_v43 = vld [vmem:[%s6697_s4 + $0x90] sm:$0xff] }
0x2184   : > { %4186 = vmatpush.msra.mxu3 %v242_v43 }
0x2185   : > { %v3934_v3 = vmul.f32 0.044715, %v3923_v14  ;;  %v3930_v18 = vmul.f32 0.5, %v3923_v14 }
0x2187   : > { %v3938_v7 = vmul.f32 %v3934_v3, %v3923_v14  ;;  %v240_v3 = vld [vmem:[%s6697_s4 + $0x80] sm:$0xff] }
0x2189   : > { %v3942_v13 = vmul.f32 %v3938_v7, %v3923_v14 }
0x218a   : > { %v3925_v26 = vpop.f32.mrf.mxu2 }
0x218b   : > { %v3926_v59 = vadd.f32 %v4618_v35, %v3925_v26  ;;  %v3946_v51 = vadd.f32 %v3942_v13, %v3923_v14  ;;  %v241_v14 = vld [vmem:[%s6697_s4 + $0x88] sm:$0xff] }
0x218c   : > { %4187 = vmatpush.msra.mxu3 %v241_v14 }
0x218d   : > { %v3935_v53 = vmul.f32 0.044715, %v3926_v59  ;;  %v3950_v42 = vmul.f32 0.7978846, %v3946_v51  ;;  %v3931_v32 = vmul.f32 0.5, %v3926_v59 }
0x218e   : > { %4188 = vmatpush.msra.mxu3 %v240_v3 }
0x218f   : > { %v3939_v38 = vmul.f32 %v3935_v53, %v3926_v59  ;;  %4903 = vtanh.f32 %v3950_v42 }
0x2191   : > { %v3943_v33 = vmul.f32 %v3939_v38, %v3926_v59 }
0x2193   : > { %v3947_v41 = vadd.f32 %v3943_v33, %v3926_v59 }
0x2195   : > { %v4904_v34 = vpop.eup %4903  ;;  %v3951_v2 = vmul.f32 0.7978846, %v3947_v41 }
0x2196   : > { %v3958_v49 = vadd.f32 1.0, %v4904_v34 }
0x2197   : > { %4905 = vtanh.f32 %v3951_v2 }
0x2198   : > { %v3962_v28 = vmul.f32 %v3958_v49, %v3930_v18 }
0x219a   : > { %4465 = vmatmul.msk.f32.gmra.mxu0 %vm1148_vm15, %v3962_v28 }
0x219d   : > { %v4906_v17 = vpop.eup %4905 }
0x219e   : > { %v3959_v20 = vadd.f32 1.0, %v4906_v17 }
0x21a0   : > { %v3963_v16 = vmul.f32 %v3959_v20, %v3931_v32 }
0x21a2   : > { %4466 = vmatmul.msk.f32.gmra.mxu0 %vm1148_vm15, %v3963_v16  ;;  %v4933_v16 = vld [vmem:[%s6695_s2 + $0x3] ss:$0 sm:$0xff] }
0x21b9   : > { %v3994_v52 = vpop.f32.mrf.mxu0 }
0x21ba   : > { %v3995_v21 = vadd.f32 %v4619_v45, %v3994_v52 }
0x21bc   : > { %v4006_v19 = vadd.f32 %v3995_v21, %v6472_v10  ;;  %v4934_v21 = vld [vmem:[%s6695_s2 + $0x4] ss:$0 sm:$0xff] }
0x21be   : > { %v4010_v6 = vsel %vm374_vm8, %v4006_v19, 0.0 }
0x21bf   : > { %4011 = vadd.xlane.f32.xlu2 %v4010_v6 }
0x21c1   : > { %v3997_v15 = vpop.f32.mrf.mxu0 }
0x21c2   : > { %v3998_v23 = vadd.f32 %v4619_v45, %v3997_v15 }
0x21c4   : > { %v4007_v62 = vadd.f32 %v3998_v23, %v6477_v46 }
0x21c6   : > { %v4013_v25 = vsel %vm374_vm8, %v4007_v62, 0.0 }
0x21c7   : > { %4014 = vadd.xlane.f32.xlu0 %v4013_v25 }
0x2217   : > { %v4000_v63 = vpop.f32.mrf.mxu0 }
0x2218   : > { %v4001_v48 = vadd.f32 %v4619_v45, %v4000_v63 }
0x221a   : > { %v4008_v35 = vadd.f32 %v4001_v48, %v6482_v27 }
0x221c   : > { %v4016_v50 = vsel %vm374_vm8, %v4008_v35, 0.0 }
0x221d   : > { %4017 = vadd.xlane.f32.xlu1 %v4016_v50 }
0x221f   : > { %v4003_v9 = vpop.f32.mrf.mxu0 }
0x2220   : > { %v4004_v39 = vadd.f32 %v4619_v45, %v4003_v9 }
0x2222   : > { %v4009_v10 = vadd.f32 %v4004_v39, %v6487_v40 }
0x2224   : > { %v4019_v36 = vsel %vm374_vm8, %v4009_v10, 0.0 }
0x2225   : > { %4020 = vadd.xlane.f32.xlu2 %v4019_v36 }
0x2232   : > { %v4012_v44 = vpop.xlane.xlu2 %4011 }
0x2233   : > { %v4022_v46 = vmul.f32 %v4012_v44, %v5131_v4 }
0x2235   : > { %v4026_v56 = vsub.f32 %v4006_v19, %v4022_v46 }
0x2237   : > { %v4030_v57 = vmul.f32 %v4026_v56, %v4026_v56 }
0x2239   : > { %v4034_v31 = vsel %vm374_vm8, %v4030_v57, 0.0 }
0x223a   : > { %4035 = vadd.xlane.f32.xlu0 %v4034_v31  ;;  %v4015_v30 = vpop.xlane.xlu0 %4014 }
0x223b   : > { %v4023_v27 = vmul.f32 %v4015_v30, %v5131_v4 }
0x223d   : > { %v4027_v47 = vsub.f32 %v4007_v62, %v4023_v27 }
0x223f   : > { %v4031_v24 = vmul.f32 %v4027_v47, %v4027_v47 }
0x2241   : > { %v4037_v37 = vsel %vm374_vm8, %v4031_v24, 0.0 }
0x2242   : > { %4038 = vadd.xlane.f32.xlu1 %v4037_v37 }
0x2290   : > { %v4018_v40 = vpop.xlane.xlu1 %4017 }
0x2291   : > { %v4024_v8 = vmul.f32 %v4018_v40, %v5131_v4 }
0x2293   : > { %v6586_v55 = vsub.f32 %v4008_v35, %v4024_v8 }
0x2295   : > { %v4032_v0 = vmul.f32 %v6586_v55, %v6586_v55 }
0x2297   : > { %v4040_v61 = vsel %vm374_vm8, %v4032_v0, 0.0 }
0x2298   : > { %4041 = vadd.xlane.f32.xlu2 %v4040_v61  ;;  %v4021_v11 = vpop.xlane.xlu2 %4020 }
0x2299   : > { %v4025_v12 = vmul.f32 %v4021_v11, %v5131_v4  ;;  %v4620_v11 = vld [vmem:[%s6695_s2 + $0x1f5] ss:$0 sm:$0xff] }
0x229b   : > { %v6592_v1 = vsub.f32 %v4009_v10, %v4025_v12 }
0x229d   : > { %v4033_v5 = vmul.f32 %v6592_v1, %v6592_v1 }
0x229f   : > { %v4043_v22 = vsel %vm374_vm8, %v4033_v5, 0.0 }
0x22a0   : > { %4044 = vadd.xlane.f32.xlu0 %v4043_v22 }
0x22ad   : > { %v4036_v7 = vpop.xlane.xlu0 %4035 }
0x22ae   : > { %v4046_v13 = vmul.f32 %v4036_v7, %v5131_v4 }
0x22b0   : > { %v4050_v26 = vadd.f32 1e-05, %v4046_v13 }
0x22b2   : > { %4907 = vrsqrt.f32 %v4050_v26  ;;  %vm4060_vm4 = vweird.f32 %v4050_v26 }
0x22b5   : > { %v4039_v59 = vpop.xlane.xlu1 %4038 }
0x22b6   : > { %v4047_v51 = vmul.f32 %v4039_v59, %v5131_v4 }
0x22b8   : > { %v4908_v53 = vpop.eup %4907  ;;  %v4051_v42 = vadd.f32 1e-05, %v4047_v51 }
0x22b9   : > { %v4055_v38 = vmul.f32 %v4908_v53, %v4050_v26  ;;  %vm4061_vm15 = vweird.f32 %v4908_v53 }
0x22ba   : > { %4909 = vrsqrt.f32 %v4051_v42  ;;  %vm4062_vm5 = vmor %vm4060_vm4, %vm4061_vm15  ;;  %vm4070_vm6 = vweird.f32 %v4051_v42 }
0x22bb   : > { %v4056_v33 = vmul.f32 %v4908_v53, %v4055_v38 }
0x22bd   : > { %v4057_v41 = vmul.f32 0.5, %v4056_v33  ;;  %v4621_v33 = vld [vmem:[%s6697_s4 + $0xa0] ss:$0 sm:$0xff] }
0x22bf   : > { %v4058_v34 = vsub.f32 1.5, %v4057_v41 }
0x22c0   : > { %v4910_v2 = vpop.eup %4909 }
0x22c1   : > { %v4059_v18 = vmul.f32 %v4908_v53, %v4058_v34  ;;  %v4065_v49 = vmul.f32 %v4910_v2, %v4051_v42  ;;  %vm4071_vm13 = vweird.f32 %v4910_v2 }
0x22c2   : > { %vm4072_vm7 = vmor %vm4070_vm6, %vm4071_vm13 }
0x22c3   : > { %v4063_v28 = vsel %vm4062_vm5, %v4908_v53, %v4059_v18  ;;  %v4066_v17 = vmul.f32 %v4910_v2, %v4065_v49 }
0x22c4   : > { %v4094_v32 = vmul.f32 %v4063_v28, %v4026_v56  ;;  %v4215_v28 = vsel %vm4202_vm1, %v6405_v58, 0.0 }
0x22c5   : > { %v4067_v20 = vmul.f32 0.5, %v4066_v17 }
0x22c6   : > { %v4098_v45 = vmul.f32 %v4933_v16, %v4094_v32 }
0x22c7   : > { %v4068_v52 = vsub.f32 1.5, %v4067_v20 }
0x22c8   : > { %v4102_v19 = vadd.f32 %v4934_v21, %v4098_v45 }
0x22c9   : > { %v4069_v6 = vmul.f32 %v4910_v2, %v4068_v52 }
0x22ca   : > { %4469 = vmatmul.msk.f32.vlgmr.msra.gmra.mxu3 %vm374_vm8, %v4102_v19 }
0x22cb   : > { %v4073_v15 = vsel %vm4072_vm7, %v4910_v2, %v4069_v6 }
0x22cc   : > { %v4095_v23 = vmul.f32 %v4073_v15, %v4027_v47 }
0x22ce   : > { %v4099_v62 = vmul.f32 %v4933_v16, %v4095_v23 }
0x22d0   : > { %v4103_v25 = vadd.f32 %v4934_v21, %v4099_v62 }
0x22d2   : > { %4470 = vmatmul.msk.f32.gmra.mxu3 %vm374_vm8, %v4103_v25 }
0x230b   : > { %v4042_v63 = vpop.xlane.xlu2 %4041 }
0x230c   : > { %v4048_v48 = vmul.f32 %v4042_v63, %v5131_v4 }
0x230e   : > { %v4052_v35 = vadd.f32 1e-05, %v4048_v48 }
0x2310   : > { %4911 = vrsqrt.f32 %v4052_v35  ;;  %vm4080_vm14 = vweird.f32 %v4052_v35 }
0x2313   : > { %v4045_v50 = vpop.xlane.xlu0 %4044 }
0x2314   : > { %v4049_v9 = vmul.f32 %v4045_v50, %v5131_v4 }
0x2316   : > { %v4912_v39 = vpop.eup %4911  ;;  %v4053_v10 = vadd.f32 1e-05, %v4049_v9 }
0x2317   : > { %v4075_v36 = vmul.f32 %v4912_v39, %v4052_v35  ;;  %vm4081_vm9 = vweird.f32 %v4912_v39 }
0x2318   : > { %4913 = vrsqrt.f32 %v4053_v10  ;;  %vm4082_vm10 = vmor %vm4080_vm14, %vm4081_vm9  ;;  %vm4090_vm12 = vweird.f32 %v4053_v10 }
0x2319   : > { %v4076_v44 = vmul.f32 %v4912_v39, %v4075_v36 }
0x231b   : > { %v4077_v46 = vmul.f32 0.5, %v4076_v44 }
0x231d   : > { %v4078_v56 = vsub.f32 1.5, %v4077_v46 }
0x231e   : > { %v4914_v57 = vpop.eup %4913 }
0x231f   : > { %v4079_v31 = vmul.f32 %v4912_v39, %v4078_v56  ;;  %v4085_v30 = vmul.f32 %v4914_v57, %v4053_v10  ;;  %vm4091_vm11 = vweird.f32 %v4914_v57 }
0x2320   : > { %vm4092_vm0 = vmor %vm4090_vm12, %vm4091_vm11 }
0x2321   : > { %v4083_v27 = vsel %vm4082_vm10, %v4912_v39, %v4079_v31  ;;  %v4086_v47 = vmul.f32 %v4914_v57, %v4085_v30 }
0x2322   : > { %v4096_v24 = vmul.f32 %v4083_v27, %v6586_v55 }
0x2323   : > { %v4087_v37 = vmul.f32 0.5, %v4086_v47 }
0x2324   : > { %v4100_v40 = vmul.f32 %v4933_v16, %v4096_v24 }
0x2325   : > { %v4088_v4 = vsub.f32 1.5, %v4087_v37 }
0x2326   : > { %v4104_v8 = vadd.f32 %v4934_v21, %v4100_v40 }
0x2327   : > { %v4089_v0 = vmul.f32 %v4914_v57, %v4088_v4 }
0x2328   : > { %4471 = vmatmul.msk.f32.gmra.mxu3 %vm374_vm8, %v4104_v8  ;;  %v4106_v61 = vsub.f32 %v4102_v19, %v4104_v8 }
0x2329   : > { %v4093_v12 = vsel %vm4092_vm0, %v4914_v57, %v4089_v0 }
0x232a   : > { %v4097_v5 = vmul.f32 %v4093_v12, %v6592_v1  ;;  %v4108_v22 = vmul.f32 %v4106_v61, %v4106_v61  ;;  %v4622_v1 = vld [vmem:[%s6695_s2 + $0x1f6] ss:$0 sm:$0xff] }
0x232c   : > { %v4111_v55 = vmul.f32 %v4620_v11, %v4108_v22  ;;  %v4101_v54 = vmul.f32 %v4933_v16, %v4097_v5 }
0x232e   : > { %v4113_v43 = vsel %vm374_vm8, %v4111_v55, 0.0  ;;  %v4105_v14 = vadd.f32 %v4934_v21, %v4101_v54  ;;  %v4216_v21 = vsel %vm4202_vm1, %v6409_v60, 0.0 }
0x232f   : > { %4114 = vadd.xlane.f32.xlu1 %v4113_v43 }
0x2330   : > { %4472 = vmatmul.msk.f32.gmra.mxu3 %vm374_vm8, %v4105_v14  ;;  %v4107_v3 = vsub.f32 %v4103_v25, %v4105_v14 }
0x2332   : > { %v4109_v7 = vmul.f32 %v4107_v3, %v4107_v3 }
0x2334   : > { %v4112_v13 = vmul.f32 %v4620_v11, %v4109_v7 }
0x2336   : > { %v4116_v26 = vsel %vm374_vm8, %v4112_v13, 0.0 }
0x2337   : > { %4117 = vadd.xlane.f32.xlu2 %v4116_v26 }
0x234d   : > { %v4190_v59 = vpop.f32.mrf.mxu3 }
0x234e   : > { %v4191_v27 = vadd.f32 %v4621_v33, %v4190_v59 }
0x2355   : > { %v6633_v53 = vpop.f32.mrf.mxu3 }
0x2356   : > { %v4194_v40 = vadd.f32 %v4621_v33, %v6633_v53 }
0x23a2   : > { %v4115_v51 = vpop.xlane.xlu1 %4114 }
0x23a3   : > { %v4120_v42 = vadd.f32 %v4622_v1, %v4115_v51 }
0x23a5   : > { %v4467_v38 = vmul.f32 -1.442695, %v4120_v42 }
0x23a7   : > { %4915 = vpow2.f32 %v4467_v38 }
0x23aa   : > { %v4118_v41 = vpop.xlane.xlu2 %4117 }
0x23ab   : > { %v4121_v34 = vadd.f32 %v4622_v1, %v4118_v41  ;;  %v4196_v2 = vpop.f32.mrf.mxu3 }
0x23ac   : > { %v4197_v18 = vadd.f32 %v4621_v33, %v4196_v2 }
0x23ad   : > { %v4916_v49 = vpop.eup %4915  ;;  %v4468_v17 = vmul.f32 -1.442695, %v4121_v34 }
0x23ae   : > { %v4128_v32 = vadd.f32 1.0, %v4916_v49  ;;  %v4219_v20 = vadd.f32 %v4215_v28, %v4197_v18 }
0x23af   : > { %4917 = vpow2.f32 %v4468_v17 }
0x23b0   : > { %4919 = vrcp.f32 %v4128_v32  ;;  %4223 = vst [vmem:[%s6645_s23 + $0x10] sm:$0xff] %v4219_v20  ;;  %v4141_v62 = vand.u32 2147483648, %v4128_v32  ;;  %v4139_v63 = vand.u32 2147483647, %v4128_v32  ;;  %vm4135_vm2 = vweird.f32 %v4128_v32 }
0x23b2   : > { %v4142_v50 = vor.u32 1.1754944e-38, %v4141_v62  ;;  %vm4140_vm15 = vcmp.eq.f32.partialorder %v4139_v63, 8.507059e+37 }
0x23b3   : > { %v4199_v16 = vpop.f32.mrf.mxu3 }
0x23b4   : > { %v4200_v45 = vadd.f32 %v4621_v33, %v4199_v16 }
0x23b5   : > { %v4918_v52 = vpop.eup %4917 }
0x23b6   : > { %v4920_v19 = vpop.eup %4919  ;;  %v4129_v6 = vadd.f32 1.0, %v4918_v52  ;;  %v4220_v58 = vadd.f32 %v4216_v21, %v4200_v45 }
0x23b7   : > { %v4131_v15 = vmul.f32 %v4920_v19, %v4128_v32  ;;  %vm4136_vm8 = vweird.f32 %v4920_v19 }
0x23b8   : > { %4921 = vrcp.f32 %v4129_v6  ;;  %4224 = vst [vmem:[%s6645_s23 + $0x18] sm:$0xff] %v4220_v58  ;;  %vm4137_vm3 = vmor %vm4135_vm2, %vm4136_vm8  ;;  %v4156_v36 = vand.u32 2147483648, %v4129_v6  ;;  %v4154_v46 = vand.u32 2147483647, %v4129_v6  ;;  %vm4150_vm5 = vweird.f32 %v4129_v6 }
0x23b9   : > { %v4132_v23 = vsub.f32 1.0, %v4131_v15 }
0x23ba   : > { %v4157_v57 = vor.u32 1.1754944e-38, %v4156_v36  ;;  %vm4155_vm6 = vcmp.eq.f32.partialorder %v4154_v46, 8.507059e+37 }
0x23bb   : > { %v4133_v25 = vmul.f32 %v4920_v19, %v4132_v23 }
0x23bd   : > { %v4134_v48 = vadd.f32 %v4920_v19, %v4133_v25 }
0x23be   : > { %v4922_v35 = vpop.eup %4921 }
0x23bf   : > { %v4138_v9 = vsel %vm4137_vm3, %v4920_v19, %v4134_v48  ;;  %v4146_v39 = vmul.f32 %v4922_v35, %v4129_v6  ;;  %vm4151_vm4 = vweird.f32 %v4922_v35 }
0x23c0   : > { %v4143_v60 = vsel %vm4140_vm15, %v4142_v50, %v4138_v9  ;;  %vm4152_vm13 = vmor %vm4150_vm5, %vm4151_vm4 }
0x23c1   : > { %4205 = vperm.xlu0 %4551, %v4143_v60   ;;  %v4147_v10 = vsub.f32 1.0, %v4146_v39 }
0x23c3   : > { %v4148_v44 = vmul.f32 %v4922_v35, %v4147_v10 }
0x23c5   : > { %v4149_v56 = vadd.f32 %v4922_v35, %v4148_v44 }
0x23c7   : > { %v4153_v31 = vsel %vm4152_vm13, %v4922_v35, %v4149_v56 }
0x23c8   : > { %v4158_v30 = vsel %vm4155_vm6, %v4157_v57, %v4153_v31 }
0x23c9   : > { %4210 = vperm.xlu1 %4572, %v4158_v30  }
0x2433   : > { %v4206_v47 = vpop.permute.xlu0 %4205 }
0x2434   : > { %v4213_v24 = vsel %vm4202_vm1, %v4206_v47, 0.0 }
0x2435   : > { %v4217_v37 = vadd.f32 %v4213_v24, %v4191_v27 }
0x2437   : > { %4221 = vst [vmem:[%s6645_s23] sm:$0xff] %v4217_v37 }
0x243b   : > { %v4211_v4 = vpop.permute.xlu1 %4210 }
0x243c   : > { %v4214_v8 = vsel %vm4202_vm1, %v4211_v4, 0.0 }
0x243d   : > { %v4218_v0 = vadd.f32 %v4214_v8, %v4194_v40 }
0x243f   : > { %4222 = vst [vmem:[%s6645_s23 + $0x8] sm:$0xff] %v4218_v0 }
0x2440   : > { %4962 = shalt.err (!%p4959_p3)
}
0x2441   : > { %s5011_s17 = smov 128   ;;  %s5012_s8 = smov 8  }
0x2442   : > { %4488 = dma.vmem_to_hbm [thread:$0]  (%p5081_p5), %s4239_s14, 512, %s4241_s25, %s4226_s22, %s5011_s17, %s5011_s17, %s5012_s8  }
0x2443 PF: > { %p4494_p4 = scmp.ge.s32.totalorder %s4997_s21, 2  ;;  %s4255_s23 = sand.u32 1, %s4985_s18  }
0x2444   : > { %s4256_s26 = scalar_lea.sflag [#allocation3], %s4255_s23 }
0x2445   : > { %p4491_p7 = pnand %p4494_p4, %p5085_p6 }
0x2447   : > { %p4492_p8 = pneg %p4491_p7 }
0x2449   : > { %4980 = dma.done.wait (%p4492_p8), %s4256_s26, 512  }
0x244a   : > { %4982 = vsyncadd (%p4492_p8), %s4256_s26, 4294966784  ;;  %p15_p9 = scmp.ge.s32.totalorder %s5068_s24, 4   ;;  %s6709_s18 = smov %s4989_s19 }
0x244b   : > { %s6710_s19 = smov %s4993_s20  ;;  %s6711_s20 = smov %s5079_s27 }
0x244c   : > { %s6712_s21 = smov %s5068_s24  ;;  %17 = sbr.rel (!%p15_p9) target bundleno = 3 (0x3), region = 75 }
0x2451   :  { %4262 = vsyncpa [#allocation3], 1 }
0x2452   :  { %4264 = vsyncpa [#allocation3 + $0x1], 1 }

</bundles_post_ra>
